<compile_context>
chip_gen: v7x
topology: tpu7x:2x2x1
jax: 0.10.0
libtpu: 0.0.40
codegen_flags: <defaults>
</compile_context>

<pallas_src>
import functools

import jax
import jax.numpy as jnp
from jax.experimental import pallas as pl
from jax.experimental.pallas import tpu as pltpu

BN_EPS = 1e-5
_ALIGN = 8     # sublane-aligned zero-halo rows for 'same' padding (K <= 17)
_LANE = 128    # channel lane padding


# ----------------------------------------------------------------------------
# Small utilities
# ----------------------------------------------------------------------------
def _round_up(x, m):
    return ((x + m - 1) // m) * m


def _vmem_limit_bytes():
    """Per-generation VMEM budget: ~3/4 of physical VMEM, capped at 100 MiB.
    -> ~48 MiB on v7x (64 MiB physical), 96-100 MiB on v5e/v6e (128 MiB)."""
    try:
        cap = pltpu.get_tpu_info().vmem_capacity_bytes
    except Exception:
        cap = 128 * 1024 * 1024
    return int(min(100 * 1024 * 1024, (cap * 3) // 4))


def _pick_bt(B, L, target_rows=512):
    """Largest divisor of B such that Bt*L stays near `target_rows` MXU rows."""
    cap = max(1, -(-target_rows // L))
    best = 1
    for bt in range(1, min(B, cap) + 1):
        if B % bt == 0:
            best = bt
    return best


def _full_spec(a):
    """Full-array (resident) BlockSpec for a weight on a 1-D grid."""
    n = a.ndim
    return pl.BlockSpec(a.shape, lambda b: (0,) * n)


# ----------------------------------------------------------------------------
# In-kernel helpers
# ----------------------------------------------------------------------------
def _silu(y):
    return y * jax.nn.sigmoid(y)


def _affine(y, scale_ref, shift_ref, act=True):
    y = y * scale_ref[...] + shift_ref[...]
    return _silu(y) if act else y


def _zero_halos(ref, L):
    """Zero only the halo rows of a (Bt, L+2*_ALIGN, C) scratch."""
    Bt = ref.shape[0]
    C = ref.shape[-1]
    z = jnp.zeros((Bt, _ALIGN, C), ref.dtype)
    ref[:, :_ALIGN, :] = z
    ref[:, _ALIGN + L:_ALIGN + L + _ALIGN, :] = z


def _conv_taps_matmul(pad_ref, w_ref, L, K, Bt):
    """'same' conv as K accumulating MXU matmuls from ref tap windows.
    pad_ref: (Bt, L+2*_ALIGN, Cin) bf16 scratch (halos zero, body = activation)
    w_ref:   (K, Cin, Cout) bf16;  returns (Bt*L, Cout) f32."""
    pad_l = (K - 1) // 2
    k0 = _ALIGN - pad_l
    cin = pad_ref.shape[-1]
    acc = None
    for k in range(K):
        win = pad_ref[:, k0 + k:k0 + k + L, :].reshape(Bt * L, cin)
        t = jnp.dot(win, w_ref[k], preferred_element_type=jnp.float32)
        acc = t if acc is None else acc + t
    return acc


# ----------------------------------------------------------------------------
# Kernel 1: standalone Conv1d('same', no bias) + folded BN affine + optional
#           SiLU.  Used for blc0 (K=ks); K=1 path kept for degenerate configs.
# ----------------------------------------------------------------------------
def _conv_bn_act_kernel(x_ref, w_ref, s_ref, b_ref, o_ref, *scratch,
                        K, L, Bt, apply_act):
    cin = x_ref.shape[-1]
    cout = o_ref.shape[-1]
    if K == 1:
        y = jnp.dot(x_ref[...].reshape(Bt * L, cin), w_ref[0],
                    preferred_element_type=jnp.float32)
    else:
        pad_ref, = scratch

        @pl.when(pl.program_id(0) == 0)
        def _init():
            _zero_halos(pad_ref, L)

        pad_ref[:, _ALIGN:_ALIGN + L, :] = x_ref[...]
        y = _conv_taps_matmul(pad_ref, w_ref, L, K, Bt)
    y = _affine(y, s_ref, b_ref, act=apply_act)
    o_ref[...] = y.reshape(Bt, L, cout).astype(o_ref.dtype)


def conv1d_bn_act(x, w, scale, shift, *, K, apply_act=True,
                  out_dtype=jnp.bfloat16):
    """x: (B, L, Cin) bf16; w: (K, Cin, Cout) bf16; scale/shift: (1, Cout) f32."""
    B, L, Cin = x.shape
    Cout = w.shape[-1]
    Bt = _pick_bt(B, L)
    kernel = functools.partial(_conv_bn_act_kernel, K=K, L=L, Bt=Bt,
                               apply_act=apply_act)
    scratch = [] if K == 1 else [pltpu.VMEM((Bt, L + 2 * _ALIGN, Cin),
                                            jnp.bfloat16)]
    return pl.pallas_call(
        kernel,
        out_shape=jax.ShapeDtypeStruct((B, L, Cout), out_dtype),
        grid=(B // Bt,),
        in_specs=[pl.BlockSpec((Bt, L, Cin), lambda b: (b, 0, 0)),
                  _full_spec(w), _full_spec(scale), _full_spec(shift)],
        out_specs=pl.BlockSpec((Bt, L, Cout), lambda b: (b, 0, 0)),
        scratch_shapes=scratch,
        compiler_params=pltpu.CompilerParams(
            dimension_semantics=("arbitrary",),   # sequential -> halo init once
            vmem_limit_bytes=_vmem_limit_bytes()),
    )(x, w, scale, shift)


# ----------------------------------------------------------------------------
# Kernel 2: fused inverted-residual block + channel-concat + resize conv
#           (+ optional final 1x1 mapper on the last block).
#   h1 = SiLU(BN(x @ We))                     1x1 expand
#   h2 = SiLU(BN(grouped_conv_k(h1)))         grouped conv (VPU + lazy rolls)
#   h2 = h2 * sigmoid(MLP(mean_L(h2)))        Squeeze-and-Excite gate
#   h4 = SiLU(BN(h2 @ Wp))                    1x1 project
#   y  = SiLU(BN(conv_k([x, h4])))            resize conv (weight split x/h)
#   [z = y @ Wm + bm]                         fused mapper (last block only)
# ----------------------------------------------------------------------------
def _inv_res_resize_kernel(x_ref,
                           we_ref, es_ref, eb_ref,
                           wd_ref, ds_ref, db_ref,
                           sw1_ref, sb1_ref, sw2_ref, sb2_ref,
                           wp_ref, ps_ref, pb_ref,
                           wrx_ref, wrh_ref, rs_ref, rb_ref,
                           *rest, K, L, fpg, Bt, fuse_mapper):
    if fuse_mapper:
        wm_ref, bm_ref, o_ref, s_mid, s_x, s_h = rest
    else:
        o_ref, s_mid, s_x, s_h = rest

    pad_l = (K - 1) // 2
    k0 = _ALIGN - pad_l
    nd = 2 * fpg - 1
    prev = x_ref.shape[-1]
    mid = we_ref.shape[-1]

    # Zero only the halo rows, once (scratch persists across grid iterations).
    @pl.when(pl.program_id(0) == 0)
    def _init():
        _zero_halos(s_mid, L)
        _zero_halos(s_x, L)
        _zero_halos(s_h, L)

    x = x_ref[...]                                            # (Bt, L, prev) bf16

    # ---- 1x1 expand + BN + SiLU --------------------------------------------
    h1 = jnp.dot(x.reshape(Bt * L, prev), we_ref[...],
                 preferred_element_type=jnp.float32)
    h1 = _affine(h1, es_ref, eb_ref)                          # (Bt*L, mid) f32

    # ---- grouped conv (kernel=K, groups=mid//fpg) on the VPU ----------------
    # bf16 halo scratch; taps are ref windows; lane rolls computed lazily so at
    # most one rolled copy is live; group boundaries are zeros in wd rows.
    s_mid[:, _ALIGN:_ALIGN + L, :] = h1.reshape(Bt, L, mid).astype(s_mid.dtype)
    acc = None
    for k in range(K):
        win = s_mid[:, k0 + k:k0 + k + L, :].reshape(Bt * L, mid)
        win = win.astype(jnp.float32)
        for di in range(nd):
            d = di - (fpg - 1)
            v = win if d == 0 else pltpu.roll(win, shift=d % mid, axis=1)
            r = k * nd + di
            term = v * wd_ref[r:r + 1, :]                     # (Bt*L, mid) f32
            acc = term if acc is None else acc + term
    h2 = _affine(acc, ds_ref, db_ref)                         # (Bt*L, mid) f32

    # ---- Squeeze-and-Excite gate (batched over the Bt sample tile) ----------
    h2_3d = h2.reshape(Bt, L, mid)
    m = jnp.mean(h2_3d, axis=1)                               # (Bt, mid) f32
    se = _silu(jnp.dot(m.astype(jnp.bfloat16), sw1_ref[...],
                       preferred_element_type=jnp.float32) + sb1_ref[...])
    g = jax.nn.sigmoid(jnp.dot(se.astype(jnp.bfloat16), sw2_ref[...],
                               preferred_element_type=jnp.float32) + sb2_ref[...])
    h2 = (h2_3d * g[:, None, :]).reshape(Bt * L, mid)         # gated

    # ---- 1x1 project + BN + SiLU --------------------------------------------
    h4 = jnp.dot(h2.astype(jnp.bfloat16), wp_ref[...],
                 preferred_element_type=jnp.float32)
    h4 = _affine(h4, ps_ref, pb_ref)                          # (Bt*L, prev) f32

    # ---- resize conv over concat([x, h4]) without materialising the concat --
    s_x[:, _ALIGN:_ALIGN + L, :] = x
    s_h[:, _ALIGN:_ALIGN + L, :] = h4.reshape(Bt, L, prev).astype(s_h.dtype)
    y = (_conv_taps_matmul(s_x, wrx_ref, L, K, Bt) +
         _conv_taps_matmul(s_h, wrh_ref, L, K, Bt))
    y = _affine(y, rs_ref, rb_ref)                            # (Bt*L, sz) f32

    if fuse_mapper:
        z = jnp.dot(y.astype(jnp.bfloat16), wm_ref[...],
                    preferred_element_type=jnp.float32) + bm_ref[...]
        o_ref[...] = z.reshape(Bt, L, o_ref.shape[-1]).astype(o_ref.dtype)
    else:
        o_ref[...] = y.reshape(Bt, L, o_ref.shape[-1]).astype(o_ref.dtype)


def inv_res_resize_block(x, p, *, K, fpg, mapper=None):
    """Fused inv_res_blc{i} + channel concat + resize_blc{i} (+ mapper)."""
    B, L, prev = x.shape
    mid = p['we'].shape[1]
    sz = p['rs'].shape[1]
    Bt = _pick_bt(B, L)
    fuse = mapper is not None
    out_c = mapper['w'].shape[-1] if fuse else sz
    out_dtype = jnp.float32 if fuse else jnp.bfloat16
    kernel = functools.partial(_inv_res_resize_kernel, K=K, L=L, fpg=fpg,
                               Bt=Bt, fuse_mapper=fuse)
    args = [x, p['we'], p['es'], p['eb'], p['wd'], p['ds'], p['db'],
            p['sw1'], p['sb1'], p['sw2'], p['sb2'],
            p['wp'], p['ps'], p['pb'],
            p['wrx'], p['wrh'], p['rs'], p['rb']]
    in_specs = [pl.BlockSpec((Bt, L, prev), lambda b: (b, 0, 0))]
    in_specs += [_full_spec(a) for a in args[1:]]
    if fuse:
        args += [mapper['w'], mapper['b']]
        in_specs += [_full_spec(mapper['w']), _full_spec(mapper['b'])]
    return pl.pallas_call(
        kernel,
        out_shape=jax.ShapeDtypeStruct((B, L, out_c), out_dtype),
        grid=(B // Bt,),
        in_specs=in_specs,
        out_specs=pl.BlockSpec((Bt, L, out_c), lambda b: (b, 0, 0)),
        scratch_shapes=[
            pltpu.VMEM((Bt, L + 2 * _ALIGN, mid), jnp.bfloat16),   # padded h1
            pltpu.VMEM((Bt, L + 2 * _ALIGN, prev), jnp.bfloat16),  # padded x
            pltpu.VMEM((Bt, L + 2 * _ALIGN, prev), jnp.bfloat16),  # padded h4
        ],
        compiler_params=pltpu.CompilerParams(
            dimension_semantics=("arbitrary",),   # sequential -> halo init once
            vmem_limit_bytes=_vmem_limit_bytes()),
    )(*args)


# ----------------------------------------------------------------------------
# Deterministic parameter construction (synthetic init, PyTorch layouts,
# channel dims lane-padded to multiples of 128 with exact-zero padded lanes).
# ----------------------------------------------------------------------------
def _bn_fold(key, c_real, c_pad):
    """Eval-mode BatchNorm1d (running_mean=0, running_var=1) -> affine; padded
    lanes get scale=shift=0 so they stay exactly zero after SiLU."""
    k1, k2 = jax.random.split(key)
    gamma = 1.0 + 0.1 * jax.random.normal(k1, (c_real,), jnp.float32)
    beta = 0.1 * jax.random.normal(k2, (c_real,), jnp.float32)
    scale = jnp.zeros((1, c_pad), jnp.float32).at[0, :c_real].set(
        gamma / jnp.sqrt(1.0 + BN_EPS))
    shift = jnp.zeros((1, c_pad), jnp.float32).at[0, :c_real].set(beta)
    return scale, shift


def _conv_w(key, K, cin_r, cout_r, cin_p, cout_p):
    """Conv1d weight, PyTorch layout (cout, cin, K) -> (K, cin_p, cout_p) bf16."""
    w = 0.05 * jax.random.normal(key, (cout_r, cin_r, K), jnp.float32)
    full = jnp.zeros((K, cin_p, cout_p), jnp.float32)
    full = full.at[:, :cin_r, :cout_r].set(jnp.transpose(w, (2, 1, 0)))
    return full.astype(jnp.bfloat16)


def _dense_w(key, cin_r, cout_r, cin_p, cout_p, std=0.05):
    """Linear / 1x1-conv weight, PyTorch layout (cout, cin) -> (cin_p, cout_p)."""
    w = std * jax.random.normal(key, (cout_r, cin_r), jnp.float32)
    full = jnp.zeros((cin_p, cout_p), jnp.float32).at[:cin_r, :cout_r].set(w.T)
    return full.astype(jnp.bfloat16)


def _grouped_conv_w(key, mid_r, mid_p, fpg, K):
    """Grouped Conv1d(mid->mid, groups=mid//fpg), PyTorch layout (mid, fpg, K),
    pre-shuffled to (K*(2*fpg-1), mid_p) per-(tap, lane-offset) rows:
    row[k*(2fpg-1) + (d+fpg-1), c] = w[c, c%fpg - d, k], zero outside the group
    and in padded lanes (so the lane-roll wrap-around never contributes)."""
    w_pt = 0.05 * jax.random.normal(key, (mid_r, fpg, K), jnp.float32)
    c = jnp.arange(mid_r)
    rows = []
    for k in range(K):
        for d in range(-(fpg - 1), fpg):
            j = (c % fpg) - d
            valid = (j >= 0) & (j < fpg)
            r = jnp.where(valid, w_pt[c, jnp.clip(j, 0, fpg - 1), k], 0.0)
            rows.append(jnp.zeros((mid_p,), jnp.float32).at[:mid_r].set(r))
    return jnp.stack(rows, axis=0)             # (K*(2fpg-1), mid_p) f32 (VPU)


def build_legnet_params(key, *, in_channels, block_sizes, ks, resize_factor,
                        filter_per_group, se_reduction, final_ch):
    keys = iter(jax.random.split(key, 4096))
    nk = lambda: next(keys)
    pad = lambda c: _round_up(c, _LANE)

    params = {'ks': ks, 'fpg': filter_per_group, 'final_ch': final_ch}

    c0_r, c0_p = block_sizes[0], pad(block_sizes[0])
    s0, b0 = _bn_fold(nk(), c0_r, c0_p)
    params['blc0'] = dict(
        w=_conv_w(nk(), ks, in_channels, c0_r, in_channels, c0_p),
        scale=s0, shift=b0)

    blocks = []
    for prev_r, sz_r in zip(block_sizes[:-1], block_sizes[1:]):
        prev_p, sz_p = pad(prev_r), pad(sz_r)
        mid_r, mid_p = sz_r * resize_factor, pad(sz_r * resize_factor)
        hidden = int(prev_r // se_reduction)
        es, eb = _bn_fold(nk(), mid_r, mid_p)
        ds, db = _bn_fold(nk(), mid_r, mid_p)
        ps, pb = _bn_fold(nk(), prev_r, prev_p)
        rs, rb = _bn_fold(nk(), sz_r, sz_p)
        # resize conv over concat([x, h4]); weight split into x / h halves
        wr = 0.05 * jax.random.normal(nk(), (sz_r, 2 * prev_r, ks), jnp.float32)
        wr = jnp.transpose(wr, (2, 1, 0))               # (ks, 2*prev, sz)
        wrx = jnp.zeros((ks, prev_p, sz_p), jnp.float32
                        ).at[:, :prev_r, :sz_r].set(wr[:, :prev_r, :])
        wrh = jnp.zeros((ks, prev_p, sz_p), jnp.float32
                        ).at[:, :prev_r, :sz_r].set(wr[:, prev_r:, :])
        blocks.append(dict(
            we=_dense_w(nk(), prev_r, mid_r, prev_p, mid_p), es=es, eb=eb,
            wd=_grouped_conv_w(nk(), mid_r, mid_p, filter_per_group, ks),
            ds=ds, db=db,
            sw1=_dense_w(nk(), mid_r, hidden, mid_p, hidden, std=0.1),
            sb1=0.1 * jax.random.normal(nk(), (1, hidden), jnp.float32),
            sw2=_dense_w(nk(), hidden, mid_r, hidden, mid_p, std=0.1),
            sb2=jnp.zeros((1, mid_p), jnp.float32).at[0, :mid_r].set(
                0.1 * jax.random.normal(nk(), (mid_r,), jnp.float32)),
            wp=_dense_w(nk(), mid_r, prev_r, mid_p, prev_p), ps=ps, pb=pb,
            wrx=wrx.astype(jnp.bfloat16), wrh=wrh.astype(jnp.bfloat16),
            rs=rs, rb=rb,
        ))
    params['blocks'] = blocks

    last_r, last_p = block_sizes[-1], pad(block_sizes[-1])
    fin_p = pad(final_ch)
    params['mapper'] = dict(
        w=_dense_w(nk(), last_r, final_ch, last_p, fin_p),
        b=jnp.zeros((1, fin_p), jnp.float32).at[0, :final_ch].set(
            0.1 * jax.random.normal(nk(), (final_ch,), jnp.float32)))
    return params


# ----------------------------------------------------------------------------
# Forward pass (only transposes / final channel slice happen outside kernels)
# ----------------------------------------------------------------------------
def legnet_forward(params, x_ncl):
    """x_ncl: (B, in_channels, L) like PyTorch; returns (B, final_ch, L)."""
    x = jnp.transpose(x_ncl, (0, 2, 1)).astype(jnp.bfloat16)       # (B, L, C)
    p0 = params['blc0']
    x = conv1d_bn_act(x, p0['w'], p0['scale'], p0['shift'], K=params['ks'])
    blocks = params['blocks']
    for i, blk in enumerate(blocks):
        mapper = params['mapper'] if i == len(blocks) - 1 else None
        x = inv_res_resize_block(x, blk, K=params['ks'], fpg=params['fpg'],
                                 mapper=mapper)
    if not blocks:   # degenerate config: standalone 1x1 mapper
        mw = params['mapper']['w'][None]
        ones = jnp.ones((1, mw.shape[-1]), jnp.float32)
        x = conv1d_bn_act(x, mw, ones, params['mapper']['b'], K=1,
                          apply_act=False, out_dtype=jnp.float32)
    y = x[:, :, :params['final_ch']].astype(jnp.float32)
    return jnp.transpose(y, (0, 2, 1))                              # (B, Cout, L)


# ----------------------------------------------------------------------------
if __name__ == "__main__":
    key = jax.random.PRNGKey(0)
    kp, kx = jax.random.split(key)

    # Small shapes consistent with the module's forward (scaled-down defaults).
    B, C_in, L = 2, 10, 16
    block_sizes = [16, 16, 8, 8]
    final_ch = 18

    params = build_legnet_params(
        kp, in_channels=C_in, block_sizes=block_sizes, ks=5,
        resize_factor=4, filter_per_group=2, se_reduction=4,
        final_ch=final_ch)

    x = jax.random.normal(kx, (B, C_in, L), jnp.float32)

    fwd = jax.jit(lambda inp: legnet_forward(params, inp))
    out = fwd(x)
    jax.block_until_ready(out)

    assert out.shape == (B, final_ch, L), out.shape
    assert bool(jnp.all(jnp.isfinite(out)))
    print("KERNEL_OK")
</pallas_src>

<mosaic_0001>
module attributes {stable_mosaic.version = 11 : i64} {
  func.func @_conv_bn_act_kernel(%arg0: i32, %arg1: memref<2x16x10xbf16, #tpu.memory_space<vmem>>, %arg2: memref<5x10x128xbf16, #tpu.memory_space<vmem>>, %arg3: memref<1x128xf32, #tpu.memory_space<vmem>>, %arg4: memref<1x128xf32, #tpu.memory_space<vmem>>, %arg5: memref<2x16x128xbf16, #tpu.memory_space<vmem>>, %arg6: memref<2x32x10xbf16, #tpu.memory_space<vmem>>) attributes {dimension_semantics = [#tpu.dimension_semantics<arbitrary>], iteration_bounds = array<i64: 1>, scalar_prefetch = 0 : i64, scratch_operands = 1 : i64, tpu.core_type = #tpu.core_type<tc>, window_params = [{transform_indices = @transform_0, window_bounds = array<i64: 2, 16, 10>}, {pipeline_mode = #tpu.pipeline_mode<synchronous>, transform_indices = @transform_1, window_bounds = array<i64: 5, 10, 128>}, {pipeline_mode = #tpu.pipeline_mode<synchronous>, transform_indices = @transform_2, window_bounds = array<i64: 1, 128>}, {pipeline_mode = #tpu.pipeline_mode<synchronous>, transform_indices = @transform_3, window_bounds = array<i64: 1, 128>}, {transform_indices = @transform_4, window_bounds = array<i64: 2, 16, 128>}]} {
    %c0_i32 = arith.constant 0 : i32
    %0 = arith.cmpi eq, %arg0, %c0_i32 : i32
    %1 = arith.extui %0 : i1 to i32
    %c0_i32_0 = arith.constant 0 : i32
    %2 = arith.cmpi ne, %1, %c0_i32_0 : i32
    scf.if %2 {
      %cst_39 = arith.constant 0.000000e+00 : bf16
      %49 = vector.broadcast %cst_39 : bf16 to vector<2x8x10xbf16>
      %c0_40 = arith.constant 0 : index
      %c0_41 = arith.constant 0 : index
      %c0_42 = arith.constant 0 : index
      %50 = vector.load %arg6[%c0_40, %c0_41, %c0_42] : memref<2x32x10xbf16, #tpu.memory_space<vmem>>, vector<2x8x10xbf16>
      tpu.vector_store %arg6[%c0_40, %c0_41, %c0_42], %49 {strides = array<i32>} : memref<2x32x10xbf16, #tpu.memory_space<vmem>>, vector<2x8x10xbf16>,
      %c0_43 = arith.constant 0 : index
      %c24 = arith.constant 24 : index
      %c0_44 = arith.constant 0 : index
      %51 = vector.load %arg6[%c0_43, %c24, %c0_44] : memref<2x32x10xbf16, #tpu.memory_space<vmem>>, vector<2x8x10xbf16>
      tpu.vector_store %arg6[%c0_43, %c24, %c0_44], %49 {strides = array<i32>} : memref<2x32x10xbf16, #tpu.memory_space<vmem>>, vector<2x8x10xbf16>,
    } else {
    }
    %c0 = arith.constant 0 : index
    %c0_1 = arith.constant 0 : index
    %c0_2 = arith.constant 0 : index
    %3 = vector.load %arg1[%c0, %c0_1, %c0_2] : memref<2x16x10xbf16, #tpu.memory_space<vmem>>, vector<2x16x10xbf16>
    %c0_3 = arith.constant 0 : index
    %c8 = arith.constant 8 : index
    %c0_4 = arith.constant 0 : index
    %4 = vector.load %arg6[%c0_3, %c8, %c0_4] : memref<2x32x10xbf16, #tpu.memory_space<vmem>>, vector<2x16x10xbf16>
    tpu.vector_store %arg6[%c0_3, %c8, %c0_4], %3 {strides = array<i32>} : memref<2x32x10xbf16, #tpu.memory_space<vmem>>, vector<2x16x10xbf16>,
    %c0_5 = arith.constant 0 : index
    %c6 = arith.constant 6 : index
    %c0_6 = arith.constant 0 : index
    %5 = vector.load %arg6[%c0_5, %c6, %c0_6] : memref<2x32x10xbf16, #tpu.memory_space<vmem>>, vector<2x16x10xbf16>
    %6 = vector.shape_cast %5 : vector<2x16x10xbf16> to vector<32x10xbf16>
    %c0_7 = arith.constant 0 : index
    %c0_8 = arith.constant 0 : index
    %c0_9 = arith.constant 0 : index
    %7 = vector.load %arg2[%c0_7, %c0_8, %c0_9] : memref<5x10x128xbf16, #tpu.memory_space<vmem>>, vector<1x10x128xbf16>
    %8 = vector.shape_cast %7 : vector<1x10x128xbf16> to vector<10x128xbf16>
    %cst = arith.constant dense<0.000000e+00> : vector<32x128xf32>
    %9 = tpu.matmul %6, %8, %cst {dimension_numbers = #tpu.dot_dimension_numbers<[1], [0], [0], [1], [0, 0, 1, 1], [], []>} : vector<32x10xbf16>, vector<10x128xbf16>, vector<32x128xf32> -> vector<32x128xf32>
    %c0_10 = arith.constant 0 : index
    %c7 = arith.constant 7 : index
    %c0_11 = arith.constant 0 : index
    %10 = vector.load %arg6[%c0_10, %c7, %c0_11] : memref<2x32x10xbf16, #tpu.memory_space<vmem>>, vector<2x16x10xbf16>
    %11 = vector.shape_cast %10 : vector<2x16x10xbf16> to vector<32x10xbf16>
    %c1 = arith.constant 1 : index
    %c0_12 = arith.constant 0 : index
    %c0_13 = arith.constant 0 : index
    %12 = vector.load %arg2[%c1, %c0_12, %c0_13] : memref<5x10x128xbf16, #tpu.memory_space<vmem>>, vector<1x10x128xbf16>
    %13 = vector.shape_cast %12 : vector<1x10x128xbf16> to vector<10x128xbf16>
    %cst_14 = arith.constant dense<0.000000e+00> : vector<32x128xf32>
    %14 = tpu.matmul %11, %13, %cst_14 {dimension_numbers = #tpu.dot_dimension_numbers<[1], [0], [0], [1], [0, 0, 1, 1], [], []>} : vector<32x10xbf16>, vector<10x128xbf16>, vector<32x128xf32> -> vector<32x128xf32>
    %15 = arith.addf %9, %14 : vector<32x128xf32>
    %c0_15 = arith.constant 0 : index
    %c8_16 = arith.constant 8 : index
    %c0_17 = arith.constant 0 : index
    %16 = vector.load %arg6[%c0_15, %c8_16, %c0_17] : memref<2x32x10xbf16, #tpu.memory_space<vmem>>, vector<2x16x10xbf16>
    %17 = vector.shape_cast %16 : vector<2x16x10xbf16> to vector<32x10xbf16>
    %c2 = arith.constant 2 : index
    %c0_18 = arith.constant 0 : index
    %c0_19 = arith.constant 0 : index
    %18 = vector.load %arg2[%c2, %c0_18, %c0_19] : memref<5x10x128xbf16, #tpu.memory_space<vmem>>, vector<1x10x128xbf16>
    %19 = vector.shape_cast %18 : vector<1x10x128xbf16> to vector<10x128xbf16>
    %cst_20 = arith.constant dense<0.000000e+00> : vector<32x128xf32>
    %20 = tpu.matmul %17, %19, %cst_20 {dimension_numbers = #tpu.dot_dimension_numbers<[1], [0], [0], [1], [0, 0, 1, 1], [], []>} : vector<32x10xbf16>, vector<10x128xbf16>, vector<32x128xf32> -> vector<32x128xf32>
    %21 = arith.addf %15, %20 : vector<32x128xf32>
    %c0_21 = arith.constant 0 : index
    %c9 = arith.constant 9 : index
    %c0_22 = arith.constant 0 : index
    %22 = vector.load %arg6[%c0_21, %c9, %c0_22] : memref<2x32x10xbf16, #tpu.memory_space<vmem>>, vector<2x16x10xbf16>
    %23 = vector.shape_cast %22 : vector<2x16x10xbf16> to vector<32x10xbf16>
    %c3 = arith.constant 3 : index
    %c0_23 = arith.constant 0 : index
    %c0_24 = arith.constant 0 : index
    %24 = vector.load %arg2[%c3, %c0_23, %c0_24] : memref<5x10x128xbf16, #tpu.memory_space<vmem>>, vector<1x10x128xbf16>
    %25 = vector.shape_cast %24 : vector<1x10x128xbf16> to vector<10x128xbf16>
    %cst_25 = arith.constant dense<0.000000e+00> : vector<32x128xf32>
    %26 = tpu.matmul %23, %25, %cst_25 {dimension_numbers = #tpu.dot_dimension_numbers<[1], [0], [0], [1], [0, 0, 1, 1], [], []>} : vector<32x10xbf16>, vector<10x128xbf16>, vector<32x128xf32> -> vector<32x128xf32>
    %27 = arith.addf %21, %26 : vector<32x128xf32>
    %c0_26 = arith.constant 0 : index
    %c10 = arith.constant 10 : index
    %c0_27 = arith.constant 0 : index
    %28 = vector.load %arg6[%c0_26, %c10, %c0_27] : memref<2x32x10xbf16, #tpu.memory_space<vmem>>, vector<2x16x10xbf16>
    %29 = vector.shape_cast %28 : vector<2x16x10xbf16> to vector<32x10xbf16>
    %c4 = arith.constant 4 : index
    %c0_28 = arith.constant 0 : index
    %c0_29 = arith.constant 0 : index
    %30 = vector.load %arg2[%c4, %c0_28, %c0_29] : memref<5x10x128xbf16, #tpu.memory_space<vmem>>, vector<1x10x128xbf16>
    %31 = vector.shape_cast %30 : vector<1x10x128xbf16> to vector<10x128xbf16>
    %cst_30 = arith.constant dense<0.000000e+00> : vector<32x128xf32>
    %32 = tpu.matmul %29, %31, %cst_30 {dimension_numbers = #tpu.dot_dimension_numbers<[1], [0], [0], [1], [0, 0, 1, 1], [], []>} : vector<32x10xbf16>, vector<10x128xbf16>, vector<32x128xf32> -> vector<32x128xf32>
    %33 = arith.addf %27, %32 : vector<32x128xf32>
    %c0_31 = arith.constant 0 : index
    %c0_32 = arith.constant 0 : index
    %34 = vector.load %arg3[%c0_31, %c0_32] : memref<1x128xf32, #tpu.memory_space<vmem>>, vector<1x128xf32>
    %35 = vector.broadcast %34 : vector<1x128xf32> to vector<32x128xf32>
    %36 = arith.mulf %33, %35 : vector<32x128xf32>
    %c0_33 = arith.constant 0 : index
    %c0_34 = arith.constant 0 : index
    %37 = vector.load %arg4[%c0_33, %c0_34] : memref<1x128xf32, #tpu.memory_space<vmem>>, vector<1x128xf32>
    %38 = vector.broadcast %37 : vector<1x128xf32> to vector<32x128xf32>
    %39 = arith.addf %36, %38 : vector<32x128xf32>
    %40 = arith.negf %39 : vector<32x128xf32>
    %41 = math.exp %40 : vector<32x128xf32>
    %cst_35 = arith.constant 1.000000e+00 : f32
    %42 = vector.broadcast %cst_35 : f32 to vector<32x128xf32>
    %43 = arith.addf %42, %41 : vector<32x128xf32>
    %44 = arith.divf %42, %43 : vector<32x128xf32>
    %45 = arith.mulf %39, %44 : vector<32x128xf32>
    %46 = vector.shape_cast %45 : vector<32x128xf32> to vector<2x16x128xf32>
    %47 = arith.truncf %46 : vector<2x16x128xf32> to vector<2x16x128xbf16>
    %c0_36 = arith.constant 0 : index
    %c0_37 = arith.constant 0 : index
    %c0_38 = arith.constant 0 : index
    %48 = vector.load %arg5[%c0_36, %c0_37, %c0_38] : memref<2x16x128xbf16, #tpu.memory_space<vmem>>, vector<2x16x128xbf16>
    tpu.vector_store %arg5[%c0_36, %c0_37, %c0_38], %47 {strides = array<i32>} : memref<2x16x128xbf16, #tpu.memory_space<vmem>>, vector<2x16x128xbf16>,
    return
  }
  func.func @transform_0(%arg0: i32) -> (i32, i32, i32) {
    %c0_i32 = arith.constant 0 : i32
    %c0_i32_0 = arith.constant 0 : i32
    %c0_i32_1 = arith.constant 0 : i32
    return %arg0, %c0_i32, %c0_i32_0 : i32, i32, i32
  }
  func.func @transform_1(%arg0: i32) -> (i32, i32, i32) {
    %c0_i32 = arith.constant 0 : i32
    %c0_i32_0 = arith.constant 0 : i32
    %c0_i32_1 = arith.constant 0 : i32
    %c0_i32_2 = arith.constant 0 : i32
    return %c0_i32, %c0_i32_0, %c0_i32_1 : i32, i32, i32
  }
  func.func @transform_2(%arg0: i32) -> (i32, i32) {
    %c0_i32 = arith.constant 0 : i32
    %c0_i32_0 = arith.constant 0 : i32
    %c0_i32_1 = arith.constant 0 : i32
    return %c0_i32, %c0_i32_0 : i32, i32
  }
  func.func @transform_3(%arg0: i32) -> (i32, i32) {
    %c0_i32 = arith.constant 0 : i32
    %c0_i32_0 = arith.constant 0 : i32
    %c0_i32_1 = arith.constant 0 : i32
    return %c0_i32, %c0_i32_0 : i32, i32
  }
  func.func @transform_4(%arg0: i32) -> (i32, i32, i32) {
    %c0_i32 = arith.constant 0 : i32
    %c0_i32_0 = arith.constant 0 : i32
    %c0_i32_1 = arith.constant 0 : i32
    return %arg0, %c0_i32, %c0_i32_0 : i32, i32, i32
  }
}

module attributes {stable_mosaic.version = 11 : i64} {
  func.func @_inv_res_resize_kernel(%arg0: i32, %arg1: memref<2x16x128xbf16, #tpu.memory_space<vmem>>, %arg2: memref<128x128xbf16, #tpu.memory_space<vmem>>, %arg3: memref<1x128xf32, #tpu.memory_space<vmem>>, %arg4: memref<1x128xf32, #tpu.memory_space<vmem>>, %arg5: memref<15x128xf32, #tpu.memory_space<vmem>>, %arg6: memref<1x128xf32, #tpu.memory_space<vmem>>, %arg7: memref<1x128xf32, #tpu.memory_space<vmem>>, %arg8: memref<128x4xbf16, #tpu.memory_space<vmem>>, %arg9: memref<1x4xf32, #tpu.memory_space<vmem>>, %arg10: memref<4x128xbf16, #tpu.memory_space<vmem>>, %arg11: memref<1x128xf32, #tpu.memory_space<vmem>>, %arg12: memref<128x128xbf16, #tpu.memory_space<vmem>>, %arg13: memref<1x128xf32, #tpu.memory_space<vmem>>, %arg14: memref<1x128xf32, #tpu.memory_space<vmem>>, %arg15: memref<5x128x128xbf16, #tpu.memory_space<vmem>>, %arg16: memref<5x128x128xbf16, #tpu.memory_space<vmem>>, %arg17: memref<1x128xf32, #tpu.memory_space<vmem>>, %arg18: memref<1x128xf32, #tpu.memory_space<vmem>>, %arg19: memref<2x16x128xbf16, #tpu.memory_space<vmem>>, %arg20: memref<2x32x128xbf16, #tpu.memory_space<vmem>>, %arg21: memref<2x32x128xbf16, #tpu.memory_space<vmem>>, %arg22: memref<2x32x128xbf16, #tpu.memory_space<vmem>>) attributes {dimension_semantics = [#tpu.dimension_semantics<arbitrary>], iteration_bounds = array<i64: 1>, scalar_prefetch = 0 : i64, scratch_operands = 3 : i64, tpu.core_type = #tpu.core_type<tc>, window_params = [{transform_indices = @transform_0, window_bounds = array<i64: 2, 16, 128>}, {pipeline_mode = #tpu.pipeline_mode<synchronous>, transform_indices = @transform_1, window_bounds = array<i64: 128, 128>}, {pipeline_mode = #tpu.pipeline_mode<synchronous>, transform_indices = @transform_2, window_bounds = array<i64: 1, 128>}, {pipeline_mode = #tpu.pipeline_mode<synchronous>, transform_indices = @transform_3, window_bounds = array<i64: 1, 128>}, {pipeline_mode = #tpu.pipeline_mode<synchronous>, transform_indices = @transform_4, window_bounds = array<i64: 15, 128>}, {pipeline_mode = #tpu.pipeline_mode<synchronous>, transform_indices = @transform_5, window_bounds = array<i64: 1, 128>}, {pipeline_mode = #tpu.pipeline_mode<synchronous>, transform_indices = @transform_6, window_bounds = array<i64: 1, 128>}, {pipeline_mode = #tpu.pipeline_mode<synchronous>, transform_indices = @transform_7, window_bounds = array<i64: 128, 4>}, {pipeline_mode = #tpu.pipeline_mode<synchronous>, transform_indices = @transform_8, window_bounds = array<i64: 1, 4>}, {pipeline_mode = #tpu.pipeline_mode<synchronous>, transform_indices = @transform_9, window_bounds = array<i64: 4, 128>}, {pipeline_mode = #tpu.pipeline_mode<synchronous>, transform_indices = @transform_10, window_bounds = array<i64: 1, 128>}, {pipeline_mode = #tpu.pipeline_mode<synchronous>, transform_indices = @transform_11, window_bounds = array<i64: 128, 128>}, {pipeline_mode = #tpu.pipeline_mode<synchronous>, transform_indices = @transform_12, window_bounds = array<i64: 1, 128>}, {pipeline_mode = #tpu.pipeline_mode<synchronous>, transform_indices = @transform_13, window_bounds = array<i64: 1, 128>}, {pipeline_mode = #tpu.pipeline_mode<synchronous>, transform_indices = @transform_14, window_bounds = array<i64: 5, 128, 128>}, {pipeline_mode = #tpu.pipeline_mode<synchronous>, transform_indices = @transform_15, window_bounds = array<i64: 5, 128, 128>}, {pipeline_mode = #tpu.pipeline_mode<synchronous>, transform_indices = @transform_16, window_bounds = array<i64: 1, 128>}, {pipeline_mode = #tpu.pipeline_mode<synchronous>, transform_indices = @transform_17, window_bounds = array<i64: 1, 128>}, {transform_indices = @transform_18, window_bounds = array<i64: 2, 16, 128>}]} {
    %c0_i32 = arith.constant 0 : i32
    %0 = arith.cmpi eq, %arg0, %c0_i32 : i32
    %1 = arith.extui %0 : i1 to i32
    %c0_i32_0 = arith.constant 0 : i32
    %2 = arith.cmpi ne, %1, %c0_i32_0 : i32
    scf.if %2 {
      %cst_163 = arith.constant 0.000000e+00 : bf16
      %242 = vector.broadcast %cst_163 : bf16 to vector<2x8x128xbf16>
      %c0_164 = arith.constant 0 : index
      %c0_165 = arith.constant 0 : index
      %c0_166 = arith.constant 0 : index
      %243 = vector.load %arg20[%c0_164, %c0_165, %c0_166] : memref<2x32x128xbf16, #tpu.memory_space<vmem>>, vector<2x8x128xbf16>
      tpu.vector_store %arg20[%c0_164, %c0_165, %c0_166], %242 {strides = array<i32>} : memref<2x32x128xbf16, #tpu.memory_space<vmem>>, vector<2x8x128xbf16>,
      %c0_167 = arith.constant 0 : index
      %c24 = arith.constant 24 : index
      %c0_168 = arith.constant 0 : index
      %244 = vector.load %arg20[%c0_167, %c24, %c0_168] : memref<2x32x128xbf16, #tpu.memory_space<vmem>>, vector<2x8x128xbf16>
      tpu.vector_store %arg20[%c0_167, %c24, %c0_168], %242 {strides = array<i32>} : memref<2x32x128xbf16, #tpu.memory_space<vmem>>, vector<2x8x128xbf16>,
      %cst_169 = arith.constant 0.000000e+00 : bf16
      %245 = vector.broadcast %cst_169 : bf16 to vector<2x8x128xbf16>
      %c0_170 = arith.constant 0 : index
      %c0_171 = arith.constant 0 : index
      %c0_172 = arith.constant 0 : index
      %246 = vector.load %arg21[%c0_170, %c0_171, %c0_172] : memref<2x32x128xbf16, #tpu.memory_space<vmem>>, vector<2x8x128xbf16>
      tpu.vector_store %arg21[%c0_170, %c0_171, %c0_172], %245 {strides = array<i32>} : memref<2x32x128xbf16, #tpu.memory_space<vmem>>, vector<2x8x128xbf16>,
      %c0_173 = arith.constant 0 : index
      %c24_174 = arith.constant 24 : index
      %c0_175 = arith.constant 0 : index
      %247 = vector.load %arg21[%c0_173, %c24_174, %c0_175] : memref<2x32x128xbf16, #tpu.memory_space<vmem>>, vector<2x8x128xbf16>
      tpu.vector_store %arg21[%c0_173, %c24_174, %c0_175], %245 {strides = array<i32>} : memref<2x32x128xbf16, #tpu.memory_space<vmem>>, vector<2x8x128xbf16>,
      %cst_176 = arith.constant 0.000000e+00 : bf16
      %248 = vector.broadcast %cst_176 : bf16 to vector<2x8x128xbf16>
      %c0_177 = arith.constant 0 : index
      %c0_178 = arith.constant 0 : index
      %c0_179 = arith.constant 0 : index
      %249 = vector.load %arg22[%c0_177, %c0_178, %c0_179] : memref<2x32x128xbf16, #tpu.memory_space<vmem>>, vector<2x8x128xbf16>
      tpu.vector_store %arg22[%c0_177, %c0_178, %c0_179], %248 {strides = array<i32>} : memref<2x32x128xbf16, #tpu.memory_space<vmem>>, vector<2x8x128xbf16>,
      %c0_180 = arith.constant 0 : index
      %c24_181 = arith.constant 24 : index
      %c0_182 = arith.constant 0 : index
      %250 = vector.load %arg22[%c0_180, %c24_181, %c0_182] : memref<2x32x128xbf16, #tpu.memory_space<vmem>>, vector<2x8x128xbf16>
      tpu.vector_store %arg22[%c0_180, %c24_181, %c0_182], %248 {strides = array<i32>} : memref<2x32x128xbf16, #tpu.memory_space<vmem>>, vector<2x8x128xbf16>,
    } else {
    }
    %c0 = arith.constant 0 : index
    %c0_1 = arith.constant 0 : index
    %c0_2 = arith.constant 0 : index
    %3 = vector.load %arg1[%c0, %c0_1, %c0_2] : memref<2x16x128xbf16, #tpu.memory_space<vmem>>, vector<2x16x128xbf16>
    %4 = vector.shape_cast %3 : vector<2x16x128xbf16> to vector<32x128xbf16>
    %c0_3 = arith.constant 0 : index
    %c0_4 = arith.constant 0 : index
    %5 = vector.load %arg2[%c0_3, %c0_4] : memref<128x128xbf16, #tpu.memory_space<vmem>>, vector<128x128xbf16>
    %cst = arith.constant dense<0.000000e+00> : vector<32x128xf32>
    %6 = tpu.matmul %4, %5, %cst {dimension_numbers = #tpu.dot_dimension_numbers<[1], [0], [0], [1], [0, 0, 1, 1], [], []>} : vector<32x128xbf16>, vector<128x128xbf16>, vector<32x128xf32> -> vector<32x128xf32>
    %c0_5 = arith.constant 0 : index
    %c0_6 = arith.constant 0 : index
    %7 = vector.load %arg3[%c0_5, %c0_6] : memref<1x128xf32, #tpu.memory_space<vmem>>, vector<1x128xf32>
    %8 = vector.broadcast %7 : vector<1x128xf32> to vector<32x128xf32>
    %9 = arith.mulf %6, %8 : vector<32x128xf32>
    %c0_7 = arith.constant 0 : index
    %c0_8 = arith.constant 0 : index
    %10 = vector.load %arg4[%c0_7, %c0_8] : memref<1x128xf32, #tpu.memory_space<vmem>>, vector<1x128xf32>
    %11 = vector.broadcast %10 : vector<1x128xf32> to vector<32x128xf32>
    %12 = arith.addf %9, %11 : vector<32x128xf32>
    %13 = arith.negf %12 : vector<32x128xf32>
    %14 = math.exp %13 : vector<32x128xf32>
    %cst_9 = arith.constant 1.000000e+00 : f32
    %15 = vector.broadcast %cst_9 : f32 to vector<32x128xf32>
    %16 = arith.addf %15, %14 : vector<32x128xf32>
    %17 = arith.divf %15, %16 : vector<32x128xf32>
    %18 = arith.mulf %12, %17 : vector<32x128xf32>
    %19 = vector.shape_cast %18 : vector<32x128xf32> to vector<2x16x128xf32>
    %20 = arith.truncf %19 : vector<2x16x128xf32> to vector<2x16x128xbf16>
    %c0_10 = arith.constant 0 : index
    %c8 = arith.constant 8 : index
    %c0_11 = arith.constant 0 : index
    %21 = vector.load %arg20[%c0_10, %c8, %c0_11] : memref<2x32x128xbf16, #tpu.memory_space<vmem>>, vector<2x16x128xbf16>
    tpu.vector_store %arg20[%c0_10, %c8, %c0_11], %20 {strides = array<i32>} : memref<2x32x128xbf16, #tpu.memory_space<vmem>>, vector<2x16x128xbf16>,
    %c0_12 = arith.constant 0 : index
    %c6 = arith.constant 6 : index
    %c0_13 = arith.constant 0 : index
    %22 = vector.load %arg20[%c0_12, %c6, %c0_13] : memref<2x32x128xbf16, #tpu.memory_space<vmem>>, vector<2x16x128xbf16>
    %23 = vector.shape_cast %22 : vector<2x16x128xbf16> to vector<32x128xbf16>
    %24 = arith.extf %23 : vector<32x128xbf16> to vector<32x128xf32>
    %c127_i32 = arith.constant 127 : i32
    %25 = tpu.dynamic_rotate %24 by %c127_i32 dim 1 : vector<32x128xf32>, i32 -> vector<32x128xf32>
    %c0_14 = arith.constant 0 : index
    %c0_15 = arith.constant 0 : index
    %26 = vector.load %arg5[%c0_14, %c0_15] : memref<15x128xf32, #tpu.memory_space<vmem>>, vector<1x128xf32>
    %27 = vector.broadcast %26 : vector<1x128xf32> to vector<32x128xf32>
    %28 = arith.mulf %25, %27 : vector<32x128xf32>
    %c1 = arith.constant 1 : index
    %c0_16 = arith.constant 0 : index
    %29 = vector.load %arg5[%c1, %c0_16] : memref<15x128xf32, #tpu.memory_space<vmem>>, vector<1x128xf32>
    %30 = vector.broadcast %29 : vector<1x128xf32> to vector<32x128xf32>
    %31 = arith.mulf %24, %30 : vector<32x128xf32>
    %32 = arith.addf %28, %31 : vector<32x128xf32>
    %c1_i32 = arith.constant 1 : i32
    %33 = tpu.dynamic_rotate %24 by %c1_i32 dim 1 : vector<32x128xf32>, i32 -> vector<32x128xf32>
    %c2 = arith.constant 2 : index
    %c0_17 = arith.constant 0 : index
    %34 = vector.load %arg5[%c2, %c0_17] : memref<15x128xf32, #tpu.memory_space<vmem>>, vector<1x128xf32>
    %35 = vector.broadcast %34 : vector<1x128xf32> to vector<32x128xf32>
    %36 = arith.mulf %33, %35 : vector<32x128xf32>
    %37 = arith.addf %32, %36 : vector<32x128xf32>
    %c0_18 = arith.constant 0 : index
    %c7 = arith.constant 7 : index
    %c0_19 = arith.constant 0 : index
    %38 = vector.load %arg20[%c0_18, %c7, %c0_19] : memref<2x32x128xbf16, #tpu.memory_space<vmem>>, vector<2x16x128xbf16>
    %39 = vector.shape_cast %38 : vector<2x16x128xbf16> to vector<32x128xbf16>
    %40 = arith.extf %39 : vector<32x128xbf16> to vector<32x128xf32>
    %c127_i32_20 = arith.constant 127 : i32
    %41 = tpu.dynamic_rotate %40 by %c127_i32_20 dim 1 : vector<32x128xf32>, i32 -> vector<32x128xf32>
    %c3 = arith.constant 3 : index
    %c0_21 = arith.constant 0 : index
    %42 = vector.load %arg5[%c3, %c0_21] : memref<15x128xf32, #tpu.memory_space<vmem>>, vector<1x128xf32>
    %43 = vector.broadcast %42 : vector<1x128xf32> to vector<32x128xf32>
    %44 = arith.mulf %41, %43 : vector<32x128xf32>
    %45 = arith.addf %37, %44 : vector<32x128xf32>
    %c4 = arith.constant 4 : index
    %c0_22 = arith.constant 0 : index
    %46 = vector.load %arg5[%c4, %c0_22] : memref<15x128xf32, #tpu.memory_space<vmem>>, vector<1x128xf32>
    %47 = vector.broadcast %46 : vector<1x128xf32> to vector<32x128xf32>
    %48 = arith.mulf %40, %47 : vector<32x128xf32>
    %49 = arith.addf %45, %48 : vector<32x128xf32>
    %c1_i32_23 = arith.constant 1 : i32
    %50 = tpu.dynamic_rotate %40 by %c1_i32_23 dim 1 : vector<32x128xf32>, i32 -> vector<32x128xf32>
    %c5 = arith.constant 5 : index
    %c0_24 = arith.constant 0 : index
    %51 = vector.load %arg5[%c5, %c0_24] : memref<15x128xf32, #tpu.memory_space<vmem>>, vector<1x128xf32>
    %52 = vector.broadcast %51 : vector<1x128xf32> to vector<32x128xf32>
    %53 = arith.mulf %50, %52 : vector<32x128xf32>
    %54 = arith.addf %49, %53 : vector<32x128xf32>
    %c0_25 = arith.constant 0 : index
    %c8_26 = arith.constant 8 : index
    %c0_27 = arith.constant 0 : index
    %55 = vector.load %arg20[%c0_25, %c8_26, %c0_27] : memref<2x32x128xbf16, #tpu.memory_space<vmem>>, vector<2x16x128xbf16>
    %56 = vector.shape_cast %55 : vector<2x16x128xbf16> to vector<32x128xbf16>
    %57 = arith.extf %56 : vector<32x128xbf16> to vector<32x128xf32>
    %c127_i32_28 = arith.constant 127 : i32
    %58 = tpu.dynamic_rotate %57 by %c127_i32_28 dim 1 : vector<32x128xf32>, i32 -> vector<32x128xf32>
    %c6_29 = arith.constant 6 : index
    %c0_30 = arith.constant 0 : index
    %59 = vector.load %arg5[%c6_29, %c0_30] : memref<15x128xf32, #tpu.memory_space<vmem>>, vector<1x128xf32>
    %60 = vector.broadcast %59 : vector<1x128xf32> to vector<32x128xf32>
    %61 = arith.mulf %58, %60 : vector<32x128xf32>
    %62 = arith.addf %54, %61 : vector<32x128xf32>
    %c7_31 = arith.constant 7 : index
    %c0_32 = arith.constant 0 : index
    %63 = vector.load %arg5[%c7_31, %c0_32] : memref<15x128xf32, #tpu.memory_space<vmem>>, vector<1x128xf32>
    %64 = vector.broadcast %63 : vector<1x128xf32> to vector<32x128xf32>
    %65 = arith.mulf %57, %64 : vector<32x128xf32>
    %66 = arith.addf %62, %65 : vector<32x128xf32>
    %c1_i32_33 = arith.constant 1 : i32
    %67 = tpu.dynamic_rotate %57 by %c1_i32_33 dim 1 : vector<32x128xf32>, i32 -> vector<32x128xf32>
    %c8_34 = arith.constant 8 : index
    %c0_35 = arith.constant 0 : index
    %68 = vector.load %arg5[%c8_34, %c0_35] : memref<15x128xf32, #tpu.memory_space<vmem>>, vector<1x128xf32>
    %69 = vector.broadcast %68 : vector<1x128xf32> to vector<32x128xf32>
    %70 = arith.mulf %67, %69 : vector<32x128xf32>
    %71 = arith.addf %66, %70 : vector<32x128xf32>
    %c0_36 = arith.constant 0 : index
    %c9 = arith.constant 9 : index
    %c0_37 = arith.constant 0 : index
    %72 = vector.load %arg20[%c0_36, %c9, %c0_37] : memref<2x32x128xbf16, #tpu.memory_space<vmem>>, vector<2x16x128xbf16>
    %73 = vector.shape_cast %72 : vector<2x16x128xbf16> to vector<32x128xbf16>
    %74 = arith.extf %73 : vector<32x128xbf16> to vector<32x128xf32>
    %c127_i32_38 = arith.constant 127 : i32
    %75 = tpu.dynamic_rotate %74 by %c127_i32_38 dim 1 : vector<32x128xf32>, i32 -> vector<32x128xf32>
    %c9_39 = arith.constant 9 : index
    %c0_40 = arith.constant 0 : index
    %76 = vector.load %arg5[%c9_39, %c0_40] : memref<15x128xf32, #tpu.memory_space<vmem>>, vector<1x128xf32>
    %77 = vector.broadcast %76 : vector<1x128xf32> to vector<32x128xf32>
    %78 = arith.mulf %75, %77 : vector<32x128xf32>
    %79 = arith.addf %71, %78 : vector<32x128xf32>
    %c10 = arith.constant 10 : index
    %c0_41 = arith.constant 0 : index
    %80 = vector.load %arg5[%c10, %c0_41] : memref<15x128xf32, #tpu.memory_space<vmem>>, vector<1x128xf32>
    %81 = vector.broadcast %80 : vector<1x128xf32> to vector<32x128xf32>
    %82 = arith.mulf %74, %81 : vector<32x128xf32>
    %83 = arith.addf %79, %82 : vector<32x128xf32>
    %c1_i32_42 = arith.constant 1 : i32
    %84 = tpu.dynamic_rotate %74 by %c1_i32_42 dim 1 : vector<32x128xf32>, i32 -> vector<32x128xf32>
    %c11 = arith.constant 11 : index
    %c0_43 = arith.constant 0 : index
    %85 = vector.load %arg5[%c11, %c0_43] : memref<15x128xf32, #tpu.memory_space<vmem>>, vector<1x128xf32>
    %86 = vector.broadcast %85 : vector<1x128xf32> to vector<32x128xf32>
    %87 = arith.mulf %84, %86 : vector<32x128xf32>
    %88 = arith.addf %83, %87 : vector<32x128xf32>
    %c0_44 = arith.constant 0 : index
    %c10_45 = arith.constant 10 : index
    %c0_46 = arith.constant 0 : index
    %89 = vector.load %arg20[%c0_44, %c10_45, %c0_46] : memref<2x32x128xbf16, #tpu.memory_space<vmem>>, vector<2x16x128xbf16>
    %90 = vector.shape_cast %89 : vector<2x16x128xbf16> to vector<32x128xbf16>
    %91 = arith.extf %90 : vector<32x128xbf16> to vector<32x128xf32>
    %c127_i32_47 = arith.constant 127 : i32
    %92 = tpu.dynamic_rotate %91 by %c127_i32_47 dim 1 : vector<32x128xf32>, i32 -> vector<32x128xf32>
    %c12 = arith.constant 12 : index
    %c0_48 = arith.constant 0 : index
    %93 = vector.load %arg5[%c12, %c0_48] : memref<15x128xf32, #tpu.memory_space<vmem>>, vector<1x128xf32>
    %94 = vector.broadcast %93 : vector<1x128xf32> to vector<32x128xf32>
    %95 = arith.mulf %92, %94 : vector<32x128xf32>
    %96 = arith.addf %88, %95 : vector<32x128xf32>
    %c13 = arith.constant 13 : index
    %c0_49 = arith.constant 0 : index
    %97 = vector.load %arg5[%c13, %c0_49] : memref<15x128xf32, #tpu.memory_space<vmem>>, vector<1x128xf32>
    %98 = vector.broadcast %97 : vector<1x128xf32> to vector<32x128xf32>
    %99 = arith.mulf %91, %98 : vector<32x128xf32>
    %100 = arith.addf %96, %99 : vector<32x128xf32>
    %c1_i32_50 = arith.constant 1 : i32
    %101 = tpu.dynamic_rotate %91 by %c1_i32_50 dim 1 : vector<32x128xf32>, i32 -> vector<32x128xf32>
    %c14 = arith.constant 14 : index
    %c0_51 = arith.constant 0 : index
    %102 = vector.load %arg5[%c14, %c0_51] : memref<15x128xf32, #tpu.memory_space<vmem>>, vector<1x128xf32>
    %103 = vector.broadcast %102 : vector<1x128xf32> to vector<32x128xf32>
    %104 = arith.mulf %101, %103 : vector<32x128xf32>
    %105 = arith.addf %100, %104 : vector<32x128xf32>
    %c0_52 = arith.constant 0 : index
    %c0_53 = arith.constant 0 : index
    %106 = vector.load %arg6[%c0_52, %c0_53] : memref<1x128xf32, #tpu.memory_space<vmem>>, vector<1x128xf32>
    %107 = vector.broadcast %106 : vector<1x128xf32> to vector<32x128xf32>
    %108 = arith.mulf %105, %107 : vector<32x128xf32>
    %c0_54 = arith.constant 0 : index
    %c0_55 = arith.constant 0 : index
    %109 = vector.load %arg7[%c0_54, %c0_55] : memref<1x128xf32, #tpu.memory_space<vmem>>, vector<1x128xf32>
    %110 = vector.broadcast %109 : vector<1x128xf32> to vector<32x128xf32>
    %111 = arith.addf %108, %110 : vector<32x128xf32>
    %112 = arith.negf %111 : vector<32x128xf32>
    %113 = math.exp %112 : vector<32x128xf32>
    %cst_56 = arith.constant 1.000000e+00 : f32
    %114 = vector.broadcast %cst_56 : f32 to vector<32x128xf32>
    %115 = arith.addf %114, %113 : vector<32x128xf32>
    %116 = arith.divf %114, %115 : vector<32x128xf32>
    %117 = arith.mulf %111, %116 : vector<32x128xf32>
    %118 = vector.shape_cast %117 : vector<32x128xf32> to vector<2x16x128xf32>
    %cst_57 = arith.constant dense<0.000000e+00> : vector<2x128xf32>
    %119 = vector.multi_reduction <add>, %118, %cst_57 [1] : vector<2x16x128xf32> to vector<2x128xf32>
    %cst_58 = arith.constant 1.600000e+01 : f32
    %120 = vector.broadcast %cst_58 : f32 to vector<2x128xf32>
    %121 = arith.divf %119, %120 : vector<2x128xf32>
    %122 = arith.truncf %121 : vector<2x128xf32> to vector<2x128xbf16>
    %c0_59 = arith.constant 0 : index
    %c0_60 = arith.constant 0 : index
    %123 = vector.load %arg8[%c0_59, %c0_60] : memref<128x4xbf16, #tpu.memory_space<vmem>>, vector<128x4xbf16>
    %cst_61 = arith.constant dense<0.000000e+00> : vector<2x4xf32>
    %124 = tpu.matmul %122, %123, %cst_61 {dimension_numbers = #tpu.dot_dimension_numbers<[1], [0], [0], [1], [0, 0, 1, 1], [], []>} : vector<2x128xbf16>, vector<128x4xbf16>, vector<2x4xf32> -> vector<2x4xf32>
    %c0_62 = arith.constant 0 : index
    %c0_63 = arith.constant 0 : index
    %125 = vector.load %arg9[%c0_62, %c0_63] : memref<1x4xf32, #tpu.memory_space<vmem>>, vector<1x4xf32>
    %126 = vector.broadcast %125 : vector<1x4xf32> to vector<2x4xf32>
    %127 = arith.addf %124, %126 : vector<2x4xf32>
    %128 = arith.negf %127 : vector<2x4xf32>
    %129 = math.exp %128 : vector<2x4xf32>
    %cst_64 = arith.constant 1.000000e+00 : f32
    %130 = vector.broadcast %cst_64 : f32 to vector<2x4xf32>
    %131 = arith.addf %130, %129 : vector<2x4xf32>
    %132 = arith.divf %130, %131 : vector<2x4xf32>
    %133 = arith.mulf %127, %132 : vector<2x4xf32>
    %134 = arith.truncf %133 : vector<2x4xf32> to vector<2x4xbf16>
    %c0_65 = arith.constant 0 : index
    %c0_66 = arith.constant 0 : index
    %135 = vector.load %arg10[%c0_65, %c0_66] : memref<4x128xbf16, #tpu.memory_space<vmem>>, vector<4x128xbf16>
    %cst_67 = arith.constant dense<0.000000e+00> : vector<2x128xf32>
    %136 = tpu.matmul %134, %135, %cst_67 {dimension_numbers = #tpu.dot_dimension_numbers<[1], [0], [0], [1], [0, 0, 1, 1], [], []>} : vector<2x4xbf16>, vector<4x128xbf16>, vector<2x128xf32> -> vector<2x128xf32>
    %c0_68 = arith.constant 0 : index
    %c0_69 = arith.constant 0 : index
    %137 = vector.load %arg11[%c0_68, %c0_69] : memref<1x128xf32, #tpu.memory_space<vmem>>, vector<1x128xf32>
    %138 = vector.broadcast %137 : vector<1x128xf32> to vector<2x128xf32>
    %139 = arith.addf %136, %138 : vector<2x128xf32>
    %140 = arith.negf %139 : vector<2x128xf32>
    %141 = math.exp %140 : vector<2x128xf32>
    %cst_70 = arith.constant 1.000000e+00 : f32
    %142 = vector.broadcast %cst_70 : f32 to vector<2x128xf32>
    %143 = arith.addf %142, %141 : vector<2x128xf32>
    %144 = arith.divf %142, %143 : vector<2x128xf32>
    %145 = vector.shape_cast %144 : vector<2x128xf32> to vector<2x1x128xf32>
    %146 = vector.broadcast %145 : vector<2x1x128xf32> to vector<2x16x128xf32>
    %147 = arith.mulf %118, %146 : vector<2x16x128xf32>
    %148 = vector.shape_cast %147 : vector<2x16x128xf32> to vector<32x128xf32>
    %149 = arith.truncf %148 : vector<32x128xf32> to vector<32x128xbf16>
    %c0_71 = arith.constant 0 : index
    %c0_72 = arith.constant 0 : index
    %150 = vector.load %arg12[%c0_71, %c0_72] : memref<128x128xbf16, #tpu.memory_space<vmem>>, vector<128x128xbf16>
    %cst_73 = arith.constant dense<0.000000e+00> : vector<32x128xf32>
    %151 = tpu.matmul %149, %150, %cst_73 {dimension_numbers = #tpu.dot_dimension_numbers<[1], [0], [0], [1], [0, 0, 1, 1], [], []>} : vector<32x128xbf16>, vector<128x128xbf16>, vector<32x128xf32> -> vector<32x128xf32>
    %c0_74 = arith.constant 0 : index
    %c0_75 = arith.constant 0 : index
    %152 = vector.load %arg13[%c0_74, %c0_75] : memref<1x128xf32, #tpu.memory_space<vmem>>, vector<1x128xf32>
    %153 = vector.broadcast %152 : vector<1x128xf32> to vector<32x128xf32>
    %154 = arith.mulf %151, %153 : vector<32x128xf32>
    %c0_76 = arith.constant 0 : index
    %c0_77 = arith.constant 0 : index
    %155 = vector.load %arg14[%c0_76, %c0_77] : memref<1x128xf32, #tpu.memory_space<vmem>>, vector<1x128xf32>
    %156 = vector.broadcast %155 : vector<1x128xf32> to vector<32x128xf32>
    %157 = arith.addf %154, %156 : vector<32x128xf32>
    %158 = arith.negf %157 : vector<32x128xf32>
    %159 = math.exp %158 : vector<32x128xf32>
    %cst_78 = arith.constant 1.000000e+00 : f32
    %160 = vector.broadcast %cst_78 : f32 to vector<32x128xf32>
    %161 = arith.addf %160, %159 : vector<32x128xf32>
    %162 = arith.divf %160, %161 : vector<32x128xf32>
    %163 = arith.mulf %157, %162 : vector<32x128xf32>
    %c0_79 = arith.constant 0 : index
    %c8_80 = arith.constant 8 : index
    %c0_81 = arith.constant 0 : index
    %164 = vector.load %arg21[%c0_79, %c8_80, %c0_81] : memref<2x32x128xbf16, #tpu.memory_space<vmem>>, vector<2x16x128xbf16>
    tpu.vector_store %arg21[%c0_79, %c8_80, %c0_81], %3 {strides = array<i32>} : memref<2x32x128xbf16, #tpu.memory_space<vmem>>, vector<2x16x128xbf16>,
    %165 = vector.shape_cast %163 : vector<32x128xf32> to vector<2x16x128xf32>
    %166 = arith.truncf %165 : vector<2x16x128xf32> to vector<2x16x128xbf16>
    %c0_82 = arith.constant 0 : index
    %c8_83 = arith.constant 8 : index
    %c0_84 = arith.constant 0 : index
    %167 = vector.load %arg22[%c0_82, %c8_83, %c0_84] : memref<2x32x128xbf16, #tpu.memory_space<vmem>>, vector<2x16x128xbf16>
    tpu.vector_store %arg22[%c0_82, %c8_83, %c0_84], %166 {strides = array<i32>} : memref<2x32x128xbf16, #tpu.memory_space<vmem>>, vector<2x16x128xbf16>,
    %c0_85 = arith.constant 0 : index
    %c6_86 = arith.constant 6 : index
    %c0_87 = arith.constant 0 : index
    %168 = vector.load %arg21[%c0_85, %c6_86, %c0_87] : memref<2x32x128xbf16, #tpu.memory_space<vmem>>, vector<2x16x128xbf16>
    %169 = vector.shape_cast %168 : vector<2x16x128xbf16> to vector<32x128xbf16>
    %c0_88 = arith.constant 0 : index
    %c0_89 = arith.constant 0 : index
    %c0_90 = arith.constant 0 : index
    %170 = vector.load %arg15[%c0_88, %c0_89, %c0_90] : memref<5x128x128xbf16, #tpu.memory_space<vmem>>, vector<1x128x128xbf16>
    %171 = vector.shape_cast %170 : vector<1x128x128xbf16> to vector<128x128xbf16>
    %cst_91 = arith.constant dense<0.000000e+00> : vector<32x128xf32>
    %172 = tpu.matmul %169, %171, %cst_91 {dimension_numbers = #tpu.dot_dimension_numbers<[1], [0], [0], [1], [0, 0, 1, 1], [], []>} : vector<32x128xbf16>, vector<128x128xbf16>, vector<32x128xf32> -> vector<32x128xf32>
    %c0_92 = arith.constant 0 : index
    %c7_93 = arith.constant 7 : index
    %c0_94 = arith.constant 0 : index
    %173 = vector.load %arg21[%c0_92, %c7_93, %c0_94] : memref<2x32x128xbf16, #tpu.memory_space<vmem>>, vector<2x16x128xbf16>
    %174 = vector.shape_cast %173 : vector<2x16x128xbf16> to vector<32x128xbf16>
    %c1_95 = arith.constant 1 : index
    %c0_96 = arith.constant 0 : index
    %c0_97 = arith.constant 0 : index
    %175 = vector.load %arg15[%c1_95, %c0_96, %c0_97] : memref<5x128x128xbf16, #tpu.memory_space<vmem>>, vector<1x128x128xbf16>
    %176 = vector.shape_cast %175 : vector<1x128x128xbf16> to vector<128x128xbf16>
    %cst_98 = arith.constant dense<0.000000e+00> : vector<32x128xf32>
    %177 = tpu.matmul %174, %176, %cst_98 {dimension_numbers = #tpu.dot_dimension_numbers<[1], [0], [0], [1], [0, 0, 1, 1], [], []>} : vector<32x128xbf16>, vector<128x128xbf16>, vector<32x128xf32> -> vector<32x128xf32>
    %178 = arith.addf %172, %177 : vector<32x128xf32>
    %c0_99 = arith.constant 0 : index
    %c8_100 = arith.constant 8 : index
    %c0_101 = arith.constant 0 : index
    %179 = vector.load %arg21[%c0_99, %c8_100, %c0_101] : memref<2x32x128xbf16, #tpu.memory_space<vmem>>, vector<2x16x128xbf16>
    %180 = vector.shape_cast %179 : vector<2x16x128xbf16> to vector<32x128xbf16>
    %c2_102 = arith.constant 2 : index
    %c0_103 = arith.constant 0 : index
    %c0_104 = arith.constant 0 : index
    %181 = vector.load %arg15[%c2_102, %c0_103, %c0_104] : memref<5x128x128xbf16, #tpu.memory_space<vmem>>, vector<1x128x128xbf16>
    %182 = vector.shape_cast %181 : vector<1x128x128xbf16> to vector<128x128xbf16>
    %cst_105 = arith.constant dense<0.000000e+00> : vector<32x128xf32>
    %183 = tpu.matmul %180, %182, %cst_105 {dimension_numbers = #tpu.dot_dimension_numbers<[1], [0], [0], [1], [0, 0, 1, 1], [], []>} : vector<32x128xbf16>, vector<128x128xbf16>, vector<32x128xf32> -> vector<32x128xf32>
    %184 = arith.addf %178, %183 : vector<32x128xf32>
    %c0_106 = arith.constant 0 : index
    %c9_107 = arith.constant 9 : index
    %c0_108 = arith.constant 0 : index
    %185 = vector.load %arg21[%c0_106, %c9_107, %c0_108] : memref<2x32x128xbf16, #tpu.memory_space<vmem>>, vector<2x16x128xbf16>
    %186 = vector.shape_cast %185 : vector<2x16x128xbf16> to vector<32x128xbf16>
    %c3_109 = arith.constant 3 : index
    %c0_110 = arith.constant 0 : index
    %c0_111 = arith.constant 0 : index
    %187 = vector.load %arg15[%c3_109, %c0_110, %c0_111] : memref<5x128x128xbf16, #tpu.memory_space<vmem>>, vector<1x128x128xbf16>
    %188 = vector.shape_cast %187 : vector<1x128x128xbf16> to vector<128x128xbf16>
    %cst_112 = arith.constant dense<0.000000e+00> : vector<32x128xf32>
    %189 = tpu.matmul %186, %188, %cst_112 {dimension_numbers = #tpu.dot_dimension_numbers<[1], [0], [0], [1], [0, 0, 1, 1], [], []>} : vector<32x128xbf16>, vector<128x128xbf16>, vector<32x128xf32> -> vector<32x128xf32>
    %190 = arith.addf %184, %189 : vector<32x128xf32>
    %c0_113 = arith.constant 0 : index
    %c10_114 = arith.constant 10 : index
    %c0_115 = arith.constant 0 : index
    %191 = vector.load %arg21[%c0_113, %c10_114, %c0_115] : memref<2x32x128xbf16, #tpu.memory_space<vmem>>, vector<2x16x128xbf16>
    %192 = vector.shape_cast %191 : vector<2x16x128xbf16> to vector<32x128xbf16>
    %c4_116 = arith.constant 4 : index
    %c0_117 = arith.constant 0 : index
    %c0_118 = arith.constant 0 : index
    %193 = vector.load %arg15[%c4_116, %c0_117, %c0_118] : memref<5x128x128xbf16, #tpu.memory_space<vmem>>, vector<1x128x128xbf16>
    %194 = vector.shape_cast %193 : vector<1x128x128xbf16> to vector<128x128xbf16>
    %cst_119 = arith.constant dense<0.000000e+00> : vector<32x128xf32>
    %195 = tpu.matmul %192, %194, %cst_119 {dimension_numbers = #tpu.dot_dimension_numbers<[1], [0], [0], [1], [0, 0, 1, 1], [], []>} : vector<32x128xbf16>, vector<128x128xbf16>, vector<32x128xf32> -> vector<32x128xf32>
    %196 = arith.addf %190, %195 : vector<32x128xf32>
    %c0_120 = arith.constant 0 : index
    %c6_121 = arith.constant 6 : index
    %c0_122 = arith.constant 0 : index
    %197 = vector.load %arg22[%c0_120, %c6_121, %c0_122] : memref<2x32x128xbf16, #tpu.memory_space<vmem>>, vector<2x16x128xbf16>
    %198 = vector.shape_cast %197 : vector<2x16x128xbf16> to vector<32x128xbf16>
    %c0_123 = arith.constant 0 : index
    %c0_124 = arith.constant 0 : index
    %c0_125 = arith.constant 0 : index
    %199 = vector.load %arg16[%c0_123, %c0_124, %c0_125] : memref<5x128x128xbf16, #tpu.memory_space<vmem>>, vector<1x128x128xbf16>
    %200 = vector.shape_cast %199 : vector<1x128x128xbf16> to vector<128x128xbf16>
    %cst_126 = arith.constant dense<0.000000e+00> : vector<32x128xf32>
    %201 = tpu.matmul %198, %200, %cst_126 {dimension_numbers = #tpu.dot_dimension_numbers<[1], [0], [0], [1], [0, 0, 1, 1], [], []>} : vector<32x128xbf16>, vector<128x128xbf16>, vector<32x128xf32> -> vector<32x128xf32>
    %c0_127 = arith.constant 0 : index
    %c7_128 = arith.constant 7 : index
    %c0_129 = arith.constant 0 : index
    %202 = vector.load %arg22[%c0_127, %c7_128, %c0_129] : memref<2x32x128xbf16, #tpu.memory_space<vmem>>, vector<2x16x128xbf16>
    %203 = vector.shape_cast %202 : vector<2x16x128xbf16> to vector<32x128xbf16>
    %c1_130 = arith.constant 1 : index
    %c0_131 = arith.constant 0 : index
    %c0_132 = arith.constant 0 : index
    %204 = vector.load %arg16[%c1_130, %c0_131, %c0_132] : memref<5x128x128xbf16, #tpu.memory_space<vmem>>, vector<1x128x128xbf16>
    %205 = vector.shape_cast %204 : vector<1x128x128xbf16> to vector<128x128xbf16>
    %cst_133 = arith.constant dense<0.000000e+00> : vector<32x128xf32>
    %206 = tpu.matmul %203, %205, %cst_133 {dimension_numbers = #tpu.dot_dimension_numbers<[1], [0], [0], [1], [0, 0, 1, 1], [], []>} : vector<32x128xbf16>, vector<128x128xbf16>, vector<32x128xf32> -> vector<32x128xf32>
    %207 = arith.addf %201, %206 : vector<32x128xf32>
    %c0_134 = arith.constant 0 : index
    %c8_135 = arith.constant 8 : index
    %c0_136 = arith.constant 0 : index
    %208 = vector.load %arg22[%c0_134, %c8_135, %c0_136] : memref<2x32x128xbf16, #tpu.memory_space<vmem>>, vector<2x16x128xbf16>
    %209 = vector.shape_cast %208 : vector<2x16x128xbf16> to vector<32x128xbf16>
    %c2_137 = arith.constant 2 : index
    %c0_138 = arith.constant 0 : index
    %c0_139 = arith.constant 0 : index
    %210 = vector.load %arg16[%c2_137, %c0_138, %c0_139] : memref<5x128x128xbf16, #tpu.memory_space<vmem>>, vector<1x128x128xbf16>
    %211 = vector.shape_cast %210 : vector<1x128x128xbf16> to vector<128x128xbf16>
    %cst_140 = arith.constant dense<0.000000e+00> : vector<32x128xf32>
    %212 = tpu.matmul %209, %211, %cst_140 {dimension_numbers = #tpu.dot_dimension_numbers<[1], [0], [0], [1], [0, 0, 1, 1], [], []>} : vector<32x128xbf16>, vector<128x128xbf16>, vector<32x128xf32> -> vector<32x128xf32>
    %213 = arith.addf %207, %212 : vector<32x128xf32>
    %c0_141 = arith.constant 0 : index
    %c9_142 = arith.constant 9 : index
    %c0_143 = arith.constant 0 : index
    %214 = vector.load %arg22[%c0_141, %c9_142, %c0_143] : memref<2x32x128xbf16, #tpu.memory_space<vmem>>, vector<2x16x128xbf16>
    %215 = vector.shape_cast %214 : vector<2x16x128xbf16> to vector<32x128xbf16>
    %c3_144 = arith.constant 3 : index
    %c0_145 = arith.constant 0 : index
    %c0_146 = arith.constant 0 : index
    %216 = vector.load %arg16[%c3_144, %c0_145, %c0_146] : memref<5x128x128xbf16, #tpu.memory_space<vmem>>, vector<1x128x128xbf16>
    %217 = vector.shape_cast %216 : vector<1x128x128xbf16> to vector<128x128xbf16>
    %cst_147 = arith.constant dense<0.000000e+00> : vector<32x128xf32>
    %218 = tpu.matmul %215, %217, %cst_147 {dimension_numbers = #tpu.dot_dimension_numbers<[1], [0], [0], [1], [0, 0, 1, 1], [], []>} : vector<32x128xbf16>, vector<128x128xbf16>, vector<32x128xf32> -> vector<32x128xf32>
    %219 = arith.addf %213, %218 : vector<32x128xf32>
    %c0_148 = arith.constant 0 : index
    %c10_149 = arith.constant 10 : index
    %c0_150 = arith.constant 0 : index
    %220 = vector.load %arg22[%c0_148, %c10_149, %c0_150] : memref<2x32x128xbf16, #tpu.memory_space<vmem>>, vector<2x16x128xbf16>
    %221 = vector.shape_cast %220 : vector<2x16x128xbf16> to vector<32x128xbf16>
    %c4_151 = arith.constant 4 : index
    %c0_152 = arith.constant 0 : index
    %c0_153 = arith.constant 0 : index
    %222 = vector.load %arg16[%c4_151, %c0_152, %c0_153] : memref<5x128x128xbf16, #tpu.memory_space<vmem>>, vector<1x128x128xbf16>
    %223 = vector.shape_cast %222 : vector<1x128x128xbf16> to vector<128x128xbf16>
    %cst_154 = arith.constant dense<0.000000e+00> : vector<32x128xf32>
    %224 = tpu.matmul %221, %223, %cst_154 {dimension_numbers = #tpu.dot_dimension_numbers<[1], [0], [0], [1], [0, 0, 1, 1], [], []>} : vector<32x128xbf16>, vector<128x128xbf16>, vector<32x128xf32> -> vector<32x128xf32>
    %225 = arith.addf %219, %224 : vector<32x128xf32>
    %226 = arith.addf %196, %225 : vector<32x128xf32>
    %c0_155 = arith.constant 0 : index
    %c0_156 = arith.constant 0 : index
    %227 = vector.load %arg17[%c0_155, %c0_156] : memref<1x128xf32, #tpu.memory_space<vmem>>, vector<1x128xf32>
    %228 = vector.broadcast %227 : vector<1x128xf32> to vector<32x128xf32>
    %229 = arith.mulf %226, %228 : vector<32x128xf32>
    %c0_157 = arith.constant 0 : index
    %c0_158 = arith.constant 0 : index
    %230 = vector.load %arg18[%c0_157, %c0_158] : memref<1x128xf32, #tpu.memory_space<vmem>>, vector<1x128xf32>
    %231 = vector.broadcast %230 : vector<1x128xf32> to vector<32x128xf32>
    %232 = arith.addf %229, %231 : vector<32x128xf32>
    %233 = arith.negf %232 : vector<32x128xf32>
    %234 = math.exp %233 : vector<32x128xf32>
    %cst_159 = arith.constant 1.000000e+00 : f32
    %235 = vector.broadcast %cst_159 : f32 to vector<32x128xf32>
    %236 = arith.addf %235, %234 : vector<32x128xf32>
    %237 = arith.divf %235, %236 : vector<32x128xf32>
    %238 = arith.mulf %232, %237 : vector<32x128xf32>
    %239 = vector.shape_cast %238 : vector<32x128xf32> to vector<2x16x128xf32>
    %240 = arith.truncf %239 : vector<2x16x128xf32> to vector<2x16x128xbf16>
    %c0_160 = arith.constant 0 : index
    %c0_161 = arith.constant 0 : index
    %c0_162 = arith.constant 0 : index
    %241 = vector.load %arg19[%c0_160, %c0_161, %c0_162] : memref<2x16x128xbf16, #tpu.memory_space<vmem>>, vector<2x16x128xbf16>
    tpu.vector_store %arg19[%c0_160, %c0_161, %c0_162], %240 {strides = array<i32>} : memref<2x16x128xbf16, #tpu.memory_space<vmem>>, vector<2x16x128xbf16>,
    return
  }
  func.func @transform_0(%arg0: i32) -> (i32, i32, i32) {
    %c0_i32 = arith.constant 0 : i32
    %c0_i32_0 = arith.constant 0 : i32
    %c0_i32_1 = arith.constant 0 : i32
    return %arg0, %c0_i32, %c0_i32_0 : i32, i32, i32
  }
  func.func @transform_1(%arg0: i32) -> (i32, i32) {
    %c0_i32 = arith.constant 0 : i32
    %c0_i32_0 = arith.constant 0 : i32
    %c0_i32_1 = arith.constant 0 : i32
    return %c0_i32, %c0_i32_0 : i32, i32
  }
  func.func @transform_2(%arg0: i32) -> (i32, i32) {
    %c0_i32 = arith.constant 0 : i32
    %c0_i32_0 = arith.constant 0 : i32
    %c0_i32_1 = arith.constant 0 : i32
    return %c0_i32, %c0_i32_0 : i32, i32
  }
  func.func @transform_3(%arg0: i32) -> (i32, i32) {
    %c0_i32 = arith.constant 0 : i32
    %c0_i32_0 = arith.constant 0 : i32
    %c0_i32_1 = arith.constant 0 : i32
    return %c0_i32, %c0_i32_0 : i32, i32
  }
  func.func @transform_4(%arg0: i32) -> (i32, i32) {
    %c0_i32 = arith.constant 0 : i32
    %c0_i32_0 = arith.constant 0 : i32
    %c0_i32_1 = arith.constant 0 : i32
    return %c0_i32, %c0_i32_0 : i32, i32
  }
  func.func @transform_5(%arg0: i32) -> (i32, i32) {
    %c0_i32 = arith.constant 0 : i32
    %c0_i32_0 = arith.constant 0 : i32
    %c0_i32_1 = arith.constant 0 : i32
    return %c0_i32, %c0_i32_0 : i32, i32
  }
  func.func @transform_6(%arg0: i32) -> (i32, i32) {
    %c0_i32 = arith.constant 0 : i32
    %c0_i32_0 = arith.constant 0 : i32
    %c0_i32_1 = arith.constant 0 : i32
    return %c0_i32, %c0_i32_0 : i32, i32
  }
  func.func @transform_7(%arg0: i32) -> (i32, i32) {
    %c0_i32 = arith.constant 0 : i32
    %c0_i32_0 = arith.constant 0 : i32
    %c0_i32_1 = arith.constant 0 : i32
    return %c0_i32, %c0_i32_0 : i32, i32
  }
  func.func @transform_8(%arg0: i32) -> (i32, i32) {
    %c0_i32 = arith.constant 0 : i32
    %c0_i32_0 = arith.constant 0 : i32
    %c0_i32_1 = arith.constant 0 : i32
    return %c0_i32, %c0_i32_0 : i32, i32
  }
  func.func @transform_9(%arg0: i32) -> (i32, i32) {
    %c0_i32 = arith.constant 0 : i32
    %c0_i32_0 = arith.constant 0 : i32
    %c0_i32_1 = arith.constant 0 : i32
    return %c0_i32, %c0_i32_0 : i32, i32
  }
  func.func @transform_10(%arg0: i32) -> (i32, i32) {
    %c0_i32 = arith.constant 0 : i32
    %c0_i32_0 = arith.constant 0 : i32
    %c0_i32_1 = arith.constant 0 : i32
    return %c0_i32, %c0_i32_0 : i32, i32
  }
  func.func @transform_11(%arg0: i32) -> (i32, i32) {
    %c0_i32 = arith.constant 0 : i32
    %c0_i32_0 = arith.constant 0 : i32
    %c0_i32_1 = arith.constant 0 : i32
    return %c0_i32, %c0_i32_0 : i32, i32
  }
  func.func @transform_12(%arg0: i32) -> (i32, i32) {
    %c0_i32 = arith.constant 0 : i32
    %c0_i32_0 = arith.constant 0 : i32
    %c0_i32_1 = arith.constant 0 : i32
    return %c0_i32, %c0_i32_0 : i32, i32
  }
  func.func @transform_13(%arg0: i32) -> (i32, i32) {
    %c0_i32 = arith.constant 0 : i32
    %c0_i32_0 = arith.constant 0 : i32
    %c0_i32_1 = arith.constant 0 : i32
    return %c0_i32, %c0_i32_0 : i32, i32
  }
  func.func @transform_14(%arg0: i32) -> (i32, i32, i32) {
    %c0_i32 = arith.constant 0 : i32
    %c0_i32_0 = arith.constant 0 : i32
    %c0_i32_1 = arith.constant 0 : i32
    %c0_i32_2 = arith.constant 0 : i32
    return %c0_i32, %c0_i32_0, %c0_i32_1 : i32, i32, i32
  }
  func.func @transform_15(%arg0: i32) -> (i32, i32, i32) {
    %c0_i32 = arith.constant 0 : i32
    %c0_i32_0 = arith.constant 0 : i32
    %c0_i32_1 = arith.constant 0 : i32
    %c0_i32_2 = arith.constant 0 : i32
    return %c0_i32, %c0_i32_0, %c0_i32_1 : i32, i32, i32
  }
  func.func @transform_16(%arg0: i32) -> (i32, i32) {
    %c0_i32 = arith.constant 0 : i32
    %c0_i32_0 = arith.constant 0 : i32
    %c0_i32_1 = arith.constant 0 : i32
    return %c0_i32, %c0_i32_0 : i32, i32
  }
  func.func @transform_17(%arg0: i32) -> (i32, i32) {
    %c0_i32 = arith.constant 0 : i32
    %c0_i32_0 = arith.constant 0 : i32
    %c0_i32_1 = arith.constant 0 : i32
    return %c0_i32, %c0_i32_0 : i32, i32
  }
  func.func @transform_18(%arg0: i32) -> (i32, i32, i32) {
    %c0_i32 = arith.constant 0 : i32
    %c0_i32_0 = arith.constant 0 : i32
    %c0_i32_1 = arith.constant 0 : i32
    return %arg0, %c0_i32, %c0_i32_0 : i32, i32, i32
  }
}

module attributes {stable_mosaic.version = 11 : i64} {
  func.func @_inv_res_resize_kernel(%arg0: i32, %arg1: memref<2x16x128xbf16, #tpu.memory_space<vmem>>, %arg2: memref<128x128xbf16, #tpu.memory_space<vmem>>, %arg3: memref<1x128xf32, #tpu.memory_space<vmem>>, %arg4: memref<1x128xf32, #tpu.memory_space<vmem>>, %arg5: memref<15x128xf32, #tpu.memory_space<vmem>>, %arg6: memref<1x128xf32, #tpu.memory_space<vmem>>, %arg7: memref<1x128xf32, #tpu.memory_space<vmem>>, %arg8: memref<128x2xbf16, #tpu.memory_space<vmem>>, %arg9: memref<1x2xf32, #tpu.memory_space<vmem>>, %arg10: memref<2x128xbf16, #tpu.memory_space<vmem>>, %arg11: memref<1x128xf32, #tpu.memory_space<vmem>>, %arg12: memref<128x128xbf16, #tpu.memory_space<vmem>>, %arg13: memref<1x128xf32, #tpu.memory_space<vmem>>, %arg14: memref<1x128xf32, #tpu.memory_space<vmem>>, %arg15: memref<5x128x128xbf16, #tpu.memory_space<vmem>>, %arg16: memref<5x128x128xbf16, #tpu.memory_space<vmem>>, %arg17: memref<1x128xf32, #tpu.memory_space<vmem>>, %arg18: memref<1x128xf32, #tpu.memory_space<vmem>>, %arg19: memref<128x128xbf16, #tpu.memory_space<vmem>>, %arg20: memref<1x128xf32, #tpu.memory_space<vmem>>, %arg21: memref<2x16x128xf32, #tpu.memory_space<vmem>>, %arg22: memref<2x32x128xbf16, #tpu.memory_space<vmem>>, %arg23: memref<2x32x128xbf16, #tpu.memory_space<vmem>>, %arg24: memref<2x32x128xbf16, #tpu.memory_space<vmem>>) attributes {dimension_semantics = [#tpu.dimension_semantics<arbitrary>], iteration_bounds = array<i64: 1>, scalar_prefetch = 0 : i64, scratch_operands = 3 : i64, tpu.core_type = #tpu.core_type<tc>, window_params = [{transform_indices = @transform_0, window_bounds = array<i64: 2, 16, 128>}, {pipeline_mode = #tpu.pipeline_mode<synchronous>, transform_indices = @transform_1, window_bounds = array<i64: 128, 128>}, {pipeline_mode = #tpu.pipeline_mode<synchronous>, transform_indices = @transform_2, window_bounds = array<i64: 1, 128>}, {pipeline_mode = #tpu.pipeline_mode<synchronous>, transform_indices = @transform_3, window_bounds = array<i64: 1, 128>}, {pipeline_mode = #tpu.pipeline_mode<synchronous>, transform_indices = @transform_4, window_bounds = array<i64: 15, 128>}, {pipeline_mode = #tpu.pipeline_mode<synchronous>, transform_indices = @transform_5, window_bounds = array<i64: 1, 128>}, {pipeline_mode = #tpu.pipeline_mode<synchronous>, transform_indices = @transform_6, window_bounds = array<i64: 1, 128>}, {pipeline_mode = #tpu.pipeline_mode<synchronous>, transform_indices = @transform_7, window_bounds = array<i64: 128, 2>}, {pipeline_mode = #tpu.pipeline_mode<synchronous>, transform_indices = @transform_8, window_bounds = array<i64: 1, 2>}, {pipeline_mode = #tpu.pipeline_mode<synchronous>, transform_indices = @transform_9, window_bounds = array<i64: 2, 128>}, {pipeline_mode = #tpu.pipeline_mode<synchronous>, transform_indices = @transform_10, window_bounds = array<i64: 1, 128>}, {pipeline_mode = #tpu.pipeline_mode<synchronous>, transform_indices = @transform_11, window_bounds = array<i64: 128, 128>}, {pipeline_mode = #tpu.pipeline_mode<synchronous>, transform_indices = @transform_12, window_bounds = array<i64: 1, 128>}, {pipeline_mode = #tpu.pipeline_mode<synchronous>, transform_indices = @transform_13, window_bounds = array<i64: 1, 128>}, {pipeline_mode = #tpu.pipeline_mode<synchronous>, transform_indices = @transform_14, window_bounds = array<i64: 5, 128, 128>}, {pipeline_mode = #tpu.pipeline_mode<synchronous>, transform_indices = @transform_15, window_bounds = array<i64: 5, 128, 128>}, {pipeline_mode = #tpu.pipeline_mode<synchronous>, transform_indices = @transform_16, window_bounds = array<i64: 1, 128>}, {pipeline_mode = #tpu.pipeline_mode<synchronous>, transform_indices = @transform_17, window_bounds = array<i64: 1, 128>}, {pipeline_mode = #tpu.pipeline_mode<synchronous>, transform_indices = @transform_18, window_bounds = array<i64: 128, 128>}, {pipeline_mode = #tpu.pipeline_mode<synchronous>, transform_indices = @transform_19, window_bounds = array<i64: 1, 128>}, {transform_indices = @transform_20, window_bounds = array<i64: 2, 16, 128>}]} {
    %c0_i32 = arith.constant 0 : i32
    %0 = arith.cmpi eq, %arg0, %c0_i32 : i32
    %1 = arith.extui %0 : i1 to i32
    %c0_i32_0 = arith.constant 0 : i32
    %2 = arith.cmpi ne, %1, %c0_i32_0 : i32
    scf.if %2 {
      %cst_168 = arith.constant 0.000000e+00 : bf16
      %247 = vector.broadcast %cst_168 : bf16 to vector<2x8x128xbf16>
      %c0_169 = arith.constant 0 : index
      %c0_170 = arith.constant 0 : index
      %c0_171 = arith.constant 0 : index
      %248 = vector.load %arg22[%c0_169, %c0_170, %c0_171] : memref<2x32x128xbf16, #tpu.memory_space<vmem>>, vector<2x8x128xbf16>
      tpu.vector_store %arg22[%c0_169, %c0_170, %c0_171], %247 {strides = array<i32>} : memref<2x32x128xbf16, #tpu.memory_space<vmem>>, vector<2x8x128xbf16>,
      %c0_172 = arith.constant 0 : index
      %c24 = arith.constant 24 : index
      %c0_173 = arith.constant 0 : index
      %249 = vector.load %arg22[%c0_172, %c24, %c0_173] : memref<2x32x128xbf16, #tpu.memory_space<vmem>>, vector<2x8x128xbf16>
      tpu.vector_store %arg22[%c0_172, %c24, %c0_173], %247 {strides = array<i32>} : memref<2x32x128xbf16, #tpu.memory_space<vmem>>, vector<2x8x128xbf16>,
      %cst_174 = arith.constant 0.000000e+00 : bf16
      %250 = vector.broadcast %cst_174 : bf16 to vector<2x8x128xbf16>
      %c0_175 = arith.constant 0 : index
      %c0_176 = arith.constant 0 : index
      %c0_177 = arith.constant 0 : index
      %251 = vector.load %arg23[%c0_175, %c0_176, %c0_177] : memref<2x32x128xbf16, #tpu.memory_space<vmem>>, vector<2x8x128xbf16>
      tpu.vector_store %arg23[%c0_175, %c0_176, %c0_177], %250 {strides = array<i32>} : memref<2x32x128xbf16, #tpu.memory_space<vmem>>, vector<2x8x128xbf16>,
      %c0_178 = arith.constant 0 : index
      %c24_179 = arith.constant 24 : index
      %c0_180 = arith.constant 0 : index
      %252 = vector.load %arg23[%c0_178, %c24_179, %c0_180] : memref<2x32x128xbf16, #tpu.memory_space<vmem>>, vector<2x8x128xbf16>
      tpu.vector_store %arg23[%c0_178, %c24_179, %c0_180], %250 {strides = array<i32>} : memref<2x32x128xbf16, #tpu.memory_space<vmem>>, vector<2x8x128xbf16>,
      %cst_181 = arith.constant 0.000000e+00 : bf16
      %253 = vector.broadcast %cst_181 : bf16 to vector<2x8x128xbf16>
      %c0_182 = arith.constant 0 : index
      %c0_183 = arith.constant 0 : index
      %c0_184 = arith.constant 0 : index
      %254 = vector.load %arg24[%c0_182, %c0_183, %c0_184] : memref<2x32x128xbf16, #tpu.memory_space<vmem>>, vector<2x8x128xbf16>
      tpu.vector_store %arg24[%c0_182, %c0_183, %c0_184], %253 {strides = array<i32>} : memref<2x32x128xbf16, #tpu.memory_space<vmem>>, vector<2x8x128xbf16>,
      %c0_185 = arith.constant 0 : index
      %c24_186 = arith.constant 24 : index
      %c0_187 = arith.constant 0 : index
      %255 = vector.load %arg24[%c0_185, %c24_186, %c0_187] : memref<2x32x128xbf16, #tpu.memory_space<vmem>>, vector<2x8x128xbf16>
      tpu.vector_store %arg24[%c0_185, %c24_186, %c0_187], %253 {strides = array<i32>} : memref<2x32x128xbf16, #tpu.memory_space<vmem>>, vector<2x8x128xbf16>,
    } else {
    }
    %c0 = arith.constant 0 : index
    %c0_1 = arith.constant 0 : index
    %c0_2 = arith.constant 0 : index
    %3 = vector.load %arg1[%c0, %c0_1, %c0_2] : memref<2x16x128xbf16, #tpu.memory_space<vmem>>, vector<2x16x128xbf16>
    %4 = vector.shape_cast %3 : vector<2x16x128xbf16> to vector<32x128xbf16>
    %c0_3 = arith.constant 0 : index
    %c0_4 = arith.constant 0 : index
    %5 = vector.load %arg2[%c0_3, %c0_4] : memref<128x128xbf16, #tpu.memory_space<vmem>>, vector<128x128xbf16>
    %cst = arith.constant dense<0.000000e+00> : vector<32x128xf32>
    %6 = tpu.matmul %4, %5, %cst {dimension_numbers = #tpu.dot_dimension_numbers<[1], [0], [0], [1], [0, 0, 1, 1], [], []>} : vector<32x128xbf16>, vector<128x128xbf16>, vector<32x128xf32> -> vector<32x128xf32>
    %c0_5 = arith.constant 0 : index
    %c0_6 = arith.constant 0 : index
    %7 = vector.load %arg3[%c0_5, %c0_6] : memref<1x128xf32, #tpu.memory_space<vmem>>, vector<1x128xf32>
    %8 = vector.broadcast %7 : vector<1x128xf32> to vector<32x128xf32>
    %9 = arith.mulf %6, %8 : vector<32x128xf32>
    %c0_7 = arith.constant 0 : index
    %c0_8 = arith.constant 0 : index
    %10 = vector.load %arg4[%c0_7, %c0_8] : memref<1x128xf32, #tpu.memory_space<vmem>>, vector<1x128xf32>
    %11 = vector.broadcast %10 : vector<1x128xf32> to vector<32x128xf32>
    %12 = arith.addf %9, %11 : vector<32x128xf32>
    %13 = arith.negf %12 : vector<32x128xf32>
    %14 = math.exp %13 : vector<32x128xf32>
    %cst_9 = arith.constant 1.000000e+00 : f32
    %15 = vector.broadcast %cst_9 : f32 to vector<32x128xf32>
    %16 = arith.addf %15, %14 : vector<32x128xf32>
    %17 = arith.divf %15, %16 : vector<32x128xf32>
    %18 = arith.mulf %12, %17 : vector<32x128xf32>
    %19 = vector.shape_cast %18 : vector<32x128xf32> to vector<2x16x128xf32>
    %20 = arith.truncf %19 : vector<2x16x128xf32> to vector<2x16x128xbf16>
    %c0_10 = arith.constant 0 : index
    %c8 = arith.constant 8 : index
    %c0_11 = arith.constant 0 : index
    %21 = vector.load %arg22[%c0_10, %c8, %c0_11] : memref<2x32x128xbf16, #tpu.memory_space<vmem>>, vector<2x16x128xbf16>
    tpu.vector_store %arg22[%c0_10, %c8, %c0_11], %20 {strides = array<i32>} : memref<2x32x128xbf16, #tpu.memory_space<vmem>>, vector<2x16x128xbf16>,
    %c0_12 = arith.constant 0 : index
    %c6 = arith.constant 6 : index
    %c0_13 = arith.constant 0 : index
    %22 = vector.load %arg22[%c0_12, %c6, %c0_13] : memref<2x32x128xbf16, #tpu.memory_space<vmem>>, vector<2x16x128xbf16>
    %23 = vector.shape_cast %22 : vector<2x16x128xbf16> to vector<32x128xbf16>
    %24 = arith.extf %23 : vector<32x128xbf16> to vector<32x128xf32>
    %c127_i32 = arith.constant 127 : i32
    %25 = tpu.dynamic_rotate %24 by %c127_i32 dim 1 : vector<32x128xf32>, i32 -> vector<32x128xf32>
    %c0_14 = arith.constant 0 : index
    %c0_15 = arith.constant 0 : index
    %26 = vector.load %arg5[%c0_14, %c0_15] : memref<15x128xf32, #tpu.memory_space<vmem>>, vector<1x128xf32>
    %27 = vector.broadcast %26 : vector<1x128xf32> to vector<32x128xf32>
    %28 = arith.mulf %25, %27 : vector<32x128xf32>
    %c1 = arith.constant 1 : index
    %c0_16 = arith.constant 0 : index
    %29 = vector.load %arg5[%c1, %c0_16] : memref<15x128xf32, #tpu.memory_space<vmem>>, vector<1x128xf32>
    %30 = vector.broadcast %29 : vector<1x128xf32> to vector<32x128xf32>
    %31 = arith.mulf %24, %30 : vector<32x128xf32>
    %32 = arith.addf %28, %31 : vector<32x128xf32>
    %c1_i32 = arith.constant 1 : i32
    %33 = tpu.dynamic_rotate %24 by %c1_i32 dim 1 : vector<32x128xf32>, i32 -> vector<32x128xf32>
    %c2 = arith.constant 2 : index
    %c0_17 = arith.constant 0 : index
    %34 = vector.load %arg5[%c2, %c0_17] : memref<15x128xf32, #tpu.memory_space<vmem>>, vector<1x128xf32>
    %35 = vector.broadcast %34 : vector<1x128xf32> to vector<32x128xf32>
    %36 = arith.mulf %33, %35 : vector<32x128xf32>
    %37 = arith.addf %32, %36 : vector<32x128xf32>
    %c0_18 = arith.constant 0 : index
    %c7 = arith.constant 7 : index
    %c0_19 = arith.constant 0 : index
    %38 = vector.load %arg22[%c0_18, %c7, %c0_19] : memref<2x32x128xbf16, #tpu.memory_space<vmem>>, vector<2x16x128xbf16>
    %39 = vector.shape_cast %38 : vector<2x16x128xbf16> to vector<32x128xbf16>
    %40 = arith.extf %39 : vector<32x128xbf16> to vector<32x128xf32>
    %c127_i32_20 = arith.constant 127 : i32
    %41 = tpu.dynamic_rotate %40 by %c127_i32_20 dim 1 : vector<32x128xf32>, i32 -> vector<32x128xf32>
    %c3 = arith.constant 3 : index
    %c0_21 = arith.constant 0 : index
    %42 = vector.load %arg5[%c3, %c0_21] : memref<15x128xf32, #tpu.memory_space<vmem>>, vector<1x128xf32>
    %43 = vector.broadcast %42 : vector<1x128xf32> to vector<32x128xf32>
    %44 = arith.mulf %41, %43 : vector<32x128xf32>
    %45 = arith.addf %37, %44 : vector<32x128xf32>
    %c4 = arith.constant 4 : index
    %c0_22 = arith.constant 0 : index
    %46 = vector.load %arg5[%c4, %c0_22] : memref<15x128xf32, #tpu.memory_space<vmem>>, vector<1x128xf32>
    %47 = vector.broadcast %46 : vector<1x128xf32> to vector<32x128xf32>
    %48 = arith.mulf %40, %47 : vector<32x128xf32>
    %49 = arith.addf %45, %48 : vector<32x128xf32>
    %c1_i32_23 = arith.constant 1 : i32
    %50 = tpu.dynamic_rotate %40 by %c1_i32_23 dim 1 : vector<32x128xf32>, i32 -> vector<32x128xf32>
    %c5 = arith.constant 5 : index
    %c0_24 = arith.constant 0 : index
    %51 = vector.load %arg5[%c5, %c0_24] : memref<15x128xf32, #tpu.memory_space<vmem>>, vector<1x128xf32>
    %52 = vector.broadcast %51 : vector<1x128xf32> to vector<32x128xf32>
    %53 = arith.mulf %50, %52 : vector<32x128xf32>
    %54 = arith.addf %49, %53 : vector<32x128xf32>
    %c0_25 = arith.constant 0 : index
    %c8_26 = arith.constant 8 : index
    %c0_27 = arith.constant 0 : index
    %55 = vector.load %arg22[%c0_25, %c8_26, %c0_27] : memref<2x32x128xbf16, #tpu.memory_space<vmem>>, vector<2x16x128xbf16>
    %56 = vector.shape_cast %55 : vector<2x16x128xbf16> to vector<32x128xbf16>
    %57 = arith.extf %56 : vector<32x128xbf16> to vector<32x128xf32>
    %c127_i32_28 = arith.constant 127 : i32
    %58 = tpu.dynamic_rotate %57 by %c127_i32_28 dim 1 : vector<32x128xf32>, i32 -> vector<32x128xf32>
    %c6_29 = arith.constant 6 : index
    %c0_30 = arith.constant 0 : index
    %59 = vector.load %arg5[%c6_29, %c0_30] : memref<15x128xf32, #tpu.memory_space<vmem>>, vector<1x128xf32>
    %60 = vector.broadcast %59 : vector<1x128xf32> to vector<32x128xf32>
    %61 = arith.mulf %58, %60 : vector<32x128xf32>
    %62 = arith.addf %54, %61 : vector<32x128xf32>
    %c7_31 = arith.constant 7 : index
    %c0_32 = arith.constant 0 : index
    %63 = vector.load %arg5[%c7_31, %c0_32] : memref<15x128xf32, #tpu.memory_space<vmem>>, vector<1x128xf32>
    %64 = vector.broadcast %63 : vector<1x128xf32> to vector<32x128xf32>
    %65 = arith.mulf %57, %64 : vector<32x128xf32>
    %66 = arith.addf %62, %65 : vector<32x128xf32>
    %c1_i32_33 = arith.constant 1 : i32
    %67 = tpu.dynamic_rotate %57 by %c1_i32_33 dim 1 : vector<32x128xf32>, i32 -> vector<32x128xf32>
    %c8_34 = arith.constant 8 : index
    %c0_35 = arith.constant 0 : index
    %68 = vector.load %arg5[%c8_34, %c0_35] : memref<15x128xf32, #tpu.memory_space<vmem>>, vector<1x128xf32>
    %69 = vector.broadcast %68 : vector<1x128xf32> to vector<32x128xf32>
    %70 = arith.mulf %67, %69 : vector<32x128xf32>
    %71 = arith.addf %66, %70 : vector<32x128xf32>
    %c0_36 = arith.constant 0 : index
    %c9 = arith.constant 9 : index
    %c0_37 = arith.constant 0 : index
    %72 = vector.load %arg22[%c0_36, %c9, %c0_37] : memref<2x32x128xbf16, #tpu.memory_space<vmem>>, vector<2x16x128xbf16>
    %73 = vector.shape_cast %72 : vector<2x16x128xbf16> to vector<32x128xbf16>
    %74 = arith.extf %73 : vector<32x128xbf16> to vector<32x128xf32>
    %c127_i32_38 = arith.constant 127 : i32
    %75 = tpu.dynamic_rotate %74 by %c127_i32_38 dim 1 : vector<32x128xf32>, i32 -> vector<32x128xf32>
    %c9_39 = arith.constant 9 : index
    %c0_40 = arith.constant 0 : index
    %76 = vector.load %arg5[%c9_39, %c0_40] : memref<15x128xf32, #tpu.memory_space<vmem>>, vector<1x128xf32>
    %77 = vector.broadcast %76 : vector<1x128xf32> to vector<32x128xf32>
    %78 = arith.mulf %75, %77 : vector<32x128xf32>
    %79 = arith.addf %71, %78 : vector<32x128xf32>
    %c10 = arith.constant 10 : index
    %c0_41 = arith.constant 0 : index
    %80 = vector.load %arg5[%c10, %c0_41] : memref<15x128xf32, #tpu.memory_space<vmem>>, vector<1x128xf32>
    %81 = vector.broadcast %80 : vector<1x128xf32> to vector<32x128xf32>
    %82 = arith.mulf %74, %81 : vector<32x128xf32>
    %83 = arith.addf %79, %82 : vector<32x128xf32>
    %c1_i32_42 = arith.constant 1 : i32
    %84 = tpu.dynamic_rotate %74 by %c1_i32_42 dim 1 : vector<32x128xf32>, i32 -> vector<32x128xf32>
    %c11 = arith.constant 11 : index
    %c0_43 = arith.constant 0 : index
    %85 = vector.load %arg5[%c11, %c0_43] : memref<15x128xf32, #tpu.memory_space<vmem>>, vector<1x128xf32>
    %86 = vector.broadcast %85 : vector<1x128xf32> to vector<32x128xf32>
    %87 = arith.mulf %84, %86 : vector<32x128xf32>
    %88 = arith.addf %83, %87 : vector<32x128xf32>
    %c0_44 = arith.constant 0 : index
    %c10_45 = arith.constant 10 : index
    %c0_46 = arith.constant 0 : index
    %89 = vector.load %arg22[%c0_44, %c10_45, %c0_46] : memref<2x32x128xbf16, #tpu.memory_space<vmem>>, vector<2x16x128xbf16>
    %90 = vector.shape_cast %89 : vector<2x16x128xbf16> to vector<32x128xbf16>
    %91 = arith.extf %90 : vector<32x128xbf16> to vector<32x128xf32>
    %c127_i32_47 = arith.constant 127 : i32
    %92 = tpu.dynamic_rotate %91 by %c127_i32_47 dim 1 : vector<32x128xf32>, i32 -> vector<32x128xf32>
    %c12 = arith.constant 12 : index
    %c0_48 = arith.constant 0 : index
    %93 = vector.load %arg5[%c12, %c0_48] : memref<15x128xf32, #tpu.memory_space<vmem>>, vector<1x128xf32>
    %94 = vector.broadcast %93 : vector<1x128xf32> to vector<32x128xf32>
    %95 = arith.mulf %92, %94 : vector<32x128xf32>
    %96 = arith.addf %88, %95 : vector<32x128xf32>
    %c13 = arith.constant 13 : index
    %c0_49 = arith.constant 0 : index
    %97 = vector.load %arg5[%c13, %c0_49] : memref<15x128xf32, #tpu.memory_space<vmem>>, vector<1x128xf32>
    %98 = vector.broadcast %97 : vector<1x128xf32> to vector<32x128xf32>
    %99 = arith.mulf %91, %98 : vector<32x128xf32>
    %100 = arith.addf %96, %99 : vector<32x128xf32>
    %c1_i32_50 = arith.constant 1 : i32
    %101 = tpu.dynamic_rotate %91 by %c1_i32_50 dim 1 : vector<32x128xf32>, i32 -> vector<32x128xf32>
    %c14 = arith.constant 14 : index
    %c0_51 = arith.constant 0 : index
    %102 = vector.load %arg5[%c14, %c0_51] : memref<15x128xf32, #tpu.memory_space<vmem>>, vector<1x128xf32>
    %103 = vector.broadcast %102 : vector<1x128xf32> to vector<32x128xf32>
    %104 = arith.mulf %101, %103 : vector<32x128xf32>
    %105 = arith.addf %100, %104 : vector<32x128xf32>
    %c0_52 = arith.constant 0 : index
    %c0_53 = arith.constant 0 : index
    %106 = vector.load %arg6[%c0_52, %c0_53] : memref<1x128xf32, #tpu.memory_space<vmem>>, vector<1x128xf32>
    %107 = vector.broadcast %106 : vector<1x128xf32> to vector<32x128xf32>
    %108 = arith.mulf %105, %107 : vector<32x128xf32>
    %c0_54 = arith.constant 0 : index
    %c0_55 = arith.constant 0 : index
    %109 = vector.load %arg7[%c0_54, %c0_55] : memref<1x128xf32, #tpu.memory_space<vmem>>, vector<1x128xf32>
    %110 = vector.broadcast %109 : vector<1x128xf32> to vector<32x128xf32>
    %111 = arith.addf %108, %110 : vector<32x128xf32>
    %112 = arith.negf %111 : vector<32x128xf32>
    %113 = math.exp %112 : vector<32x128xf32>
    %cst_56 = arith.constant 1.000000e+00 : f32
    %114 = vector.broadcast %cst_56 : f32 to vector<32x128xf32>
    %115 = arith.addf %114, %113 : vector<32x128xf32>
    %116 = arith.divf %114, %115 : vector<32x128xf32>
    %117 = arith.mulf %111, %116 : vector<32x128xf32>
    %118 = vector.shape_cast %117 : vector<32x128xf32> to vector<2x16x128xf32>
    %cst_57 = arith.constant dense<0.000000e+00> : vector<2x128xf32>
    %119 = vector.multi_reduction <add>, %118, %cst_57 [1] : vector<2x16x128xf32> to vector<2x128xf32>
    %cst_58 = arith.constant 1.600000e+01 : f32
    %120 = vector.broadcast %cst_58 : f32 to vector<2x128xf32>
    %121 = arith.divf %119, %120 : vector<2x128xf32>
    %122 = arith.truncf %121 : vector<2x128xf32> to vector<2x128xbf16>
    %c0_59 = arith.constant 0 : index
    %c0_60 = arith.constant 0 : index
    %123 = vector.load %arg8[%c0_59, %c0_60] : memref<128x2xbf16, #tpu.memory_space<vmem>>, vector<128x2xbf16>
    %cst_61 = arith.constant dense<0.000000e+00> : vector<2x2xf32>
    %124 = tpu.matmul %122, %123, %cst_61 {dimension_numbers = #tpu.dot_dimension_numbers<[1], [0], [0], [1], [0, 0, 1, 1], [], []>} : vector<2x128xbf16>, vector<128x2xbf16>, vector<2x2xf32> -> vector<2x2xf32>
    %c0_62 = arith.constant 0 : index
    %c0_63 = arith.constant 0 : index
    %125 = vector.load %arg9[%c0_62, %c0_63] : memref<1x2xf32, #tpu.memory_space<vmem>>, vector<1x2xf32>
    %126 = vector.broadcast %125 : vector<1x2xf32> to vector<2x2xf32>
    %127 = arith.addf %124, %126 : vector<2x2xf32>
    %128 = arith.negf %127 : vector<2x2xf32>
    %129 = math.exp %128 : vector<2x2xf32>
    %cst_64 = arith.constant 1.000000e+00 : f32
    %130 = vector.broadcast %cst_64 : f32 to vector<2x2xf32>
    %131 = arith.addf %130, %129 : vector<2x2xf32>
    %132 = arith.divf %130, %131 : vector<2x2xf32>
    %133 = arith.mulf %127, %132 : vector<2x2xf32>
    %134 = arith.truncf %133 : vector<2x2xf32> to vector<2x2xbf16>
    %c0_65 = arith.constant 0 : index
    %c0_66 = arith.constant 0 : index
    %135 = vector.load %arg10[%c0_65, %c0_66] : memref<2x128xbf16, #tpu.memory_space<vmem>>, vector<2x128xbf16>
    %cst_67 = arith.constant dense<0.000000e+00> : vector<2x128xf32>
    %136 = tpu.matmul %134, %135, %cst_67 {dimension_numbers = #tpu.dot_dimension_numbers<[1], [0], [0], [1], [0, 0, 1, 1], [], []>} : vector<2x2xbf16>, vector<2x128xbf16>, vector<2x128xf32> -> vector<2x128xf32>
    %c0_68 = arith.constant 0 : index
    %c0_69 = arith.constant 0 : index
    %137 = vector.load %arg11[%c0_68, %c0_69] : memref<1x128xf32, #tpu.memory_space<vmem>>, vector<1x128xf32>
    %138 = vector.broadcast %137 : vector<1x128xf32> to vector<2x128xf32>
    %139 = arith.addf %136, %138 : vector<2x128xf32>
    %140 = arith.negf %139 : vector<2x128xf32>
    %141 = math.exp %140 : vector<2x128xf32>
    %cst_70 = arith.constant 1.000000e+00 : f32
    %142 = vector.broadcast %cst_70 : f32 to vector<2x128xf32>
    %143 = arith.addf %142, %141 : vector<2x128xf32>
    %144 = arith.divf %142, %143 : vector<2x128xf32>
    %145 = vector.shape_cast %144 : vector<2x128xf32> to vector<2x1x128xf32>
    %146 = vector.broadcast %145 : vector<2x1x128xf32> to vector<2x16x128xf32>
    %147 = arith.mulf %118, %146 : vector<2x16x128xf32>
    %148 = vector.shape_cast %147 : vector<2x16x128xf32> to vector<32x128xf32>
    %149 = arith.truncf %148 : vector<32x128xf32> to vector<32x128xbf16>
    %c0_71 = arith.constant 0 : index
    %c0_72 = arith.constant 0 : index
    %150 = vector.load %arg12[%c0_71, %c0_72] : memref<128x128xbf16, #tpu.memory_space<vmem>>, vector<128x128xbf16>
    %cst_73 = arith.constant dense<0.000000e+00> : vector<32x128xf32>
    %151 = tpu.matmul %149, %150, %cst_73 {dimension_numbers = #tpu.dot_dimension_numbers<[1], [0], [0], [1], [0, 0, 1, 1], [], []>} : vector<32x128xbf16>, vector<128x128xbf16>, vector<32x128xf32> -> vector<32x128xf32>
    %c0_74 = arith.constant 0 : index
    %c0_75 = arith.constant 0 : index
    %152 = vector.load %arg13[%c0_74, %c0_75] : memref<1x128xf32, #tpu.memory_space<vmem>>, vector<1x128xf32>
    %153 = vector.broadcast %152 : vector<1x128xf32> to vector<32x128xf32>
    %154 = arith.mulf %151, %153 : vector<32x128xf32>
    %c0_76 = arith.constant 0 : index
    %c0_77 = arith.constant 0 : index
    %155 = vector.load %arg14[%c0_76, %c0_77] : memref<1x128xf32, #tpu.memory_space<vmem>>, vector<1x128xf32>
    %156 = vector.broadcast %155 : vector<1x128xf32> to vector<32x128xf32>
    %157 = arith.addf %154, %156 : vector<32x128xf32>
    %158 = arith.negf %157 : vector<32x128xf32>
    %159 = math.exp %158 : vector<32x128xf32>
    %cst_78 = arith.constant 1.000000e+00 : f32
    %160 = vector.broadcast %cst_78 : f32 to vector<32x128xf32>
    %161 = arith.addf %160, %159 : vector<32x128xf32>
    %162 = arith.divf %160, %161 : vector<32x128xf32>
    %163 = arith.mulf %157, %162 : vector<32x128xf32>
    %c0_79 = arith.constant 0 : index
    %c8_80 = arith.constant 8 : index
    %c0_81 = arith.constant 0 : index
    %164 = vector.load %arg23[%c0_79, %c8_80, %c0_81] : memref<2x32x128xbf16, #tpu.memory_space<vmem>>, vector<2x16x128xbf16>
    tpu.vector_store %arg23[%c0_79, %c8_80, %c0_81], %3 {strides = array<i32>} : memref<2x32x128xbf16, #tpu.memory_space<vmem>>, vector<2x16x128xbf16>,
    %165 = vector.shape_cast %163 : vector<32x128xf32> to vector<2x16x128xf32>
    %166 = arith.truncf %165 : vector<2x16x128xf32> to vector<2x16x128xbf16>
    %c0_82 = arith.constant 0 : index
    %c8_83 = arith.constant 8 : index
    %c0_84 = arith.constant 0 : index
    %167 = vector.load %arg24[%c0_82, %c8_83, %c0_84] : memref<2x32x128xbf16, #tpu.memory_space<vmem>>, vector<2x16x128xbf16>
    tpu.vector_store %arg24[%c0_82, %c8_83, %c0_84], %166 {strides = array<i32>} : memref<2x32x128xbf16, #tpu.memory_space<vmem>>, vector<2x16x128xbf16>,
    %c0_85 = arith.constant 0 : index
    %c6_86 = arith.constant 6 : index
    %c0_87 = arith.constant 0 : index
    %168 = vector.load %arg23[%c0_85, %c6_86, %c0_87] : memref<2x32x128xbf16, #tpu.memory_space<vmem>>, vector<2x16x128xbf16>
    %169 = vector.shape_cast %168 : vector<2x16x128xbf16> to vector<32x128xbf16>
    %c0_88 = arith.constant 0 : index
    %c0_89 = arith.constant 0 : index
    %c0_90 = arith.constant 0 : index
    %170 = vector.load %arg15[%c0_88, %c0_89, %c0_90] : memref<5x128x128xbf16, #tpu.memory_space<vmem>>, vector<1x128x128xbf16>
    %171 = vector.shape_cast %170 : vector<1x128x128xbf16> to vector<128x128xbf16>
    %cst_91 = arith.constant dense<0.000000e+00> : vector<32x128xf32>
    %172 = tpu.matmul %169, %171, %cst_91 {dimension_numbers = #tpu.dot_dimension_numbers<[1], [0], [0], [1], [0, 0, 1, 1], [], []>} : vector<32x128xbf16>, vector<128x128xbf16>, vector<32x128xf32> -> vector<32x128xf32>
    %c0_92 = arith.constant 0 : index
    %c7_93 = arith.constant 7 : index
    %c0_94 = arith.constant 0 : index
    %173 = vector.load %arg23[%c0_92, %c7_93, %c0_94] : memref<2x32x128xbf16, #tpu.memory_space<vmem>>, vector<2x16x128xbf16>
    %174 = vector.shape_cast %173 : vector<2x16x128xbf16> to vector<32x128xbf16>
    %c1_95 = arith.constant 1 : index
    %c0_96 = arith.constant 0 : index
    %c0_97 = arith.constant 0 : index
    %175 = vector.load %arg15[%c1_95, %c0_96, %c0_97] : memref<5x128x128xbf16, #tpu.memory_space<vmem>>, vector<1x128x128xbf16>
    %176 = vector.shape_cast %175 : vector<1x128x128xbf16> to vector<128x128xbf16>
    %cst_98 = arith.constant dense<0.000000e+00> : vector<32x128xf32>
    %177 = tpu.matmul %174, %176, %cst_98 {dimension_numbers = #tpu.dot_dimension_numbers<[1], [0], [0], [1], [0, 0, 1, 1], [], []>} : vector<32x128xbf16>, vector<128x128xbf16>, vector<32x128xf32> -> vector<32x128xf32>
    %178 = arith.addf %172, %177 : vector<32x128xf32>
    %c0_99 = arith.constant 0 : index
    %c8_100 = arith.constant 8 : index
    %c0_101 = arith.constant 0 : index
    %179 = vector.load %arg23[%c0_99, %c8_100, %c0_101] : memref<2x32x128xbf16, #tpu.memory_space<vmem>>, vector<2x16x128xbf16>
    %180 = vector.shape_cast %179 : vector<2x16x128xbf16> to vector<32x128xbf16>
    %c2_102 = arith.constant 2 : index
    %c0_103 = arith.constant 0 : index
    %c0_104 = arith.constant 0 : index
    %181 = vector.load %arg15[%c2_102, %c0_103, %c0_104] : memref<5x128x128xbf16, #tpu.memory_space<vmem>>, vector<1x128x128xbf16>
    %182 = vector.shape_cast %181 : vector<1x128x128xbf16> to vector<128x128xbf16>
    %cst_105 = arith.constant dense<0.000000e+00> : vector<32x128xf32>
    %183 = tpu.matmul %180, %182, %cst_105 {dimension_numbers = #tpu.dot_dimension_numbers<[1], [0], [0], [1], [0, 0, 1, 1], [], []>} : vector<32x128xbf16>, vector<128x128xbf16>, vector<32x128xf32> -> vector<32x128xf32>
    %184 = arith.addf %178, %183 : vector<32x128xf32>
    %c0_106 = arith.constant 0 : index
    %c9_107 = arith.constant 9 : index
    %c0_108 = arith.constant 0 : index
    %185 = vector.load %arg23[%c0_106, %c9_107, %c0_108] : memref<2x32x128xbf16, #tpu.memory_space<vmem>>, vector<2x16x128xbf16>
    %186 = vector.shape_cast %185 : vector<2x16x128xbf16> to vector<32x128xbf16>
    %c3_109 = arith.constant 3 : index
    %c0_110 = arith.constant 0 : index
    %c0_111 = arith.constant 0 : index
    %187 = vector.load %arg15[%c3_109, %c0_110, %c0_111] : memref<5x128x128xbf16, #tpu.memory_space<vmem>>, vector<1x128x128xbf16>
    %188 = vector.shape_cast %187 : vector<1x128x128xbf16> to vector<128x128xbf16>
    %cst_112 = arith.constant dense<0.000000e+00> : vector<32x128xf32>
    %189 = tpu.matmul %186, %188, %cst_112 {dimension_numbers = #tpu.dot_dimension_numbers<[1], [0], [0], [1], [0, 0, 1, 1], [], []>} : vector<32x128xbf16>, vector<128x128xbf16>, vector<32x128xf32> -> vector<32x128xf32>
    %190 = arith.addf %184, %189 : vector<32x128xf32>
    %c0_113 = arith.constant 0 : index
    %c10_114 = arith.constant 10 : index
    %c0_115 = arith.constant 0 : index
    %191 = vector.load %arg23[%c0_113, %c10_114, %c0_115] : memref<2x32x128xbf16, #tpu.memory_space<vmem>>, vector<2x16x128xbf16>
    %192 = vector.shape_cast %191 : vector<2x16x128xbf16> to vector<32x128xbf16>
    %c4_116 = arith.constant 4 : index
    %c0_117 = arith.constant 0 : index
    %c0_118 = arith.constant 0 : index
    %193 = vector.load %arg15[%c4_116, %c0_117, %c0_118] : memref<5x128x128xbf16, #tpu.memory_space<vmem>>, vector<1x128x128xbf16>
    %194 = vector.shape_cast %193 : vector<1x128x128xbf16> to vector<128x128xbf16>
    %cst_119 = arith.constant dense<0.000000e+00> : vector<32x128xf32>
    %195 = tpu.matmul %192, %194, %cst_119 {dimension_numbers = #tpu.dot_dimension_numbers<[1], [0], [0], [1], [0, 0, 1, 1], [], []>} : vector<32x128xbf16>, vector<128x128xbf16>, vector<32x128xf32> -> vector<32x128xf32>
    %196 = arith.addf %190, %195 : vector<32x128xf32>
    %c0_120 = arith.constant 0 : index
    %c6_121 = arith.constant 6 : index
    %c0_122 = arith.constant 0 : index
    %197 = vector.load %arg24[%c0_120, %c6_121, %c0_122] : memref<2x32x128xbf16, #tpu.memory_space<vmem>>, vector<2x16x128xbf16>
    %198 = vector.shape_cast %197 : vector<2x16x128xbf16> to vector<32x128xbf16>
    %c0_123 = arith.constant 0 : index
    %c0_124 = arith.constant 0 : index
    %c0_125 = arith.constant 0 : index
    %199 = vector.load %arg16[%c0_123, %c0_124, %c0_125] : memref<5x128x128xbf16, #tpu.memory_space<vmem>>, vector<1x128x128xbf16>
    %200 = vector.shape_cast %199 : vector<1x128x128xbf16> to vector<128x128xbf16>
    %cst_126 = arith.constant dense<0.000000e+00> : vector<32x128xf32>
    %201 = tpu.matmul %198, %200, %cst_126 {dimension_numbers = #tpu.dot_dimension_numbers<[1], [0], [0], [1], [0, 0, 1, 1], [], []>} : vector<32x128xbf16>, vector<128x128xbf16>, vector<32x128xf32> -> vector<32x128xf32>
    %c0_127 = arith.constant 0 : index
    %c7_128 = arith.constant 7 : index
    %c0_129 = arith.constant 0 : index
    %202 = vector.load %arg24[%c0_127, %c7_128, %c0_129] : memref<2x32x128xbf16, #tpu.memory_space<vmem>>, vector<2x16x128xbf16>
    %203 = vector.shape_cast %202 : vector<2x16x128xbf16> to vector<32x128xbf16>
    %c1_130 = arith.constant 1 : index
    %c0_131 = arith.constant 0 : index
    %c0_132 = arith.constant 0 : index
    %204 = vector.load %arg16[%c1_130, %c0_131, %c0_132] : memref<5x128x128xbf16, #tpu.memory_space<vmem>>, vector<1x128x128xbf16>
    %205 = vector.shape_cast %204 : vector<1x128x128xbf16> to vector<128x128xbf16>
    %cst_133 = arith.constant dense<0.000000e+00> : vector<32x128xf32>
    %206 = tpu.matmul %203, %205, %cst_133 {dimension_numbers = #tpu.dot_dimension_numbers<[1], [0], [0], [1], [0, 0, 1, 1], [], []>} : vector<32x128xbf16>, vector<128x128xbf16>, vector<32x128xf32> -> vector<32x128xf32>
    %207 = arith.addf %201, %206 : vector<32x128xf32>
    %c0_134 = arith.constant 0 : index
    %c8_135 = arith.constant 8 : index
    %c0_136 = arith.constant 0 : index
    %208 = vector.load %arg24[%c0_134, %c8_135, %c0_136] : memref<2x32x128xbf16, #tpu.memory_space<vmem>>, vector<2x16x128xbf16>
    %209 = vector.shape_cast %208 : vector<2x16x128xbf16> to vector<32x128xbf16>
    %c2_137 = arith.constant 2 : index
    %c0_138 = arith.constant 0 : index
    %c0_139 = arith.constant 0 : index
    %210 = vector.load %arg16[%c2_137, %c0_138, %c0_139] : memref<5x128x128xbf16, #tpu.memory_space<vmem>>, vector<1x128x128xbf16>
    %211 = vector.shape_cast %210 : vector<1x128x128xbf16> to vector<128x128xbf16>
    %cst_140 = arith.constant dense<0.000000e+00> : vector<32x128xf32>
    %212 = tpu.matmul %209, %211, %cst_140 {dimension_numbers = #tpu.dot_dimension_numbers<[1], [0], [0], [1], [0, 0, 1, 1], [], []>} : vector<32x128xbf16>, vector<128x128xbf16>, vector<32x128xf32> -> vector<32x128xf32>
    %213 = arith.addf %207, %212 : vector<32x128xf32>
    %c0_141 = arith.constant 0 : index
    %c9_142 = arith.constant 9 : index
    %c0_143 = arith.constant 0 : index
    %214 = vector.load %arg24[%c0_141, %c9_142, %c0_143] : memref<2x32x128xbf16, #tpu.memory_space<vmem>>, vector<2x16x128xbf16>
    %215 = vector.shape_cast %214 : vector<2x16x128xbf16> to vector<32x128xbf16>
    %c3_144 = arith.constant 3 : index
    %c0_145 = arith.constant 0 : index
    %c0_146 = arith.constant 0 : index
    %216 = vector.load %arg16[%c3_144, %c0_145, %c0_146] : memref<5x128x128xbf16, #tpu.memory_space<vmem>>, vector<1x128x128xbf16>
    %217 = vector.shape_cast %216 : vector<1x128x128xbf16> to vector<128x128xbf16>
    %cst_147 = arith.constant dense<0.000000e+00> : vector<32x128xf32>
    %218 = tpu.matmul %215, %217, %cst_147 {dimension_numbers = #tpu.dot_dimension_numbers<[1], [0], [0], [1], [0, 0, 1, 1], [], []>} : vector<32x128xbf16>, vector<128x128xbf16>, vector<32x128xf32> -> vector<32x128xf32>
    %219 = arith.addf %213, %218 : vector<32x128xf32>
    %c0_148 = arith.constant 0 : index
    %c10_149 = arith.constant 10 : index
    %c0_150 = arith.constant 0 : index
    %220 = vector.load %arg24[%c0_148, %c10_149, %c0_150] : memref<2x32x128xbf16, #tpu.memory_space<vmem>>, vector<2x16x128xbf16>
    %221 = vector.shape_cast %220 : vector<2x16x128xbf16> to vector<32x128xbf16>
    %c4_151 = arith.constant 4 : index
    %c0_152 = arith.constant 0 : index
    %c0_153 = arith.constant 0 : index
    %222 = vector.load %arg16[%c4_151, %c0_152, %c0_153] : memref<5x128x128xbf16, #tpu.memory_space<vmem>>, vector<1x128x128xbf16>
    %223 = vector.shape_cast %222 : vector<1x128x128xbf16> to vector<128x128xbf16>
    %cst_154 = arith.constant dense<0.000000e+00> : vector<32x128xf32>
    %224 = tpu.matmul %221, %223, %cst_154 {dimension_numbers = #tpu.dot_dimension_numbers<[1], [0], [0], [1], [0, 0, 1, 1], [], []>} : vector<32x128xbf16>, vector<128x128xbf16>, vector<32x128xf32> -> vector<32x128xf32>
    %225 = arith.addf %219, %224 : vector<32x128xf32>
    %226 = arith.addf %196, %225 : vector<32x128xf32>
    %c0_155 = arith.constant 0 : index
    %c0_156 = arith.constant 0 : index
    %227 = vector.load %arg17[%c0_155, %c0_156] : memref<1x128xf32, #tpu.memory_space<vmem>>, vector<1x128xf32>
    %228 = vector.broadcast %227 : vector<1x128xf32> to vector<32x128xf32>
    %229 = arith.mulf %226, %228 : vector<32x128xf32>
    %c0_157 = arith.constant 0 : index
    %c0_158 = arith.constant 0 : index
    %230 = vector.load %arg18[%c0_157, %c0_158] : memref<1x128xf32, #tpu.memory_space<vmem>>, vector<1x128xf32>
    %231 = vector.broadcast %230 : vector<1x128xf32> to vector<32x128xf32>
    %232 = arith.addf %229, %231 : vector<32x128xf32>
    %233 = arith.negf %232 : vector<32x128xf32>
    %234 = math.exp %233 : vector<32x128xf32>
    %cst_159 = arith.constant 1.000000e+00 : f32
    %235 = vector.broadcast %cst_159 : f32 to vector<32x128xf32>
    %236 = arith.addf %235, %234 : vector<32x128xf32>
    %237 = arith.divf %235, %236 : vector<32x128xf32>
    %238 = arith.mulf %232, %237 : vector<32x128xf32>
    %239 = arith.truncf %238 : vector<32x128xf32> to vector<32x128xbf16>
    %c0_160 = arith.constant 0 : index
    %c0_161 = arith.constant 0 : index
    %240 = vector.load %arg19[%c0_160, %c0_161] : memref<128x128xbf16, #tpu.memory_space<vmem>>, vector<128x128xbf16>
    %cst_162 = arith.constant dense<0.000000e+00> : vector<32x128xf32>
    %241 = tpu.matmul %239, %240, %cst_162 {dimension_numbers = #tpu.dot_dimension_numbers<[1], [0], [0], [1], [0, 0, 1, 1], [], []>} : vector<32x128xbf16>, vector<128x128xbf16>, vector<32x128xf32> -> vector<32x128xf32>
    %c0_163 = arith.constant 0 : index
    %c0_164 = arith.constant 0 : index
    %242 = vector.load %arg20[%c0_163, %c0_164] : memref<1x128xf32, #tpu.memory_space<vmem>>, vector<1x128xf32>
    %243 = vector.broadcast %242 : vector<1x128xf32> to vector<32x128xf32>
    %244 = arith.addf %241, %243 : vector<32x128xf32>
    %245 = vector.shape_cast %244 : vector<32x128xf32> to vector<2x16x128xf32>
    %c0_165 = arith.constant 0 : index
    %c0_166 = arith.constant 0 : index
    %c0_167 = arith.constant 0 : index
    %246 = vector.load %arg21[%c0_165, %c0_166, %c0_167] : memref<2x16x128xf32, #tpu.memory_space<vmem>>, vector<2x16x128xf32>
    tpu.vector_store %arg21[%c0_165, %c0_166, %c0_167], %245 {strides = array<i32>} : memref<2x16x128xf32, #tpu.memory_space<vmem>>, vector<2x16x128xf32>,
    return
  }
  func.func @transform_0(%arg0: i32) -> (i32, i32, i32) {
    %c0_i32 = arith.constant 0 : i32
    %c0_i32_0 = arith.constant 0 : i32
    %c0_i32_1 = arith.constant 0 : i32
    return %arg0, %c0_i32, %c0_i32_0 : i32, i32, i32
  }
  func.func @transform_1(%arg0: i32) -> (i32, i32) {
    %c0_i32 = arith.constant 0 : i32
    %c0_i32_0 = arith.constant 0 : i32
    %c0_i32_1 = arith.constant 0 : i32
    return %c0_i32, %c0_i32_0 : i32, i32
  }
  func.func @transform_2(%arg0: i32) -> (i32, i32) {
    %c0_i32 = arith.constant 0 : i32
    %c0_i32_0 = arith.constant 0 : i32
    %c0_i32_1 = arith.constant 0 : i32
    return %c0_i32, %c0_i32_0 : i32, i32
  }
  func.func @transform_3(%arg0: i32) -> (i32, i32) {
    %c0_i32 = arith.constant 0 : i32
    %c0_i32_0 = arith.constant 0 : i32
    %c0_i32_1 = arith.constant 0 : i32
    return %c0_i32, %c0_i32_0 : i32, i32
  }
  func.func @transform_4(%arg0: i32) -> (i32, i32) {
    %c0_i32 = arith.constant 0 : i32
    %c0_i32_0 = arith.constant 0 : i32
    %c0_i32_1 = arith.constant 0 : i32
    return %c0_i32, %c0_i32_0 : i32, i32
  }
  func.func @transform_5(%arg0: i32) -> (i32, i32) {
    %c0_i32 = arith.constant 0 : i32
    %c0_i32_0 = arith.constant 0 : i32
    %c0_i32_1 = arith.constant 0 : i32
    return %c0_i32, %c0_i32_0 : i32, i32
  }
  func.func @transform_6(%arg0: i32) -> (i32, i32) {
    %c0_i32 = arith.constant 0 : i32
    %c0_i32_0 = arith.constant 0 : i32
    %c0_i32_1 = arith.constant 0 : i32
    return %c0_i32, %c0_i32_0 : i32, i32
  }
  func.func @transform_7(%arg0: i32) -> (i32, i32) {
    %c0_i32 = arith.constant 0 : i32
    %c0_i32_0 = arith.constant 0 : i32
    %c0_i32_1 = arith.constant 0 : i32
    return %c0_i32, %c0_i32_0 : i32, i32
  }
  func.func @transform_8(%arg0: i32) -> (i32, i32) {
    %c0_i32 = arith.constant 0 : i32
    %c0_i32_0 = arith.constant 0 : i32
    %c0_i32_1 = arith.constant 0 : i32
    return %c0_i32, %c0_i32_0 : i32, i32
  }
  func.func @transform_9(%arg0: i32) -> (i32, i32) {
    %c0_i32 = arith.constant 0 : i32
    %c0_i32_0 = arith.constant 0 : i32
    %c0_i32_1 = arith.constant 0 : i32
    return %c0_i32, %c0_i32_0 : i32, i32
  }
  func.func @transform_10(%arg0: i32) -> (i32, i32) {
    %c0_i32 = arith.constant 0 : i32
    %c0_i32_0 = arith.constant 0 : i32
    %c0_i32_1 = arith.constant 0 : i32
    return %c0_i32, %c0_i32_0 : i32, i32
  }
  func.func @transform_11(%arg0: i32) -> (i32, i32) {
    %c0_i32 = arith.constant 0 : i32
    %c0_i32_0 = arith.constant 0 : i32
    %c0_i32_1 = arith.constant 0 : i32
    return %c0_i32, %c0_i32_0 : i32, i32
  }
  func.func @transform_12(%arg0: i32) -> (i32, i32) {
    %c0_i32 = arith.constant 0 : i32
    %c0_i32_0 = arith.constant 0 : i32
    %c0_i32_1 = arith.constant 0 : i32
    return %c0_i32, %c0_i32_0 : i32, i32
  }
  func.func @transform_13(%arg0: i32) -> (i32, i32) {
    %c0_i32 = arith.constant 0 : i32
    %c0_i32_0 = arith.constant 0 : i32
    %c0_i32_1 = arith.constant 0 : i32
    return %c0_i32, %c0_i32_0 : i32, i32
  }
  func.func @transform_14(%arg0: i32) -> (i32, i32, i32) {
    %c0_i32 = arith.constant 0 : i32
    %c0_i32_0 = arith.constant 0 : i32
    %c0_i32_1 = arith.constant 0 : i32
    %c0_i32_2 = arith.constant 0 : i32
    return %c0_i32, %c0_i32_0, %c0_i32_1 : i32, i32, i32
  }
  func.func @transform_15(%arg0: i32) -> (i32, i32, i32) {
    %c0_i32 = arith.constant 0 : i32
    %c0_i32_0 = arith.constant 0 : i32
    %c0_i32_1 = arith.constant 0 : i32
    %c0_i32_2 = arith.constant 0 : i32
    return %c0_i32, %c0_i32_0, %c0_i32_1 : i32, i32, i32
  }
  func.func @transform_16(%arg0: i32) -> (i32, i32) {
    %c0_i32 = arith.constant 0 : i32
    %c0_i32_0 = arith.constant 0 : i32
    %c0_i32_1 = arith.constant 0 : i32
    return %c0_i32, %c0_i32_0 : i32, i32
  }
  func.func @transform_17(%arg0: i32) -> (i32, i32) {
    %c0_i32 = arith.constant 0 : i32
    %c0_i32_0 = arith.constant 0 : i32
    %c0_i32_1 = arith.constant 0 : i32
    return %c0_i32, %c0_i32_0 : i32, i32
  }
  func.func @transform_18(%arg0: i32) -> (i32, i32) {
    %c0_i32 = arith.constant 0 : i32
    %c0_i32_0 = arith.constant 0 : i32
    %c0_i32_1 = arith.constant 0 : i32
    return %c0_i32, %c0_i32_0 : i32, i32
  }
  func.func @transform_19(%arg0: i32) -> (i32, i32) {
    %c0_i32 = arith.constant 0 : i32
    %c0_i32_0 = arith.constant 0 : i32
    %c0_i32_1 = arith.constant 0 : i32
    return %c0_i32, %c0_i32_0 : i32, i32
  }
  func.func @transform_20(%arg0: i32) -> (i32, i32, i32) {
    %c0_i32 = arith.constant 0 : i32
    %c0_i32_0 = arith.constant 0 : i32
    %c0_i32_1 = arith.constant 0 : i32
    return %arg0, %c0_i32, %c0_i32_0 : i32, i32, i32
  }
}

</mosaic_0001>

<bundles_post_ra>
// kernel: _lambda_.4
= control target key start
LH: loop header
LB: loop body
LE: loop exit
PB: predicated region body
PF: predicated region fallthrough
CT: control target
= control target key end

     0   :  { %9 = vsyncpa [#allocation4], 0  ;;  %s1080_s0 = inlined_call_operand.hbm [shape: bf16[2,16,10], index: 0, kind: input, shape index: {}]   ;;  %s1081_s1 = inlined_call_operand.hbm [shape: bf16[5,10,128], index: 1, kind: input, shape index: {}]   ;;  %s1082_s2 = inlined_call_operand.hbm [shape: f32[1,128], index: 2, kind: input, shape index: {}]   ;;  %s1083_s3 = inlined_call_operand.hbm [shape: f32[1,128], index: 3, kind: input, shape index: {}]   ;;  %s1084_s4 = inlined_call_operand.hbm [shape: bf16[2,16,128], index: 4, kind: output, shape index: {}]  }
   0x1   :  { %10 = vsyncpa [#allocation7], 0 }
   0x2   :  { %11 = vsyncpa [#allocation10], 0 }
   0x3   :  { %12 = vsyncpa [#allocation5], 0  ;;  %s914_s15 = smov [#allocation6]   ;;  %s915_s17 = smov [#allocation3]  }
   0x4   :  { %s30_s16 = sshll.u32 %s914_s15, 4  ;;  %s18_s18 = sshll.u32 %s915_s17, 4  ;;  %s31_s16 = int_to_ptr.vmem [resolvable:$true] %s30_s16  ;;  %s947_s18 = int_to_ptr.vmem [resolvable:$true] %s18_s18 }
   0x5   :  { %s796_s21 = scalar_lea.hbm %s1081_s1, 640 }
   0x6   :  { %p797_p0 = scmp.ne.s32.totalorder %s1081_s1, %s796_s21  ;;  %p800_p1 = scmp.lt.u32.totalorder %s796_s21, %s1081_s1 }
   0x8   :  { %p802_p2 = pnand %p800_p1, %p797_p0 }
   0xa   :  { %805 = shalt.err (!%p802_p2)
}
   0xb   :  { %s806_s26 = scalar_lea.vmem %s31_s16, 640  ;;  %p811_p4 = scmp.lt.s32.totalorder %s31_s16, %s31_s16 }
   0xc   :  { %p807_p3 = scmp.ne.s32.totalorder %s31_s16, %s806_s26  ;;  %p812_p5 = scmp.lt.s32.totalorder %s806_s26, %s806_s26 }
   0xe   :  { %p813_p6 = por %p812_p5, %p811_p4 }
  0x10   :  { %p814_p7 = pnand %p813_p6, %p807_p3 }
  0x12   :  { %817 = shalt.err (!%p814_p7)
}
  0x13   :  { %s916_s27 = smov 64   ;;  %s917_s28 = smov 4  }
  0x14   :  { %36 = dma.hbm_to_vmem [thread:$0]  %s1081_s1, 640, %s31_s16, [#allocation7], %s916_s27, %s916_s27, %s917_s28  }
  0x15   :  { %s818_s7 = scalar_lea.hbm %s1080_s0, 256 }
  0x16   :  { %p819_p8 = scmp.ne.s32.totalorder %s1080_s0, %s818_s7  ;;  %p822_p9 = scmp.lt.u32.totalorder %s818_s7, %s1080_s0 }
  0x18   :  { %p824_p10 = pnand %p822_p9, %p819_p8 }
  0x1a   :  { %827 = shalt.err (!%p824_p10)
}
  0x1b   :  { %s828_s12 = scalar_lea.vmem %s947_s18, 256  ;;  %p833_p12 = scmp.lt.s32.totalorder %s947_s18, %s947_s18 }
  0x1c   :  { %p829_p11 = scmp.ne.s32.totalorder %s947_s18, %s828_s12  ;;  %p834_p13 = scmp.lt.s32.totalorder %s828_s12, %s828_s12 }
  0x1e   :  { %p835_p0 = por %p834_p13, %p833_p12 }
  0x20   :  { %p836_p1 = pnand %p835_p0, %p829_p11 }
  0x22   :  { %839 = shalt.err (!%p836_p1)
}
  0x23   :  { %24 = dma.hbm_to_vmem [thread:$0]  %s1080_s0, 256, %s947_s18, [#allocation4], %s916_s27, %s916_s27, %s917_s28  }
  0x24   :  { %s918_s14 = smov [#allocation8]   ;;  %s919_s16 = smov [#allocation9]  }
  0x25   :  { %s43_s15 = sshll.u32 %s918_s14, 4  ;;  %s53_s17 = sshll.u32 %s919_s16, 4  ;;  %s44_s15 = int_to_ptr.vmem [resolvable:$true] %s43_s15  ;;  %s54_s17 = int_to_ptr.vmem [resolvable:$true] %s53_s17 }
  0x26   :  { %s840_s21 = scalar_lea.hbm %s1082_s2, 16 }
  0x27   :  { %p841_p2 = scmp.ne.s32.totalorder %s1082_s2, %s840_s21  ;;  %p844_p3 = scmp.lt.u32.totalorder %s840_s21, %s1082_s2 }
  0x29   :  { %p846_p4 = pnand %p844_p3, %p841_p2 }
  0x2b   :  { %849 = shalt.err (!%p846_p4)
}
  0x2c   :  { %s850_s0 = scalar_lea.vmem %s44_s15, 16  ;;  %s854_s18 = scalar_lea.vmem %s44_s15, 32 }
  0x2d   :  { %p851_p5 = scmp.ne.s32.totalorder %s44_s15, %s850_s0  ;;  %p855_p6 = scmp.lt.s32.totalorder %s44_s15, %s44_s15 }
  0x2e   :  { %p856_p7 = scmp.lt.s32.totalorder %s854_s18, %s850_s0 }
  0x30   :  { %p857_p8 = por %p856_p7, %p855_p6 }
  0x32   :  { %p858_p9 = pnand %p857_p8, %p851_p5 }
  0x34   :  { %861 = shalt.err (!%p858_p9)
}
  0x35   :  { %46 = dma.hbm_to_vmem [thread:$0]  %s1082_s2, 16, %s44_s15, [#allocation7]  }
  0x36   :  { %s862_s6 = scalar_lea.hbm %s1083_s3, 16 }
  0x37   :  { %p863_p10 = scmp.ne.s32.totalorder %s1083_s3, %s862_s6  ;;  %p866_p11 = scmp.lt.u32.totalorder %s862_s6, %s1083_s3 }
  0x39   :  { %p868_p12 = pnand %p866_p11, %p863_p10 }
  0x3b   :  { %871 = shalt.err (!%p868_p12)
}
  0x3c   :  { %s872_s11 = scalar_lea.vmem %s54_s17, 16  ;;  %s876_s12 = scalar_lea.vmem %s54_s17, 32 }
  0x3d   :  { %p873_p13 = scmp.ne.s32.totalorder %s54_s17, %s872_s11  ;;  %p877_p0 = scmp.lt.s32.totalorder %s54_s17, %s54_s17 }
  0x3e   :  { %p878_p1 = scmp.lt.s32.totalorder %s876_s12, %s872_s11 }
  0x40   :  { %p879_p2 = por %p878_p1, %p877_p0 }
  0x42   :  { %p880_p3 = pnand %p879_p2, %p873_p13 }
  0x44   :  { %883 = shalt.err (!%p880_p3)
}
  0x45   :  { %56 = dma.hbm_to_vmem [thread:$0]  %s1083_s3, 16, %s54_s17, [#allocation10]  }
  0x46   :  { %906 = dma.done.wait [#allocation4], 256  }
  0x47   :  { %907 = vsyncadd [#allocation4], 4294967040 }
  0x48   :  { %908 = dma.done.wait [#allocation7], 656  }
  0x49   :  { %909 = vsyncadd [#allocation7], 4294966640 }
  0x4a   :  { %910 = dma.done.wait [#allocation10], 16  }
  0x4b   :  { %911 = vsyncadd [#allocation10], 4294967280  ;;  %vm74_vm0 = vcmask 76800   ;;  %vm77_vm1 = vcmask 80900   ;;  %v920_v0 = vmov 0   ;;  %vm114_vm2 = vcmask 1044480  }
  0x4c   :  { %75 = vst.msk [vmem:[#allocation2] sm:$0xf] %vm74_vm0, %v920_v0  ;;  %76 = vst.msk [vmem:[#allocation2 + $0x10] sm:$0xf] %vm74_vm0, %v920_v0  ;;  %v771_v1 = vld [vmem:[#allocation6 + $0x10] sm:$0x1f]  }
  0x4d   :  { %78 = vst.msk [vmem:[#allocation2 + $0x8] sm:$0xf0] %vm77_vm1, %v920_v0  ;;  %79 = vst.msk [vmem:[#allocation2 + $0x18] sm:$0xf0] %vm77_vm1, %v920_v0  ;;  %v772_v2 = vld [vmem:[#allocation3] ss:$0 sps:$4 sm:$0xff]   ;;  %760 = vmatprep.subr.msk.bf16.mxu0 %vm114_vm2, %v771_v1 }
  0x4e   :  { %v319_v3 = vsel %vm114_vm2, %v771_v1, 0  ;;  %v773_v4 = vld [vmem:[#allocation3 + $0x4] ss:$0 sps:$4 sm:$0xff]   ;;  %101 = vst.msk [vmem:[#allocation2] sm:$0xf0] %vm77_vm1, %v772_v2  ;;  %vm168_vm3 = vcmask 80896  }
  0x4f   :  { %725 = vmatpush3.bf16.msra.mxu0 %v319_v3  ;;  %v774_v5 = vld [vmem:[#allocation6 + $0x18] sm:$0x1f]   ;;  %103 = vst.msk [vmem:[#allocation2 + $0x8] sm:$0xf] %vm74_vm0, %v773_v4  ;;  %v775_v6 = vld [vmem:[#allocation6 + $0x8] sm:$0x1f]  }
  0x50   :  { %761 = vmatprep.subr.msk.bf16.mxu0 %vm114_vm2, %v774_v5  ;;  %v776_v7 = vld [vmem:[#allocation3 + $0x8] ss:$0 sps:$4 sm:$0xff]   ;;  %v777_v8 = vld [vmem:[#allocation3 + $0xc] ss:$0 sps:$4 sm:$0xff]   ;;  %758 = vmatprep.subr.msk.bf16.mxu1 %vm114_vm2, %v775_v6  ;;  %v177_v9 = vsel %vm114_vm2, %v775_v6, 0  ;;  %vm297_vm5 = vcmask 1043456  }
  0x51   :  { %104 = vst.msk [vmem:[#allocation2 + $0x10] sm:$0xf0] %vm77_vm1, %v776_v7  ;;  %713 = vmatpush3.bf16.msra.mxu1 %v177_v9  ;;  %v1021_v10 = vld [vmem:[#allocation6] sm:$0x1f]   ;;  %vm125_vm4 = vsmask.f32 4352 }
  0x52   :  { %105 = vst.msk [vmem:[#allocation2 + $0x18] sm:$0xf] %vm74_vm0, %v777_v8  ;;  %759 = vmatprep.subr.msk.bf16.mxu1 %vm114_vm2, %v1021_v10  ;;  %v426_v12 = vsel %vm114_vm2, %v774_v5, 0  ;;  %v779_v42 = vld [vmem:[#allocation6 + $0x20] sm:$0x1f]   ;;  %v240_v2 = vsel %vm114_vm2, %v1021_v10, 0 }
  0x53   :  { %vm376_vm6 = vsmask.f32 3328  ;;  %vm487_vm7 = vcmask 1042432   ;;  %s921_s3 = smov [#allocation11]  }
  0x54   :  { %s639_s13 = sshll.u32 %s921_s3, 4  ;;  %s640_s13 = int_to_ptr.vmem [resolvable:$true] %s639_s13 }
  0x55   :  { %v291_v11 = vld [vmem:[#allocation2] sm:$0xf0]  ;;  %s884_s14 = scalar_lea.vmem %s640_s13, 256  ;;  %p889_p5 = scmp.lt.s32.totalorder %s640_s13, %s640_s13 }
  0x56   :  { %v1026_v13 = vld [vmem:[#allocation2] sm:$0xf8]  ;;  %v123_v14 = vld [vmem:[#allocation2 + $0x8] sm:$0xf]  ;;  %v298_v15 = vrot.slane %v291_v11, 4  ;;  %v378_v16 = vshrl.u32 %v291_v11, 16  ;;  %p885_p4 = scmp.ne.s32.totalorder %s640_s13, %s884_s14  ;;  %p890_p6 = scmp.lt.s32.totalorder %s884_s14, %s884_s14 }
  0x57   :  { %v381_v17 = vshll.u32 %v291_v11, 16  ;;  %v127_v18 = vshrl.u32 %v1026_v13, 16  ;;  %v299_v19 = vrot.slane %v123_v14, 4  ;;  %v130_v20 = vshll.u32 %v1026_v13, 16  ;;  %v1030_v23 = vld [vmem:[#allocation2 + $0x8] sm:$0x1f] }
  0x58   :  { %v135_v21 = vshrl.u32 %v123_v14, 16  ;;  %v138_v22 = vshll.u32 %v123_v14, 16  ;;  %v380_v25 = vrot.slane %v378_v16, 4  ;;  %v386_v27 = vshrl.u32 %v1030_v23, 16  ;;  %v292_v30 = vld [vmem:[#allocation2 + $0x10] sm:$0xf0]  ;;  %p891_p7 = por %p890_p6, %p889_p5 }
  0x59   :  { %v129_v24 = vrot.slane %v127_v18, 3  ;;  %v383_v26 = vrot.slane %v381_v17, 5  ;;  %v300_v28 = vsel %vm297_vm5, %v298_v15, %v299_v19  ;;  %v124_v29 = vld [vmem:[#allocation2 + $0x18] sm:$0xf]  ;;  %v132_v31 = vrot.slane %v130_v20, 4 }
  0x5a   :  { %v137_v32 = vrot.slane %v135_v21, 3  ;;  %726 = vmatprep.mubr.msk.bf16.mxu0 %vm168_vm3, %v300_v28  ;;  %v301_v33 = vrot.slane %v292_v30, 4  ;;  %v302_v34 = vrot.slane %v124_v29, 4  ;;  %v395_v35 = vshrl.u32 %v292_v30, 16  ;;  %v1035_v37 = vld [vmem:[#allocation2 + $0x10] sm:$0xf8]  ;;  %p892_p8 = pnand %p891_p7, %p885_p4 }
  0x5b   :  { %v398_v36 = vshll.u32 %v292_v30, 16  ;;  %v133_v38 = vor.u32 %v132_v31, %v129_v24  ;;  %v140_v39 = vrot.slane %v138_v22, 4  ;;  %v144_v40 = vshrl.u32 %v1035_v37, 16  ;;  %v375_v47 = vld [vmem:[#allocation2 + $0x18] sm:$0x1f] }
  0x5c   :  { %v147_v41 = vshll.u32 %v1035_v37, 16  ;;  %v303_v43 = vsel %vm297_vm5, %v301_v33, %v302_v34  ;;  %v152_v44 = vshrl.u32 %v124_v29, 16  ;;  %v155_v45 = vshll.u32 %v124_v29, 16  ;;  %v107_v56 = vld [vmem:[#allocation2 + $0x8] sm:$0x7] }
  0x5d   :  { %v384_v46 = vor.u32 %v383_v26, %v380_v25  ;;  %727 = vmatmul.mubr.msk.bf16.vlgmr.msra.gmra.mrb[0].mxu0 %vm168_vm3, %v303_v43  ;;  %v141_v48 = vor.u32 %v140_v39, %v137_v32  ;;  %v146_v49 = vrot.slane %v144_v40, 3  ;;  %v388_v51 = vrot.slane %v386_v27, 4  ;;  %v481_v1 = vld [vmem:[#allocation2] sm:$0xe0]  ;;  %v109_v10 = vld [vmem:[#allocation2 + $0x18] sm:$0x7] }
  0x5e   :  { %v149_v50 = vrot.slane %v147_v41, 4  ;;  %731 = vmatpush3.bf16.msra.mxu0 %v426_v12  ;;  %v154_v52 = vrot.slane %v152_v44, 3  ;;  %v157_v53 = vrot.slane %v155_v45, 4  ;;  %v389_v54 = vshll.u32 %v1030_v23, 16  ;;  %v482_v20 = vld [vmem:[#allocation2 + $0x10] sm:$0xe0] }
  0x5f   :  { %v397_v55 = vrot.slane %v395_v35, 4  ;;  %v142_v57 = vsel %vm125_vm4, %v133_v38, %v141_v48  ;;  %762 = vmatprep.subr.msk.bf16.mxu0 %vm114_vm2, %v779_v42  ;;  %v400_v59 = vrot.slane %v398_v36, 5  ;;  %v403_v60 = vshrl.u32 %v375_v47, 16  ;;  %v672_v30 = vld [vmem:[#allocation8] ss:$0 sm:$0xff] }
  0x60   :  { %v150_v58 = vor.u32 %v149_v50, %v146_v49  ;;  %714 = vmatprep.mubr.msk.bf16.mxu1 %vm168_vm3, %v142_v57  ;;  %v158_v61 = vor.u32 %v157_v53, %v154_v52  ;;  %v391_v62 = vrot.slane %v389_v54, 5  ;;  %v406_v63 = vshll.u32 %v375_v47, 16  ;;  %v673_v33 = vld [vmem:[#allocation9] ss:$0 sm:$0xff] }
  0x61   :  { %v115_v0 = vrot.slane %v1026_v13, 3  ;;  %v405_v3 = vrot.slane %v403_v60, 4  ;;  %v116_v4 = vrot.slane %v107_v56, 3  ;;  %v401_v7 = vor.u32 %v400_v59, %v397_v55 }
  0x62   :  { %v159_v5 = vsel %vm125_vm4, %v150_v58, %v158_v61  ;;  %v392_v6 = vor.u32 %v391_v62, %v388_v51  ;;  %v408_v8 = vrot.slane %v406_v63, 5  ;;  %v488_v11 = vrot.slane %v481_v1, 5 }
  0x63   :  { %715 = vmatmul.mubr.msk.bf16.vlgmr.msra.gmra.mrb[0].mxu1 %vm168_vm3, %v159_v5  ;;  %v117_v9 = vsel %vm114_vm2, %v115_v0, %v116_v4  ;;  %v489_v12 = vrot.slane %v1030_v23, 5  ;;  %v509_v16 = vsel %vm114_vm2, %v779_v42, 0  ;;  %v118_v18 = vrot.slane %v1035_v37, 3 }
  0x64   :  { %v393_v13 = vsel %vm376_vm6, %v384_v46, %v392_v6  ;;  %719 = vmatpush3.bf16.msra.mxu1 %v240_v2  ;;  %v409_v14 = vor.u32 %v408_v8, %v405_v3  ;;  %720 = vmatprep.mubr.msk.bf16.mxu1 %vm168_vm3, %v117_v9  ;;  %v119_v19 = vrot.slane %v109_v10, 3  ;;  %v491_v22 = vrot.slane %v482_v20, 5 }
  0x65   :  { %732 = vmatprep.mubr.msk.bf16.mxu0 %vm168_vm3, %v393_v13  ;;  %v490_v17 = vsel %vm487_vm7, %v488_v11, %v489_v12  ;;  %v492_v23 = vrot.slane %v375_v47, 5 }
  0x66   :  { %v410_v15 = vsel %vm376_vm6, %v401_v7, %v409_v14  ;;  %v120_v21 = vsel %vm114_vm2, %v118_v18, %v119_v19 }
  0x67   :  { %v493_v24 = vsel %vm487_vm7, %v491_v22, %v492_v23 }
  0x69   :  { %733 = vmatmul.mubr.msk.bf16.vlgmr.msra.gmra.mrb[0].mxu0 %vm168_vm3, %v410_v15 }
  0x6a   :  { %737 = vmatpush3.bf16.msra.mxu0 %v509_v16  ;;  %738 = vmatprep.mubr.msk.bf16.mxu0 %vm168_vm3, %v490_v17 }
  0x6f   :  { %721 = vmatmul.mubr.msk.bf16.vlgmr.msra.gmra.mrb[0].mxu1 %vm168_vm3, %v120_v21 }
  0x75   :  { %739 = vmatmul.mubr.msk.bf16.vlgmr.msra.gmra.mrb[0].mxu0 %vm168_vm3, %v493_v24 }
 0x142   :  { %v722_v25 = vpop.f32.mrb[0].mxu1 }
 0x143   :  { %v276_v26 = vpop.f32.mrb[1].mxu1 }
 0x144   :  { %v723_v27 = vpop.f32.mrb[2].mxu1 }
 0x145   :  { %v279_v28 = vpop.f32.mrb[3].mxu1 }
 0x148   :  { %v740_v29 = vpop.f32.mrb[0].mxu0 }
 0x149   :  { %v742_v31 = vadd.f32 %v740_v29, %v722_v25  ;;  %v545_v32 = vpop.f32.mrb[1].mxu0 }
 0x14a   :  { %v743_v34 = vadd.f32 %v545_v32, %v276_v26  ;;  %v741_v35 = vpop.f32.mrb[2].mxu0 }
 0x14b   :  { %v573_v36 = vmul.f32 %v742_v31, %v672_v30  ;;  %v744_v37 = vadd.f32 %v741_v35, %v723_v27  ;;  %v548_v38 = vpop.f32.mrb[3].mxu0 }
 0x14c   :  { %v571_v39 = vmul.f32 %v743_v34, %v672_v30  ;;  %v745_v40 = vadd.f32 %v548_v38, %v279_v28 }
 0x14d   :  { %v584_v41 = vadd.f32 %v673_v33, %v573_v36  ;;  %v574_v42 = vmul.f32 %v744_v37, %v672_v30 }
 0x14e   :  { %v582_v43 = vadd.f32 %v673_v33, %v571_v39  ;;  %v572_v44 = vmul.f32 %v745_v40, %v672_v30 }
 0x14f   :  { %v676_v45 = vmul.f32 -1.442695, %v584_v41  ;;  %v585_v46 = vadd.f32 %v673_v33, %v574_v42 }
 0x150   :  { %v674_v47 = vmul.f32 -1.442695, %v582_v43  ;;  %v583_v48 = vadd.f32 %v673_v33, %v572_v44 }
 0x151   :  { %780 = vpow2.f32 %v676_v45  ;;  %v677_v49 = vmul.f32 -1.442695, %v585_v46 }
 0x152   :  { %782 = vpow2.f32 %v674_v47  ;;  %v675_v50 = vmul.f32 -1.442695, %v583_v48 }
 0x153   :  { %784 = vpow2.f32 %v677_v49 }
 0x154   :  { %786 = vpow2.f32 %v675_v50 }
 0x15b   :  { %v781_v51 = vpop.eup %780 }
 0x15c   :  { %v783_v52 = vpop.eup %782  ;;  %v600_v53 = vadd.f32 1.0, %v781_v51 }
 0x15d   :  { %v785_v54 = vpop.eup %784  ;;  %v598_v55 = vadd.f32 1.0, %v783_v52 }
 0x15e   :  { %v787_v56 = vpop.eup %786  ;;  %788 = vrcp.f32 %v600_v53  ;;  %v601_v57 = vadd.f32 1.0, %v785_v54 }
 0x15f   :  { %790 = vrcp.f32 %v598_v55  ;;  %v599_v58 = vadd.f32 1.0, %v787_v56 }
 0x160   :  { %792 = vrcp.f32 %v601_v57 }
 0x161   :  { %794 = vrcp.f32 %v599_v58 }
 0x168   :  { %v789_v59 = vpop.eup %788 }
 0x169   :  { %v791_v60 = vpop.eup %790  ;;  %v612_v63 = vmul.f32 %v789_v59, %v584_v41 }
 0x16a   :  { %v793_v61 = vpop.eup %792  ;;  %v610_v1 = vmul.f32 %v791_v60, %v582_v43 }
 0x16b   :  { %v795_v62 = vpop.eup %794  ;;  %v613_v0 = vmul.f32 %v793_v61, %v585_v46 }
 0x16c   :  { %v611_v2 = vmul.f32 %v795_v62, %v583_v48 }
 0x16d   :  { %v694_v3 = vpack.c.bf16 %v613_v0, %v612_v63 }
 0x16e   :  { %v689_v4 = vpack.c.bf16 %v611_v2, %v610_v1 }
 0x16f   :  { %696 = vst [vmem:[#allocation11 + $0x8] sm:$0xff] %v694_v3  }
 0x170   :  { %690 = vst [vmem:[#allocation11] sm:$0xff] %v689_v4  }
 0x171   :  { %895 = shalt.err (!%p892_p8)
}
 0x172   :  { %s896_s17 = scalar_lea.hbm %s1084_s4, 256 }
 0x173   :  { %p897_p9 = scmp.ne.s32.totalorder %s1084_s4, %s896_s17  ;;  %p900_p10 = scmp.lt.u32.totalorder %s896_s17, %s1084_s4 }
 0x175   :  { %p902_p11 = pnand %p900_p10, %p897_p9 }
 0x177   :  { %905 = shalt.err (!%p902_p11)
}
 0x178   :  { %645 = dma.vmem_to_hbm [thread:$0]  %s640_s13, 256, %s1084_s4, [#allocation5], %s916_s27, %s916_s27, %s917_s28  }
 0x179   :  { %912 = dma.done.wait [#allocation5], 256  }
 0x17a   :  { %913 = vsyncadd [#allocation5], 4294967040 }
 0x17b   :  { %649 = vsyncpa [#allocation4], 1 }
 0x17c   :  { %650 = vsyncpa [#allocation7], 1 }
 0x17d   :  { %651 = vsyncpa [#allocation10], 1 }
 0x17e   :  { %652 = vsyncpa [#allocation5], 1 }

// kernel: _lambda_.5
= control target key start
LH: loop header
LB: loop body
LE: loop exit
PB: predicated region body
PF: predicated region fallthrough
CT: control target
= control target key end

     0   :  { %s4964_s0 = inlined_call_operand.hbm [shape: bf16[2,16,128], index: 0, kind: input, shape index: {}]   ;;  %s4965_s1 = inlined_call_operand.hbm [shape: bf16[128,128], index: 1, kind: input, shape index: {}]   ;;  %s4966_s2 = inlined_call_operand.hbm [shape: f32[1,128], index: 2, kind: input, shape index: {}]   ;;  %s4967_s3 = inlined_call_operand.hbm [shape: f32[1,128], index: 3, kind: input, shape index: {}]   ;;  %s4968_s4 = inlined_call_operand.hbm [shape: f32[15,128], index: 4, kind: input, shape index: {}]   ;;  %s4969_s5 = inlined_call_operand.hbm [shape: f32[1,128], index: 5, kind: input, shape index: {}]   ;;  %s4970_s6 = inlined_call_operand.hbm [shape: f32[1,128], index: 6, kind: input, shape index: {}]   ;;  %s4971_s7 = inlined_call_operand.hbm [shape: bf16[128,4], index: 7, kind: input, shape index: {}]   ;;  %s4972_s8 = inlined_call_operand.hbm [shape: f32[1,4], index: 8, kind: input, shape index: {}]   ;;  %s4973_s9 = inlined_call_operand.hbm [shape: bf16[4,128], index: 9, kind: input, shape index: {}]   ;;  %s4974_s10 = inlined_call_operand.hbm [shape: f32[1,128], index: 10, kind: input, shape index: {}]   ;;  %s4975_s11 = inlined_call_operand.hbm [shape: bf16[128,128], index: 11, kind: input, shape index: {}]   ;;  %s4976_s12 = inlined_call_operand.hbm [shape: f32[1,128], index: 12, kind: input, shape index: {}]   ;;  %s4977_s13 = inlined_call_operand.hbm [shape: f32[1,128], index: 13, kind: input, shape index: {}]   ;;  %s4978_s14 = inlined_call_operand.hbm [shape: bf16[5,128,128], index: 14, kind: input, shape index: {}]   ;;  %s4979_s15 = inlined_call_operand.hbm [shape: bf16[5,128,128], index: 15, kind: input, shape index: {}]   ;;  %s4980_s16 = inlined_call_operand.hbm [shape: f32[1,128], index: 16, kind: input, shape index: {}]   ;;  %s4981_s17 = inlined_call_operand.hbm [shape: f32[1,128], index: 17, kind: input, shape index: {}]   ;;  %s4982_s18 = inlined_call_operand.hbm [shape: bf16[2,16,128], index: 18, kind: output, shape index: {}]  }
   0x1   :  { %4988 = sst [smem:[#allocation46_spill]] %s4964_s0 }
   0x2   :  { %4989 = sst [smem:[#allocation47_spill]] %s4965_s1 }
   0x3   :  { %4990 = sst [smem:[#allocation48_spill]] %s4966_s2 }
   0x4   :  { %23 = vsyncpa [#allocation6], 0 }
   0x5   :  { %24 = vsyncpa [#allocation9], 0 }
   0x6   :  { %25 = vsyncpa [#allocation12], 0 }
   0x7   :  { %26 = vsyncpa [#allocation15], 0 }
   0x8   :  { %27 = vsyncpa [#allocation18], 0 }
   0x9   :  { %28 = vsyncpa [#allocation21], 0 }
   0xa   :  { %29 = vsyncpa [#allocation24], 0 }
   0xb   :  { %30 = vsyncpa [#allocation27], 0 }
   0xc   :  { %31 = vsyncpa [#allocation30], 0 }
   0xd   :  { %32 = vsyncpa [#allocation33], 0 }
   0xe   :  { %33 = vsyncpa [#allocation7], 0  ;;  %s4249_s27 = smov [#allocation8]   ;;  %s4250_s29 = smov [#allocation11]  }
   0xf   :  { %s51_s28 = sshll.u32 %s4249_s27, 4  ;;  %s74_s30 = sshll.u32 %s4250_s29, 4  ;;  %s52_s28 = int_to_ptr.vmem [resolvable:$true] %s51_s28  ;;  %s4373_s30 = int_to_ptr.vmem [resolvable:$true] %s74_s30 }
  0x10   :  { %s4991_s1 = sld [smem:[#allocation47_spill]] }
  0x16   :  { %s3809_s20 = scalar_lea.hbm %s4991_s1, 1024 }
  0x17   :  { %p3810_p0 = scmp.ne.s32.totalorder %s4991_s1, %s3809_s20  ;;  %p3813_p1 = scmp.lt.u32.totalorder %s3809_s20, %s4991_s1 }
  0x19   :  { %p3815_p2 = pnand %p3813_p1, %p3810_p0 }
  0x1b   :  { %3818 = shalt.err (!%p3815_p2)
}
  0x1c   :  { %s3819_s24 = scalar_lea.vmem %s52_s28, 1024  ;;  %p3824_p4 = scmp.lt.s32.totalorder %s52_s28, %s52_s28 }
  0x1d   :  { %p3820_p3 = scmp.ne.s32.totalorder %s52_s28, %s3819_s24  ;;  %p3825_p5 = scmp.lt.s32.totalorder %s3819_s24, %s3819_s24 }
  0x1f   :  { %p3826_p6 = por %p3825_p5, %p3824_p4 }
  0x21   :  { %p3827_p7 = pnand %p3826_p6, %p3820_p3 }
  0x23   :  { %3830 = shalt.err (!%p3827_p7)
}
  0x24   :  { %s4986_s25 = smov 64   ;;  %s4252_s26 = smov 4  }
  0x25   :  { %57 = dma.hbm_to_vmem [thread:$0]  %s4991_s1, 1024, %s52_s28, [#allocation9], %s4986_s25, %s4986_s25, %s4252_s26  }
  0x26   :  { %s3831_s20 = scalar_lea.hbm %s4967_s3, 16 }
  0x27   :  { %p3832_p8 = scmp.ne.s32.totalorder %s4967_s3, %s3831_s20  ;;  %p3835_p9 = scmp.lt.u32.totalorder %s3831_s20, %s4967_s3 }
  0x29   :  { %p3837_p10 = pnand %p3835_p9, %p3832_p8 }
  0x2b   :  { %3840 = shalt.err (!%p3837_p10)
}
  0x2c   :  { %s3841_s24 = scalar_lea.vmem %s4373_s30, 16  ;;  %s3845_s28 = scalar_lea.vmem %s4373_s30, 32 }
  0x2d   :  { %p3842_p11 = scmp.ne.s32.totalorder %s4373_s30, %s3841_s24  ;;  %p3846_p12 = scmp.lt.s32.totalorder %s4373_s30, %s4373_s30 }
  0x2e   :  { %p3847_p13 = scmp.lt.s32.totalorder %s3845_s28, %s3841_s24 }
  0x30   :  { %p3848_p0 = por %p3847_p13, %p3846_p12 }
  0x32   :  { %p3849_p1 = pnand %p3848_p0, %p3842_p11 }
  0x34   :  { %3852 = shalt.err (!%p3849_p1)
}
  0x35   :  { %77 = dma.hbm_to_vmem [thread:$0]  %s4967_s3, 16, %s4373_s30, [#allocation12]  }
  0x36   :  { %s4253_s29 = smov [#allocation14]   ;;  %s4254_s19 = smov [#allocation17]  }
  0x37   :  { %s96_s0 = sshll.u32 %s4253_s29, 4  ;;  %s115_s20 = sshll.u32 %s4254_s19, 4  ;;  %s97_s0 = int_to_ptr.vmem [resolvable:$true] %s96_s0  ;;  %s4408_s20 = int_to_ptr.vmem [resolvable:$true] %s115_s20 }
  0x38   :  { %s3853_s2 = scalar_lea.hbm %s4969_s5, 16 }
  0x39   :  { %p3854_p2 = scmp.ne.s32.totalorder %s4969_s5, %s3853_s2  ;;  %p3857_p3 = scmp.lt.u32.totalorder %s3853_s2, %s4969_s5 }
  0x3b   :  { %p3859_p4 = pnand %p3857_p3, %p3854_p2 }
  0x3d   :  { %3862 = shalt.err (!%p3859_p4)
}
  0x3e   :  { %s3863_s3 = scalar_lea.vmem %s97_s0, 16  ;;  %s3867_s30 = scalar_lea.vmem %s97_s0, 32 }
  0x3f   :  { %p3864_p5 = scmp.ne.s32.totalorder %s97_s0, %s3863_s3  ;;  %p3868_p6 = scmp.lt.s32.totalorder %s97_s0, %s97_s0 }
  0x40   :  { %p3869_p7 = scmp.lt.s32.totalorder %s3867_s30, %s3863_s3 }
  0x42   :  { %p3870_p8 = por %p3869_p7, %p3868_p6 }
  0x44   :  { %p3871_p9 = pnand %p3870_p8, %p3864_p5 }
  0x46   :  { %3874 = shalt.err (!%p3871_p9)
}
  0x47   :  { %99 = dma.hbm_to_vmem [thread:$0]  %s4969_s5, 16, %s97_s0, [#allocation15]  }
  0x48   :  { %s3875_s21 = scalar_lea.hbm %s4971_s7, 1024 }
  0x49   :  { %p3876_p10 = scmp.ne.s32.totalorder %s4971_s7, %s3875_s21  ;;  %p3879_p11 = scmp.lt.u32.totalorder %s3875_s21, %s4971_s7 }
  0x4b   :  { %p3881_p12 = pnand %p3879_p11, %p3876_p10 }
  0x4d   :  { %3884 = shalt.err (!%p3881_p12)
}
  0x4e   :  { %s3885_s24 = scalar_lea.vmem %s4408_s20, 1024  ;;  %p3890_p0 = scmp.lt.s32.totalorder %s4408_s20, %s4408_s20 }
  0x4f   :  { %p3886_p13 = scmp.ne.s32.totalorder %s4408_s20, %s3885_s24  ;;  %p3891_p1 = scmp.lt.s32.totalorder %s3885_s24, %s3885_s24 }
  0x51   :  { %p3892_p2 = por %p3891_p1, %p3890_p0 }
  0x53   :  { %p3893_p3 = pnand %p3892_p2, %p3886_p13 }
  0x55   :  { %3896 = shalt.err (!%p3893_p3)
}
  0x56   :  { %s4992_s5 = smov 64   ;;  %s4255_s3 = smov [#allocation20]  }
  0x57   :  { %121 = dma.hbm_to_vmem [thread:$0]  %s4971_s7, 1024, %s4408_s20, [#allocation18], %s4992_s5, %s4992_s5, %s4252_s26  }
  0x58   :  { %s138_s30 = sshll.u32 %s4255_s3, 4  ;;  %s4256_s1 = smov [#allocation23]   ;;  %s139_s30 = int_to_ptr.vmem [resolvable:$true] %s138_s30 }
  0x59   :  { %s157_s27 = sshll.u32 %s4256_s1, 4  ;;  %s3897_s21 = scalar_lea.hbm %s4973_s9, 32  ;;  %s4442_s27 = int_to_ptr.vmem [resolvable:$true] %s157_s27 }
  0x5a   :  { %p3898_p4 = scmp.ne.s32.totalorder %s4973_s9, %s3897_s21  ;;  %p3901_p5 = scmp.lt.u32.totalorder %s3897_s21, %s4973_s9 }
  0x5c   :  { %p3903_p6 = pnand %p3901_p5, %p3898_p4 }
  0x5e   :  { %3906 = shalt.err (!%p3903_p6)
}
  0x5f   :  { %s3907_s7 = scalar_lea.vmem %s139_s30, 32  ;;  %p3912_p8 = scmp.lt.s32.totalorder %s139_s30, %s139_s30 }
  0x60   :  { %p3908_p7 = scmp.ne.s32.totalorder %s139_s30, %s3907_s7  ;;  %p3913_p9 = scmp.lt.s32.totalorder %s3907_s7, %s3907_s7 }
  0x62   :  { %p3914_p10 = por %p3913_p9, %p3912_p8 }
  0x64   :  { %p3915_p11 = pnand %p3914_p10, %p3908_p7 }
  0x66   :  { %3918 = shalt.err (!%p3915_p11)
}
  0x67   :  { %141 = dma.hbm_to_vmem [thread:$0]  %s4973_s9, 32, %s139_s30, [#allocation21]  }
  0x68   :  { %s3919_s3 = scalar_lea.hbm %s4975_s11, 1024 }
  0x69   :  { %p3920_p12 = scmp.ne.s32.totalorder %s4975_s11, %s3919_s3  ;;  %p3923_p13 = scmp.lt.u32.totalorder %s3919_s3, %s4975_s11 }
  0x6b   :  { %p3925_p0 = pnand %p3923_p13, %p3920_p12 }
  0x6d   :  { %3928 = shalt.err (!%p3925_p0)
}
  0x6e   :  { %s3929_s25 = scalar_lea.vmem %s4442_s27, 1024  ;;  %p3934_p2 = scmp.lt.s32.totalorder %s4442_s27, %s4442_s27 }
  0x6f   :  { %p3930_p1 = scmp.ne.s32.totalorder %s4442_s27, %s3929_s25  ;;  %p3935_p3 = scmp.lt.s32.totalorder %s3929_s25, %s3929_s25 }
  0x71   :  { %p3936_p4 = por %p3935_p3, %p3934_p2 }
  0x73   :  { %p3937_p5 = pnand %p3936_p4, %p3930_p1 }
  0x75   :  { %3940 = shalt.err (!%p3937_p5)
}
  0x76   :  { %163 = dma.hbm_to_vmem [thread:$0]  %s4975_s11, 1024, %s4442_s27, [#allocation24], %s4992_s5, %s4992_s5, %s4252_s26  }
  0x77   :  { %s4257_s22 = smov [#allocation26]   ;;  %s4258_s23 = smov [#allocation29]  }
  0x78   :  { %s180_s2 = sshll.u32 %s4257_s22, 4  ;;  %s201_s7 = sshll.u32 %s4258_s23, 4  ;;  %s181_s2 = int_to_ptr.vmem [resolvable:$true] %s180_s2  ;;  %s4476_s7 = int_to_ptr.vmem [resolvable:$true] %s201_s7 }
  0x79   :  { %s3941_s0 = scalar_lea.hbm %s4977_s13, 16 }
  0x7a   :  { %p3942_p6 = scmp.ne.s32.totalorder %s4977_s13, %s3941_s0  ;;  %p3945_p7 = scmp.lt.u32.totalorder %s3941_s0, %s4977_s13 }
  0x7c   :  { %p3947_p8 = pnand %p3945_p7, %p3942_p6 }
  0x7e   :  { %3950 = shalt.err (!%p3947_p8)
}
  0x7f   :  { %s3951_s11 = scalar_lea.vmem %s181_s2, 16  ;;  %s3955_s27 = scalar_lea.vmem %s181_s2, 32 }
  0x80   :  { %p3952_p9 = scmp.ne.s32.totalorder %s181_s2, %s3951_s11  ;;  %p3956_p10 = scmp.lt.s32.totalorder %s181_s2, %s181_s2 }
  0x81   :  { %p3957_p11 = scmp.lt.s32.totalorder %s3955_s27, %s3951_s11 }
  0x83   :  { %p3958_p12 = por %p3957_p11, %p3956_p10 }
  0x85   :  { %p3959_p13 = pnand %p3958_p12, %p3952_p9 }
  0x87   :  { %3962 = shalt.err (!%p3959_p13)
}
  0x88   :  { %183 = dma.hbm_to_vmem [thread:$0]  %s4977_s13, 16, %s181_s2, [#allocation27]  }
  0x89   :  { %s3963_s30 = scalar_lea.hbm %s4979_s15, 5120 }
  0x8a   :  { %p3964_p0 = scmp.ne.s32.totalorder %s4979_s15, %s3963_s30  ;;  %p3967_p1 = scmp.lt.u32.totalorder %s3963_s30, %s4979_s15 }
  0x8c   :  { %p3969_p2 = pnand %p3967_p1, %p3964_p0 }
  0x8e   :  { %3972 = shalt.err (!%p3969_p2)
}
  0x8f   :  { %s3973_s0 = scalar_lea.vmem %s4476_s7, 5120  ;;  %p3978_p4 = scmp.lt.s32.totalorder %s4476_s7, %s4476_s7 }
  0x90   :  { %p3974_p3 = scmp.ne.s32.totalorder %s4476_s7, %s3973_s0  ;;  %p3979_p5 = scmp.lt.s32.totalorder %s3973_s0, %s3973_s0 }
  0x92   :  { %p3980_p6 = por %p3979_p5, %p3978_p4 }
  0x94   :  { %p3981_p7 = pnand %p3980_p6, %p3974_p3 }
  0x96   :  { %3984 = shalt.err (!%p3981_p7)
}
  0x97   :  { %207 = dma.hbm_to_vmem [thread:$0]  %s4979_s15, 5120, %s4476_s7, [#allocation30], %s4992_s5, %s4992_s5, %s4252_s26  }
  0x98   :  { %s4259_s28 = smov [#allocation5]   ;;  %s4260_s1 = smov [#allocation10]  }
  0x99   :  { %s39_s3 = sshll.u32 %s4259_s28, 4  ;;  %s64_s29 = sshll.u32 %s4260_s1, 4  ;;  %s40_s3 = int_to_ptr.vmem [resolvable:$true] %s39_s3  ;;  %s65_s29 = int_to_ptr.vmem [resolvable:$true] %s64_s29 }
  0x9a   :  { %s4993_s19 = sld [smem:[#allocation46_spill]] }
  0xa0   :  { %s3985_s21 = scalar_lea.hbm %s4993_s19, 256 }
  0xa1   :  { %p3986_p8 = scmp.ne.s32.totalorder %s4993_s19, %s3985_s21  ;;  %p3989_p9 = scmp.lt.u32.totalorder %s3985_s21, %s4993_s19 }
  0xa3   :  { %p3991_p10 = pnand %p3989_p9, %p3986_p8 }
  0xa5   :  { %3994 = shalt.err (!%p3991_p10)
}
  0xa6   :  { %s3995_s15 = scalar_lea.vmem %s40_s3, 256  ;;  %p4000_p12 = scmp.lt.s32.totalorder %s40_s3, %s40_s3 }
  0xa7   :  { %p3996_p11 = scmp.ne.s32.totalorder %s40_s3, %s3995_s15  ;;  %p4001_p13 = scmp.lt.s32.totalorder %s3995_s15, %s3995_s15 }
  0xa9   :  { %p4002_p0 = por %p4001_p13, %p4000_p12 }
  0xab   :  { %p4003_p1 = pnand %p4002_p0, %p3996_p11 }
  0xad   :  { %4006 = shalt.err (!%p4003_p1)
}
  0xae   :  { %45 = dma.hbm_to_vmem [thread:$0]  %s4993_s19, 256, %s40_s3, [#allocation6], %s4992_s5, %s4992_s5, %s4252_s26  }
  0xaf   :  { %s4994_s0 = sld [smem:[#allocation48_spill]] }
  0xb5   :  { %s4007_s13 = scalar_lea.hbm %s4994_s0, 16 }
  0xb6   :  { %p4008_p2 = scmp.ne.s32.totalorder %s4994_s0, %s4007_s13  ;;  %p4011_p3 = scmp.lt.u32.totalorder %s4007_s13, %s4994_s0 }
  0xb8   :  { %p4013_p4 = pnand %p4011_p3, %p4008_p2 }
  0xba   :  { %4016 = shalt.err (!%p4013_p4)
}
  0xbb   :  { %s4017_s27 = scalar_lea.vmem %s65_s29, 16  ;;  %s4021_s21 = scalar_lea.vmem %s65_s29, 32 }
  0xbc   :  { %p4018_p5 = scmp.ne.s32.totalorder %s65_s29, %s4017_s27  ;;  %p4022_p6 = scmp.lt.s32.totalorder %s65_s29, %s65_s29 }
  0xbd   :  { %p4023_p7 = scmp.lt.s32.totalorder %s4021_s21, %s4017_s27 }
  0xbf   :  { %p4024_p8 = por %p4023_p7, %p4022_p6 }
  0xc1   :  { %p4025_p9 = pnand %p4024_p8, %p4018_p5 }
  0xc3   :  { %4028 = shalt.err (!%p4025_p9)
}
  0xc4   :  { %67 = dma.hbm_to_vmem [thread:$0]  %s4994_s0, 16, %s65_s29, [#allocation9]  }
  0xc5   :  { %s4261_s25 = smov [#allocation13]   ;;  %s4029_s15 = scalar_lea.hbm %s4968_s4, 256 }
  0xc6   :  { %s83_s9 = sshll.u32 %s4261_s25, 4  ;;  %p4030_p10 = scmp.ne.s32.totalorder %s4968_s4, %s4029_s15  ;;  %s84_s9 = int_to_ptr.vmem [resolvable:$true] %s83_s9 }
  0xc7   :  { %p4033_p11 = scmp.lt.u32.totalorder %s4029_s15, %s4968_s4 }
  0xc9   :  { %p4035_p12 = pnand %p4033_p11, %p4030_p10 }
  0xcb   :  { %4038 = shalt.err (!%p4035_p12)
}
  0xcc   :  { %s4039_s13 = scalar_lea.vmem %s84_s9, 256  ;;  %p4044_p0 = scmp.lt.s32.totalorder %s84_s9, %s84_s9 }
  0xcd   :  { %p4040_p13 = scmp.ne.s32.totalorder %s84_s9, %s4039_s13  ;;  %p4045_p1 = scmp.lt.s32.totalorder %s4039_s13, %s4039_s13 }
  0xcf   :  { %p4046_p2 = por %p4045_p1, %p4044_p0 }
  0xd1   :  { %p4047_p3 = pnand %p4046_p2, %p4040_p13 }
  0xd3   :  { %4050 = shalt.err (!%p4047_p3)
}
  0xd4   :  { %s4262_s29 = smov 128   ;;  %s4263_s0 = smov 8  }
  0xd5   :  { %89 = dma.hbm_to_vmem [thread:$0]  %s4968_s4, 256, %s84_s9, [#allocation12], %s4262_s29, %s4262_s29, %s4263_s0  }
  0xd6   :  { %s4264_s1 = smov [#allocation16]   ;;  %s4265_s27 = smov [#allocation19]  }
  0xd7   :  { %s106_s11 = sshll.u32 %s4264_s1, 4  ;;  %s128_s21 = sshll.u32 %s4265_s27, 4  ;;  %s107_s11 = int_to_ptr.vmem [resolvable:$true] %s106_s11  ;;  %s129_s21 = int_to_ptr.vmem [resolvable:$true] %s128_s21 }
  0xd8   :  { %s4051_s25 = scalar_lea.hbm %s4970_s6, 16 }
  0xd9   :  { %p4052_p4 = scmp.ne.s32.totalorder %s4970_s6, %s4051_s25  ;;  %p4055_p5 = scmp.lt.u32.totalorder %s4051_s25, %s4970_s6 }
  0xdb   :  { %p4057_p6 = pnand %p4055_p5, %p4052_p4 }
  0xdd   :  { %4060 = shalt.err (!%p4057_p6)
}
  0xde   :  { %s4061_s4 = scalar_lea.vmem %s107_s11, 16  ;;  %s4065_s9 = scalar_lea.vmem %s107_s11, 32 }
  0xdf   :  { %p4062_p7 = scmp.ne.s32.totalorder %s107_s11, %s4061_s4  ;;  %p4066_p8 = scmp.lt.s32.totalorder %s107_s11, %s107_s11 }
  0xe0   :  { %p4067_p9 = scmp.lt.s32.totalorder %s4065_s9, %s4061_s4 }
  0xe2   :  { %p4068_p10 = por %p4067_p9, %p4066_p8 }
  0xe4   :  { %p4069_p11 = pnand %p4068_p10, %p4062_p7 }
  0xe6   :  { %4072 = shalt.err (!%p4069_p11)
}
  0xe7   :  { %109 = dma.hbm_to_vmem [thread:$0]  %s4970_s6, 16, %s107_s11, [#allocation15]  }
  0xe8   :  { %s4073_s29 = scalar_lea.hbm %s4972_s8, 16 }
  0xe9   :  { %p4074_p12 = scmp.ne.s32.totalorder %s4972_s8, %s4073_s29  ;;  %p4077_p13 = scmp.lt.u32.totalorder %s4073_s29, %s4972_s8 }
  0xeb   :  { %p4079_p0 = pnand %p4077_p13, %p4074_p12 }
  0xed   :  { %4082 = shalt.err (!%p4079_p0)
}
  0xee   :  { %s4083_s27 = scalar_lea.vmem %s129_s21, 16  ;;  %s4087_s3 = scalar_lea.vmem %s129_s21, 32 }
  0xef   :  { %p4084_p1 = scmp.ne.s32.totalorder %s129_s21, %s4083_s27  ;;  %p4088_p2 = scmp.lt.s32.totalorder %s129_s21, %s129_s21 }
  0xf0   :  { %p4089_p3 = scmp.lt.s32.totalorder %s4087_s3, %s4083_s27 }
  0xf2   :  { %p4090_p4 = por %p4089_p3, %p4088_p2 }
  0xf4   :  { %p4091_p5 = pnand %p4090_p4, %p4084_p1 }
  0xf6   :  { %4094 = shalt.err (!%p4091_p5)
}
  0xf7   :  { %131 = dma.hbm_to_vmem [thread:$0]  %s4972_s8, 16, %s129_s21, [#allocation18]  }
  0xf8   :  { %s4266_s19 = smov [#allocation22]   ;;  %s4267_s30 = smov [#allocation25]  }
  0xf9   :  { %s148_s25 = sshll.u32 %s4266_s19, 4  ;;  %s170_s22 = sshll.u32 %s4267_s30, 4  ;;  %s149_s25 = int_to_ptr.vmem [resolvable:$true] %s148_s25  ;;  %s171_s22 = int_to_ptr.vmem [resolvable:$true] %s170_s22 }
  0xfa   :  { %s4095_s4 = scalar_lea.hbm %s4974_s10, 16 }
  0xfb   :  { %p4096_p6 = scmp.ne.s32.totalorder %s4974_s10, %s4095_s4  ;;  %p4099_p7 = scmp.lt.u32.totalorder %s4095_s4, %s4974_s10 }
  0xfd   :  { %p4101_p8 = pnand %p4099_p7, %p4096_p6 }
  0xff   :  { %4104 = shalt.err (!%p4101_p8)
}
 0x100   :  { %s4105_s8 = scalar_lea.vmem %s149_s25, 16  ;;  %s4109_s21 = scalar_lea.vmem %s149_s25, 32 }
 0x101   :  { %p4106_p9 = scmp.ne.s32.totalorder %s149_s25, %s4105_s8  ;;  %p4110_p10 = scmp.lt.s32.totalorder %s149_s25, %s149_s25 }
 0x102   :  { %p4111_p11 = scmp.lt.s32.totalorder %s4109_s21, %s4105_s8 }
 0x104   :  { %p4112_p12 = por %p4111_p11, %p4110_p10 }
 0x106   :  { %p4113_p13 = pnand %p4112_p12, %p4106_p9 }
 0x108   :  { %4116 = shalt.err (!%p4113_p13)
}
 0x109   :  { %151 = dma.hbm_to_vmem [thread:$0]  %s4974_s10, 16, %s149_s25, [#allocation21]  }
 0x10a   :  { %s4117_s28 = scalar_lea.hbm %s4976_s12, 16 }
 0x10b   :  { %p4118_p0 = scmp.ne.s32.totalorder %s4976_s12, %s4117_s28  ;;  %p4121_p1 = scmp.lt.u32.totalorder %s4117_s28, %s4976_s12 }
 0x10d   :  { %p4123_p2 = pnand %p4121_p1, %p4118_p0 }
 0x10f   :  { %4126 = shalt.err (!%p4123_p2)
}
 0x110   :  { %s4127_s11 = scalar_lea.vmem %s171_s22, 16  ;;  %s4131_s19 = scalar_lea.vmem %s171_s22, 32 }
 0x111   :  { %p4128_p3 = scmp.ne.s32.totalorder %s171_s22, %s4127_s11  ;;  %p4132_p4 = scmp.lt.s32.totalorder %s171_s22, %s171_s22 }
 0x112   :  { %p4133_p5 = scmp.lt.s32.totalorder %s4131_s19, %s4127_s11 }
 0x114   :  { %p4134_p6 = por %p4133_p5, %p4132_p4 }
 0x116   :  { %p4135_p7 = pnand %p4134_p6, %p4128_p3 }
 0x118   :  { %4138 = shalt.err (!%p4135_p7)
}
 0x119   :  { %173 = dma.hbm_to_vmem [thread:$0]  %s4976_s12, 16, %s171_s22, [#allocation24]  }
 0x11a   :  { %s4268_s30 = smov [#allocation28]   ;;  %s4269_s7 = smov [#allocation31]  }
 0x11b   :  { %s189_s15 = sshll.u32 %s4268_s30, 4  ;;  %s214_s4 = sshll.u32 %s4269_s7, 4  ;;  %s190_s15 = int_to_ptr.vmem [resolvable:$true] %s189_s15  ;;  %s215_s4 = int_to_ptr.vmem [resolvable:$true] %s214_s4 }
 0x11c   :  { %s4139_s20 = scalar_lea.hbm %s4978_s14, 5120 }
 0x11d   :  { %p4140_p8 = scmp.ne.s32.totalorder %s4978_s14, %s4139_s20  ;;  %p4143_p9 = scmp.lt.u32.totalorder %s4139_s20, %s4978_s14 }
 0x11f   :  { %p4145_p10 = pnand %p4143_p9, %p4140_p8 }
 0x121   :  { %4148 = shalt.err (!%p4145_p10)
}
 0x122   :  { %s4149_s12 = scalar_lea.vmem %s190_s15, 5120  ;;  %p4154_p12 = scmp.lt.s32.totalorder %s190_s15, %s190_s15 }
 0x123   :  { %p4150_p11 = scmp.ne.s32.totalorder %s190_s15, %s4149_s12  ;;  %p4155_p13 = scmp.lt.s32.totalorder %s4149_s12, %s4149_s12 }
 0x125   :  { %p4156_p0 = por %p4155_p13, %p4154_p12 }
 0x127   :  { %p4157_p1 = pnand %p4156_p0, %p4150_p11 }
 0x129   :  { %4160 = shalt.err (!%p4157_p1)
}
 0x12a   :  { %195 = dma.hbm_to_vmem [thread:$0]  %s4978_s14, 5120, %s190_s15, [#allocation27], %s4992_s5, %s4992_s5, %s4252_s26  }
 0x12b   :  { %s4161_s28 = scalar_lea.hbm %s4980_s16, 16 }
 0x12c   :  { %p4162_p2 = scmp.ne.s32.totalorder %s4980_s16, %s4161_s28  ;;  %p4165_p3 = scmp.lt.u32.totalorder %s4161_s28, %s4980_s16 }
 0x12e   :  { %p4167_p4 = pnand %p4165_p3, %p4162_p2 }
 0x130   :  { %4170 = shalt.err (!%p4167_p4)
}
 0x131   :  { %s4171_s11 = scalar_lea.vmem %s215_s4, 16  ;;  %s4175_s19 = scalar_lea.vmem %s215_s4, 32 }
 0x132   :  { %p4172_p5 = scmp.ne.s32.totalorder %s215_s4, %s4171_s11  ;;  %p4176_p6 = scmp.lt.s32.totalorder %s215_s4, %s215_s4 }
 0x133   :  { %p4177_p7 = scmp.lt.s32.totalorder %s4175_s19, %s4171_s11 }
 0x135   :  { %p4178_p8 = por %p4177_p7, %p4176_p6 }
 0x137   :  { %p4179_p9 = pnand %p4178_p8, %p4172_p5 }
 0x139   :  { %4182 = shalt.err (!%p4179_p9)
}
 0x13a   :  { %217 = dma.hbm_to_vmem [thread:$0]  %s4980_s16, 16, %s215_s4, [#allocation30]  }
 0x13b   :  { %s4270_s25 = smov [#allocation32]   ;;  %s4183_s9 = scalar_lea.hbm %s4981_s17, 16 }
 0x13c   :  { %s224_s30 = sshll.u32 %s4270_s25, 4  ;;  %p4184_p10 = scmp.ne.s32.totalorder %s4981_s17, %s4183_s9  ;;  %s225_s30 = int_to_ptr.vmem [resolvable:$true] %s224_s30 }
 0x13d   :  { %p4187_p11 = scmp.lt.u32.totalorder %s4183_s9, %s4981_s17 }
 0x13f   :  { %p4189_p12 = pnand %p4187_p11, %p4184_p10 }
 0x141   :  { %4192 = shalt.err (!%p4189_p12)
}
 0x142   :  { %s4193_s21 = scalar_lea.vmem %s225_s30, 16  ;;  %s4197_s16 = scalar_lea.vmem %s225_s30, 32 }
 0x143   :  { %p4194_p13 = scmp.ne.s32.totalorder %s225_s30, %s4193_s21  ;;  %p4198_p0 = scmp.lt.s32.totalorder %s225_s30, %s225_s30 }
 0x144   :  { %p4199_p1 = scmp.lt.s32.totalorder %s4197_s16, %s4193_s21 }
 0x146   :  { %p4200_p2 = por %p4199_p1, %p4198_p0 }
 0x148   :  { %p4201_p3 = pnand %p4200_p2, %p4194_p13 }
 0x14a   :  { %4204 = shalt.err (!%p4201_p3)
}
 0x14b   :  { %227 = dma.hbm_to_vmem [thread:$0]  %s4981_s17, 16, %s225_s30, [#allocation33]  }
 0x14c   :  { %4227 = dma.done.wait [#allocation6], 256  }
 0x14d   :  { %4228 = vsyncadd [#allocation6], 4294967040 }
 0x14e   :  { %4229 = dma.done.wait [#allocation9], 1040  }
 0x14f   :  { %4230 = vsyncadd [#allocation9], 4294966256 }
 0x150   :  { %4231 = dma.done.wait [#allocation12], 272  }
 0x151   :  { %4232 = vsyncadd [#allocation12], 4294967024 }
 0x152   :  { %4233 = dma.done.wait [#allocation15], 32  }
 0x153   :  { %4234 = vsyncadd [#allocation15], 4294967264 }
 0x154   :  { %4235 = dma.done.wait [#allocation18], 1040  }
 0x155   :  { %4236 = vsyncadd [#allocation18], 4294966256 }
 0x156   :  { %4237 = dma.done.wait [#allocation21], 48  }
 0x157   :  { %4238 = vsyncadd [#allocation21], 4294967248 }
 0x158   :  { %4239 = dma.done.wait [#allocation24], 1040  }
 0x159   :  { %4240 = vsyncadd [#allocation24], 4294966256 }
 0x15a   :  { %4241 = dma.done.wait [#allocation27], 5136  }
 0x15b   :  { %4242 = vsyncadd [#allocation27], 4294962160 }
 0x15c   :  { %4243 = dma.done.wait [#allocation30], 5136  }
 0x15d   :  { %4244 = vsyncadd [#allocation30], 4294962160 }
 0x15e   :  { %4245 = dma.done.wait [#allocation33], 16  }
 0x15f   :  { %4246 = vsyncadd [#allocation33], 4294967280  ;;  %v3627_v0 = vld [vmem:[#allocation8] sm:$0xff]   ;;  %v3628_v1 = vld [vmem:[#allocation8 + $0x8] sm:$0xff]   ;;  %v4271_v18 = vmov 0   ;;  %vm498_vm0 = vcmask 1044480  }
 0x160   :  { %3196 = vmatprep.subr.bf16.mxu1 %v3627_v0  ;;  %v3629_v2 = vld [vmem:[#allocation8 + $0x10] sm:$0xff]   ;;  %v3630_v3 = vld [vmem:[#allocation8 + $0x18] sm:$0xff]   ;;  %v3631_v12 = vld [vmem:[#allocation8 + $0x20] sm:$0xff]   ;;  %288 = vst [vmem:[#allocation2 + $0x10] sm:$0xf] %v4271_v18  ;;  %vm666_vm1 = vcmask 1043456  }
 0x161   :  { %3197 = vmatpush3.bf16.msra.mxu1 %v3627_v0  ;;  %v299_v4 = vld [vmem:[#allocation5] sm:$0xf]  ;;  %v300_v5 = vld [vmem:[#allocation5 + $0x4] sm:$0xf]  ;;  %v301_v6 = vld [vmem:[#allocation5 + $0x8] sm:$0xf] }
 0x162   :  { %3198 = vmatprep.subr.bf16.mxu1 %v3628_v1  ;;  %v2892_v7 = vcombine.low %v299_v4, %v300_v5  ;;  %v2956_v8 = vcombine.low %v299_v4, %v299_v4  ;;  %v2957_v9 = vcombine.low %v300_v5, %v300_v5  ;;  %v302_v10 = vld [vmem:[#allocation5 + $0xc] sm:$0xf]  ;;  %v2958_v11 = vcombine.low %v301_v6, %v301_v6  ;;  %v3632_v14 = vld [vmem:[#allocation8 + $0x28] sm:$0xff]   ;;  %v3633_v15 = vld [vmem:[#allocation8 + $0x30] sm:$0xff]   ;;  %s4272_s17 = smov 1   ;;  %s4273_s12 = smov 127  }
 0x163   :  { %v2959_v13 = vcombine.low %v302_v10, %v302_v10  ;;  %v3634_v16 = vld [vmem:[#allocation8 + $0x38] sm:$0xff]   ;;  %v2893_v17 = vcombine.low %v301_v6, %v302_v10  ;;  %287 = vst [vmem:[#allocation2] sm:$0xf] %v4271_v18  ;;  %289 = vst [vmem:[#allocation2 + $0x8] sm:$0xf0] %v4271_v18  ;;  %vm838_vm4 = vcmask 1042432  }
 0x164   :  { %3212 = vmatprep.mubr.bf16.mxu1 %v2892_v7  ;;  %1374 = vst [vmem:[#allocation3] sm:$0xf0] %v2956_v8  ;;  %1375 = vst [vmem:[#allocation3 + $0x8] sm:$0xf] %v2957_v9  ;;  %v2902_v19 = vld [vmem:[#allocation10] ss:$0 sm:$0xff] }
 0x165   :  { %3199 = vmatpush3.bf16.msra.mxu1 %v3628_v1  ;;  %1376 = vst [vmem:[#allocation3 + $0x10] sm:$0xf0] %v2958_v11  ;;  %1377 = vst [vmem:[#allocation3 + $0x18] sm:$0xf] %v2959_v13  ;;  %v2903_v21 = vld [vmem:[#allocation11] ss:$0 sm:$0xff] }
 0x166   :  { %3200 = vmatprep.subr.bf16.mxu1 %v3629_v2  ;;  %290 = vst [vmem:[#allocation2 + $0x18] sm:$0xf0] %v4271_v18  ;;  %291 = vst [vmem:[#allocation3] sm:$0xf] %v4271_v18  ;;  %vm564_vm2 = vsmask.f32 4352 }
 0x167   :  { %292 = vst [vmem:[#allocation3 + $0x10] sm:$0xf] %v4271_v18  ;;  %293 = vst [vmem:[#allocation3 + $0x8] sm:$0xf0] %v4271_v18  ;;  %vm736_vm3 = vsmask.f32 3328 }
 0x168   :  { %294 = vst [vmem:[#allocation3 + $0x18] sm:$0xf0] %v4271_v18  ;;  %295 = vst [vmem:[#allocation4] sm:$0xf] %v4271_v18  ;;  %vm4275_vm5 = vmmov 0   ;;  %vm1002_vm6 = vcmask 1041409  }
 0x169   :  { %3201 = vmatpush3.bf16.msra.mxu1 %v3629_v2  ;;  %296 = vst [vmem:[#allocation4 + $0x10] sm:$0xf] %v4271_v18  ;;  %297 = vst [vmem:[#allocation4 + $0x8] sm:$0xf0] %v4271_v18  ;;  %vm1114_vm7 = vcmask 1041408   ;;  %vm1110_vm8 = vcmask 31744  }
 0x16a   :  { %3202 = vmatprep.subr.bf16.mxu1 %v3630_v3  ;;  %298 = vst [vmem:[#allocation4 + $0x18] sm:$0xf0] %v4271_v18  ;;  %s4277_s22 = smov [#allocation34]  }
 0x16b   :  { %s2871_s29 = sshll.u32 %s4277_s22, 4  ;;  %s2872_s29 = int_to_ptr.vmem [resolvable:$true] %s2871_s29 }
 0x16c   :  { %s4205_s0 = scalar_lea.vmem %s2872_s29, 256  ;;  %p4210_p5 = scmp.lt.s32.totalorder %s2872_s29, %s2872_s29 }
 0x16d   :  { %3203 = vmatpush3.bf16.msra.mxu1 %v3630_v3  ;;  %p4206_p4 = scmp.ne.s32.totalorder %s2872_s29, %s4205_s0  ;;  %p4211_p6 = scmp.lt.s32.totalorder %s4205_s0, %s4205_s0 }
 0x16e   :  { %3204 = vmatprep.subr.bf16.mxu1 %v3631_v12 }
 0x16f   :  { %p4212_p7 = por %p4211_p6, %p4210_p5 }
 0x171   :  { %3205 = vmatpush3.bf16.msra.mxu1 %v3631_v12  ;;  %p4213_p8 = pnand %p4212_p7, %p4206_p4 }
 0x172   :  { %3206 = vmatprep.subr.bf16.mxu1 %v3632_v14 }
 0x175   :  { %3207 = vmatpush3.bf16.msra.mxu1 %v3632_v14 }
 0x176   :  { %3208 = vmatprep.subr.bf16.mxu1 %v3633_v15 }
 0x179   :  { %3209 = vmatpush3.bf16.msra.mxu1 %v3633_v15 }
 0x17a   :  { %3210 = vmatprep.subr.bf16.mxu1 %v3634_v16 }
 0x17d   :  { %3211 = vmatpush3.bf16.msra.mxu1 %v3634_v16 }
 0x180   :  { %3213 = vmatmul.mubr.bf16.vlgmr.msra.gmra.mrb[0].mxu1 %v2893_v17 }
 0x253   :  { %v3214_v20 = vpop.f32.mrb[0].mxu1 }
 0x254   :  { %v437_v22 = vmul.f32 %v3214_v20, %v2902_v19  ;;  %v413_v23 = vpop.f32.mrb[1].mxu1 }
 0x255   :  { %v435_v24 = vmul.f32 %v2902_v19, %v413_v23  ;;  %v3215_v25 = vpop.f32.mrb[2].mxu1 }
 0x256   :  { %v448_v26 = vadd.f32 %v2903_v21, %v437_v22  ;;  %v438_v27 = vmul.f32 %v3215_v25, %v2902_v19  ;;  %v416_v28 = vpop.f32.mrb[3].mxu1 }
 0x257   :  { %v446_v29 = vadd.f32 %v2903_v21, %v435_v24  ;;  %v436_v30 = vmul.f32 %v2902_v19, %v416_v28 }
 0x258   :  { %v2906_v31 = vmul.f32 -1.442695, %v448_v26  ;;  %v449_v32 = vadd.f32 %v2903_v21, %v438_v27 }
 0x259   :  { %v2904_v33 = vmul.f32 -1.442695, %v446_v29  ;;  %v447_v34 = vadd.f32 %v2903_v21, %v436_v30 }
 0x25a   :  { %3737 = vpow2.f32 %v2906_v31  ;;  %v2907_v35 = vmul.f32 -1.442695, %v449_v32 }
 0x25b   :  { %3739 = vpow2.f32 %v2904_v33  ;;  %v2905_v36 = vmul.f32 -1.442695, %v447_v34 }
 0x25c   :  { %3741 = vpow2.f32 %v2907_v35 }
 0x25d   :  { %3743 = vpow2.f32 %v2905_v36 }
 0x264   :  { %v3738_v37 = vpop.eup %3737 }
 0x265   :  { %v3740_v38 = vpop.eup %3739  ;;  %v464_v39 = vadd.f32 1.0, %v3738_v37 }
 0x266   :  { %v3742_v40 = vpop.eup %3741  ;;  %v462_v41 = vadd.f32 1.0, %v3740_v38 }
 0x267   :  { %v3744_v42 = vpop.eup %3743  ;;  %3745 = vrcp.f32 %v464_v39  ;;  %v465_v43 = vadd.f32 1.0, %v3742_v40 }
 0x268   :  { %3747 = vrcp.f32 %v462_v41  ;;  %v463_v44 = vadd.f32 1.0, %v3744_v42 }
 0x269   :  { %3749 = vrcp.f32 %v465_v43 }
 0x26a   :  { %3751 = vrcp.f32 %v463_v44 }
 0x271   :  { %v3746_v45 = vpop.eup %3745 }
 0x272   :  { %v3748_v46 = vpop.eup %3747  ;;  %v476_v49 = vmul.f32 %v3746_v45, %v448_v26 }
 0x273   :  { %v3750_v47 = vpop.eup %3749  ;;  %v474_v51 = vmul.f32 %v3748_v46, %v446_v29 }
 0x274   :  { %v3752_v48 = vpop.eup %3751  ;;  %v477_v50 = vmul.f32 %v3750_v47, %v449_v32 }
 0x275   :  { %v475_v52 = vmul.f32 %v3752_v48, %v447_v34 }
 0x276   :  { %v479_v53 = vpack.c.bf16 %v477_v50, %v476_v49 }
 0x277   :  { %v478_v54 = vpack.c.bf16 %v475_v52, %v474_v51 }
 0x278   :  { %v483_v55 = vrot.slane %v479_v53, 4 }
 0x279   :  { %v482_v56 = vrot.slane %v478_v54, 4 }
 0x27a   :  { %488 = vst [vmem:[#allocation2 + $0x18] ss:$-4 sps:$4 sm:$0xff] %v483_v55  }
 0x27b   :  { %486 = vst [vmem:[#allocation2 + $0x8] ss:$-4 sps:$4 sm:$0xff] %v482_v56  }
 0x281   :  { %v492_v57 = vld [vmem:[#allocation2 + $0x10] sm:$0xf8]  ;;  %v493_v58 = vld [vmem:[#allocation2 + $0x18] sm:$0x7] }
 0x282   :  { %v563_v59 = vld [vmem:[#allocation2 + $0x18] sm:$0xf]  ;;  %v502_v60 = vrot.slane %v492_v57, 3  ;;  %v503_v61 = vrot.slane %v493_v58, 3  ;;  %v583_v62 = vshrl.u32 %v492_v57, 16  ;;  %v586_v63 = vshll.u32 %v492_v57, 16 }
 0x283   :  { %v661_v0 = vld [vmem:[#allocation2 + $0x10] sm:$0xf0]  ;;  %v671_v2 = vrot.slane %v563_v59, 4  ;;  %v490_v3 = vld [vmem:[#allocation2] sm:$0xf8]  ;;  %v591_v28 = vshrl.u32 %v563_v59, 16 }
 0x284   :  { %v670_v1 = vrot.slane %v661_v0, 4  ;;  %v491_v4 = vld [vmem:[#allocation2 + $0x8] sm:$0x7]  ;;  %v4637_v5 = vsel %vm498_vm0, %v502_v60, %v503_v61  ;;  %v499_v6 = vrot.slane %v490_v3, 3  ;;  %v4639_v9 = vld [vmem:[#allocation2] sm:$0xf0] }
 0x285   :  { %v500_v7 = vrot.slane %v491_v4, 3  ;;  %v562_v8 = vld [vmem:[#allocation2 + $0x8] sm:$0xf]  ;;  %v509_v10 = vunpack.c.l.bf16 %v4637_v5  ;;  %v510_v11 = vunpack.c.h.bf16 %v4637_v5  ;;  %v667_v13 = vrot.slane %v4639_v9, 4  ;;  %v4675_v34 = vld [vmem:[#allocation2 + $0x18] sm:$0x1f] }
 0x286   :  { %v4644_v12 = vsel %vm666_vm1, %v670_v1, %v671_v2  ;;  %v668_v17 = vrot.slane %v562_v8, 4  ;;  %v585_v22 = vrot.slane %v583_v62, 3  ;;  %v588_v23 = vrot.slane %v586_v63, 4 }
 0x287   :  { %v677_v14 = vunpack.c.l.bf16 %v4644_v12  ;;  %v678_v15 = vunpack.c.h.bf16 %v4644_v12  ;;  %v4650_v16 = vsel %vm498_vm0, %v499_v6, %v500_v7  ;;  %v3532_v18 = vpack.i.bf16 %v510_v11, %v509_v10 }
 0x288   :  { %v507_v19 = vunpack.c.l.bf16 %v4650_v16  ;;  %v508_v20 = vunpack.c.h.bf16 %v4650_v16  ;;  %v4659_v21 = vsel %vm666_vm1, %v667_v13, %v668_v17  ;;  %v594_v29 = vshll.u32 %v563_v59, 16  ;;  %v734_v59 = vld [vmem:[#allocation2 + $0x8] sm:$0x1f]  ;;  %v2918_v16 = vld [vmem:[#allocation13 + $0xa] ss:$0 sm:$0xff] }
 0x289   :  { %3533 = vrot.lane.b32.xlu1 %v3532_v18, %s4272_s17  ;;  %3528 = vrot.lane.b32.xlu0 %v3532_v18, %s4273_s12  ;;  %v4667_v24 = vpack.i.bf16 %v678_v15, %v677_v14  ;;  %v675_v25 = vunpack.c.l.bf16 %v4659_v21  ;;  %v676_v26 = vunpack.c.h.bf16 %v4659_v21  ;;  %v566_v30 = vshrl.u32 %v490_v3, 16 }
 0x28a   :  { %v3542_v27 = vpack.i.bf16 %v508_v20, %v507_v19  ;;  %v569_v31 = vshll.u32 %v490_v3, 16  ;;  %v574_v32 = vshrl.u32 %v562_v8, 16  ;;  %v577_v33 = vshll.u32 %v562_v8, 16 }
 0x28b   :  { %v589_v35 = vor.u32 %v588_v23, %v585_v22  ;;  %v593_v36 = vrot.slane %v591_v28, 3  ;;  %v596_v37 = vrot.slane %v594_v29, 4  ;;  %v568_v38 = vrot.slane %v566_v30, 3  ;;  %v833_v22 = vld [vmem:[#allocation2 + $0x10] sm:$0xe0] }
 0x28c   :  { %v3552_v39 = vpack.i.bf16 %v676_v26, %v675_v25  ;;  %v571_v40 = vrot.slane %v569_v31, 4  ;;  %v576_v41 = vrot.slane %v574_v32, 3  ;;  %v579_v42 = vrot.slane %v577_v33, 4 }
 0x28d   :  { %3538 = vrot.lane.b32.xlu1 %v4667_v24, %s4273_s12  ;;  %3543 = vrot.lane.b32.xlu0 %v3542_v27, %s4273_s12  ;;  %v597_v43 = vor.u32 %v596_v37, %v593_v36  ;;  %v755_v44 = vshrl.u32 %v661_v0, 16  ;;  %v758_v45 = vshll.u32 %v661_v0, 16  ;;  %v763_v46 = vshrl.u32 %v4675_v34, 16 }
 0x28e   :  { %v572_v47 = vor.u32 %v571_v40, %v568_v38  ;;  %v580_v48 = vor.u32 %v579_v42, %v576_v41  ;;  %v766_v49 = vshll.u32 %v4675_v34, 16  ;;  %v738_v50 = vshrl.u32 %v4639_v9, 16 }
 0x28f   :  { %v4688_v51 = vsel %vm564_vm2, %v589_v35, %v597_v43  ;;  %v757_v52 = vrot.slane %v755_v44, 4  ;;  %v760_v53 = vrot.slane %v758_v45, 5  ;;  %v765_v54 = vrot.slane %v763_v46, 4  ;;  %v3641_v45 = vld [vmem:[#allocation17] sm:$0xff]  }
 0x290   :  { %v603_v55 = vunpack.c.l.bf16 %v4688_v51  ;;  %v604_v56 = vunpack.c.h.bf16 %v4688_v51  ;;  %v4695_v57 = vsel %vm564_vm2, %v572_v47, %v580_v48  ;;  %v768_v58 = vrot.slane %v766_v49, 5  ;;  %v3642_v47 = vld [vmem:[#allocation17 + $0x8] sm:$0xff]   ;;  %v3643_v48 = vld [vmem:[#allocation17 + $0x10] sm:$0xff]   ;;  %v3644_v49 = vld [vmem:[#allocation17 + $0x18] sm:$0xff]  }
 0x291   :  { %3548 = vrot.lane.b32.xlu1 %v3542_v27, %s4272_s17  ;;  %3553 = vrot.lane.b32.xlu0 %v3552_v39, %s4273_s12  ;;  %v601_v60 = vunpack.c.l.bf16 %v4695_v57  ;;  %v602_v61 = vunpack.c.h.bf16 %v4695_v57  ;;  %v761_v63 = vor.u32 %v760_v53, %v757_v52  ;;  %v740_v0 = vrot.slane %v738_v50, 4  ;;  %v832_v27 = vld [vmem:[#allocation2] sm:$0xe0]  ;;  %v3645_v50 = vld [vmem:[#allocation17 + $0x20] sm:$0xff]   ;;  %v3646_v52 = vld [vmem:[#allocation17 + $0x28] sm:$0xff]  }
 0x292   :  { %v3557_v62 = vpack.i.bf16 %v604_v56, %v603_v55  ;;  %v741_v1 = vshll.u32 %v4639_v9, 16  ;;  %v769_v3 = vor.u32 %v768_v58, %v765_v54  ;;  %v746_v4 = vshrl.u32 %v734_v59, 16  ;;  %v3647_v53 = vld [vmem:[#allocation17 + $0x30] sm:$0xff]   ;;  %v3648_v54 = vld [vmem:[#allocation17 + $0x38] sm:$0xff]  }
 0x293   :  { %v3567_v2 = vpack.i.bf16 %v602_v61, %v601_v60  ;;  %v749_v6 = vshll.u32 %v734_v59, 16  ;;  %v842_v32 = vrot.slane %v833_v22, 5  ;;  %v843_v33 = vrot.slane %v4675_v34, 5 }
 0x294   :  { %v743_v7 = vrot.slane %v741_v1, 5  ;;  %v748_v8 = vrot.slane %v746_v4, 4  ;;  %v4711_v18 = vsel %vm736_vm3, %v761_v63, %v769_v3  ;;  %v839_v35 = vrot.slane %v832_v27, 5  ;;  %v2912_v1 = vld [vmem:[#allocation13 + $0x4] ss:$0 sm:$0xff] }
 0x295   :  { %3558 = vrot.lane.b32.xlu1 %v3557_v62, %s4273_s12  ;;  %3568 = vrot.lane.b32.xlu0 %v3567_v2, %s4273_s12  ;;  %v751_v13 = vrot.slane %v749_v6, 5  ;;  %v775_v28 = vunpack.c.l.bf16 %v4711_v18  ;;  %v776_v29 = vunpack.c.h.bf16 %v4711_v18  ;;  %v840_v36 = vrot.slane %v734_v59, 5  ;;  %v2909_v59 = vld [vmem:[#allocation13 + $0x1] ss:$0 sm:$0xff]  ;;  %v2915_v6 = vld [vmem:[#allocation13 + $0x7] ss:$0 sm:$0xff] }
 0x296   :  { %v744_v17 = vor.u32 %v743_v7, %v740_v0  ;;  %v4735_v34 = vsel %vm838_vm4, %v842_v32, %v843_v33  ;;  %v4274_v46 = vmov 0.0   ;;  %v536_v3 = vmul.f32 %v2909_v59, %v510_v11 }
 0x297   :  { %v752_v9 = vor.u32 %v751_v13, %v748_v8  ;;  %v3587_v37 = vpack.i.bf16 %v776_v29, %v775_v28  ;;  %v850_v40 = vunpack.c.h.bf16 %v4735_v34  ;;  %3216 = vmatprep.subr.bf16.mxu1 %v4274_v46  ;;  %3232 = vmatprep.mubr.msk.bf16.mxu1 %vm4275_vm5, %v4274_v46  ;;  %v535_v4 = vmul.f32 %v2909_v59, %v509_v10 }
 0x298   :  { %3217 = vmatpush3.bf16.msra.mxu1 %v3641_v45  ;;  %v534_v8 = vmul.f32 %v2909_v59, %v508_v20  ;;  %v4785_v22 = vmul.f32 %v2912_v1, %v604_v56  ;;  %v4789_v10 = vmul.f32 %v2912_v1, %v601_v60  ;;  %v4793_v20 = vmul.f32 %v2912_v1, %v602_v61  ;;  %v2910_v61 = vld [vmem:[#allocation13 + $0x2] ss:$0 sm:$0xff] }
 0x299   :  { %3563 = vrot.lane.b32.xlu1 %v3557_v62, %s4272_s17  ;;  %3573 = vrot.lane.b32.xlu0 %v3567_v2, %s4272_s17  ;;  %v4716_v23 = vsel %vm736_vm3, %v744_v17, %v752_v9  ;;  %v2908_v2 = vld [vmem:[#allocation13] ss:$0 sm:$0xff]  ;;  %v533_v17 = vmul.f32 %v2909_v59, %v507_v19  ;;  %v4781_v9 = vmul.f32 %v2912_v1, %v603_v55 }
 0x29a   :  { %v773_v30 = vunpack.c.l.bf16 %v4716_v23  ;;  %v774_v31 = vunpack.c.h.bf16 %v4716_v23  ;;  %3218 = vmatprep.subr.bf16.mxu1 %v4274_v46  ;;  %v4797_v55 = vmul.f32 %v2915_v6, %v677_v14  ;;  %v4801_v51 = vmul.f32 %v2915_v6, %v678_v15 }
 0x29b   :  { %v4805_v60 = vmul.f32 %v2915_v6, %v675_v25  ;;  %v4809_v57 = vmul.f32 %v2915_v6, %v676_v26  ;;  %v4813_v12 = vmul.f32 %v2918_v16, %v775_v28  ;;  %v4817_v15 = vmul.f32 %v2918_v16, %v776_v29 }
 0x29c   :  { %v3597_v38 = vpack.i.bf16 %v774_v31, %v773_v30  ;;  %3219 = vmatpush3.bf16.msra.mxu1 %v3642_v47  ;;  %v4821_v45 = vmul.f32 %v2918_v16, %v773_v30  ;;  %v4825_v47 = vmul.f32 %v2918_v16, %v774_v31 }
 0x29d   :  { %3583 = vrot.lane.b32.xlu1 %v4667_v24, %s4272_s17  ;;  %3578 = vrot.lane.b32.xlu0 %v3552_v39, %s4272_s17  ;;  %v4739_v24 = vsel %vm838_vm4, %v839_v35, %v840_v36  ;;  %v849_v39 = vunpack.c.l.bf16 %v4735_v34 }
 0x29e   :  { %v847_v41 = vunpack.c.l.bf16 %v4739_v24  ;;  %v848_v42 = vunpack.c.h.bf16 %v4739_v24  ;;  %3220 = vmatprep.subr.bf16.mxu1 %v4274_v46 }
 0x29f   :  { %v3612_v43 = vpack.i.bf16 %v850_v40, %v849_v39 }
 0x2a0   :  { %v3607_v44 = vpack.i.bf16 %v848_v42, %v847_v41  ;;  %3221 = vmatpush3.bf16.msra.mxu1 %v3643_v48 }
 0x2a1   :  { %3588 = vrot.lane.b32.xlu1 %v3587_v37, %s4273_s12  ;;  %3598 = vrot.lane.b32.xlu0 %v3597_v38, %s4273_s12 }
 0x2a2   :  { %3222 = vmatprep.subr.bf16.mxu1 %v4274_v46 }
 0x2a4   :  { %3223 = vmatpush3.bf16.msra.mxu1 %v3644_v49 }
 0x2a5   :  { %3593 = vrot.lane.b32.xlu1 %v3587_v37, %s4272_s17  ;;  %3603 = vrot.lane.b32.xlu0 %v3597_v38, %s4272_s17  ;;  %v2914_v38 = vld [vmem:[#allocation13 + $0x6] ss:$0 sm:$0xff] }
 0x2a6   :  { %3224 = vmatprep.subr.bf16.mxu1 %v4274_v46 }
 0x2a8   :  { %3225 = vmatpush3.bf16.msra.mxu1 %v3645_v50 }
 0x2a9   :  { %3613 = vrot.lane.b32.xlu1 %v3612_v43, %s4273_s12  ;;  %3608 = vrot.lane.b32.xlu0 %v3607_v44, %s4273_s12 }
 0x2aa   :  { %3226 = vmatprep.subr.bf16.mxu1 %v4274_v46 }
 0x2ac   :  { %3227 = vmatpush3.bf16.msra.mxu1 %v3646_v52 }
 0x2ad   :  { %3623 = vrot.lane.b32.xlu1 %v3612_v43, %s4272_s17  ;;  %3618 = vrot.lane.b32.xlu0 %v3607_v44, %s4272_s17 }
 0x2ae   :  { %3228 = vmatprep.subr.bf16.mxu1 %v4274_v46 }
 0x2b0   :  { %3229 = vmatpush3.bf16.msra.mxu1 %v3647_v53 }
 0x2b1   :  { %3230 = vmatprep.subr.bf16.mxu1 %v4274_v46 }
 0x2b4   :  { %3231 = vmatpush3.bf16.msra.mxu1 %v3648_v54  ;;  %v2911_v54 = vld [vmem:[#allocation13 + $0x3] ss:$0 sm:$0xff] }
 0x2b5   :  { %3236 = vmatprep.subr.bf16.mxu1 %v4274_v46 }
 0x2fb   :  { %v3534_v58 = vpop.permute.xlu1 %3533  ;;  %v3529_v62 = vpop.permute.xlu0 %3528 }
 0x2fc   :  { %v3531_v63 = vunpack.i.h.bf16 %v3529_v62  ;;  %v3530_v0 = vunpack.i.l.bf16 %v3529_v62  ;;  %v3536_v56 = vunpack.i.h.bf16 %v3534_v58  ;;  %v3535_v32 = vunpack.i.l.bf16 %v3534_v58 }
 0x2fe   :  { %v527_v11 = vmul.f32 %v3531_v63, %v2908_v2  ;;  %v526_v5 = vmul.f32 %v3530_v0, %v2908_v2  ;;  %v557_v28 = vmul.f32 %v3536_v56, %v2910_v61  ;;  %v556_v48 = vmul.f32 %v3535_v32, %v2910_v61 }
 0x2ff   :  { %v3539_v7 = vpop.permute.xlu1 %3538  ;;  %v3544_v13 = vpop.permute.xlu0 %3543 }
 0x300   :  { %v3546_v19 = vunpack.i.h.bf16 %v3544_v13  ;;  %v3545_v27 = vunpack.i.l.bf16 %v3544_v13  ;;  %v3541_v33 = vunpack.i.h.bf16 %v3539_v7  ;;  %v3540_v35 = vunpack.i.l.bf16 %v3539_v7 }
 0x301   :  { %v540_v37 = vadd.f32 %v536_v3, %v527_v11  ;;  %v539_v25 = vadd.f32 %v535_v4, %v526_v5 }
 0x302   :  { %v525_v26 = vmul.f32 %v3546_v19, %v2908_v2  ;;  %v524_v44 = vmul.f32 %v3545_v27, %v2908_v2  ;;  %v695_v49 = vmul.f32 %v3541_v33, %v2914_v38  ;;  %v694_v50 = vmul.f32 %v3540_v35, %v2914_v38  ;;  %v2913_v19 = vld [vmem:[#allocation13 + $0x5] ss:$0 sm:$0xff] }
 0x303   :  { %v3549_v36 = vpop.permute.xlu1 %3548  ;;  %v3554_v14 = vpop.permute.xlu0 %3553  ;;  %v560_v59 = vadd.f32 %v556_v48, %v539_v25  ;;  %v561_v62 = vadd.f32 %v557_v28, %v540_v37  ;;  %v2916_v48 = vld [vmem:[#allocation13 + $0x8] ss:$0 sm:$0xff] }
 0x304   :  { %v3551_v43 = vunpack.i.h.bf16 %v3549_v36  ;;  %v3550_v21 = vunpack.i.l.bf16 %v3549_v36  ;;  %v3556_v18 = vunpack.i.h.bf16 %v3554_v14  ;;  %v3555_v29 = vunpack.i.l.bf16 %v3554_v14 }
 0x305   :  { %v538_v1 = vadd.f32 %v534_v8, %v525_v26  ;;  %v537_v2 = vadd.f32 %v533_v17, %v524_v44 }
 0x306   :  { %v555_v52 = vmul.f32 %v3551_v43, %v2910_v61  ;;  %v554_v53 = vmul.f32 %v3550_v21, %v2910_v61  ;;  %v693_v3 = vmul.f32 %v3556_v18, %v2914_v38  ;;  %v692_v4 = vmul.f32 %v3555_v29, %v2914_v38 }
 0x307   :  { %v3559_v58 = vpop.permute.xlu1 %3558  ;;  %v3569_v30 = vpop.permute.xlu0 %3568 }
 0x308   :  { %v3561_v63 = vunpack.i.h.bf16 %v3559_v58  ;;  %v3560_v0 = vunpack.i.l.bf16 %v3559_v58  ;;  %v3571_v23 = vunpack.i.h.bf16 %v3569_v30  ;;  %v3570_v31 = vunpack.i.l.bf16 %v3569_v30 }
 0x309   :  { %v558_v13 = vadd.f32 %v554_v53, %v537_v2  ;;  %v559_v11 = vadd.f32 %v555_v52, %v538_v1 }
 0x30a   :  { %v621_v6 = vmul.f32 %v3561_v63, %v2911_v54  ;;  %v620_v7 = vmul.f32 %v3560_v0, %v2911_v54  ;;  %v619_v5 = vmul.f32 %v3571_v23, %v2911_v54  ;;  %v618_v16 = vmul.f32 %v3570_v31, %v2911_v54  ;;  %v2917_v31 = vld [vmem:[#allocation13 + $0x9] ss:$0 sm:$0xff] }
 0x30b   :  { %v3564_v27 = vpop.permute.xlu1 %3563  ;;  %v3574_v35 = vpop.permute.xlu0 %3573 }
 0x30c   :  { %v625_v56 = vadd.f32 %v621_v6, %v561_v62  ;;  %v624_v32 = vadd.f32 %v620_v7, %v560_v59  ;;  %v3566_v61 = vunpack.i.h.bf16 %v3564_v27  ;;  %v3565_v33 = vunpack.i.l.bf16 %v3564_v27 }
 0x30d   :  { %v622_v36 = vadd.f32 %v618_v16, %v558_v13  ;;  %v623_v8 = vadd.f32 %v619_v5, %v559_v11  ;;  %v3576_v17 = vunpack.i.h.bf16 %v3574_v35  ;;  %v3575_v14 = vunpack.i.l.bf16 %v3574_v35 }
 0x30e   :  { %v655_v37 = vmul.f32 %v3566_v61, %v2913_v19  ;;  %v637_v25 = vadd.f32 %v4781_v9, %v624_v32  ;;  %v638_v38 = vadd.f32 %v4785_v22, %v625_v56  ;;  %v654_v43 = vmul.f32 %v3565_v33, %v2913_v19 }
 0x30f   :  { %v653_v21 = vmul.f32 %v3576_v17, %v2913_v19  ;;  %v635_v26 = vadd.f32 %v4789_v10, %v622_v36  ;;  %v636_v44 = vadd.f32 %v4793_v20, %v623_v8  ;;  %v652_v28 = vmul.f32 %v3575_v14, %v2913_v19  ;;  %v3584_v18 = vpop.permute.xlu1 %3583  ;;  %v3579_v58 = vpop.permute.xlu0 %3578 }
 0x310   :  { %v658_v29 = vadd.f32 %v654_v43, %v637_v25  ;;  %v659_v52 = vadd.f32 %v655_v37, %v638_v38  ;;  %v3586_v53 = vunpack.i.h.bf16 %v3584_v18  ;;  %v3585_v54 = vunpack.i.l.bf16 %v3584_v18 }
 0x311   :  { %v656_v59 = vadd.f32 %v652_v28, %v635_v26  ;;  %v657_v62 = vadd.f32 %v653_v21, %v636_v44  ;;  %v3581_v63 = vunpack.i.h.bf16 %v3579_v58  ;;  %v3580_v9 = vunpack.i.l.bf16 %v3579_v58  ;;  %v2921_v21 = vld [vmem:[#allocation13 + $0xd] ss:$0 sm:$0xff] }
 0x312   :  { %v698_v0 = vadd.f32 %v694_v50, %v658_v29  ;;  %v699_v22 = vadd.f32 %v695_v49, %v659_v52  ;;  %v729_v30 = vmul.f32 %v3586_v53, %v2916_v48  ;;  %v728_v1 = vmul.f32 %v3585_v54, %v2916_v48  ;;  %v2920_v54 = vld [vmem:[#allocation13 + $0xc] ss:$0 sm:$0xff] }
 0x313   :  { %v696_v2 = vadd.f32 %v692_v4, %v656_v59  ;;  %v697_v10 = vadd.f32 %v693_v3, %v657_v62  ;;  %v727_v23 = vmul.f32 %v3581_v63, %v2916_v48  ;;  %v726_v20 = vmul.f32 %v3580_v9, %v2916_v48  ;;  %v3589_v6 = vpop.permute.xlu1 %3588  ;;  %v3599_v16 = vpop.permute.xlu0 %3598 }
 0x314   :  { %v711_v7 = vadd.f32 %v4797_v55, %v698_v0  ;;  %v712_v13 = vadd.f32 %v4801_v51, %v699_v22  ;;  %v3591_v11 = vunpack.i.h.bf16 %v3589_v6  ;;  %v3590_v5 = vunpack.i.l.bf16 %v3589_v6  ;;  %v2919_v55 = vld [vmem:[#allocation13 + $0xb] ss:$0 sm:$0xff] }
 0x315   :  { %v709_v19 = vadd.f32 %v4805_v60, %v696_v2  ;;  %v710_v50 = vadd.f32 %v4809_v57, %v697_v10  ;;  %v3601_v49 = vunpack.i.h.bf16 %v3599_v16  ;;  %v3600_v27 = vunpack.i.l.bf16 %v3599_v16 }
 0x316   :  { %v732_v56 = vadd.f32 %v728_v1, %v711_v7  ;;  %v733_v4 = vadd.f32 %v729_v30, %v712_v13  ;;  %v793_v3 = vmul.f32 %v3591_v11, %v2917_v31  ;;  %v792_v32 = vmul.f32 %v3590_v5, %v2917_v31 }
 0x317   :  { %v730_v61 = vadd.f32 %v726_v20, %v709_v19  ;;  %v731_v33 = vadd.f32 %v727_v23, %v710_v50  ;;  %v791_v35 = vmul.f32 %v3601_v49, %v2917_v31  ;;  %v790_v36 = vmul.f32 %v3600_v27, %v2917_v31  ;;  %v3594_v8 = vpop.permute.xlu1 %3593  ;;  %v3604_v25 = vpop.permute.xlu0 %3603  ;;  %v2923_v27 = vld [vmem:[#allocation14] ss:$0 sm:$0xff] }
 0x318   :  { %v796_v51 = vadd.f32 %v792_v32, %v732_v56  ;;  %v797_v17 = vadd.f32 %v793_v3, %v733_v4  ;;  %v3596_v14 = vunpack.i.h.bf16 %v3594_v8  ;;  %v3595_v37 = vunpack.i.l.bf16 %v3594_v8 }
 0x319   :  { %v794_v60 = vadd.f32 %v790_v36, %v730_v61  ;;  %v795_v38 = vadd.f32 %v791_v35, %v731_v33  ;;  %v3606_v57 = vunpack.i.h.bf16 %v3604_v25  ;;  %v3605_v43 = vunpack.i.l.bf16 %v3604_v25  ;;  %v2924_v35 = vld [vmem:[#allocation16] ss:$0 sm:$0xff] }
 0x31a   :  { %v827_v26 = vmul.f32 %v3596_v14, %v2919_v55  ;;  %v809_v44 = vadd.f32 %v4813_v12, %v796_v51  ;;  %v810_v28 = vadd.f32 %v4817_v15, %v797_v17  ;;  %v826_v48 = vmul.f32 %v3595_v37, %v2919_v55 }
 0x31b   :  { %v825_v18 = vmul.f32 %v3606_v57, %v2919_v55  ;;  %v807_v29 = vadd.f32 %v4821_v45, %v794_v60  ;;  %v808_v52 = vadd.f32 %v4825_v47, %v795_v38  ;;  %v824_v53 = vmul.f32 %v3605_v43, %v2919_v55  ;;  %v3614_v58 = vpop.permute.xlu1 %3613  ;;  %v3609_v63 = vpop.permute.xlu0 %3608 }
 0x31c   :  { %v3616_v59 = vunpack.i.h.bf16 %v3614_v58  ;;  %v3615_v62 = vunpack.i.l.bf16 %v3614_v58  ;;  %v879_v9 = vmul.f32 %v2921_v21, %v849_v39  ;;  %v880_v12 = vmul.f32 %v2921_v21, %v850_v40  ;;  %v2922_v39 = vld [vmem:[#allocation13 + $0xe] ss:$0 sm:$0xff] }
 0x31d   :  { %v3611_v0 = vunpack.i.h.bf16 %v3609_v63  ;;  %v3610_v15 = vunpack.i.l.bf16 %v3609_v63  ;;  %v877_v22 = vmul.f32 %v2921_v21, %v847_v41  ;;  %v878_v45 = vmul.f32 %v2921_v21, %v848_v42 }
 0x31e   :  { %v830_v47 = vadd.f32 %v826_v48, %v809_v44  ;;  %v831_v30 = vadd.f32 %v827_v26, %v810_v28  ;;  %v867_v1 = vmul.f32 %v3616_v59, %v2920_v54  ;;  %v866_v2 = vmul.f32 %v3615_v62, %v2920_v54 }
 0x31f   :  { %v828_v10 = vadd.f32 %v824_v53, %v807_v29  ;;  %v829_v23 = vadd.f32 %v825_v18, %v808_v52  ;;  %v865_v20 = vmul.f32 %v3611_v0, %v2920_v54  ;;  %v864_v31 = vmul.f32 %v3610_v15, %v2920_v54  ;;  %v3624_v6 = vpop.permute.xlu1 %3623  ;;  %v3619_v11 = vpop.permute.xlu0 %3618 }
 0x320   :  { %v870_v34 = vadd.f32 %v866_v2, %v830_v47  ;;  %v871_v40 = vadd.f32 %v867_v1, %v831_v30  ;;  %v3626_v7 = vunpack.i.h.bf16 %v3624_v6  ;;  %v3625_v13 = vunpack.i.l.bf16 %v3624_v6 }
 0x321   :  { %v868_v5 = vadd.f32 %v864_v31, %v828_v10  ;;  %v869_v41 = vadd.f32 %v865_v20, %v829_v23  ;;  %v3621_v16 = vunpack.i.h.bf16 %v3619_v11  ;;  %v3620_v24 = vunpack.i.l.bf16 %v3619_v11 }
 0x322   :  { %v901_v42 = vmul.f32 %v3626_v7, %v2922_v39  ;;  %v883_v19 = vadd.f32 %v879_v9, %v870_v34  ;;  %v884_v50 = vadd.f32 %v880_v12, %v871_v40  ;;  %v900_v49 = vmul.f32 %v3625_v13, %v2922_v39 }
 0x323   :  { %v899_v56 = vmul.f32 %v3621_v16, %v2922_v39  ;;  %v881_v4 = vadd.f32 %v877_v22, %v868_v5  ;;  %v882_v3 = vadd.f32 %v878_v45, %v869_v41  ;;  %v898_v32 = vmul.f32 %v3620_v24, %v2922_v39 }
 0x324   :  { %v904_v61 = vadd.f32 %v900_v49, %v883_v19  ;;  %v905_v33 = vadd.f32 %v901_v42, %v884_v50  ;;  %v1102_v19 = vld [vmem:[#allocation20] sm:$0x3]  ;;  %v2929_v49 = vld [vmem:[#allocation19] ss:$0 sm:$0xff] }
 0x325   :  { %v902_v36 = vadd.f32 %v898_v32, %v881_v4  ;;  %v903_v55 = vadd.f32 %v899_v56, %v882_v3  ;;  %v1116_v50 = vsel %vm1114_vm7, %v1102_v19, 0 }
 0x326   :  { %v915_v8 = vmul.f32 %v2923_v27, %v904_v61  ;;  %v916_v51 = vmul.f32 %v2923_v27, %v905_v33 }
 0x327   :  { %v913_v17 = vmul.f32 %v2923_v27, %v902_v36  ;;  %v914_v14 = vmul.f32 %v2923_v27, %v903_v55 }
 0x328   :  { %v926_v37 = vadd.f32 %v2924_v35, %v915_v8  ;;  %v927_v25 = vadd.f32 %v2924_v35, %v916_v51  ;;  %v3650_v51 = vld [vmem:[#allocation23 + $0x8] sm:$0xff]  }
 0x329   :  { %v924_v60 = vadd.f32 %v2924_v35, %v913_v17  ;;  %v925_v38 = vadd.f32 %v2924_v35, %v914_v14  ;;  %v3651_v17 = vld [vmem:[#allocation23 + $0x10] sm:$0xff]   ;;  %v3652_v14 = vld [vmem:[#allocation23 + $0x18] sm:$0xff]  }
 0x32a   :  { %v2927_v57 = vmul.f32 -1.442695, %v926_v37  ;;  %v2928_v43 = vmul.f32 -1.442695, %v927_v25 }
 0x32b   :  { %v2925_v21 = vmul.f32 -1.442695, %v924_v60  ;;  %v2926_v26 = vmul.f32 -1.442695, %v925_v38 }
 0x32c   :  { %3753 = vpow2.f32 %v2927_v57  ;;  %v3658_v57 = vld [vmem:[#allocation28 + $0xc8] sm:$0xff]  }
 0x32d   :  { %3755 = vpow2.f32 %v2928_v43  ;;  %v3656_v43 = vld [vmem:[#allocation23 + $0x38] sm:$0xff]  }
 0x32e   :  { %3757 = vpow2.f32 %v2925_v21  ;;  %v4861_v21 = vld [vmem:[#allocation3] sm:$0xf0] }
 0x32f   :  { %3759 = vpow2.f32 %v2926_v26  ;;  %v4863_v26 = vld [vmem:[#allocation3 + $0x8] sm:$0x1f] }
 0x336   :  { %v3754_v44 = vpop.eup %3753 }
 0x337   :  { %v3756_v28 = vpop.eup %3755  ;;  %v942_v48 = vadd.f32 1.0, %v3754_v44  ;;  %v1806_v44 = vshrl.u32 %v4861_v21, 16 }
 0x338   :  { %v3758_v18 = vpop.eup %3757  ;;  %v943_v29 = vadd.f32 1.0, %v3756_v28  ;;  %v1809_v28 = vshll.u32 %v4861_v21, 16 }
 0x339   :  { %v3760_v52 = vpop.eup %3759  ;;  %3761 = vrcp.f32 %v942_v48  ;;  %v940_v53 = vadd.f32 1.0, %v3758_v18  ;;  %v3659_v48 = vld [vmem:[#allocation28 + $0xd0] sm:$0xff]   ;;  %v1814_v18 = vshrl.u32 %v4863_v26, 16 }
 0x33a   :  { %3763 = vrcp.f32 %v943_v29  ;;  %v941_v54 = vadd.f32 1.0, %v3760_v52  ;;  %v1817_v29 = vshll.u32 %v4863_v26, 16  ;;  %v1808_v52 = vrot.slane %v1806_v44, 4 }
 0x33b   :  { %3765 = vrcp.f32 %v940_v53  ;;  %v1811_v53 = vrot.slane %v1809_v28, 5 }
 0x33c   :  { %3767 = vrcp.f32 %v941_v54  ;;  %v1816_v54 = vrot.slane %v1814_v18, 4 }
 0x343   :  { %v3762_v58 = vpop.eup %3761 }
 0x344   :  { %v3764_v59 = vpop.eup %3763  ;;  %v4847_v62 = vmul.f32 %v3762_v58, %v926_v37  ;;  %v3653_v37 = vld [vmem:[#allocation23 + $0x20] sm:$0xff]   ;;  %v1819_v58 = vrot.slane %v1817_v29, 5 }
 0x345   :  { %v3766_v63 = vpop.eup %3765  ;;  %v4849_v9 = vmul.f32 %v3764_v59, %v927_v25  ;;  %v3654_v25 = vld [vmem:[#allocation23 + $0x28] sm:$0xff]   ;;  %v1812_v59 = vor.u32 %v1811_v53, %v1808_v52  ;;  %v3668_v29 = vld [vmem:[#allocation28 + $0x118] sm:$0xff]  }
 0x346   :  { %v3768_v12 = vpop.eup %3767  ;;  %v4851_v0 = vmul.f32 %v3766_v63, %v924_v60  ;;  %v3655_v60 = vld [vmem:[#allocation23 + $0x30] sm:$0xff]   ;;  %v3660_v63 = vld [vmem:[#allocation28 + $0xd8] sm:$0xff]   ;;  %v3669_v52 = vld [vmem:[#allocation28 + $0x120] sm:$0xff]  }
 0x347   :  { %v963_v15 = vadd.f32 %v4849_v9, %v4847_v62  ;;  %v4855_v22 = vmul.f32 %v3768_v12, %v925_v38  ;;  %v3657_v38 = vld [vmem:[#allocation28 + $0xc0] sm:$0xff]   ;;  %v1820_v12 = vor.u32 %v1819_v58, %v1816_v54  ;;  %v3670_v53 = vld [vmem:[#allocation28 + $0x128] sm:$0xff]  }
 0x348   :  { %3322 = vmatprep.subr.bf16.mxu0 %v3657_v38  ;;  %v3673_v54 = vld [vmem:[#allocation28 + $0x40] sm:$0xff]  }
 0x349   :  { %v964_v45 = vrot.slane %v963_v15, 4  ;;  %v956_v47 = vadd.f32 %v4855_v22, %v4851_v0  ;;  %3323 = vmatpush3.bf16.msra.mxu0 %v3657_v38  ;;  %v3674_v58 = vld [vmem:[#allocation29 + $0x40] sm:$0xff]  }
 0x34a   :  { %3324 = vmatprep.subr.bf16.mxu0 %v3658_v57 }
 0x34b   :  { %v965_v30 = vadd.f32 %v964_v45, %v963_v15  ;;  %v957_v1 = vrot.slane %v956_v47, 4  ;;  %v1821_v15 = vsel %vm736_vm3, %v1812_v59, %v1820_v12  ;;  %v3661_v45 = vld [vmem:[#allocation28 + $0xe0] sm:$0xff]  }
 0x34c   :  { %3338 = vmatprep.mubr.bf16.mxu0 %v1821_v15  ;;  %v1960_v12 = vld [vmem:[#allocation3 + $0x10] sm:$0xe0]  ;;  %v3675_v15 = vld [vmem:[#allocation28 + $0x48] sm:$0xff]  }
 0x34d   :  { %v966_v2 = vrot.slane %v965_v30, 2  ;;  %v958_v10 = vadd.f32 %v957_v1, %v956_v47  ;;  %3325 = vmatpush3.bf16.msra.mxu0 %v3658_v57  ;;  %v3662_v47 = vld [vmem:[#allocation28 + $0xe8] sm:$0xff]  }
 0x34e   :  { %3326 = vmatprep.subr.bf16.mxu0 %v3659_v48  ;;  %v4872_v1 = vld [vmem:[#allocation3 + $0x18] sm:$0x1f] }
 0x34f   :  { %v959_v23 = vrot.slane %v958_v10, 2  ;;  %v967_v20 = vadd.f32 %v966_v2, %v965_v30  ;;  %v4870_v30 = vld [vmem:[#allocation3 + $0x10] sm:$0xf0]  ;;  %v1969_v59 = vrot.slane %v4872_v1, 5 }
 0x350   :  { %v1823_v2 = vshrl.u32 %v4870_v30, 16 }
 0x351   :  { %v960_v31 = vadd.f32 %v959_v23, %v958_v10  ;;  %v968_v39 = vrot.slane %v967_v20, 1  ;;  %3327 = vmatpush3.bf16.msra.mxu0 %v3659_v48  ;;  %v1826_v10 = vshll.u32 %v4870_v30, 16  ;;  %v1831_v23 = vshrl.u32 %v4872_v1, 16 }
 0x352   :  { %3328 = vmatprep.subr.bf16.mxu0 %v3660_v63 }
 0x353   :  { %v961_v6 = vrot.slane %v960_v31, 1  ;;  %v969_v34 = vadd.f32 %v968_v39, %v967_v20  ;;  %v1834_v20 = vshll.u32 %v4872_v1, 16  ;;  %v1825_v39 = vrot.slane %v1823_v2, 4  ;;  %v3676_v2 = vld [vmem:[#allocation29 + $0x48] sm:$0xff]   ;;  %v4887_v1 = vld [vmem:[#allocation3] sm:$0xf8] }
 0x355   :  { %v962_v40 = vadd.f32 %v961_v6, %v960_v31  ;;  %v972_v7 = vmul.f32 0.0625, %v969_v34  ;;  %3329 = vmatpush3.bf16.msra.mxu0 %v3660_v63  ;;  %v3663_v31 = vld [vmem:[#allocation28 + $0xf0] sm:$0xff]   ;;  %v1828_v6 = vrot.slane %v1826_v10, 5  ;;  %v1833_v34 = vrot.slane %v1831_v23, 4 }
 0x356   :  { %3330 = vmatprep.subr.bf16.mxu0 %v3661_v45  ;;  %v4889_v23 = vld [vmem:[#allocation3 + $0x8] sm:$0xf] }
 0x357   :  { %v971_v13 = vmul.f32 0.0625, %v962_v40  ;;  %v974_v11 = vpack.c.bf16 %v972_v7, %v972_v7  ;;  %v1836_v40 = vrot.slane %v1834_v20, 5  ;;  %v3664_v7 = vld [vmem:[#allocation28 + $0xf8] sm:$0xff]   ;;  %v3678_v20 = vld [vmem:[#allocation29 + $0x50] sm:$0xff]  }
 0x359   :  { %v973_v5 = vpack.c.bf16 %v971_v13, %v971_v13  ;;  %v1001_v41 = vunpack.c.l.b16 %v974_v11  ;;  %3331 = vmatpush3.bf16.msra.mxu0 %v3661_v45  ;;  %v1829_v13 = vor.u32 %v1828_v6, %v1825_v39  ;;  %v1837_v11 = vor.u32 %v1836_v40, %v1833_v34  ;;  %v3679_v40 = vld [vmem:[#allocation28 + $0x58] sm:$0xff]  }
 0x35a   :  { %3332 = vmatprep.subr.bf16.mxu0 %v3662_v47  ;;  %v1968_v45 = vrot.slane %v1960_v12, 5  ;;  %v1428_v39 = vshll.u32 %v4887_v1, 16  ;;  %v1433_v6 = vshrl.u32 %v4889_v23, 16  ;;  %v1436_v34 = vshll.u32 %v4889_v23, 16  ;;  %v3707_v12 = vld [vmem:[#allocation28 + $0x88] sm:$0xff]  }
 0x35b   :  { %v1000_v16 = vunpack.c.l.b16 %v973_v5  ;;  %v3665_v5 = vld [vmem:[#allocation28 + $0x100] sm:$0xff]  }
 0x35c   :  { %v1970_v10 = vsel %vm838_vm4, %v1968_v45, %v1969_v59  ;;  %v3705_v59 = vld [vmem:[#allocation28 + $0x80] sm:$0xff]   ;;  %v3711_v45 = vld [vmem:[#allocation28 + $0x98] sm:$0xff]  }
 0x35d   :  { %v1003_v24 = vsel %vm1002_vm6, %v1001_v41, %v1000_v16  ;;  %3333 = vmatpush3.bf16.msra.mxu0 %v3662_v47  ;;  %v1838_v41 = vsel %vm736_vm3, %v1829_v13, %v1837_v11  ;;  %v3666_v16 = vld [vmem:[#allocation28 + $0x108] sm:$0xff]   ;;  %v1430_v13 = vrot.slane %v1428_v39, 4  ;;  %v1435_v11 = vrot.slane %v1433_v6, 3  ;;  %v2951_v6 = vld [vmem:[#allocation26] ss:$0 sm:$0xff] }
 0x35e   :  { %v1004_v42 = vpack.c.b16 %v1003_v24, %v1003_v24  ;;  %3334 = vmatprep.subr.bf16.mxu0 %v3663_v31  ;;  %v3667_v24 = vld [vmem:[#allocation28 + $0x110] sm:$0xff]  }
 0x360   :  { %3233 = vmatmul.mubr.bf16.vlgmr.msra.gmra.mrb[4].mxu1 %v1004_v42  ;;  %v2939_v42 = vld [vmem:[#allocation22] ss:$0 sm:$0xff] }
 0x361   :  { %3238 = vmatprep.mubr.msk.bf16.mxu1 %vm4275_vm5, %v4274_v46  ;;  %3237 = vmatpush3.bf16.msra.mxu1 %v1116_v50  ;;  %v3649_v46 = vld [vmem:[#allocation23] sm:$0xff]  }
 0x362   :  { %3242 = vmatprep.subr.bf16.mxu1 %v3649_v46  ;;  %3335 = vmatpush3.bf16.msra.mxu0 %v3663_v31  ;;  %v1425_v31 = vshrl.u32 %v4887_v1, 16 }
 0x363   :  { %3336 = vmatprep.subr.bf16.mxu0 %v3664_v7 }
 0x366   :  { %3337 = vmatpush3.bf16.msra.mxu0 %v3664_v7  ;;  %v1427_v7 = vrot.slane %v1425_v31, 3  ;;  %v2950_v31 = vld [vmem:[#allocation25] ss:$0 sm:$0xff] }
 0x367   :  { %3342 = vmatprep.subr.bf16.mxu0 %v3665_v5 }
 0x369   :  { %3339 = vmatmul.mubr.bf16.vlgmr.msra.gmra.mrb[0].mxu0 %v1838_v41  ;;  %v3680_v41 = vld [vmem:[#allocation29 + $0x58] sm:$0xff]  }
 0x36a   :  { %3343 = vmatpush3.bf16.msra.mxu0 %v3665_v5  ;;  %v1438_v5 = vrot.slane %v1436_v34, 4 }
 0x36b   :  { %3344 = vmatprep.subr.bf16.mxu0 %v3666_v16 }
 0x36e   :  { %3345 = vmatpush3.bf16.msra.mxu0 %v3666_v16  ;;  %v1431_v16 = vor.u32 %v1430_v13, %v1427_v7 }
 0x36f   :  { %3346 = vmatprep.subr.bf16.mxu0 %v3667_v24 }
 0x372   :  { %3347 = vmatpush3.bf16.msra.mxu0 %v3667_v24  ;;  %v1439_v24 = vor.u32 %v1438_v5, %v1435_v11 }
 0x373   :  { %3348 = vmatprep.subr.bf16.mxu0 %v3668_v29 }
 0x376   :  { %3349 = vmatpush3.bf16.msra.mxu0 %v3668_v29  ;;  %v1398_v29 = vrot.slane %v4887_v1, 3  ;;  %v3715_v1 = vld [vmem:[#allocation28 + $0xa8] sm:$0xff]  }
 0x377   :  { %3350 = vmatprep.subr.bf16.mxu0 %v3669_v52 }
 0x37a   :  { %3351 = vmatpush3.bf16.msra.mxu0 %v3669_v52 }
 0x37b   :  { %3352 = vmatprep.subr.bf16.mxu0 %v3670_v53 }
 0x37e   :  { %3353 = vmatpush3.bf16.msra.mxu0 %v3670_v53  ;;  %v3699_v53 = vld [vmem:[#allocation28 + $0x28] sm:$0xff]  }
 0x433   :  { %v1088_v27 = vpop.f32.mrb[4].mxu1 }
 0x434   :  { %v1089_v56 = vadd.f32 %v2929_v49, %v1088_v27  ;;  %v3234_v4 = vpop.f32.mrb[5].mxu1 }
 0x435   :  { %v1091_v3 = vpop.f32.mrb[6].mxu1 }
 0x436   :  { %v2938_v32 = vmul.f32 -1.442695, %v1089_v56  ;;  %v3235_v61 = vpop.f32.mrb[7].mxu1 }
 0x437   :  { %v4276_v61 = vmov 1966171168  }
 0x438   :  { %3769 = vpow2.f32 %v2938_v32 }
 0x442   :  { %v3770_v33 = vpop.eup %3769 }
 0x443   :  { %v1097_v35 = vadd.f32 1.0, %v3770_v33  ;;  %v1166_v33 = vunpack.c.l.s4 %v4276_v61 }
 0x445   :  { %3771 = vrcp.f32 %v1097_v35  ;;  %v1168_v35 = vlaneseq }
 0x44f   :  { %v3772_v36 = vpop.eup %3771 }
 0x450   :  { %v1100_v55 = vmul.f32 %v3772_v36, %v1089_v56  ;;  %v1167_v36 = vunpack.c.0.s8 %v1166_v33 }
 0x452   :  { %v1101_v8 = vpack.c.bf16 %v1100_v55, %v1100_v55  ;;  %v1169_v55 = vshrl.u32 %v1168_v35, 7  ;;  %v3685_v35 = vld [vmem:[#allocation28 + $0x70] sm:$0xff]  }
 0x454   :  { %3239 = vmatmul.mubr.msk.bf16.vlgmr.msra.gmra.mrb[8].mxu1 %vm1110_vm8, %v1101_v8  ;;  %v1170_v8 = vsub.s32 %v1167_v36, %v1169_v55  ;;  %v3686_v36 = vld [vmem:[#allocation29 + $0x70] sm:$0xff]  }
 0x455   :  { %3243 = vmatpush3.bf16.msra.mxu1 %v3649_v46 }
 0x456   :  { %3244 = vmatprep.subr.bf16.mxu1 %v3650_v51 }
 0x459   :  { %3245 = vmatpush3.bf16.msra.mxu1 %v3650_v51 }
 0x45a   :  { %3246 = vmatprep.subr.bf16.mxu1 %v3651_v17 }
 0x45d   :  { %3247 = vmatpush3.bf16.msra.mxu1 %v3651_v17  ;;  %v1189_v17 = vsub.s32 0, %v1169_v55 }
 0x45e   :  { %3248 = vmatprep.subr.bf16.mxu1 %v3652_v14 }
 0x461   :  { %3249 = vmatpush3.bf16.msra.mxu1 %v3652_v14 }
 0x462   :  { %3250 = vmatprep.subr.bf16.mxu1 %v3653_v37 }
 0x465   :  { %3251 = vmatpush3.bf16.msra.mxu1 %v3653_v37 }
 0x466   :  { %3252 = vmatprep.subr.bf16.mxu1 %v3654_v25 }
 0x469   :  { %3253 = vmatpush3.bf16.msra.mxu1 %v3654_v25 }
 0x46a   :  { %3254 = vmatprep.subr.bf16.mxu1 %v3655_v60 }
 0x46d   :  { %3255 = vmatpush3.bf16.msra.mxu1 %v3655_v60 }
 0x46e   :  { %3256 = vmatprep.subr.bf16.mxu1 %v3656_v43 }
 0x471   :  { %3257 = vmatpush3.bf16.msra.mxu1 %v3656_v43 }
 0x472   :  { %3262 = vmatprep.subr.bf16.mxu1 %v3673_v54 }
 0x527   :  { %v1152_v19 = vpop.f32.mrb[8].mxu1 }
 0x528   :  { %v1153_v50 = vadd.f32 %v2939_v42, %v1152_v19  ;;  %v3240_v49 = vpop.f32.mrb[9].mxu1  ;;  %v3681_v42 = vld [vmem:[#allocation28 + $0x60] sm:$0xff]   ;;  %v1440_v19 = vsel %vm564_vm2, %v1431_v16, %v1439_v24 }
 0x529   :  { %v1155_v27 = vpop.f32.mrb[10].mxu1  ;;  %v3683_v49 = vld [vmem:[#allocation28 + $0x68] sm:$0xff]  }
 0x52a   :  { %v2941_v56 = vmul.f32 -1.442695, %v1153_v50  ;;  %v3241_v4 = vpop.f32.mrb[11].mxu1  ;;  %v3682_v50 = vld [vmem:[#allocation29 + $0x60] sm:$0xff]  }
 0x52b   :  { %v4896_v27 = vld [vmem:[#allocation3 + $0x10] sm:$0xf8]  ;;  %v3684_v4 = vld [vmem:[#allocation29 + $0x68] sm:$0xff]  }
 0x52c   :  { %3773 = vpow2.f32 %v2941_v56  ;;  %v4898_v56 = vld [vmem:[#allocation3 + $0x18] sm:$0xf] }
 0x52d   :  { %v1450_v61 = vshrl.u32 %v4898_v56, 16  ;;  %v1453_v33 = vshll.u32 %v4898_v56, 16  ;;  %v1681_v16 = vrot.slane %v4898_v56, 4 }
 0x536   :  { %v3774_v3 = vpop.eup %3773 }
 0x537   :  { %v1161_v32 = vadd.f32 1.0, %v3774_v3  ;;  %v1442_v3 = vshrl.u32 %v4896_v27, 16 }
 0x539   :  { %3775 = vrcp.f32 %v1161_v32  ;;  %v1445_v32 = vshll.u32 %v4896_v27, 16  ;;  %v1444_v55 = vrot.slane %v1442_v3, 3 }
 0x543   :  { %v3776_v46 = vpop.eup %3775 }
 0x544   :  { %v1171_v51 = vrot.slane %v3776_v46, %v1170_v8  ;;  %v1452_v46 = vrot.slane %v1450_v61, 3 }
 0x546   :  { %v1172_v14 = vcombine.high %v1171_v51, %v1171_v51  ;;  %v1179_v37 = vrot.slane %v1171_v51, %v1170_v8  ;;  %v1455_v51 = vrot.slane %v1453_v33, 4 }
 0x548   :  { %v1190_v25 = vrot.slane %v1179_v37, %v1189_v17  ;;  %v1186_v60 = vrot.slane %v1172_v14, %v1170_v8  ;;  %v1447_v8 = vrot.slane %v1445_v32, 4  ;;  %v3688_v14 = vld [vmem:[#allocation29 + $0x78] sm:$0xff]  }
 0x54a   :  { %v1197_v38 = vmul.f32 %v1190_v25, %v4851_v0  ;;  %v1198_v57 = vmul.f32 %v1190_v25, %v4855_v22  ;;  %v1194_v43 = vrot.slane %v1186_v60, %v1189_v17  ;;  %v3671_v0 = vld [vmem:[#allocation28 + $0x130] sm:$0xff]   ;;  %v3672_v22 = vld [vmem:[#allocation28 + $0x138] sm:$0xff]   ;;  %v1448_v37 = vor.u32 %v1447_v8, %v1444_v55  ;;  %v3689_v60 = vld [vmem:[#allocation28] sm:$0xff]  }
 0x54b   :  { %3354 = vmatprep.subr.bf16.mxu0 %v3671_v0  ;;  %v3687_v17 = vld [vmem:[#allocation28 + $0x78] sm:$0xff]   ;;  %v1456_v25 = vor.u32 %v1455_v51, %v1452_v46 }
 0x54c   :  { %v1201_v44 = vpack.c.bf16 %v1198_v57, %v1197_v38  ;;  %v1199_v28 = vmul.f32 %v1194_v43, %v4847_v62  ;;  %v1200_v48 = vmul.f32 %v1194_v43, %v4849_v9  ;;  %3355 = vmatpush3.bf16.msra.mxu0 %v3671_v0  ;;  %v1959_v62 = vld [vmem:[#allocation3] sm:$0xe0]  ;;  %v1966_v9 = vrot.slane %v4863_v26, 5  ;;  %v4905_v57 = vld [vmem:[#allocation29] sm:$0xff]   ;;  %v3691_v43 = vld [vmem:[#allocation28 + $0x8] sm:$0xff]  }
 0x54d   :  { %3356 = vmatprep.subr.bf16.mxu0 %v3672_v22  ;;  %v1965_v63 = vrot.slane %v1959_v62, 5  ;;  %v3677_v26 = vld [vmem:[#allocation28 + $0x50] sm:$0xff]   ;;  %v1457_v38 = vsel %vm564_vm2, %v1448_v37, %v1456_v25  ;;  %v1393_v62 = vld [vmem:[#allocation3 + $0x18] sm:$0x7] }
 0x54e   :  { %3258 = vmatprep.mubr.bf16.mxu1 %v1201_v44  ;;  %v1202_v18 = vpack.c.bf16 %v1200_v48, %v1199_v28  ;;  %v3693_v44 = vld [vmem:[#allocation28 + $0x10] sm:$0xff]   ;;  %v3695_v28 = vld [vmem:[#allocation28 + $0x18] sm:$0xff]   ;;  %v3697_v48 = vld [vmem:[#allocation28 + $0x20] sm:$0xff]  }
 0x54f   :  { %v1967_v47 = vsel %vm838_vm4, %v1965_v63, %v1966_v9  ;;  %v1401_v9 = vrot.slane %v4896_v27, 3 }
 0x550   :  { %3259 = vmatmul.mubr.bf16.vlgmr.msra.gmra.mrb[12].mxu1 %v1202_v18  ;;  %3357 = vmatpush3.bf16.msra.mxu0 %v3672_v22  ;;  %v1391_v18 = vld [vmem:[#allocation3 + $0x8] sm:$0x7] }
 0x551   :  { %3263 = vmatpush3.bf16.msra.mxu1 %v3673_v54  ;;  %3362 = vmatprep.subr.bf16.mxu0 %v3674_v58  ;;  %v1399_v52 = vrot.slane %v1391_v18, 3  ;;  %v3701_v22 = vld [vmem:[#allocation28 + $0x30] sm:$0xff]   ;;  %v3703_v54 = vld [vmem:[#allocation28 + $0x38] sm:$0xff]  }
 0x552   :  { %3358 = vmatprep.mubr.bf16.mxu0 %v1967_v47  ;;  %3264 = vmatprep.subr.bf16.mxu1 %v3675_v15  ;;  %v1677_v47 = vrot.slane %v4861_v21, 4  ;;  %v3719_v21 = vld [vmem:[#allocation28 + $0xb8] sm:$0xff]  }
 0x553   :  { %3359 = vmatmul.mubr.bf16.vlgmr.msra.gmra.mrb[0].mxu0 %v1970_v10  ;;  %3278 = vmatprep.mubr.bf16.mxu1 %v1440_v19  ;;  %v1400_v0 = vsel %vm498_vm0, %v1398_v29, %v1399_v52  ;;  %v3713_v10 = vld [vmem:[#allocation28 + $0xa0] sm:$0xff]  }
 0x554   :  { %3363 = vmatpush3.bf16.msra.mxu0 %v3674_v58  ;;  %v1402_v58 = vrot.slane %v1393_v62, 3 }
 0x555   :  { %3265 = vmatpush3.bf16.msra.mxu1 %v3675_v15  ;;  %3364 = vmatprep.subr.bf16.mxu0 %v3676_v2  ;;  %v3709_v15 = vld [vmem:[#allocation28 + $0x90] sm:$0xff]  }
 0x556   :  { %3266 = vmatprep.subr.bf16.mxu1 %v3677_v26  ;;  %v1403_v63 = vsel %vm498_vm0, %v1401_v9, %v1402_v58 }
 0x558   :  { %3365 = vmatpush3.bf16.msra.mxu0 %v3676_v2  ;;  %v1678_v2 = vrot.slane %v4889_v23, 4 }
 0x559   :  { %3267 = vmatpush3.bf16.msra.mxu1 %v3677_v26  ;;  %3366 = vmatprep.subr.bf16.mxu0 %v3678_v20 }
 0x55a   :  { %3268 = vmatprep.subr.bf16.mxu1 %v3679_v40  ;;  %v1679_v26 = vsel %vm666_vm1, %v1677_v47, %v1678_v2 }
 0x55c   :  { %3367 = vmatpush3.bf16.msra.mxu0 %v3678_v20  ;;  %v3717_v20 = vld [vmem:[#allocation28 + $0xb0] sm:$0xff]  }
 0x55d   :  { %3269 = vmatpush3.bf16.msra.mxu1 %v3679_v40  ;;  %3368 = vmatprep.subr.bf16.mxu0 %v3680_v41 }
 0x55e   :  { %3270 = vmatprep.subr.bf16.mxu1 %v3681_v42 }
 0x560   :  { %3369 = vmatpush3.bf16.msra.mxu0 %v3680_v41  ;;  %v1680_v41 = vrot.slane %v4870_v30, 4 }
 0x561   :  { %3271 = vmatpush3.bf16.msra.mxu1 %v3681_v42  ;;  %3370 = vmatprep.subr.bf16.mxu0 %v3682_v50 }
 0x562   :  { %3272 = vmatprep.subr.bf16.mxu1 %v3683_v49  ;;  %v1682_v3 = vsel %vm666_vm1, %v1680_v41, %v1681_v16  ;;  %v3696_v41 = vld [vmem:[#allocation29 + $0x18] sm:$0xff]   ;;  %v3698_v16 = vld [vmem:[#allocation29 + $0x20] sm:$0xff]  }
 0x564   :  { %3371 = vmatpush3.bf16.msra.mxu0 %v3682_v50 }
 0x565   :  { %3273 = vmatpush3.bf16.msra.mxu1 %v3683_v49  ;;  %3372 = vmatprep.subr.bf16.mxu0 %v3684_v4 }
 0x566   :  { %3274 = vmatprep.subr.bf16.mxu1 %v3685_v35 }
 0x568   :  { %3373 = vmatpush3.bf16.msra.mxu0 %v3684_v4 }
 0x569   :  { %3275 = vmatpush3.bf16.msra.mxu1 %v3685_v35  ;;  %3374 = vmatprep.subr.bf16.mxu0 %v3686_v36 }
 0x56a   :  { %3276 = vmatprep.subr.bf16.mxu1 %v3687_v17 }
 0x56c   :  { %3375 = vmatpush3.bf16.msra.mxu0 %v3686_v36 }
 0x56d   :  { %3277 = vmatpush3.bf16.msra.mxu1 %v3687_v17  ;;  %3376 = vmatprep.subr.bf16.mxu0 %v3688_v14 }
 0x56e   :  { %3282 = vmatprep.subr.bf16.mxu1 %v3689_v60 }
 0x570   :  { %3377 = vmatpush3.bf16.msra.mxu0 %v3688_v14  ;;  %3279 = vmatmul.mubr.bf16.vlgmr.msra.gmra.mrb[16].mxu1 %v1457_v38 }
 0x571   :  { %3283 = vmatpush3.bf16.msra.mxu1 %v3689_v60  ;;  %3382 = vmatprep.subr.bf16.mxu0 %v4905_v57 }
 0x572   :  { %3284 = vmatprep.subr.bf16.mxu1 %v3691_v43  ;;  %3298 = vmatprep.mubr.bf16.mxu1 %v1400_v0 }
 0x575   :  { %3285 = vmatpush3.bf16.msra.mxu1 %v3691_v43 }
 0x576   :  { %3286 = vmatprep.subr.bf16.mxu1 %v3693_v44 }
 0x579   :  { %3287 = vmatpush3.bf16.msra.mxu1 %v3693_v44 }
 0x57a   :  { %3288 = vmatprep.subr.bf16.mxu1 %v3695_v28 }
 0x57d   :  { %3289 = vmatpush3.bf16.msra.mxu1 %v3695_v28 }
 0x57e   :  { %3290 = vmatprep.subr.bf16.mxu1 %v3697_v48 }
 0x581   :  { %3291 = vmatpush3.bf16.msra.mxu1 %v3697_v48 }
 0x582   :  { %3292 = vmatprep.subr.bf16.mxu1 %v3699_v53 }
 0x585   :  { %3293 = vmatpush3.bf16.msra.mxu1 %v3699_v53 }
 0x586   :  { %3294 = vmatprep.subr.bf16.mxu1 %v3701_v22 }
 0x589   :  { %3295 = vmatpush3.bf16.msra.mxu1 %v3701_v22 }
 0x58a   :  { %3296 = vmatprep.subr.bf16.mxu1 %v3703_v54 }
 0x58d   :  { %3297 = vmatpush3.bf16.msra.mxu1 %v3703_v54 }
 0x58e   :  { %3302 = vmatprep.subr.bf16.mxu1 %v3705_v59 }
 0x590   :  { %3299 = vmatmul.mubr.bf16.vlgmr.msra.gmra.mrb[16].mxu1 %v1403_v63 }
 0x591   :  { %3303 = vmatpush3.bf16.msra.mxu1 %v3705_v59  ;;  %3318 = vmatprep.mubr.bf16.mxu1 %v1679_v26 }
 0x592   :  { %3304 = vmatprep.subr.bf16.mxu1 %v3707_v12 }
 0x595   :  { %3305 = vmatpush3.bf16.msra.mxu1 %v3707_v12 }
 0x596   :  { %3306 = vmatprep.subr.bf16.mxu1 %v3709_v15 }
 0x599   :  { %3307 = vmatpush3.bf16.msra.mxu1 %v3709_v15 }
 0x59a   :  { %3308 = vmatprep.subr.bf16.mxu1 %v3711_v45 }
 0x59d   :  { %3309 = vmatpush3.bf16.msra.mxu1 %v3711_v45 }
 0x59e   :  { %3310 = vmatprep.subr.bf16.mxu1 %v3713_v10 }
 0x5a1   :  { %3311 = vmatpush3.bf16.msra.mxu1 %v3713_v10 }
 0x5a2   :  { %3312 = vmatprep.subr.bf16.mxu1 %v3715_v1 }
 0x5a5   :  { %3313 = vmatpush3.bf16.msra.mxu1 %v3715_v1 }
 0x5a6   :  { %3314 = vmatprep.subr.bf16.mxu1 %v3717_v20 }
 0x5a9   :  { %3315 = vmatpush3.bf16.msra.mxu1 %v3717_v20 }
 0x5aa   :  { %3316 = vmatprep.subr.bf16.mxu1 %v3719_v21 }
 0x5ad   :  { %3317 = vmatpush3.bf16.msra.mxu1 %v3719_v21 }
 0x5b0   :  { %3319 = vmatmul.mubr.bf16.vlgmr.msra.gmra.mrb[16].mxu1 %v1682_v3 }
 0x623   :  { %v3260_v39 = vpop.f32.mrb[12].mxu1 }
 0x624   :  { %v1325_v34 = vmul.f32 %v3260_v39, %v2950_v31  ;;  %v1301_v23 = vpop.f32.mrb[13].mxu1 }
 0x625   :  { %v1323_v40 = vmul.f32 %v2950_v31, %v1301_v23  ;;  %v3261_v7 = vpop.f32.mrb[14].mxu1 }
 0x626   :  { %v1336_v13 = vadd.f32 %v2951_v6, %v1325_v34  ;;  %v1326_v11 = vmul.f32 %v3261_v7, %v2950_v31  ;;  %v1304_v5 = vpop.f32.mrb[15].mxu1  ;;  %v3692_v7 = vld [vmem:[#allocation29 + $0x8] sm:$0xff]  }
 0x627   :  { %v1334_v24 = vadd.f32 %v2951_v6, %v1323_v40  ;;  %v1324_v42 = vmul.f32 %v2950_v31, %v1304_v5  ;;  %v3694_v5 = vld [vmem:[#allocation29 + $0x10] sm:$0xff]  }
 0x628   :  { %v2954_v19 = vmul.f32 -1.442695, %v1336_v13  ;;  %v1337_v50 = vadd.f32 %v2951_v6, %v1326_v11 }
 0x629   :  { %v2952_v49 = vmul.f32 -1.442695, %v1334_v24  ;;  %v1335_v27 = vadd.f32 %v2951_v6, %v1324_v42  ;;  %v3702_v42 = vld [vmem:[#allocation29 + $0x30] sm:$0xff]  }
 0x62a   :  { %3777 = vpow2.f32 %v2954_v19  ;;  %v2955_v4 = vmul.f32 -1.442695, %v1337_v50  ;;  %v3704_v19 = vld [vmem:[#allocation29 + $0x38] sm:$0xff]  }
 0x62b   :  { %3779 = vpow2.f32 %v2952_v49  ;;  %v2953_v32 = vmul.f32 -1.442695, %v1335_v27  ;;  %v3706_v49 = vld [vmem:[#allocation29 + $0x80] sm:$0xff]  }
 0x62c   :  { %3781 = vpow2.f32 %v2955_v4 }
 0x62d   :  { %3783 = vpow2.f32 %v2953_v32 }
 0x634   :  { %v3778_v30 = vpop.eup %3777 }
 0x635   :  { %v3780_v61 = vpop.eup %3779  ;;  %v1352_v56 = vadd.f32 1.0, %v3778_v30  ;;  %v3708_v30 = vld [vmem:[#allocation29 + $0x88] sm:$0xff]  }
 0x636   :  { %v3782_v33 = vpop.eup %3781  ;;  %v1350_v35 = vadd.f32 1.0, %v3780_v61 }
 0x637   :  { %v3784_v36 = vpop.eup %3783  ;;  %3785 = vrcp.f32 %v1352_v56  ;;  %v1353_v55 = vadd.f32 1.0, %v3782_v33  ;;  %v3710_v33 = vld [vmem:[#allocation29 + $0x90] sm:$0xff]  }
 0x638   :  { %3787 = vrcp.f32 %v1350_v35  ;;  %v1351_v8 = vadd.f32 1.0, %v3784_v36  ;;  %v3712_v35 = vld [vmem:[#allocation29 + $0x98] sm:$0xff]   ;;  %v3714_v36 = vld [vmem:[#allocation29 + $0xa0] sm:$0xff]  }
 0x639   :  { %3789 = vrcp.f32 %v1353_v55  ;;  %v3716_v55 = vld [vmem:[#allocation29 + $0xa8] sm:$0xff]  }
 0x63a   :  { %3791 = vrcp.f32 %v1351_v8 }
 0x641   :  { %v3786_v46 = vpop.eup %3785 }
 0x642   :  { %v3788_v51 = vpop.eup %3787  ;;  %v1364_v37 = vmul.f32 %v3786_v46, %v1336_v13  ;;  %v3718_v46 = vld [vmem:[#allocation29 + $0xb0] sm:$0xff]  }
 0x643   :  { %v3790_v17 = vpop.eup %3789  ;;  %v1362_v60 = vmul.f32 %v3788_v51, %v1334_v24  ;;  %v3700_v24 = vld [vmem:[#allocation29 + $0x28] sm:$0xff]  }
 0x644   :  { %v3792_v14 = vpop.eup %3791  ;;  %v1365_v25 = vmul.f32 %v3790_v17, %v1337_v50 }
 0x645   :  { %v1363_v38 = vmul.f32 %v3792_v14, %v1335_v27 }
 0x646   :  { %v1379_v43 = vpack.c.bf16 %v1365_v25, %v1364_v37  ;;  %v3720_v25 = vld [vmem:[#allocation29 + $0xb8] sm:$0xff]  }
 0x647   :  { %v1378_v44 = vpack.c.bf16 %v1363_v38, %v1362_v60 }
 0x648   :  { %v1383_v28 = vrot.slane %v1379_v43, 4 }
 0x649   :  { %v1382_v48 = vrot.slane %v1378_v44, 4 }
 0x64a   :  { %1388 = vst [vmem:[#allocation4 + $0x18] ss:$-4 sps:$4 sm:$0xff] %v1383_v28  }
 0x64b   :  { %1386 = vst [vmem:[#allocation4 + $0x8] ss:$-4 sps:$4 sm:$0xff] %v1382_v48   ;;  %v3721_v48 = vld [vmem:[#allocation29 + $0xc0] sm:$0xff]  }
 0x651   :  { %v4918_v18 = vld [vmem:[#allocation4 + $0x10] sm:$0xf8]  ;;  %v4920_v29 = vld [vmem:[#allocation4 + $0x18] sm:$0xf] }
 0x652   :  { %v2091_v52 = vld [vmem:[#allocation4] sm:$0xf8]  ;;  %v4922_v53 = vld [vmem:[#allocation4 + $0x8] sm:$0xf]  ;;  %v2143_v0 = vshrl.u32 %v4918_v18, 16  ;;  %v2146_v22 = vshll.u32 %v4918_v18, 16 }
 0x653   :  { %v2126_v54 = vshrl.u32 %v2091_v52, 16  ;;  %v2129_v62 = vshll.u32 %v2091_v52, 16  ;;  %v2134_v9 = vshrl.u32 %v4922_v53, 16  ;;  %v2137_v58 = vshll.u32 %v4922_v53, 16  ;;  %v2092_v45 = vld [vmem:[#allocation4 + $0x8] sm:$0x7] }
 0x654   :  { %v2145_v59 = vrot.slane %v2143_v0, 3  ;;  %v2148_v63 = vrot.slane %v2146_v22, 4  ;;  %v2151_v12 = vshrl.u32 %v4920_v29, 16  ;;  %v2154_v15 = vshll.u32 %v4920_v29, 16  ;;  %v2094_v50 = vld [vmem:[#allocation4 + $0x18] sm:$0x7] }
 0x655   :  { %v2128_v47 = vrot.slane %v2126_v54, 3  ;;  %v2131_v2 = vrot.slane %v2129_v62, 4  ;;  %v2136_v10 = vrot.slane %v2134_v9, 3  ;;  %v2139_v26 = vrot.slane %v2137_v58, 4  ;;  %v4938_v8 = vld [vmem:[#allocation4 + $0x8] sm:$0x1f] }
 0x656   :  { %v2149_v1 = vor.u32 %v2148_v63, %v2145_v59  ;;  %v2153_v20 = vrot.slane %v2151_v12, 3  ;;  %v2156_v31 = vrot.slane %v2154_v15, 4  ;;  %v2099_v21 = vrot.slane %v2091_v52, 3  ;;  %v2373_v60 = vld [vmem:[#allocation4 + $0x10] sm:$0xf0]  ;;  %v3722_v22 = vld [vmem:[#allocation29 + $0xc8] sm:$0xff]  }
 0x657   :  { %v2132_v39 = vor.u32 %v2131_v2, %v2128_v47  ;;  %v2140_v6 = vor.u32 %v2139_v26, %v2136_v10  ;;  %v2100_v34 = vrot.slane %v2092_v45, 3  ;;  %v2102_v27 = vrot.slane %v4918_v18, 3  ;;  %v3723_v9 = vld [vmem:[#allocation29 + $0xd0] sm:$0xff]   ;;  %v3724_v58 = vld [vmem:[#allocation29 + $0xd8] sm:$0xff]   ;;  %v3726_v59 = vld [vmem:[#allocation29 + $0xe8] sm:$0xff]  }
 0x658   :  { %v2157_v23 = vor.u32 %v2156_v31, %v2153_v20  ;;  %v2103_v4 = vrot.slane %v2094_v50, 3  ;;  %v2379_v32 = vrot.slane %v4922_v53, 4  ;;  %v2515_v14 = vshrl.u32 %v4938_v8, 16  ;;  %v2505_v63 = vld [vmem:[#allocation4 + $0x18] sm:$0x1f]  ;;  %v3727_v12 = vld [vmem:[#allocation29 + $0xf0] sm:$0xff]  }
 0x659   :  { %v2141_v40 = vsel %vm564_vm2, %v2132_v39, %v2140_v6  ;;  %v2101_v11 = vsel %vm498_vm0, %v2099_v21, %v2100_v34  ;;  %v2518_v37 = vshll.u32 %v4938_v8, 16  ;;  %v2381_v18 = vrot.slane %v2373_v60, 4  ;;  %v3728_v10 = vld [vmem:[#allocation29 + $0xf8] sm:$0xff]   ;;  %v2660_v39 = vld [vmem:[#allocation4] sm:$0xe0]  ;;  %v3729_v6 = vld [vmem:[#allocation29 + $0x100] sm:$0xff]  }
 0x65a   :  { %3378 = vmatprep.mubr.bf16.mxu0 %v2141_v40  ;;  %v2158_v13 = vsel %vm564_vm2, %v2149_v1, %v2157_v23  ;;  %v2104_v61 = vsel %vm498_vm0, %v2102_v27, %v2103_v4  ;;  %v2517_v44 = vrot.slane %v2515_v14, 4  ;;  %v2382_v52 = vrot.slane %v4920_v29, 4  ;;  %v3725_v29 = vld [vmem:[#allocation29 + $0xe0] sm:$0xff]  }
 0x65b   :  { %3379 = vmatmul.mubr.bf16.vlgmr.msra.gmra.mrb[0].mxu0 %v2158_v13  ;;  %v2520_v28 = vrot.slane %v2518_v37, 5  ;;  %v2524_v15 = vshrl.u32 %v2373_v60, 16  ;;  %v2527_v45 = vshll.u32 %v2373_v60, 16  ;;  %v2532_v47 = vshrl.u32 %v2505_v63, 16  ;;  %v2661_v50 = vld [vmem:[#allocation4 + $0x10] sm:$0xe0] }
 0x65c   :  { %3383 = vmatpush3.bf16.msra.mxu0 %v4905_v57  ;;  %3398 = vmatprep.mubr.bf16.mxu0 %v2101_v11  ;;  %v2372_v57 = vld [vmem:[#allocation4] sm:$0xf0]  ;;  %v2383_v54 = vsel %vm666_vm1, %v2381_v18, %v2382_v52  ;;  %v2535_v2 = vshll.u32 %v2505_v63, 16  ;;  %v2666_v23 = vrot.slane %v2660_v39, 5  ;;  %v2667_v40 = vrot.slane %v4938_v8, 5 }
 0x65d   :  { %3384 = vmatprep.subr.bf16.mxu0 %v3692_v7  ;;  %v2378_v3 = vrot.slane %v2372_v57, 4  ;;  %v2507_v51 = vshrl.u32 %v2372_v57, 16  ;;  %v2510_v17 = vshll.u32 %v2372_v57, 16  ;;  %v2521_v0 = vor.u32 %v2520_v28, %v2517_v44 }
 0x65e   :  { %v2526_v26 = vrot.slane %v2524_v15, 4  ;;  %v2529_v1 = vrot.slane %v2527_v45, 5  ;;  %v2534_v20 = vrot.slane %v2532_v47, 4  ;;  %v2537_v31 = vrot.slane %v2535_v2, 5 }
 0x65f   :  { %v2380_v56 = vsel %vm666_vm1, %v2378_v3, %v2379_v32  ;;  %v2509_v38 = vrot.slane %v2507_v51, 4  ;;  %v2512_v43 = vrot.slane %v2510_v17, 5  ;;  %v2668_v11 = vsel %vm838_vm4, %v2666_v23, %v2667_v40 }
 0x660   :  { %3385 = vmatpush3.bf16.msra.mxu0 %v3692_v7  ;;  %v2530_v21 = vor.u32 %v2529_v1, %v2526_v26  ;;  %v2538_v34 = vor.u32 %v2537_v31, %v2534_v20  ;;  %v3730_v7 = vld [vmem:[#allocation29 + $0x108] sm:$0xff]   ;;  %v2669_v57 = vrot.slane %v2661_v50, 5 }
 0x661   :  { %3386 = vmatprep.subr.bf16.mxu0 %v3694_v5  ;;  %v2513_v53 = vor.u32 %v2512_v43, %v2509_v38 }
 0x662   :  { %v2539_v13 = vsel %vm736_vm3, %v2530_v21, %v2538_v34 }
 0x663   :  { %v2522_v62 = vsel %vm736_vm3, %v2513_v53, %v2521_v0 }
 0x664   :  { %3387 = vmatpush3.bf16.msra.mxu0 %v3694_v5  ;;  %v3731_v5 = vld [vmem:[#allocation29 + $0x110] sm:$0xff]  }
 0x665   :  { %3388 = vmatprep.subr.bf16.mxu0 %v3696_v41 }
 0x668   :  { %3389 = vmatpush3.bf16.msra.mxu0 %v3696_v41  ;;  %v3732_v41 = vld [vmem:[#allocation29 + $0x118] sm:$0xff]  }
 0x669   :  { %3390 = vmatprep.subr.bf16.mxu0 %v3698_v16 }
 0x66c   :  { %3391 = vmatpush3.bf16.msra.mxu0 %v3698_v16  ;;  %v3733_v16 = vld [vmem:[#allocation29 + $0x120] sm:$0xff]  }
 0x66d   :  { %3392 = vmatprep.subr.bf16.mxu0 %v3700_v24 }
 0x670   :  { %3393 = vmatpush3.bf16.msra.mxu0 %v3700_v24  ;;  %v3734_v24 = vld [vmem:[#allocation29 + $0x128] sm:$0xff]  }
 0x671   :  { %3394 = vmatprep.subr.bf16.mxu0 %v3702_v42 }
 0x674   :  { %3395 = vmatpush3.bf16.msra.mxu0 %v3702_v42  ;;  %v3735_v42 = vld [vmem:[#allocation29 + $0x130] sm:$0xff]  }
 0x675   :  { %3396 = vmatprep.subr.bf16.mxu0 %v3704_v19 }
 0x678   :  { %3397 = vmatpush3.bf16.msra.mxu0 %v3704_v19  ;;  %v3736_v19 = vld [vmem:[#allocation29 + $0x138] sm:$0xff]  }
 0x679   :  { %3402 = vmatprep.subr.bf16.mxu0 %v3706_v49 }
 0x67b   :  { %3399 = vmatmul.mubr.bf16.vlgmr.msra.gmra.mrb[0].mxu0 %v2104_v61 }
 0x67c   :  { %3403 = vmatpush3.bf16.msra.mxu0 %v3706_v49  ;;  %3418 = vmatprep.mubr.bf16.mxu0 %v2380_v56  ;;  %v2670_v49 = vrot.slane %v2505_v63, 5  ;;  %v3040_v56 = vld [vmem:[#allocation31] ss:$0 sm:$0xff] }
 0x67d   :  { %3404 = vmatprep.subr.bf16.mxu0 %v3708_v30 }
 0x67e   :  { %v2671_v27 = vsel %vm838_vm4, %v2669_v57, %v2670_v49 }
 0x680   :  { %3405 = vmatpush3.bf16.msra.mxu0 %v3708_v30 }
 0x681   :  { %3406 = vmatprep.subr.bf16.mxu0 %v3710_v33 }
 0x683   :  { %v3320_v4 = vpop.f32.mrb[16].mxu1 }
 0x684   :  { %3407 = vmatpush3.bf16.msra.mxu0 %v3710_v33  ;;  %v1784_v3 = vpop.f32.mrb[17].mxu1 }
 0x685   :  { %3408 = vmatprep.subr.bf16.mxu0 %v3712_v35  ;;  %v3321_v32 = vpop.f32.mrb[18].mxu1 }
 0x686   :  { %v1787_v30 = vpop.f32.mrb[19].mxu1 }
 0x688   :  { %3409 = vmatpush3.bf16.msra.mxu0 %v3712_v35 }
 0x689   :  { %3410 = vmatprep.subr.bf16.mxu0 %v3714_v36 }
 0x68c   :  { %3411 = vmatpush3.bf16.msra.mxu0 %v3714_v36  ;;  %v3041_v36 = vld [vmem:[#allocation32] ss:$0 sm:$0xff] }
 0x68d   :  { %3412 = vmatprep.subr.bf16.mxu0 %v3716_v55 }
 0x690   :  { %3413 = vmatpush3.bf16.msra.mxu0 %v3716_v55 }
 0x691   :  { %3414 = vmatprep.subr.bf16.mxu0 %v3718_v46 }
 0x694   :  { %3415 = vmatpush3.bf16.msra.mxu0 %v3718_v46 }
 0x695   :  { %3416 = vmatprep.subr.bf16.mxu0 %v3720_v25 }
 0x698   :  { %3417 = vmatpush3.bf16.msra.mxu0 %v3720_v25 }
 0x699   :  { %3422 = vmatprep.subr.bf16.mxu0 %v3721_v48 }
 0x69b   :  { %3419 = vmatmul.mubr.bf16.vlgmr.msra.gmra.mrb[0].mxu0 %v2383_v54 }
 0x69c   :  { %3423 = vmatpush3.bf16.msra.mxu0 %v3721_v48  ;;  %3438 = vmatprep.mubr.bf16.mxu0 %v2522_v62 }
 0x69d   :  { %3424 = vmatprep.subr.bf16.mxu0 %v3722_v22 }
 0x6a0   :  { %3425 = vmatpush3.bf16.msra.mxu0 %v3722_v22 }
 0x6a1   :  { %3426 = vmatprep.subr.bf16.mxu0 %v3723_v9 }
 0x6a4   :  { %3427 = vmatpush3.bf16.msra.mxu0 %v3723_v9 }
 0x6a5   :  { %3428 = vmatprep.subr.bf16.mxu0 %v3724_v58 }
 0x6a8   :  { %3429 = vmatpush3.bf16.msra.mxu0 %v3724_v58 }
 0x6a9   :  { %3430 = vmatprep.subr.bf16.mxu0 %v3725_v29 }
 0x6ac   :  { %3431 = vmatpush3.bf16.msra.mxu0 %v3725_v29 }
 0x6ad   :  { %3432 = vmatprep.subr.bf16.mxu0 %v3726_v59 }
 0x6b0   :  { %3433 = vmatpush3.bf16.msra.mxu0 %v3726_v59 }
 0x6b1   :  { %3434 = vmatprep.subr.bf16.mxu0 %v3727_v12 }
 0x6b4   :  { %3435 = vmatpush3.bf16.msra.mxu0 %v3727_v12 }
 0x6b5   :  { %3436 = vmatprep.subr.bf16.mxu0 %v3728_v10 }
 0x6b8   :  { %3437 = vmatpush3.bf16.msra.mxu0 %v3728_v10 }
 0x6b9   :  { %3442 = vmatprep.subr.bf16.mxu0 %v3729_v6 }
 0x6bb   :  { %3439 = vmatmul.mubr.bf16.vlgmr.msra.gmra.mrb[0].mxu0 %v2539_v13 }
 0x6bc   :  { %3443 = vmatpush3.bf16.msra.mxu0 %v3729_v6  ;;  %3458 = vmatprep.mubr.bf16.mxu0 %v2668_v11 }
 0x6bd   :  { %3444 = vmatprep.subr.bf16.mxu0 %v3730_v7 }
 0x6c0   :  { %3445 = vmatpush3.bf16.msra.mxu0 %v3730_v7 }
 0x6c1   :  { %3446 = vmatprep.subr.bf16.mxu0 %v3731_v5 }
 0x6c4   :  { %3447 = vmatpush3.bf16.msra.mxu0 %v3731_v5 }
 0x6c5   :  { %3448 = vmatprep.subr.bf16.mxu0 %v3732_v41 }
 0x6c8   :  { %3449 = vmatpush3.bf16.msra.mxu0 %v3732_v41 }
 0x6c9   :  { %3450 = vmatprep.subr.bf16.mxu0 %v3733_v16 }
 0x6cc   :  { %3451 = vmatpush3.bf16.msra.mxu0 %v3733_v16 }
 0x6cd   :  { %3452 = vmatprep.subr.bf16.mxu0 %v3734_v24 }
 0x6d0   :  { %3453 = vmatpush3.bf16.msra.mxu0 %v3734_v24 }
 0x6d1   :  { %3454 = vmatprep.subr.bf16.mxu0 %v3735_v42 }
 0x6d4   :  { %3455 = vmatpush3.bf16.msra.mxu0 %v3735_v42 }
 0x6d5   :  { %3456 = vmatprep.subr.bf16.mxu0 %v3736_v19 }
 0x6d8   :  { %3457 = vmatpush3.bf16.msra.mxu0 %v3736_v19 }
 0x6db   :  { %3459 = vmatmul.mubr.bf16.vlgmr.msra.gmra.mrb[0].mxu0 %v2671_v27 }
 0x7ae   :  { %v3460_v61 = vpop.f32.mrb[0].mxu0 }
 0x7af   :  { %v3462_v33 = vadd.f32 %v3460_v61, %v3320_v4  ;;  %v2773_v35 = vpop.f32.mrb[1].mxu0 }
 0x7b0   :  { %v3463_v55 = vadd.f32 %v2773_v35, %v1784_v3  ;;  %v3461_v8 = vpop.f32.mrb[2].mxu0 }
 0x7b1   :  { %v2805_v46 = vmul.f32 %v3462_v33, %v3040_v56  ;;  %v3464_v51 = vadd.f32 %v3461_v8, %v3321_v32  ;;  %v2776_v17 = vpop.f32.mrb[3].mxu0 }
 0x7b2   :  { %v2803_v14 = vmul.f32 %v3463_v55, %v3040_v56  ;;  %v3465_v37 = vadd.f32 %v2776_v17, %v1787_v30 }
 0x7b3   :  { %v2816_v25 = vadd.f32 %v3041_v36, %v2805_v46  ;;  %v2806_v60 = vmul.f32 %v3464_v51, %v3040_v56 }
 0x7b4   :  { %v2814_v38 = vadd.f32 %v3041_v36, %v2803_v14  ;;  %v2804_v43 = vmul.f32 %v3465_v37, %v3040_v56 }
 0x7b5   :  { %v3044_v44 = vmul.f32 -1.442695, %v2816_v25  ;;  %v2817_v28 = vadd.f32 %v3041_v36, %v2806_v60 }
 0x7b6   :  { %v3042_v48 = vmul.f32 -1.442695, %v2814_v38  ;;  %v2815_v18 = vadd.f32 %v3041_v36, %v2804_v43 }
 0x7b7   :  { %3793 = vpow2.f32 %v3044_v44  ;;  %v3045_v52 = vmul.f32 -1.442695, %v2817_v28 }
 0x7b8   :  { %3795 = vpow2.f32 %v3042_v48  ;;  %v3043_v53 = vmul.f32 -1.442695, %v2815_v18 }
 0x7b9   :  { %3797 = vpow2.f32 %v3045_v52 }
 0x7ba   :  { %3799 = vpow2.f32 %v3043_v53 }
 0x7c1   :  { %v3794_v0 = vpop.eup %3793 }
 0x7c2   :  { %v3796_v22 = vpop.eup %3795  ;;  %v2832_v54 = vadd.f32 1.0, %v3794_v0 }
 0x7c3   :  { %v3798_v62 = vpop.eup %3797  ;;  %v2830_v9 = vadd.f32 1.0, %v3796_v22 }
 0x7c4   :  { %v3800_v58 = vpop.eup %3799  ;;  %3801 = vrcp.f32 %v2832_v54  ;;  %v2833_v29 = vadd.f32 1.0, %v3798_v62 }
 0x7c5   :  { %3803 = vrcp.f32 %v2830_v9  ;;  %v2831_v59 = vadd.f32 1.0, %v3800_v58 }
 0x7c6   :  { %3805 = vrcp.f32 %v2833_v29 }
 0x7c7   :  { %3807 = vrcp.f32 %v2831_v59 }
 0x7ce   :  { %v3802_v63 = vpop.eup %3801 }
 0x7cf   :  { %v3804_v12 = vpop.eup %3803  ;;  %v2844_v47 = vmul.f32 %v3802_v63, %v2816_v25 }
 0x7d0   :  { %v3806_v15 = vpop.eup %3805  ;;  %v2842_v10 = vmul.f32 %v3804_v12, %v2814_v38 }
 0x7d1   :  { %v3808_v45 = vpop.eup %3807  ;;  %v2845_v2 = vmul.f32 %v3806_v15, %v2817_v28 }
 0x7d2   :  { %v2843_v26 = vmul.f32 %v3808_v45, %v2815_v18 }
 0x7d3   :  { %v3062_v1 = vpack.c.bf16 %v2845_v2, %v2844_v47 }
 0x7d4   :  { %v3057_v20 = vpack.c.bf16 %v2843_v26, %v2842_v10 }
 0x7d5   :  { %3064 = vst [vmem:[#allocation34 + $0x8] sm:$0xff] %v3062_v1  }
 0x7d6   :  { %3058 = vst [vmem:[#allocation34] sm:$0xff] %v3057_v20  }
 0x7d7   :  { %4216 = shalt.err (!%p4213_p8)
}
 0x7d8   :  { %s4217_s1 = scalar_lea.hbm %s4982_s18, 256 }
 0x7d9   :  { %p4218_p9 = scmp.ne.s32.totalorder %s4982_s18, %s4217_s1  ;;  %p4221_p10 = scmp.lt.u32.totalorder %s4217_s1, %s4982_s18 }
 0x7db   :  { %p4223_p11 = pnand %p4221_p10, %p4218_p9 }
 0x7dd   :  { %4226 = shalt.err (!%p4223_p11)
}
 0x7de   :  { %2877 = dma.vmem_to_hbm [thread:$0]  %s2872_s29, 256, %s4982_s18, [#allocation7], %s4992_s5, %s4992_s5, %s4252_s26  }
 0x7df   :  { %4247 = dma.done.wait [#allocation7], 256  }
 0x7e0   :  { %4248 = vsyncadd [#allocation7], 4294967040 }
 0x7e1   :  { %2881 = vsyncpa [#allocation6], 1 }
 0x7e2   :  { %2882 = vsyncpa [#allocation9], 1 }
 0x7e3   :  { %2883 = vsyncpa [#allocation12], 1 }
 0x7e4   :  { %2884 = vsyncpa [#allocation15], 1 }
 0x7e5   :  { %2885 = vsyncpa [#allocation18], 1 }
 0x7e6   :  { %2886 = vsyncpa [#allocation21], 1 }
 0x7e7   :  { %2887 = vsyncpa [#allocation24], 1 }
 0x7e8   :  { %2888 = vsyncpa [#allocation27], 1 }
 0x7e9   :  { %2889 = vsyncpa [#allocation30], 1 }
 0x7ea   :  { %2890 = vsyncpa [#allocation33], 1 }
 0x7eb   :  { %2891 = vsyncpa [#allocation7], 1 }

// kernel: _lambda_.7
= control target key start
LH: loop header
LB: loop body
LE: loop exit
PB: predicated region body
PF: predicated region fallthrough
CT: control target
= control target key end

     0   :  { %s5221_s0 = inlined_call_operand.hbm [shape: bf16[2,16,128], index: 0, kind: input, shape index: {}]   ;;  %s5222_s1 = inlined_call_operand.hbm [shape: bf16[128,128], index: 1, kind: input, shape index: {}]   ;;  %s5223_s2 = inlined_call_operand.hbm [shape: f32[1,128], index: 2, kind: input, shape index: {}]   ;;  %s5224_s3 = inlined_call_operand.hbm [shape: f32[1,128], index: 3, kind: input, shape index: {}]   ;;  %s5225_s4 = inlined_call_operand.hbm [shape: f32[15,128], index: 4, kind: input, shape index: {}]   ;;  %s5226_s5 = inlined_call_operand.hbm [shape: f32[1,128], index: 5, kind: input, shape index: {}]   ;;  %s5227_s6 = inlined_call_operand.hbm [shape: f32[1,128], index: 6, kind: input, shape index: {}]   ;;  %s5228_s7 = inlined_call_operand.hbm [shape: bf16[128,2], index: 7, kind: input, shape index: {}]   ;;  %s5229_s8 = inlined_call_operand.hbm [shape: f32[1,2], index: 8, kind: input, shape index: {}]   ;;  %s5230_s9 = inlined_call_operand.hbm [shape: bf16[2,128], index: 9, kind: input, shape index: {}]   ;;  %s5231_s10 = inlined_call_operand.hbm [shape: f32[1,128], index: 10, kind: input, shape index: {}]   ;;  %s5232_s11 = inlined_call_operand.hbm [shape: bf16[128,128], index: 11, kind: input, shape index: {}]   ;;  %s5233_s12 = inlined_call_operand.hbm [shape: f32[1,128], index: 12, kind: input, shape index: {}]   ;;  %s5234_s13 = inlined_call_operand.hbm [shape: f32[1,128], index: 13, kind: input, shape index: {}]   ;;  %s5235_s14 = inlined_call_operand.hbm [shape: bf16[5,128,128], index: 14, kind: input, shape index: {}]   ;;  %s5236_s15 = inlined_call_operand.hbm [shape: bf16[5,128,128], index: 15, kind: input, shape index: {}]   ;;  %s5237_s16 = inlined_call_operand.hbm [shape: f32[1,128], index: 16, kind: input, shape index: {}]   ;;  %s5238_s17 = inlined_call_operand.hbm [shape: f32[1,128], index: 17, kind: input, shape index: {}]   ;;  %s5239_s18 = inlined_call_operand.hbm [shape: bf16[128,128], index: 18, kind: input, shape index: {}]   ;;  %s5240_s19 = inlined_call_operand.hbm [shape: f32[1,128], index: 19, kind: input, shape index: {}]   ;;  %s5241_s20 = inlined_call_operand.hbm [shape: f32[2,16,128], index: 20, kind: output, shape index: {}]  }
   0x1   :  { %5251 = sst [smem:[#allocation50_spill]] %s5221_s0 }
   0x2   :  { %5252 = sst [smem:[#allocation51_spill]] %s5222_s1 }
   0x3   :  { %5253 = sst [smem:[#allocation52_spill]] %s5223_s2 }
   0x4   :  { %5254 = sst [smem:[#allocation53_spill]] %s5224_s3 }
   0x5   :  { %5255 = sst [smem:[#allocation54_spill]] %s5225_s4 }
   0x6   :  { %25 = vsyncpa [#allocation6], 0 }
   0x7   :  { %26 = vsyncpa [#allocation9], 0 }
   0x8   :  { %27 = vsyncpa [#allocation12], 0 }
   0x9   :  { %28 = vsyncpa [#allocation15], 0 }
   0xa   :  { %29 = vsyncpa [#allocation18], 0 }
   0xb   :  { %30 = vsyncpa [#allocation21], 0 }
   0xc   :  { %31 = vsyncpa [#allocation24], 0 }
   0xd   :  { %32 = vsyncpa [#allocation27], 0 }
   0xe   :  { %33 = vsyncpa [#allocation30], 0 }
   0xf   :  { %34 = vsyncpa [#allocation33], 0 }
  0x10   :  { %35 = vsyncpa [#allocation36], 0 }
  0x11   :  { %36 = vsyncpa [#allocation7], 0  ;;  %s4463_s1 = smov [#allocation8]   ;;  %s4464_s23 = smov [#allocation11]  }
  0x12   :  { %s54_s22 = sshll.u32 %s4463_s1, 4  ;;  %s77_s24 = sshll.u32 %s4464_s23, 4  ;;  %s55_s22 = int_to_ptr.vmem [resolvable:$true] %s54_s22  ;;  %s4599_s24 = int_to_ptr.vmem [resolvable:$true] %s77_s24 }
  0x13   :  { %s5256_s3 = sld [smem:[#allocation51_spill]] }
  0x19   :  { %s3977_s26 = scalar_lea.hbm %s5256_s3, 1024 }
  0x1a   :  { %p3978_p0 = scmp.ne.s32.totalorder %s5256_s3, %s3977_s26  ;;  %p3981_p1 = scmp.lt.u32.totalorder %s3977_s26, %s5256_s3 }
  0x1c   :  { %p3983_p2 = pnand %p3981_p1, %p3978_p0 }
  0x1e   :  { %3986 = shalt.err (!%p3983_p2)
}
  0x1f   :  { %s3987_s30 = scalar_lea.vmem %s55_s22, 1024  ;;  %p3992_p4 = scmp.lt.s32.totalorder %s55_s22, %s55_s22 }
  0x20   :  { %p3988_p3 = scmp.ne.s32.totalorder %s55_s22, %s3987_s30  ;;  %p3993_p5 = scmp.lt.s32.totalorder %s3987_s30, %s3987_s30 }
  0x22   :  { %p3994_p6 = por %p3993_p5, %p3992_p4 }
  0x24   :  { %p3995_p7 = pnand %p3994_p6, %p3988_p3 }
  0x26   :  { %3998 = shalt.err (!%p3995_p7)
}
  0x27   :  { %s5247_s0 = smov 64   ;;  %s5249_s21 = smov 4  }
  0x28   :  { %60 = dma.hbm_to_vmem [thread:$0]  %s5256_s3, 1024, %s55_s22, [#allocation9], %s5247_s0, %s5247_s0, %s5249_s21  }
  0x29   :  { %s5257_s26 = sld [smem:[#allocation53_spill]] }
  0x2f   :  { %s3999_s27 = scalar_lea.hbm %s5257_s26, 16 }
  0x30   :  { %p4000_p8 = scmp.ne.s32.totalorder %s5257_s26, %s3999_s27  ;;  %p4003_p9 = scmp.lt.u32.totalorder %s3999_s27, %s5257_s26 }
  0x32   :  { %p4005_p10 = pnand %p4003_p9, %p4000_p8 }
  0x34   :  { %4008 = shalt.err (!%p4005_p10)
}
  0x35   :  { %s4009_s1 = scalar_lea.vmem %s4599_s24, 16  ;;  %s4013_s22 = scalar_lea.vmem %s4599_s24, 32 }
  0x36   :  { %p4010_p11 = scmp.ne.s32.totalorder %s4599_s24, %s4009_s1  ;;  %p4014_p12 = scmp.lt.s32.totalorder %s4599_s24, %s4599_s24 }
  0x37   :  { %p4015_p13 = scmp.lt.s32.totalorder %s4013_s22, %s4009_s1 }
  0x39   :  { %p4016_p0 = por %p4015_p13, %p4014_p12 }
  0x3b   :  { %p4017_p1 = pnand %p4016_p0, %p4010_p11 }
  0x3d   :  { %4020 = shalt.err (!%p4017_p1)
}
  0x3e   :  { %80 = dma.hbm_to_vmem [thread:$0]  %s5257_s26, 16, %s4599_s24, [#allocation12]  }
  0x3f   :  { %s4467_s2 = smov [#allocation14]   ;;  %s4468_s27 = smov [#allocation17]  }
  0x40   :  { %s99_s25 = sshll.u32 %s4467_s2, 4  ;;  %s118_s28 = sshll.u32 %s4468_s27, 4  ;;  %s100_s25 = int_to_ptr.vmem [resolvable:$true] %s99_s25  ;;  %s4634_s28 = int_to_ptr.vmem [resolvable:$true] %s118_s28 }
  0x41   :  { %s4021_s30 = scalar_lea.hbm %s5226_s5, 16 }
  0x42   :  { %p4022_p2 = scmp.ne.s32.totalorder %s5226_s5, %s4021_s30  ;;  %p4025_p3 = scmp.lt.u32.totalorder %s4021_s30, %s5226_s5 }
  0x44   :  { %p4027_p4 = pnand %p4025_p3, %p4022_p2 }
  0x46   :  { %4030 = shalt.err (!%p4027_p4)
}
  0x47   :  { %s4031_s24 = scalar_lea.vmem %s100_s25, 16  ;;  %s4035_s26 = scalar_lea.vmem %s100_s25, 32 }
  0x48   :  { %p4032_p5 = scmp.ne.s32.totalorder %s100_s25, %s4031_s24  ;;  %p4036_p6 = scmp.lt.s32.totalorder %s100_s25, %s100_s25 }
  0x49   :  { %p4037_p7 = scmp.lt.s32.totalorder %s4035_s26, %s4031_s24 }
  0x4b   :  { %p4038_p8 = por %p4037_p7, %p4036_p6 }
  0x4d   :  { %p4039_p9 = pnand %p4038_p8, %p4032_p5 }
  0x4f   :  { %4042 = shalt.err (!%p4039_p9)
}
  0x50   :  { %102 = dma.hbm_to_vmem [thread:$0]  %s5226_s5, 16, %s100_s25, [#allocation15]  }
  0x51   :  { %s4043_s4 = scalar_lea.hbm %s5228_s7, 1024 }
  0x52   :  { %p4044_p10 = scmp.ne.s32.totalorder %s5228_s7, %s4043_s4  ;;  %p4047_p11 = scmp.lt.u32.totalorder %s4043_s4, %s5228_s7 }
  0x54   :  { %p4049_p12 = pnand %p4047_p11, %p4044_p10 }
  0x56   :  { %4052 = shalt.err (!%p4049_p12)
}
  0x57   :  { %s4053_s1 = scalar_lea.vmem %s4634_s28, 1024  ;;  %p4058_p0 = scmp.lt.s32.totalorder %s4634_s28, %s4634_s28 }
  0x58   :  { %p4054_p13 = scmp.ne.s32.totalorder %s4634_s28, %s4053_s1  ;;  %p4059_p1 = scmp.lt.s32.totalorder %s4053_s1, %s4053_s1 }
  0x5a   :  { %p4060_p2 = por %p4059_p1, %p4058_p0 }
  0x5c   :  { %p4061_p3 = pnand %p4060_p2, %p4054_p13 }
  0x5e   :  { %4064 = shalt.err (!%p4061_p3)
}
  0x5f   :  { %s5258_s5 = smov 4   ;;  %s5259_s25 = smov 64  }
  0x60   :  { %124 = dma.hbm_to_vmem [thread:$0]  %s5228_s7, 1024, %s4634_s28, [#allocation18], %s5259_s25, %s5259_s25, %s5258_s5  }
  0x61   :  { %s4469_s26 = smov [#allocation20]   ;;  %s4470_s23 = smov [#allocation23]  }
  0x62   :  { %s141_s3 = sshll.u32 %s4469_s26, 4  ;;  %s160_s2 = sshll.u32 %s4470_s23, 4  ;;  %s142_s3 = int_to_ptr.vmem [resolvable:$true] %s141_s3  ;;  %s4668_s2 = int_to_ptr.vmem [resolvable:$true] %s160_s2 }
  0x63   :  { %s4065_s0 = scalar_lea.hbm %s5230_s9, 16 }
  0x64   :  { %p4066_p4 = scmp.ne.s32.totalorder %s5230_s9, %s4065_s0  ;;  %p4069_p5 = scmp.lt.u32.totalorder %s4065_s0, %s5230_s9 }
  0x66   :  { %p4071_p6 = pnand %p4069_p5, %p4066_p4 }
  0x68   :  { %4074 = shalt.err (!%p4071_p6)
}
  0x69   :  { %s4075_s7 = scalar_lea.vmem %s142_s3, 16  ;;  %s4079_s28 = scalar_lea.vmem %s142_s3, 32 }
  0x6a   :  { %p4076_p7 = scmp.ne.s32.totalorder %s142_s3, %s4075_s7  ;;  %p4080_p8 = scmp.lt.s32.totalorder %s142_s3, %s142_s3 }
  0x6b   :  { %p4081_p9 = scmp.lt.s32.totalorder %s4079_s28, %s4075_s7 }
  0x6d   :  { %p4082_p10 = por %p4081_p9, %p4080_p8 }
  0x6f   :  { %p4083_p11 = pnand %p4082_p10, %p4076_p7 }
  0x71   :  { %4086 = shalt.err (!%p4083_p11)
}
  0x72   :  { %144 = dma.hbm_to_vmem [thread:$0]  %s5230_s9, 16, %s142_s3, [#allocation21]  }
  0x73   :  { %s4087_s27 = scalar_lea.hbm %s5232_s11, 1024 }
  0x74   :  { %p4088_p12 = scmp.ne.s32.totalorder %s5232_s11, %s4087_s27  ;;  %p4091_p13 = scmp.lt.u32.totalorder %s4087_s27, %s5232_s11 }
  0x76   :  { %p4093_p0 = pnand %p4091_p13, %p4088_p12 }
  0x78   :  { %4096 = shalt.err (!%p4093_p0)
}
  0x79   :  { %s4097_s30 = scalar_lea.vmem %s4668_s2, 1024  ;;  %p4102_p2 = scmp.lt.s32.totalorder %s4668_s2, %s4668_s2 }
  0x7a   :  { %p4098_p1 = scmp.ne.s32.totalorder %s4668_s2, %s4097_s30  ;;  %p4103_p3 = scmp.lt.s32.totalorder %s4097_s30, %s4097_s30 }
  0x7c   :  { %p4104_p4 = por %p4103_p3, %p4102_p2 }
  0x7e   :  { %p4105_p5 = pnand %p4104_p4, %p4098_p1 }
  0x80   :  { %4108 = shalt.err (!%p4105_p5)
}
  0x81   :  { %166 = dma.hbm_to_vmem [thread:$0]  %s5232_s11, 1024, %s4668_s2, [#allocation24], %s5259_s25, %s5259_s25, %s5258_s5  }
  0x82   :  { %s4471_s1 = smov [#allocation26]   ;;  %s4472_s28 = smov [#allocation29]  }
  0x83   :  { %s183_s7 = sshll.u32 %s4471_s1, 4  ;;  %s204_s22 = sshll.u32 %s4472_s28, 4  ;;  %s184_s7 = int_to_ptr.vmem [resolvable:$true] %s183_s7  ;;  %s4702_s22 = int_to_ptr.vmem [resolvable:$true] %s204_s22 }
  0x84   :  { %s4109_s23 = scalar_lea.hbm %s5234_s13, 16 }
  0x85   :  { %p4110_p6 = scmp.ne.s32.totalorder %s5234_s13, %s4109_s23  ;;  %p4113_p7 = scmp.lt.u32.totalorder %s4109_s23, %s5234_s13 }
  0x87   :  { %p4115_p8 = pnand %p4113_p7, %p4110_p6 }
  0x89   :  { %4118 = shalt.err (!%p4115_p8)
}
  0x8a   :  { %s4119_s11 = scalar_lea.vmem %s184_s7, 16  ;;  %s4123_s2 = scalar_lea.vmem %s184_s7, 32 }
  0x8b   :  { %p4120_p9 = scmp.ne.s32.totalorder %s184_s7, %s4119_s11  ;;  %p4124_p10 = scmp.lt.s32.totalorder %s184_s7, %s184_s7 }
  0x8c   :  { %p4125_p11 = scmp.lt.s32.totalorder %s4123_s2, %s4119_s11 }
  0x8e   :  { %p4126_p12 = por %p4125_p11, %p4124_p10 }
  0x90   :  { %p4127_p13 = pnand %p4126_p12, %p4120_p9 }
  0x92   :  { %4130 = shalt.err (!%p4127_p13)
}
  0x93   :  { %186 = dma.hbm_to_vmem [thread:$0]  %s5234_s13, 16, %s184_s7, [#allocation27]  }
  0x94   :  { %s4131_s1 = scalar_lea.hbm %s5236_s15, 5120 }
  0x95   :  { %p4132_p0 = scmp.ne.s32.totalorder %s5236_s15, %s4131_s1  ;;  %p4135_p1 = scmp.lt.u32.totalorder %s4131_s1, %s5236_s15 }
  0x97   :  { %p4137_p2 = pnand %p4135_p1, %p4132_p0 }
  0x99   :  { %4140 = shalt.err (!%p4137_p2)
}
  0x9a   :  { %s4141_s27 = scalar_lea.vmem %s4702_s22, 5120  ;;  %p4146_p4 = scmp.lt.s32.totalorder %s4702_s22, %s4702_s22 }
  0x9b   :  { %p4142_p3 = scmp.ne.s32.totalorder %s4702_s22, %s4141_s27  ;;  %p4147_p5 = scmp.lt.s32.totalorder %s4141_s27, %s4141_s27 }
  0x9d   :  { %p4148_p6 = por %p4147_p5, %p4146_p4 }
  0x9f   :  { %p4149_p7 = pnand %p4148_p6, %p4142_p3 }
  0xa1   :  { %4152 = shalt.err (!%p4149_p7)
}
  0xa2   :  { %210 = dma.hbm_to_vmem [thread:$0]  %s5236_s15, 5120, %s4702_s22, [#allocation30], %s5259_s25, %s5259_s25, %s5258_s5  }
  0xa3   :  { %s4473_s4 = smov [#allocation32]   ;;  %s4474_s21 = smov [#allocation5]  }
  0xa4   :  { %s227_s0 = sshll.u32 %s4473_s4, 4  ;;  %s42_s11 = sshll.u32 %s4474_s21, 4  ;;  %s228_s0 = int_to_ptr.vmem [resolvable:$true] %s227_s0  ;;  %s4736_s11 = int_to_ptr.vmem [resolvable:$true] %s42_s11 }
  0xa5   :  { %s4153_s30 = scalar_lea.hbm %s5238_s17, 16 }
  0xa6   :  { %p4154_p8 = scmp.ne.s32.totalorder %s5238_s17, %s4153_s30  ;;  %p4157_p9 = scmp.lt.u32.totalorder %s4153_s30, %s5238_s17 }
  0xa8   :  { %p4159_p10 = pnand %p4157_p9, %p4154_p8 }
  0xaa   :  { %4162 = shalt.err (!%p4159_p10)
}
  0xab   :  { %s4163_s15 = scalar_lea.vmem %s228_s0, 16  ;;  %s4167_s22 = scalar_lea.vmem %s228_s0, 32 }
  0xac   :  { %p4164_p11 = scmp.ne.s32.totalorder %s228_s0, %s4163_s15  ;;  %p4168_p12 = scmp.lt.s32.totalorder %s228_s0, %s228_s0 }
  0xad   :  { %p4169_p13 = scmp.lt.s32.totalorder %s4167_s22, %s4163_s15 }
  0xaf   :  { %p4170_p0 = por %p4169_p13, %p4168_p12 }
  0xb1   :  { %p4171_p1 = pnand %p4170_p0, %p4164_p11 }
  0xb3   :  { %4174 = shalt.err (!%p4171_p1)
}
  0xb4   :  { %230 = dma.hbm_to_vmem [thread:$0]  %s5238_s17, 16, %s228_s0, [#allocation33]  }
  0xb5   :  { %s5260_s13 = sld [smem:[#allocation50_spill]] }
  0xbb   :  { %s4175_s7 = scalar_lea.hbm %s5260_s13, 256 }
  0xbc   :  { %p4176_p2 = scmp.ne.s32.totalorder %s5260_s13, %s4175_s7  ;;  %p4179_p3 = scmp.lt.u32.totalorder %s4175_s7, %s5260_s13 }
  0xbe   :  { %p4181_p4 = pnand %p4179_p3, %p4176_p2 }
  0xc0   :  { %4184 = shalt.err (!%p4181_p4)
}
  0xc1   :  { %s4185_s30 = scalar_lea.vmem %s4736_s11, 256  ;;  %p4190_p6 = scmp.lt.s32.totalorder %s4736_s11, %s4736_s11 }
  0xc2   :  { %p4186_p5 = scmp.ne.s32.totalorder %s4736_s11, %s4185_s30  ;;  %p4191_p7 = scmp.lt.s32.totalorder %s4185_s30, %s4185_s30 }
  0xc4   :  { %p4192_p8 = por %p4191_p7, %p4190_p6 }
  0xc6   :  { %p4193_p9 = pnand %p4192_p8, %p4186_p5 }
  0xc8   :  { %4196 = shalt.err (!%p4193_p9)
}
  0xc9   :  { %48 = dma.hbm_to_vmem [thread:$0]  %s5260_s13, 256, %s4736_s11, [#allocation6], %s5259_s25, %s5259_s25, %s5258_s5  }
  0xca   :  { %s4475_s9 = smov [#allocation10]   ;;  %s4476_s1 = smov [#allocation13]  }
  0xcb   :  { %s67_s3 = sshll.u32 %s4475_s9, 4  ;;  %s86_s28 = sshll.u32 %s4476_s1, 4  ;;  %s68_s3 = int_to_ptr.vmem [resolvable:$true] %s67_s3  ;;  %s4770_s28 = int_to_ptr.vmem [resolvable:$true] %s86_s28 }
  0xcc   :  { %s5261_s24 = sld [smem:[#allocation52_spill]] }
  0xd2   :  { %s4197_s26 = scalar_lea.hbm %s5261_s24, 16 }
  0xd3   :  { %p4198_p10 = scmp.ne.s32.totalorder %s5261_s24, %s4197_s26  ;;  %p4201_p11 = scmp.lt.u32.totalorder %s4197_s26, %s5261_s24 }
  0xd5   :  { %p4203_p12 = pnand %p4201_p11, %p4198_p10 }
  0xd7   :  { %4206 = shalt.err (!%p4203_p12)
}
  0xd8   :  { %s4207_s11 = scalar_lea.vmem %s68_s3, 16  ;;  %s4211_s13 = scalar_lea.vmem %s68_s3, 32 }
  0xd9   :  { %p4208_p13 = scmp.ne.s32.totalorder %s68_s3, %s4207_s11  ;;  %p4212_p0 = scmp.lt.s32.totalorder %s68_s3, %s68_s3 }
  0xda   :  { %p4213_p1 = scmp.lt.s32.totalorder %s4211_s13, %s4207_s11 }
  0xdc   :  { %p4214_p2 = por %p4213_p1, %p4212_p0 }
  0xde   :  { %p4215_p3 = pnand %p4214_p2, %p4208_p13 }
  0xe0   :  { %4218 = shalt.err (!%p4215_p3)
}
  0xe1   :  { %70 = dma.hbm_to_vmem [thread:$0]  %s5261_s24, 16, %s68_s3, [#allocation9]  }
  0xe2   :  { %s5262_s17 = sld [smem:[#allocation54_spill]] }
  0xe8   :  { %s4219_s0 = scalar_lea.hbm %s5262_s17, 256 }
  0xe9   :  { %p4220_p4 = scmp.ne.s32.totalorder %s5262_s17, %s4219_s0  ;;  %p4223_p5 = scmp.lt.u32.totalorder %s4219_s0, %s5262_s17 }
  0xeb   :  { %p4225_p6 = pnand %p4223_p5, %p4220_p4 }
  0xed   :  { %4228 = shalt.err (!%p4225_p6)
}
  0xee   :  { %s4229_s26 = scalar_lea.vmem %s4770_s28, 256  ;;  %p4234_p8 = scmp.lt.s32.totalorder %s4770_s28, %s4770_s28 }
  0xef   :  { %p4230_p7 = scmp.ne.s32.totalorder %s4770_s28, %s4229_s26  ;;  %p4235_p9 = scmp.lt.s32.totalorder %s4229_s26, %s4229_s26 }
  0xf1   :  { %p4236_p10 = por %p4235_p9, %p4234_p8 }
  0xf3   :  { %p4237_p11 = pnand %p4236_p10, %p4230_p7 }
  0xf5   :  { %4240 = shalt.err (!%p4237_p11)
}
  0xf6   :  { %s4477_s3 = smov 128   ;;  %s4478_s24 = smov 8  }
  0xf7   :  { %92 = dma.hbm_to_vmem [thread:$0]  %s5262_s17, 256, %s4770_s28, [#allocation12], %s4477_s3, %s4477_s3, %s4478_s24  }
  0xf8   :  { %s4479_s7 = smov [#allocation16]   ;;  %s4480_s11 = smov [#allocation19]  }
  0xf9   :  { %s109_s4 = sshll.u32 %s4479_s7, 4  ;;  %s131_s13 = sshll.u32 %s4480_s11, 4  ;;  %s110_s4 = int_to_ptr.vmem [resolvable:$true] %s109_s4  ;;  %s132_s13 = int_to_ptr.vmem [resolvable:$true] %s131_s13 }
  0xfa   :  { %s4241_s29 = scalar_lea.hbm %s5227_s6, 16 }
  0xfb   :  { %p4242_p12 = scmp.ne.s32.totalorder %s5227_s6, %s4241_s29  ;;  %p4245_p13 = scmp.lt.u32.totalorder %s4241_s29, %s5227_s6 }
  0xfd   :  { %p4247_p0 = pnand %p4245_p13, %p4242_p12 }
  0xff   :  { %4250 = shalt.err (!%p4247_p0)
}
 0x100   :  { %s4251_s28 = scalar_lea.vmem %s110_s4, 16  ;;  %s4255_s17 = scalar_lea.vmem %s110_s4, 32 }
 0x101   :  { %p4252_p1 = scmp.ne.s32.totalorder %s110_s4, %s4251_s28  ;;  %p4256_p2 = scmp.lt.s32.totalorder %s110_s4, %s110_s4 }
 0x102   :  { %p4257_p3 = scmp.lt.s32.totalorder %s4255_s17, %s4251_s28 }
 0x104   :  { %p4258_p4 = por %p4257_p3, %p4256_p2 }
 0x106   :  { %p4259_p5 = pnand %p4258_p4, %p4252_p1 }
 0x108   :  { %4262 = shalt.err (!%p4259_p5)
}
 0x109   :  { %112 = dma.hbm_to_vmem [thread:$0]  %s5227_s6, 16, %s110_s4, [#allocation15]  }
 0x10a   :  { %s4263_s27 = scalar_lea.hbm %s5229_s8, 16 }
 0x10b   :  { %p4264_p6 = scmp.ne.s32.totalorder %s5229_s8, %s4263_s27  ;;  %p4267_p7 = scmp.lt.u32.totalorder %s4263_s27, %s5229_s8 }
 0x10d   :  { %p4269_p8 = pnand %p4267_p7, %p4264_p6 }
 0x10f   :  { %4272 = shalt.err (!%p4269_p8)
}
 0x110   :  { %s4273_s29 = scalar_lea.vmem %s132_s13, 16  ;;  %s4277_s30 = scalar_lea.vmem %s132_s13, 32 }
 0x111   :  { %p4274_p9 = scmp.ne.s32.totalorder %s132_s13, %s4273_s29  ;;  %p4278_p10 = scmp.lt.s32.totalorder %s132_s13, %s132_s13 }
 0x112   :  { %p4279_p11 = scmp.lt.s32.totalorder %s4277_s30, %s4273_s29 }
 0x114   :  { %p4280_p12 = por %p4279_p11, %p4278_p10 }
 0x116   :  { %p4281_p13 = pnand %p4280_p12, %p4274_p9 }
 0x118   :  { %4284 = shalt.err (!%p4281_p13)
}
 0x119   :  { %134 = dma.hbm_to_vmem [thread:$0]  %s5229_s8, 16, %s132_s13, [#allocation18]  }
 0x11a   :  { %s4481_s0 = smov [#allocation22]   ;;  %s4482_s1 = smov [#allocation25]  }
 0x11b   :  { %s151_s9 = sshll.u32 %s4481_s0, 4  ;;  %s173_s28 = sshll.u32 %s4482_s1, 4  ;;  %s152_s9 = int_to_ptr.vmem [resolvable:$true] %s151_s9  ;;  %s174_s28 = int_to_ptr.vmem [resolvable:$true] %s173_s28 }
 0x11c   :  { %s4285_s22 = scalar_lea.hbm %s5231_s10, 16 }
 0x11d   :  { %p4286_p0 = scmp.ne.s32.totalorder %s5231_s10, %s4285_s22  ;;  %p4289_p1 = scmp.lt.u32.totalorder %s4285_s22, %s5231_s10 }
 0x11f   :  { %p4291_p2 = pnand %p4289_p1, %p4286_p0 }
 0x121   :  { %4294 = shalt.err (!%p4291_p2)
}
 0x122   :  { %s4295_s8 = scalar_lea.vmem %s152_s9, 16  ;;  %s4299_s13 = scalar_lea.vmem %s152_s9, 32 }
 0x123   :  { %p4296_p3 = scmp.ne.s32.totalorder %s152_s9, %s4295_s8  ;;  %p4300_p4 = scmp.lt.s32.totalorder %s152_s9, %s152_s9 }
 0x124   :  { %p4301_p5 = scmp.lt.s32.totalorder %s4299_s13, %s4295_s8 }
 0x126   :  { %p4302_p6 = por %p4301_p5, %p4300_p4 }
 0x128   :  { %p4303_p7 = pnand %p4302_p6, %p4296_p3 }
 0x12a   :  { %4306 = shalt.err (!%p4303_p7)
}
 0x12b   :  { %154 = dma.hbm_to_vmem [thread:$0]  %s5231_s10, 16, %s152_s9, [#allocation21]  }
 0x12c   :  { %s4307_s30 = scalar_lea.hbm %s5233_s12, 16 }
 0x12d   :  { %p4308_p8 = scmp.ne.s32.totalorder %s5233_s12, %s4307_s30  ;;  %p4311_p9 = scmp.lt.u32.totalorder %s4307_s30, %s5233_s12 }
 0x12f   :  { %p4313_p10 = pnand %p4311_p9, %p4308_p8 }
 0x131   :  { %4316 = shalt.err (!%p4313_p10)
}
 0x132   :  { %s4317_s17 = scalar_lea.vmem %s174_s28, 16  ;;  %s4321_s15 = scalar_lea.vmem %s174_s28, 32 }
 0x133   :  { %p4318_p11 = scmp.ne.s32.totalorder %s174_s28, %s4317_s17  ;;  %p4322_p12 = scmp.lt.s32.totalorder %s174_s28, %s174_s28 }
 0x134   :  { %p4323_p13 = scmp.lt.s32.totalorder %s4321_s15, %s4317_s17 }
 0x136   :  { %p4324_p0 = por %p4323_p13, %p4322_p12 }
 0x138   :  { %p4325_p1 = pnand %p4324_p0, %p4318_p11 }
 0x13a   :  { %4328 = shalt.err (!%p4325_p1)
}
 0x13b   :  { %176 = dma.hbm_to_vmem [thread:$0]  %s5233_s12, 16, %s174_s28, [#allocation24]  }
 0x13c   :  { %s4483_s22 = smov [#allocation28]   ;;  %s4484_s23 = smov [#allocation31]  }
 0x13d   :  { %s192_s26 = sshll.u32 %s4483_s22, 4  ;;  %s217_s27 = sshll.u32 %s4484_s23, 4  ;;  %s193_s26 = int_to_ptr.vmem [resolvable:$true] %s192_s26  ;;  %s218_s27 = int_to_ptr.vmem [resolvable:$true] %s217_s27 }
 0x13e   :  { %s4329_s13 = scalar_lea.hbm %s5235_s14, 5120 }
 0x13f   :  { %p4330_p2 = scmp.ne.s32.totalorder %s5235_s14, %s4329_s13  ;;  %p4333_p3 = scmp.lt.u32.totalorder %s4329_s13, %s5235_s14 }
 0x141   :  { %p4335_p4 = pnand %p4333_p3, %p4330_p2 }
 0x143   :  { %4338 = shalt.err (!%p4335_p4)
}
 0x144   :  { %s4339_s12 = scalar_lea.vmem %s193_s26, 5120  ;;  %p4344_p6 = scmp.lt.s32.totalorder %s193_s26, %s193_s26 }
 0x145   :  { %p4340_p5 = scmp.ne.s32.totalorder %s193_s26, %s4339_s12  ;;  %p4345_p7 = scmp.lt.s32.totalorder %s4339_s12, %s4339_s12 }
 0x147   :  { %p4346_p8 = por %p4345_p7, %p4344_p6 }
 0x149   :  { %p4347_p9 = pnand %p4346_p8, %p4340_p5 }
 0x14b   :  { %4350 = shalt.err (!%p4347_p9)
}
 0x14c   :  { %198 = dma.hbm_to_vmem [thread:$0]  %s5235_s14, 5120, %s193_s26, [#allocation27], %s5259_s25, %s5259_s25, %s5258_s5  }
 0x14d   :  { %s4351_s0 = scalar_lea.hbm %s5237_s16, 16 }
 0x14e   :  { %p4352_p10 = scmp.ne.s32.totalorder %s5237_s16, %s4351_s0  ;;  %p4355_p11 = scmp.lt.u32.totalorder %s4351_s0, %s5237_s16 }
 0x150   :  { %p4357_p12 = pnand %p4355_p11, %p4352_p10 }
 0x152   :  { %4360 = shalt.err (!%p4357_p12)
}
 0x153   :  { %s4361_s9 = scalar_lea.vmem %s218_s27, 16  ;;  %s4365_s22 = scalar_lea.vmem %s218_s27, 32 }
 0x154   :  { %p4362_p13 = scmp.ne.s32.totalorder %s218_s27, %s4361_s9  ;;  %p4366_p0 = scmp.lt.s32.totalorder %s218_s27, %s218_s27 }
 0x155   :  { %p4367_p1 = scmp.lt.s32.totalorder %s4365_s22, %s4361_s9 }
 0x157   :  { %p4368_p2 = por %p4367_p1, %p4366_p0 }
 0x159   :  { %p4369_p3 = pnand %p4368_p2, %p4362_p13 }
 0x15b   :  { %4372 = shalt.err (!%p4369_p3)
}
 0x15c   :  { %220 = dma.hbm_to_vmem [thread:$0]  %s5237_s16, 16, %s218_s27, [#allocation30]  }
 0x15d   :  { %s4485_s23 = smov [#allocation34]   ;;  %s4486_s8 = smov [#allocation35]  }
 0x15e   :  { %s236_s7 = sshll.u32 %s4485_s23, 4  ;;  %s249_s13 = sshll.u32 %s4486_s8, 4  ;;  %s237_s7 = int_to_ptr.vmem [resolvable:$true] %s236_s7  ;;  %s250_s13 = int_to_ptr.vmem [resolvable:$true] %s249_s13 }
 0x15f   :  { %s4373_s2 = scalar_lea.hbm %s5239_s18, 1024 }
 0x160   :  { %p4374_p4 = scmp.ne.s32.totalorder %s5239_s18, %s4373_s2  ;;  %p4377_p5 = scmp.lt.u32.totalorder %s4373_s2, %s5239_s18 }
 0x162   :  { %p4379_p6 = pnand %p4377_p5, %p4374_p4 }
 0x164   :  { %4382 = shalt.err (!%p4379_p6)
}
 0x165   :  { %s4383_s16 = scalar_lea.vmem %s237_s7, 1024  ;;  %p4388_p8 = scmp.lt.s32.totalorder %s237_s7, %s237_s7 }
 0x166   :  { %p4384_p7 = scmp.ne.s32.totalorder %s237_s7, %s4383_s16  ;;  %p4389_p9 = scmp.lt.s32.totalorder %s4383_s16, %s4383_s16 }
 0x168   :  { %p4390_p10 = por %p4389_p9, %p4388_p8 }
 0x16a   :  { %p4391_p11 = pnand %p4390_p10, %p4384_p7 }
 0x16c   :  { %4394 = shalt.err (!%p4391_p11)
}
 0x16d   :  { %242 = dma.hbm_to_vmem [thread:$0]  %s5239_s18, 1024, %s237_s7, [#allocation33], %s5259_s25, %s5259_s25, %s5258_s5  }
 0x16e   :  { %s4395_s1 = scalar_lea.hbm %s5240_s19, 16 }
 0x16f   :  { %p4396_p12 = scmp.ne.s32.totalorder %s5240_s19, %s4395_s1  ;;  %p4399_p13 = scmp.lt.u32.totalorder %s4395_s1, %s5240_s19 }
 0x171   :  { %p4401_p0 = pnand %p4399_p13, %p4396_p12 }
 0x173   :  { %4404 = shalt.err (!%p4401_p0)
}
 0x174   :  { %s4405_s22 = scalar_lea.vmem %s250_s13, 16  ;;  %s4409_s14 = scalar_lea.vmem %s250_s13, 32 }
 0x175   :  { %p4406_p1 = scmp.ne.s32.totalorder %s250_s13, %s4405_s22  ;;  %p4410_p2 = scmp.lt.s32.totalorder %s250_s13, %s250_s13 }
 0x176   :  { %p4411_p3 = scmp.lt.s32.totalorder %s4409_s14, %s4405_s22 }
 0x178   :  { %p4412_p4 = por %p4411_p3, %p4410_p2 }
 0x17a   :  { %p4413_p5 = pnand %p4412_p4, %p4406_p1 }
 0x17c   :  { %4416 = shalt.err (!%p4413_p5)
}
 0x17d   :  { %252 = dma.hbm_to_vmem [thread:$0]  %s5240_s19, 16, %s250_s13, [#allocation36]  }
 0x17e   :  { %4439 = dma.done.wait [#allocation6], 256  }
 0x17f   :  { %4440 = vsyncadd [#allocation6], 4294967040 }
 0x180   :  { %4441 = dma.done.wait [#allocation9], 1040  }
 0x181   :  { %4442 = vsyncadd [#allocation9], 4294966256 }
 0x182   :  { %4443 = dma.done.wait [#allocation12], 272  }
 0x183   :  { %4444 = vsyncadd [#allocation12], 4294967024 }
 0x184   :  { %4445 = dma.done.wait [#allocation15], 32  }
 0x185   :  { %4446 = vsyncadd [#allocation15], 4294967264 }
 0x186   :  { %4447 = dma.done.wait [#allocation18], 1040  }
 0x187   :  { %4448 = vsyncadd [#allocation18], 4294966256 }
 0x188   :  { %4449 = dma.done.wait [#allocation21], 32  }
 0x189   :  { %4450 = vsyncadd [#allocation21], 4294967264 }
 0x18a   :  { %4451 = dma.done.wait [#allocation24], 1040  }
 0x18b   :  { %4452 = vsyncadd [#allocation24], 4294966256 }
 0x18c   :  { %4453 = dma.done.wait [#allocation27], 5136  }
 0x18d   :  { %4454 = vsyncadd [#allocation27], 4294962160 }
 0x18e   :  { %4455 = dma.done.wait [#allocation30], 5136  }
 0x18f   :  { %4456 = vsyncadd [#allocation30], 4294962160 }
 0x190   :  { %4457 = dma.done.wait [#allocation33], 1040  }
 0x191   :  { %4458 = vsyncadd [#allocation33], 4294966256 }
 0x192   :  { %4459 = dma.done.wait [#allocation36], 16  }
 0x193   :  { %4460 = vsyncadd [#allocation36], 4294967280  ;;  %v3787_v0 = vld [vmem:[#allocation8] sm:$0xff]   ;;  %v3788_v1 = vld [vmem:[#allocation8 + $0x8] sm:$0xff]   ;;  %v4487_v18 = vmov 0   ;;  %vm529_vm0 = vcmask 1044480  }
 0x194   :  { %3334 = vmatprep.subr.bf16.mxu1 %v3787_v0  ;;  %v3789_v2 = vld [vmem:[#allocation8 + $0x10] sm:$0xff]   ;;  %v3790_v3 = vld [vmem:[#allocation8 + $0x18] sm:$0xff]   ;;  %v3791_v12 = vld [vmem:[#allocation8 + $0x20] sm:$0xff]   ;;  %319 = vst [vmem:[#allocation2 + $0x10] sm:$0xf] %v4487_v18  ;;  %vm697_vm1 = vcmask 1043456  }
 0x195   :  { %3335 = vmatpush3.bf16.msra.mxu1 %v3787_v0  ;;  %v330_v4 = vld [vmem:[#allocation5] sm:$0xf]  ;;  %v331_v5 = vld [vmem:[#allocation5 + $0x4] sm:$0xf]  ;;  %v332_v6 = vld [vmem:[#allocation5 + $0x8] sm:$0xf] }
 0x196   :  { %3336 = vmatprep.subr.bf16.mxu1 %v3788_v1  ;;  %v3030_v7 = vcombine.low %v330_v4, %v331_v5  ;;  %v3094_v8 = vcombine.low %v330_v4, %v330_v4  ;;  %v3095_v9 = vcombine.low %v331_v5, %v331_v5  ;;  %v333_v10 = vld [vmem:[#allocation5 + $0xc] sm:$0xf]  ;;  %v3096_v11 = vcombine.low %v332_v6, %v332_v6  ;;  %v3792_v14 = vld [vmem:[#allocation8 + $0x28] sm:$0xff]   ;;  %v3793_v15 = vld [vmem:[#allocation8 + $0x30] sm:$0xff]   ;;  %s4488_s19 = smov 1   ;;  %s4489_s25 = smov 127  }
 0x197   :  { %v3097_v13 = vcombine.low %v333_v10, %v333_v10  ;;  %v3794_v16 = vld [vmem:[#allocation8 + $0x38] sm:$0xff]   ;;  %v3031_v17 = vcombine.low %v332_v6, %v333_v10  ;;  %318 = vst [vmem:[#allocation2] sm:$0xf] %v4487_v18  ;;  %320 = vst [vmem:[#allocation2 + $0x8] sm:$0xf0] %v4487_v18  ;;  %vm869_vm4 = vcmask 1042432  }
 0x198   :  { %3350 = vmatprep.mubr.bf16.mxu1 %v3030_v7  ;;  %1405 = vst [vmem:[#allocation3] sm:$0xf0] %v3094_v8  ;;  %1406 = vst [vmem:[#allocation3 + $0x8] sm:$0xf] %v3095_v9  ;;  %v3040_v19 = vld [vmem:[#allocation10] ss:$0 sm:$0xff] }
 0x199   :  { %3337 = vmatpush3.bf16.msra.mxu1 %v3788_v1  ;;  %1407 = vst [vmem:[#allocation3 + $0x10] sm:$0xf0] %v3096_v11  ;;  %1408 = vst [vmem:[#allocation3 + $0x18] sm:$0xf] %v3097_v13  ;;  %v3041_v21 = vld [vmem:[#allocation11] ss:$0 sm:$0xff] }
 0x19a   :  { %3338 = vmatprep.subr.bf16.mxu1 %v3789_v2  ;;  %321 = vst [vmem:[#allocation2 + $0x18] sm:$0xf0] %v4487_v18  ;;  %322 = vst [vmem:[#allocation3] sm:$0xf] %v4487_v18  ;;  %vm595_vm2 = vsmask.f32 4352 }
 0x19b   :  { %323 = vst [vmem:[#allocation3 + $0x10] sm:$0xf] %v4487_v18  ;;  %324 = vst [vmem:[#allocation3 + $0x8] sm:$0xf0] %v4487_v18  ;;  %vm767_vm3 = vsmask.f32 3328 }
 0x19c   :  { %325 = vst [vmem:[#allocation3 + $0x18] sm:$0xf0] %v4487_v18  ;;  %326 = vst [vmem:[#allocation4] sm:$0xf] %v4487_v18  ;;  %vm4491_vm5 = vmmov 0   ;;  %vm1033_vm6 = vcmask 1041409  }
 0x19d   :  { %3339 = vmatpush3.bf16.msra.mxu1 %v3789_v2  ;;  %327 = vst [vmem:[#allocation4 + $0x10] sm:$0xf] %v4487_v18  ;;  %328 = vst [vmem:[#allocation4 + $0x8] sm:$0xf0] %v4487_v18  ;;  %vm1145_vm7 = vcmask 1040384   ;;  %vm1141_vm8 = vcmask 15360  }
 0x19e   :  { %3340 = vmatprep.subr.bf16.mxu1 %v3790_v3  ;;  %329 = vst [vmem:[#allocation4 + $0x18] sm:$0xf0] %v4487_v18  ;;  %s4493_s26 = smov [#allocation37]  }
 0x19f   :  { %s3008_s23 = sshll.u32 %s4493_s26, 4  ;;  %s3009_s23 = int_to_ptr.vmem [resolvable:$true] %s3008_s23 }
 0x1a0   :  { %s4417_s7 = scalar_lea.vmem %s3009_s23, 512  ;;  %p4422_p7 = scmp.lt.s32.totalorder %s3009_s23, %s3009_s23 }
 0x1a1   :  { %3341 = vmatpush3.bf16.msra.mxu1 %v3790_v3  ;;  %p4418_p6 = scmp.ne.s32.totalorder %s3009_s23, %s4417_s7  ;;  %p4423_p8 = scmp.lt.s32.totalorder %s4417_s7, %s4417_s7 }
 0x1a2   :  { %3342 = vmatprep.subr.bf16.mxu1 %v3791_v12 }
 0x1a3   :  { %p4424_p9 = por %p4423_p8, %p4422_p7 }
 0x1a5   :  { %3343 = vmatpush3.bf16.msra.mxu1 %v3791_v12  ;;  %p4425_p10 = pnand %p4424_p9, %p4418_p6 }
 0x1a6   :  { %3344 = vmatprep.subr.bf16.mxu1 %v3792_v14 }
 0x1a9   :  { %3345 = vmatpush3.bf16.msra.mxu1 %v3792_v14 }
 0x1aa   :  { %3346 = vmatprep.subr.bf16.mxu1 %v3793_v15 }
 0x1ad   :  { %3347 = vmatpush3.bf16.msra.mxu1 %v3793_v15 }
 0x1ae   :  { %3348 = vmatprep.subr.bf16.mxu1 %v3794_v16 }
 0x1b1   :  { %3349 = vmatpush3.bf16.msra.mxu1 %v3794_v16 }
 0x1b4   :  { %3351 = vmatmul.mubr.bf16.vlgmr.msra.gmra.mrb[0].mxu1 %v3031_v17 }
 0x287   :  { %v3352_v20 = vpop.f32.mrb[0].mxu1 }
 0x288   :  { %v468_v22 = vmul.f32 %v3352_v20, %v3040_v19  ;;  %v444_v23 = vpop.f32.mrb[1].mxu1 }
 0x289   :  { %v466_v24 = vmul.f32 %v3040_v19, %v444_v23  ;;  %v3353_v25 = vpop.f32.mrb[2].mxu1 }
 0x28a   :  { %v479_v26 = vadd.f32 %v3041_v21, %v468_v22  ;;  %v469_v27 = vmul.f32 %v3353_v25, %v3040_v19  ;;  %v447_v28 = vpop.f32.mrb[3].mxu1 }
 0x28b   :  { %v477_v29 = vadd.f32 %v3041_v21, %v466_v24  ;;  %v467_v30 = vmul.f32 %v3040_v19, %v447_v28 }
 0x28c   :  { %v3044_v31 = vmul.f32 -1.442695, %v479_v26  ;;  %v480_v32 = vadd.f32 %v3041_v21, %v469_v27 }
 0x28d   :  { %v3042_v33 = vmul.f32 -1.442695, %v477_v29  ;;  %v478_v34 = vadd.f32 %v3041_v21, %v467_v30 }
 0x28e   :  { %3905 = vpow2.f32 %v3044_v31  ;;  %v3045_v35 = vmul.f32 -1.442695, %v480_v32 }
 0x28f   :  { %3907 = vpow2.f32 %v3042_v33  ;;  %v3043_v36 = vmul.f32 -1.442695, %v478_v34 }
 0x290   :  { %3909 = vpow2.f32 %v3045_v35 }
 0x291   :  { %3911 = vpow2.f32 %v3043_v36 }
 0x298   :  { %v3906_v37 = vpop.eup %3905 }
 0x299   :  { %v3908_v38 = vpop.eup %3907  ;;  %v495_v39 = vadd.f32 1.0, %v3906_v37 }
 0x29a   :  { %v3910_v40 = vpop.eup %3909  ;;  %v493_v41 = vadd.f32 1.0, %v3908_v38 }
 0x29b   :  { %v3912_v42 = vpop.eup %3911  ;;  %3913 = vrcp.f32 %v495_v39  ;;  %v496_v43 = vadd.f32 1.0, %v3910_v40 }
 0x29c   :  { %3915 = vrcp.f32 %v493_v41  ;;  %v494_v44 = vadd.f32 1.0, %v3912_v42 }
 0x29d   :  { %3917 = vrcp.f32 %v496_v43 }
 0x29e   :  { %3919 = vrcp.f32 %v494_v44 }
 0x2a5   :  { %v3914_v45 = vpop.eup %3913 }
 0x2a6   :  { %v3916_v46 = vpop.eup %3915  ;;  %v507_v49 = vmul.f32 %v3914_v45, %v479_v26 }
 0x2a7   :  { %v3918_v47 = vpop.eup %3917  ;;  %v505_v51 = vmul.f32 %v3916_v46, %v477_v29 }
 0x2a8   :  { %v3920_v48 = vpop.eup %3919  ;;  %v508_v50 = vmul.f32 %v3918_v47, %v480_v32 }
 0x2a9   :  { %v506_v52 = vmul.f32 %v3920_v48, %v478_v34 }
 0x2aa   :  { %v510_v53 = vpack.c.bf16 %v508_v50, %v507_v49 }
 0x2ab   :  { %v509_v54 = vpack.c.bf16 %v506_v52, %v505_v51 }
 0x2ac   :  { %v514_v55 = vrot.slane %v510_v53, 4 }
 0x2ad   :  { %v513_v56 = vrot.slane %v509_v54, 4 }
 0x2ae   :  { %519 = vst [vmem:[#allocation2 + $0x18] ss:$-4 sps:$4 sm:$0xff] %v514_v55  }
 0x2af   :  { %517 = vst [vmem:[#allocation2 + $0x8] ss:$-4 sps:$4 sm:$0xff] %v513_v56  }
 0x2b5   :  { %v523_v57 = vld [vmem:[#allocation2 + $0x10] sm:$0xf8]  ;;  %v524_v58 = vld [vmem:[#allocation2 + $0x18] sm:$0x7] }
 0x2b6   :  { %v594_v59 = vld [vmem:[#allocation2 + $0x18] sm:$0xf]  ;;  %v533_v60 = vrot.slane %v523_v57, 3  ;;  %v534_v61 = vrot.slane %v524_v58, 3  ;;  %v614_v62 = vshrl.u32 %v523_v57, 16  ;;  %v617_v63 = vshll.u32 %v523_v57, 16 }
 0x2b7   :  { %v692_v0 = vld [vmem:[#allocation2 + $0x10] sm:$0xf0]  ;;  %v702_v2 = vrot.slane %v594_v59, 4  ;;  %v521_v3 = vld [vmem:[#allocation2] sm:$0xf8]  ;;  %v622_v28 = vshrl.u32 %v594_v59, 16 }
 0x2b8   :  { %v701_v1 = vrot.slane %v692_v0, 4  ;;  %v522_v4 = vld [vmem:[#allocation2 + $0x8] sm:$0x7]  ;;  %v4907_v5 = vsel %vm529_vm0, %v533_v60, %v534_v61  ;;  %v530_v6 = vrot.slane %v521_v3, 3  ;;  %v4909_v9 = vld [vmem:[#allocation2] sm:$0xf0] }
 0x2b9   :  { %v531_v7 = vrot.slane %v522_v4, 3  ;;  %v593_v8 = vld [vmem:[#allocation2 + $0x8] sm:$0xf]  ;;  %v540_v10 = vunpack.c.l.bf16 %v4907_v5  ;;  %v541_v11 = vunpack.c.h.bf16 %v4907_v5  ;;  %v698_v13 = vrot.slane %v4909_v9, 4  ;;  %v4945_v34 = vld [vmem:[#allocation2 + $0x18] sm:$0x1f] }
 0x2ba   :  { %v4914_v12 = vsel %vm697_vm1, %v701_v1, %v702_v2  ;;  %v699_v17 = vrot.slane %v593_v8, 4  ;;  %v616_v22 = vrot.slane %v614_v62, 3  ;;  %v619_v23 = vrot.slane %v617_v63, 4 }
 0x2bb   :  { %v708_v14 = vunpack.c.l.bf16 %v4914_v12  ;;  %v709_v15 = vunpack.c.h.bf16 %v4914_v12  ;;  %v4920_v16 = vsel %vm529_vm0, %v530_v6, %v531_v7  ;;  %v3692_v18 = vpack.i.bf16 %v541_v11, %v540_v10 }
 0x2bc   :  { %v538_v19 = vunpack.c.l.bf16 %v4920_v16  ;;  %v539_v20 = vunpack.c.h.bf16 %v4920_v16  ;;  %v4929_v21 = vsel %vm697_vm1, %v698_v13, %v699_v17  ;;  %v625_v29 = vshll.u32 %v594_v59, 16  ;;  %v765_v59 = vld [vmem:[#allocation2 + $0x8] sm:$0x1f]  ;;  %v3056_v16 = vld [vmem:[#allocation13 + $0xa] ss:$0 sm:$0xff] }
 0x2bd   :  { %3693 = vrot.lane.b32.xlu1 %v3692_v18, %s4488_s19  ;;  %3688 = vrot.lane.b32.xlu0 %v3692_v18, %s4489_s25  ;;  %v4937_v24 = vpack.i.bf16 %v709_v15, %v708_v14  ;;  %v706_v25 = vunpack.c.l.bf16 %v4929_v21  ;;  %v707_v26 = vunpack.c.h.bf16 %v4929_v21  ;;  %v597_v30 = vshrl.u32 %v521_v3, 16 }
 0x2be   :  { %v3702_v27 = vpack.i.bf16 %v539_v20, %v538_v19  ;;  %v600_v31 = vshll.u32 %v521_v3, 16  ;;  %v605_v32 = vshrl.u32 %v593_v8, 16  ;;  %v608_v33 = vshll.u32 %v593_v8, 16 }
 0x2bf   :  { %v620_v35 = vor.u32 %v619_v23, %v616_v22  ;;  %v624_v36 = vrot.slane %v622_v28, 3  ;;  %v627_v37 = vrot.slane %v625_v29, 4  ;;  %v599_v38 = vrot.slane %v597_v30, 3  ;;  %v864_v22 = vld [vmem:[#allocation2 + $0x10] sm:$0xe0] }
 0x2c0   :  { %v3712_v39 = vpack.i.bf16 %v707_v26, %v706_v25  ;;  %v602_v40 = vrot.slane %v600_v31, 4  ;;  %v607_v41 = vrot.slane %v605_v32, 3  ;;  %v610_v42 = vrot.slane %v608_v33, 4 }
 0x2c1   :  { %3698 = vrot.lane.b32.xlu1 %v4937_v24, %s4489_s25  ;;  %3703 = vrot.lane.b32.xlu0 %v3702_v27, %s4489_s25  ;;  %v628_v43 = vor.u32 %v627_v37, %v624_v36  ;;  %v786_v44 = vshrl.u32 %v692_v0, 16  ;;  %v789_v45 = vshll.u32 %v692_v0, 16  ;;  %v794_v46 = vshrl.u32 %v4945_v34, 16 }
 0x2c2   :  { %v603_v47 = vor.u32 %v602_v40, %v599_v38  ;;  %v611_v48 = vor.u32 %v610_v42, %v607_v41  ;;  %v797_v49 = vshll.u32 %v4945_v34, 16  ;;  %v769_v50 = vshrl.u32 %v4909_v9, 16 }
 0x2c3   :  { %v4958_v51 = vsel %vm595_vm2, %v620_v35, %v628_v43  ;;  %v788_v52 = vrot.slane %v786_v44, 4  ;;  %v791_v53 = vrot.slane %v789_v45, 5  ;;  %v796_v54 = vrot.slane %v794_v46, 4  ;;  %v3801_v45 = vld [vmem:[#allocation17] sm:$0xff]  }
 0x2c4   :  { %v634_v55 = vunpack.c.l.bf16 %v4958_v51  ;;  %v635_v56 = vunpack.c.h.bf16 %v4958_v51  ;;  %v4965_v57 = vsel %vm595_vm2, %v603_v47, %v611_v48  ;;  %v799_v58 = vrot.slane %v797_v49, 5  ;;  %v3802_v47 = vld [vmem:[#allocation17 + $0x8] sm:$0xff]   ;;  %v3803_v48 = vld [vmem:[#allocation17 + $0x10] sm:$0xff]   ;;  %v3804_v49 = vld [vmem:[#allocation17 + $0x18] sm:$0xff]  }
 0x2c5   :  { %3708 = vrot.lane.b32.xlu1 %v3702_v27, %s4488_s19  ;;  %3713 = vrot.lane.b32.xlu0 %v3712_v39, %s4489_s25  ;;  %v632_v60 = vunpack.c.l.bf16 %v4965_v57  ;;  %v633_v61 = vunpack.c.h.bf16 %v4965_v57  ;;  %v792_v63 = vor.u32 %v791_v53, %v788_v52  ;;  %v771_v0 = vrot.slane %v769_v50, 4  ;;  %v863_v27 = vld [vmem:[#allocation2] sm:$0xe0]  ;;  %v3805_v50 = vld [vmem:[#allocation17 + $0x20] sm:$0xff]   ;;  %v3806_v52 = vld [vmem:[#allocation17 + $0x28] sm:$0xff]  }
 0x2c6   :  { %v3717_v62 = vpack.i.bf16 %v635_v56, %v634_v55  ;;  %v772_v1 = vshll.u32 %v4909_v9, 16  ;;  %v800_v3 = vor.u32 %v799_v58, %v796_v54  ;;  %v777_v4 = vshrl.u32 %v765_v59, 16  ;;  %v3807_v53 = vld [vmem:[#allocation17 + $0x30] sm:$0xff]   ;;  %v3808_v54 = vld [vmem:[#allocation17 + $0x38] sm:$0xff]  }
 0x2c7   :  { %v3727_v2 = vpack.i.bf16 %v633_v61, %v632_v60  ;;  %v780_v6 = vshll.u32 %v765_v59, 16  ;;  %v873_v32 = vrot.slane %v864_v22, 5  ;;  %v874_v33 = vrot.slane %v4945_v34, 5 }
 0x2c8   :  { %v774_v7 = vrot.slane %v772_v1, 5  ;;  %v779_v8 = vrot.slane %v777_v4, 4  ;;  %v4981_v18 = vsel %vm767_vm3, %v792_v63, %v800_v3  ;;  %v870_v35 = vrot.slane %v863_v27, 5  ;;  %v3050_v1 = vld [vmem:[#allocation13 + $0x4] ss:$0 sm:$0xff] }
 0x2c9   :  { %3718 = vrot.lane.b32.xlu1 %v3717_v62, %s4489_s25  ;;  %3728 = vrot.lane.b32.xlu0 %v3727_v2, %s4489_s25  ;;  %v782_v13 = vrot.slane %v780_v6, 5  ;;  %v806_v28 = vunpack.c.l.bf16 %v4981_v18  ;;  %v807_v29 = vunpack.c.h.bf16 %v4981_v18  ;;  %v871_v36 = vrot.slane %v765_v59, 5  ;;  %v3047_v59 = vld [vmem:[#allocation13 + $0x1] ss:$0 sm:$0xff]  ;;  %v3053_v6 = vld [vmem:[#allocation13 + $0x7] ss:$0 sm:$0xff] }
 0x2ca   :  { %v775_v17 = vor.u32 %v774_v7, %v771_v0  ;;  %v5005_v34 = vsel %vm869_vm4, %v873_v32, %v874_v33  ;;  %v4490_v46 = vmov 0.0   ;;  %v567_v3 = vmul.f32 %v3047_v59, %v541_v11 }
 0x2cb   :  { %v783_v9 = vor.u32 %v782_v13, %v779_v8  ;;  %v3747_v37 = vpack.i.bf16 %v807_v29, %v806_v28  ;;  %v881_v40 = vunpack.c.h.bf16 %v5005_v34  ;;  %3354 = vmatprep.subr.bf16.mxu1 %v4490_v46  ;;  %3370 = vmatprep.mubr.msk.bf16.mxu1 %vm4491_vm5, %v4490_v46  ;;  %v566_v4 = vmul.f32 %v3047_v59, %v540_v10 }
 0x2cc   :  { %3355 = vmatpush3.bf16.msra.mxu1 %v3801_v45  ;;  %3374 = vmatprep.subr.bf16.mxu0 %v4490_v46  ;;  %v565_v8 = vmul.f32 %v3047_v59, %v539_v20  ;;  %v5044_v22 = vmul.f32 %v3050_v1, %v635_v56  ;;  %v5048_v10 = vmul.f32 %v3050_v1, %v632_v60 }
 0x2cd   :  { %3723 = vrot.lane.b32.xlu1 %v3717_v62, %s4488_s19  ;;  %3733 = vrot.lane.b32.xlu0 %v3727_v2, %s4488_s19  ;;  %v4986_v23 = vsel %vm767_vm3, %v775_v17, %v783_v9  ;;  %v3046_v2 = vld [vmem:[#allocation13] ss:$0 sm:$0xff]  ;;  %v564_v17 = vmul.f32 %v3047_v59, %v538_v19  ;;  %v5040_v9 = vmul.f32 %v3050_v1, %v634_v55 }
 0x2ce   :  { %v804_v30 = vunpack.c.l.bf16 %v4986_v23  ;;  %v805_v31 = vunpack.c.h.bf16 %v4986_v23  ;;  %3356 = vmatprep.subr.bf16.mxu1 %v4490_v46  ;;  %3376 = vmatprep.mubr.msk.bf16.mxu0 %vm4491_vm5, %v4490_v46  ;;  %v5052_v20 = vmul.f32 %v3050_v1, %v633_v61  ;;  %v5056_v55 = vmul.f32 %v3053_v6, %v708_v14  ;;  %v3048_v61 = vld [vmem:[#allocation13 + $0x2] ss:$0 sm:$0xff] }
 0x2cf   :  { %v5060_v51 = vmul.f32 %v3053_v6, %v709_v15  ;;  %v5064_v60 = vmul.f32 %v3053_v6, %v706_v25  ;;  %v5068_v57 = vmul.f32 %v3053_v6, %v707_v26  ;;  %v5072_v12 = vmul.f32 %v3056_v16, %v806_v28 }
 0x2d0   :  { %v3757_v38 = vpack.i.bf16 %v805_v31, %v804_v30  ;;  %3357 = vmatpush3.bf16.msra.mxu1 %v3802_v47  ;;  %v5076_v15 = vmul.f32 %v3056_v16, %v807_v29  ;;  %v5080_v45 = vmul.f32 %v3056_v16, %v804_v30 }
 0x2d1   :  { %3743 = vrot.lane.b32.xlu1 %v4937_v24, %s4488_s19  ;;  %3738 = vrot.lane.b32.xlu0 %v3712_v39, %s4488_s19  ;;  %v5009_v24 = vsel %vm869_vm4, %v870_v35, %v871_v36  ;;  %v880_v39 = vunpack.c.l.bf16 %v5005_v34 }
 0x2d2   :  { %v878_v41 = vunpack.c.l.bf16 %v5009_v24  ;;  %v879_v42 = vunpack.c.h.bf16 %v5009_v24  ;;  %3358 = vmatprep.subr.bf16.mxu1 %v4490_v46 }
 0x2d3   :  { %v3772_v43 = vpack.i.bf16 %v881_v40, %v880_v39 }
 0x2d4   :  { %v3767_v44 = vpack.i.bf16 %v879_v42, %v878_v41  ;;  %3359 = vmatpush3.bf16.msra.mxu1 %v3803_v48 }
 0x2d5   :  { %3748 = vrot.lane.b32.xlu1 %v3747_v37, %s4489_s25  ;;  %3758 = vrot.lane.b32.xlu0 %v3757_v38, %s4489_s25 }
 0x2d6   :  { %3360 = vmatprep.subr.bf16.mxu1 %v4490_v46 }
 0x2d8   :  { %3361 = vmatpush3.bf16.msra.mxu1 %v3804_v49 }
 0x2d9   :  { %3753 = vrot.lane.b32.xlu1 %v3747_v37, %s4488_s19  ;;  %3763 = vrot.lane.b32.xlu0 %v3757_v38, %s4488_s19  ;;  %v3052_v38 = vld [vmem:[#allocation13 + $0x6] ss:$0 sm:$0xff] }
 0x2da   :  { %3362 = vmatprep.subr.bf16.mxu1 %v4490_v46 }
 0x2dc   :  { %3363 = vmatpush3.bf16.msra.mxu1 %v3805_v50 }
 0x2dd   :  { %3773 = vrot.lane.b32.xlu1 %v3772_v43, %s4489_s25  ;;  %3768 = vrot.lane.b32.xlu0 %v3767_v44, %s4489_s25 }
 0x2de   :  { %3364 = vmatprep.subr.bf16.mxu1 %v4490_v46 }
 0x2e0   :  { %3365 = vmatpush3.bf16.msra.mxu1 %v3806_v52 }
 0x2e1   :  { %3783 = vrot.lane.b32.xlu1 %v3772_v43, %s4488_s19  ;;  %3778 = vrot.lane.b32.xlu0 %v3767_v44, %s4488_s19 }
 0x2e2   :  { %3366 = vmatprep.subr.bf16.mxu1 %v4490_v46 }
 0x2e4   :  { %3367 = vmatpush3.bf16.msra.mxu1 %v3807_v53  ;;  %v3049_v53 = vld [vmem:[#allocation13 + $0x3] ss:$0 sm:$0xff] }
 0x2e5   :  { %3368 = vmatprep.subr.bf16.mxu1 %v4490_v46  ;;  %v5084_v46 = vmul.f32 %v3056_v16, %v805_v31  ;;  %v3051_v16 = vld [vmem:[#allocation13 + $0x5] ss:$0 sm:$0xff] }
 0x2e8   :  { %3369 = vmatpush3.bf16.msra.mxu1 %v3808_v54 }
 0x32f   :  { %v3694_v58 = vpop.permute.xlu1 %3693  ;;  %v3689_v62 = vpop.permute.xlu0 %3688 }
 0x330   :  { %v3691_v63 = vunpack.i.h.bf16 %v3689_v62  ;;  %v3690_v0 = vunpack.i.l.bf16 %v3689_v62  ;;  %v3696_v56 = vunpack.i.h.bf16 %v3694_v58  ;;  %v3695_v32 = vunpack.i.l.bf16 %v3694_v58 }
 0x332   :  { %v558_v11 = vmul.f32 %v3691_v63, %v3046_v2  ;;  %v557_v5 = vmul.f32 %v3690_v0, %v3046_v2  ;;  %v588_v28 = vmul.f32 %v3696_v56, %v3048_v61  ;;  %v587_v47 = vmul.f32 %v3695_v32, %v3048_v61 }
 0x333   :  { %v3699_v7 = vpop.permute.xlu1 %3698  ;;  %v3704_v13 = vpop.permute.xlu0 %3703 }
 0x334   :  { %v3706_v19 = vunpack.i.h.bf16 %v3704_v13  ;;  %v3705_v27 = vunpack.i.l.bf16 %v3704_v13  ;;  %v3701_v33 = vunpack.i.h.bf16 %v3699_v7  ;;  %v3700_v35 = vunpack.i.l.bf16 %v3699_v7 }
 0x335   :  { %v571_v37 = vadd.f32 %v567_v3, %v558_v11  ;;  %v570_v25 = vadd.f32 %v566_v4, %v557_v5 }
 0x336   :  { %v556_v26 = vmul.f32 %v3706_v19, %v3046_v2  ;;  %v555_v44 = vmul.f32 %v3705_v27, %v3046_v2  ;;  %v726_v48 = vmul.f32 %v3701_v33, %v3052_v38  ;;  %v725_v49 = vmul.f32 %v3700_v35, %v3052_v38 }
 0x337   :  { %v3709_v36 = vpop.permute.xlu1 %3708  ;;  %v3714_v14 = vpop.permute.xlu0 %3713  ;;  %v591_v58 = vadd.f32 %v587_v47, %v570_v25  ;;  %v592_v59 = vadd.f32 %v588_v28, %v571_v37  ;;  %v3054_v28 = vld [vmem:[#allocation13 + $0x8] ss:$0 sm:$0xff] }
 0x338   :  { %v3711_v43 = vunpack.i.h.bf16 %v3709_v36  ;;  %v3710_v21 = vunpack.i.l.bf16 %v3709_v36  ;;  %v3716_v18 = vunpack.i.h.bf16 %v3714_v14  ;;  %v3715_v29 = vunpack.i.l.bf16 %v3714_v14 }
 0x339   :  { %v569_v0 = vadd.f32 %v565_v8, %v556_v26  ;;  %v568_v1 = vadd.f32 %v564_v17, %v555_v44 }
 0x33a   :  { %v586_v50 = vmul.f32 %v3711_v43, %v3048_v61  ;;  %v585_v52 = vmul.f32 %v3710_v21, %v3048_v61  ;;  %v724_v2 = vmul.f32 %v3716_v18, %v3052_v38  ;;  %v723_v3 = vmul.f32 %v3715_v29, %v3052_v38 }
 0x33b   :  { %v3719_v54 = vpop.permute.xlu1 %3718  ;;  %v3729_v30 = vpop.permute.xlu0 %3728 }
 0x33c   :  { %v3721_v62 = vunpack.i.h.bf16 %v3719_v54  ;;  %v3720_v63 = vunpack.i.l.bf16 %v3719_v54  ;;  %v3731_v23 = vunpack.i.h.bf16 %v3729_v30  ;;  %v3730_v31 = vunpack.i.l.bf16 %v3729_v30 }
 0x33d   :  { %v589_v7 = vadd.f32 %v585_v52, %v568_v1  ;;  %v590_v13 = vadd.f32 %v586_v50, %v569_v0 }
 0x33e   :  { %v652_v4 = vmul.f32 %v3721_v62, %v3049_v53  ;;  %v651_v6 = vmul.f32 %v3720_v63, %v3049_v53  ;;  %v650_v11 = vmul.f32 %v3731_v23, %v3049_v53  ;;  %v649_v5 = vmul.f32 %v3730_v31, %v3049_v53  ;;  %v3055_v23 = vld [vmem:[#allocation13 + $0x9] ss:$0 sm:$0xff] }
 0x33f   :  { %v3724_v19 = vpop.permute.xlu1 %3723  ;;  %v3734_v33 = vpop.permute.xlu0 %3733 }
 0x340   :  { %v656_v27 = vadd.f32 %v652_v4, %v592_v59  ;;  %v655_v56 = vadd.f32 %v651_v6, %v591_v58  ;;  %v3726_v32 = vunpack.i.h.bf16 %v3724_v19  ;;  %v3725_v61 = vunpack.i.l.bf16 %v3724_v19 }
 0x341   :  { %v653_v35 = vadd.f32 %v649_v5, %v589_v7  ;;  %v654_v8 = vadd.f32 %v650_v11, %v590_v13  ;;  %v3736_v17 = vunpack.i.h.bf16 %v3734_v33  ;;  %v3735_v36 = vunpack.i.l.bf16 %v3734_v33 }
 0x342   :  { %v686_v14 = vmul.f32 %v3726_v32, %v3051_v16  ;;  %v668_v37 = vadd.f32 %v5040_v9, %v655_v56  ;;  %v669_v25 = vadd.f32 %v5044_v22, %v656_v27  ;;  %v685_v38 = vmul.f32 %v3725_v61, %v3051_v16 }
 0x343   :  { %v684_v43 = vmul.f32 %v3736_v17, %v3051_v16  ;;  %v666_v21 = vadd.f32 %v5048_v10, %v653_v35  ;;  %v667_v26 = vadd.f32 %v5052_v20, %v654_v8  ;;  %v683_v44 = vmul.f32 %v3735_v36, %v3051_v16  ;;  %v3744_v47 = vpop.permute.xlu1 %3743  ;;  %v3739_v53 = vpop.permute.xlu0 %3738 }
 0x344   :  { %v689_v18 = vadd.f32 %v685_v38, %v668_v37  ;;  %v690_v29 = vadd.f32 %v686_v14, %v669_v25  ;;  %v3746_v50 = vunpack.i.h.bf16 %v3744_v47  ;;  %v3745_v52 = vunpack.i.l.bf16 %v3744_v47  ;;  %v3059_v38 = vld [vmem:[#allocation13 + $0xd] ss:$0 sm:$0xff] }
 0x345   :  { %v687_v54 = vadd.f32 %v683_v44, %v666_v21  ;;  %v688_v58 = vadd.f32 %v684_v43, %v667_v26  ;;  %v3741_v59 = vunpack.i.h.bf16 %v3739_v53  ;;  %v3740_v9 = vunpack.i.l.bf16 %v3739_v53 }
 0x346   :  { %v729_v62 = vadd.f32 %v725_v49, %v689_v18  ;;  %v730_v22 = vadd.f32 %v726_v48, %v690_v29  ;;  %v760_v63 = vmul.f32 %v3746_v50, %v3054_v28  ;;  %v759_v30 = vmul.f32 %v3745_v52, %v3054_v28  ;;  %v3058_v50 = vld [vmem:[#allocation13 + $0xc] ss:$0 sm:$0xff] }
 0x347   :  { %v727_v0 = vadd.f32 %v723_v3, %v687_v54  ;;  %v728_v10 = vadd.f32 %v724_v2, %v688_v58  ;;  %v758_v1 = vmul.f32 %v3741_v59, %v3054_v28  ;;  %v757_v20 = vmul.f32 %v3740_v9, %v3054_v28  ;;  %v3749_v31 = vpop.permute.xlu1 %3748  ;;  %v3759_v11 = vpop.permute.xlu0 %3758 }
 0x348   :  { %v742_v4 = vadd.f32 %v5056_v55, %v729_v62  ;;  %v743_v6 = vadd.f32 %v5060_v51, %v730_v22  ;;  %v3751_v7 = vunpack.i.h.bf16 %v3749_v31  ;;  %v3750_v13 = vunpack.i.l.bf16 %v3749_v31  ;;  %v3057_v55 = vld [vmem:[#allocation13 + $0xb] ss:$0 sm:$0xff] }
 0x349   :  { %v740_v5 = vadd.f32 %v5064_v60, %v727_v0  ;;  %v741_v49 = vadd.f32 %v5068_v57, %v728_v10  ;;  %v3761_v48 = vunpack.i.h.bf16 %v3759_v11  ;;  %v3760_v16 = vunpack.i.l.bf16 %v3759_v11 }
 0x34a   :  { %v763_v19 = vadd.f32 %v759_v30, %v742_v4  ;;  %v764_v3 = vadd.f32 %v760_v63, %v743_v6  ;;  %v824_v2 = vmul.f32 %v3751_v7, %v3055_v23  ;;  %v823_v27 = vmul.f32 %v3750_v13, %v3055_v23 }
 0x34b   :  { %v761_v56 = vadd.f32 %v757_v20, %v740_v5  ;;  %v762_v32 = vadd.f32 %v758_v1, %v741_v49  ;;  %v822_v61 = vmul.f32 %v3761_v48, %v3055_v23  ;;  %v821_v33 = vmul.f32 %v3760_v16, %v3055_v23  ;;  %v3754_v35 = vpop.permute.xlu1 %3753  ;;  %v3764_v14 = vpop.permute.xlu0 %3763  ;;  %v3061_v48 = vld [vmem:[#allocation14] ss:$0 sm:$0xff] }
 0x34c   :  { %v827_v51 = vadd.f32 %v823_v27, %v763_v19  ;;  %v828_v8 = vadd.f32 %v824_v2, %v764_v3  ;;  %v3756_v17 = vunpack.i.h.bf16 %v3754_v35  ;;  %v3755_v36 = vunpack.i.l.bf16 %v3754_v35 }
 0x34d   :  { %v825_v60 = vadd.f32 %v821_v33, %v761_v56  ;;  %v826_v37 = vadd.f32 %v822_v61, %v762_v32  ;;  %v3766_v57 = vunpack.i.h.bf16 %v3764_v14  ;;  %v3765_v25 = vunpack.i.l.bf16 %v3764_v14  ;;  %v3062_v32 = vld [vmem:[#allocation16] ss:$0 sm:$0xff] }
 0x34e   :  { %v858_v43 = vmul.f32 %v3756_v17, %v3057_v55  ;;  %v840_v21 = vadd.f32 %v5072_v12, %v827_v51  ;;  %v841_v26 = vadd.f32 %v5076_v15, %v828_v8  ;;  %v857_v44 = vmul.f32 %v3755_v36, %v3057_v55 }
 0x34f   :  { %v856_v28 = vmul.f32 %v3766_v57, %v3057_v55  ;;  %v838_v47 = vadd.f32 %v5080_v45, %v825_v60  ;;  %v839_v18 = vadd.f32 %v5084_v46, %v826_v37  ;;  %v855_v29 = vmul.f32 %v3765_v25, %v3057_v55  ;;  %v3774_v52 = vpop.permute.xlu1 %3773  ;;  %v3769_v58 = vpop.permute.xlu0 %3768 }
 0x350   :  { %v3776_v53 = vunpack.i.h.bf16 %v3774_v52  ;;  %v3775_v54 = vunpack.i.l.bf16 %v3774_v52  ;;  %v910_v59 = vmul.f32 %v3059_v38, %v880_v39  ;;  %v911_v12 = vmul.f32 %v3059_v38, %v881_v40  ;;  %v3060_v39 = vld [vmem:[#allocation13 + $0xe] ss:$0 sm:$0xff] }
 0x351   :  { %v3771_v9 = vunpack.i.h.bf16 %v3769_v58  ;;  %v3770_v15 = vunpack.i.l.bf16 %v3769_v58  ;;  %v908_v62 = vmul.f32 %v3059_v38, %v878_v41  ;;  %v909_v45 = vmul.f32 %v3059_v38, %v879_v42 }
 0x352   :  { %v861_v46 = vadd.f32 %v857_v44, %v840_v21  ;;  %v862_v22 = vadd.f32 %v858_v43, %v841_v26  ;;  %v898_v63 = vmul.f32 %v3776_v53, %v3058_v50  ;;  %v897_v30 = vmul.f32 %v3775_v54, %v3058_v50 }
 0x353   :  { %v859_v0 = vadd.f32 %v855_v29, %v838_v47  ;;  %v860_v10 = vadd.f32 %v856_v28, %v839_v18  ;;  %v896_v1 = vmul.f32 %v3771_v9, %v3058_v50  ;;  %v895_v20 = vmul.f32 %v3770_v15, %v3058_v50  ;;  %v3784_v23 = vpop.permute.xlu1 %3783  ;;  %v3779_v6 = vpop.permute.xlu0 %3778 }
 0x354   :  { %v901_v34 = vadd.f32 %v897_v30, %v861_v46  ;;  %v902_v40 = vadd.f32 %v898_v63, %v862_v22  ;;  %v3786_v31 = vunpack.i.h.bf16 %v3784_v23  ;;  %v3785_v4 = vunpack.i.l.bf16 %v3784_v23 }
 0x355   :  { %v899_v7 = vadd.f32 %v895_v20, %v859_v0  ;;  %v900_v41 = vadd.f32 %v896_v1, %v860_v10  ;;  %v3781_v13 = vunpack.i.h.bf16 %v3779_v6  ;;  %v3780_v24 = vunpack.i.l.bf16 %v3779_v6 }
 0x356   :  { %v932_v42 = vmul.f32 %v3786_v31, %v3060_v39  ;;  %v914_v11 = vadd.f32 %v910_v59, %v901_v34  ;;  %v915_v5 = vadd.f32 %v911_v12, %v902_v40  ;;  %v931_v49 = vmul.f32 %v3785_v4, %v3060_v39 }
 0x357   :  { %v930_v16 = vmul.f32 %v3781_v13, %v3060_v39  ;;  %v912_v19 = vadd.f32 %v908_v62, %v899_v7  ;;  %v913_v3 = vadd.f32 %v909_v45, %v900_v41  ;;  %v929_v2 = vmul.f32 %v3780_v24, %v3060_v39 }
 0x358   :  { %v935_v27 = vadd.f32 %v931_v49, %v914_v11  ;;  %v936_v56 = vadd.f32 %v932_v42, %v915_v5  ;;  %v1133_v42 = vld [vmem:[#allocation20] sm:$0x1]  ;;  %v3067_v5 = vld [vmem:[#allocation19] ss:$0 sm:$0xff] }
 0x359   :  { %v933_v61 = vadd.f32 %v929_v2, %v912_v19  ;;  %v934_v33 = vadd.f32 %v930_v16, %v913_v3  ;;  %v1147_v11 = vsel %vm1145_vm7, %v1133_v42, 0 }
 0x35a   :  { %v946_v55 = vmul.f32 %v3061_v48, %v935_v27  ;;  %v947_v35 = vmul.f32 %v3061_v48, %v936_v56  ;;  %3375 = vmatpush3.bf16.msra.mxu0 %v1147_v11 }
 0x35b   :  { %v944_v51 = vmul.f32 %v3061_v48, %v933_v61  ;;  %v945_v8 = vmul.f32 %v3061_v48, %v934_v33 }
 0x35c   :  { %v957_v17 = vadd.f32 %v3062_v32, %v946_v55  ;;  %v958_v36 = vadd.f32 %v3062_v32, %v947_v35  ;;  %v3809_v55 = vld [vmem:[#allocation23] sm:$0xff]   ;;  %v3810_v35 = vld [vmem:[#allocation23 + $0x8] sm:$0xff]  }
 0x35d   :  { %v955_v14 = vadd.f32 %v3062_v32, %v944_v51  ;;  %v956_v60 = vadd.f32 %v3062_v32, %v945_v8  ;;  %3380 = vmatprep.subr.bf16.mxu1 %v3809_v55  ;;  %v3811_v51 = vld [vmem:[#allocation23 + $0x10] sm:$0xff]   ;;  %v3812_v8 = vld [vmem:[#allocation23 + $0x18] sm:$0xff]  }
 0x35e   :  { %v3065_v37 = vmul.f32 -1.442695, %v957_v17  ;;  %v3066_v57 = vmul.f32 -1.442695, %v958_v36 }
 0x35f   :  { %v3063_v25 = vmul.f32 -1.442695, %v955_v14  ;;  %v3064_v38 = vmul.f32 -1.442695, %v956_v60 }
 0x360   :  { %3921 = vpow2.f32 %v3065_v37  ;;  %v3818_v37 = vld [vmem:[#allocation28 + $0xc8] sm:$0xff]  }
 0x361   :  { %3923 = vpow2.f32 %v3066_v57  ;;  %v3816_v57 = vld [vmem:[#allocation23 + $0x38] sm:$0xff]  }
 0x362   :  { %3925 = vpow2.f32 %v3063_v25  ;;  %v5118_v25 = vld [vmem:[#allocation3] sm:$0xf0] }
 0x363   :  { %3927 = vpow2.f32 %v3064_v38  ;;  %v5120_v38 = vld [vmem:[#allocation3 + $0x8] sm:$0x1f] }
 0x36a   :  { %v3922_v43 = vpop.eup %3921 }
 0x36b   :  { %v3924_v21 = vpop.eup %3923  ;;  %v973_v26 = vadd.f32 1.0, %v3922_v43  ;;  %v1837_v43 = vshrl.u32 %v5118_v25, 16 }
 0x36c   :  { %v3926_v44 = vpop.eup %3925  ;;  %v974_v28 = vadd.f32 1.0, %v3924_v21  ;;  %v1840_v21 = vshll.u32 %v5118_v25, 16 }
 0x36d   :  { %v3928_v47 = vpop.eup %3927  ;;  %3929 = vrcp.f32 %v973_v26  ;;  %v971_v18 = vadd.f32 1.0, %v3926_v44  ;;  %v3819_v26 = vld [vmem:[#allocation28 + $0xd0] sm:$0xff]   ;;  %v1845_v44 = vshrl.u32 %v5120_v38, 16 }
 0x36e   :  { %3931 = vrcp.f32 %v974_v28  ;;  %v972_v29 = vadd.f32 1.0, %v3928_v47  ;;  %v1848_v28 = vshll.u32 %v5120_v38, 16  ;;  %v1839_v47 = vrot.slane %v1837_v43, 4 }
 0x36f   :  { %3933 = vrcp.f32 %v971_v18  ;;  %v1842_v18 = vrot.slane %v1840_v21, 5 }
 0x370   :  { %3935 = vrcp.f32 %v972_v29  ;;  %v1847_v29 = vrot.slane %v1845_v44, 4 }
 0x377   :  { %v3930_v50 = vpop.eup %3929 }
 0x378   :  { %v3932_v52 = vpop.eup %3931  ;;  %v5106_v53 = vmul.f32 %v3930_v50, %v957_v17  ;;  %v3813_v17 = vld [vmem:[#allocation23 + $0x20] sm:$0xff]   ;;  %v1850_v50 = vrot.slane %v1848_v28, 5 }
 0x379   :  { %v3934_v54 = vpop.eup %3933  ;;  %v5108_v58 = vmul.f32 %v3932_v52, %v958_v36  ;;  %v3814_v36 = vld [vmem:[#allocation23 + $0x28] sm:$0xff]   ;;  %v1843_v52 = vor.u32 %v1842_v18, %v1839_v47  ;;  %v3828_v28 = vld [vmem:[#allocation28 + $0x118] sm:$0xff]  }
 0x37a   :  { %v3936_v59 = vpop.eup %3935  ;;  %v5110_v12 = vmul.f32 %v3934_v54, %v955_v14  ;;  %v3815_v14 = vld [vmem:[#allocation23 + $0x30] sm:$0xff]   ;;  %v3820_v54 = vld [vmem:[#allocation28 + $0xd8] sm:$0xff]   ;;  %v3829_v47 = vld [vmem:[#allocation28 + $0x120] sm:$0xff]  }
 0x37b   :  { %v994_v9 = vadd.f32 %v5108_v58, %v5106_v53  ;;  %v5114_v15 = vmul.f32 %v3936_v59, %v956_v60  ;;  %v3817_v60 = vld [vmem:[#allocation28 + $0xc0] sm:$0xff]   ;;  %v1851_v59 = vor.u32 %v1850_v50, %v1847_v29  ;;  %v3830_v18 = vld [vmem:[#allocation28 + $0x128] sm:$0xff]  }
 0x37c   :  { %3460 = vmatprep.subr.bf16.mxu0 %v3817_v60  ;;  %v3833_v29 = vld [vmem:[#allocation28 + $0x40] sm:$0xff]  }
 0x37d   :  { %v995_v62 = vrot.slane %v994_v9, 4  ;;  %v987_v45 = vadd.f32 %v5114_v15, %v5110_v12  ;;  %v3834_v50 = vld [vmem:[#allocation29 + $0x40] sm:$0xff]  }
 0x37f   :  { %v996_v46 = vadd.f32 %v995_v62, %v994_v9  ;;  %v988_v22 = vrot.slane %v987_v45, 4  ;;  %v1852_v9 = vsel %vm767_vm3, %v1843_v52, %v1851_v59  ;;  %v3821_v62 = vld [vmem:[#allocation28 + $0xe0] sm:$0xff]  }
 0x380   :  { %v1991_v59 = vld [vmem:[#allocation3 + $0x10] sm:$0xe0] }
 0x381   :  { %v997_v63 = vrot.slane %v996_v46, 2  ;;  %v989_v30 = vadd.f32 %v988_v22, %v987_v45  ;;  %v3822_v45 = vld [vmem:[#allocation28 + $0xe8] sm:$0xff]  }
 0x382   :  { %v5129_v22 = vld [vmem:[#allocation3 + $0x18] sm:$0x1f] }
 0x383   :  { %v990_v0 = vrot.slane %v989_v30, 2  ;;  %v998_v10 = vadd.f32 %v997_v63, %v996_v46  ;;  %v5127_v46 = vld [vmem:[#allocation3 + $0x10] sm:$0xf0]  ;;  %v2000_v52 = vrot.slane %v5129_v22, 5 }
 0x384   :  { %v1854_v63 = vshrl.u32 %v5127_v46, 16 }
 0x385   :  { %v991_v1 = vadd.f32 %v990_v0, %v989_v30  ;;  %v999_v20 = vrot.slane %v998_v10, 1  ;;  %v1857_v30 = vshll.u32 %v5127_v46, 16  ;;  %v1862_v0 = vshrl.u32 %v5129_v22, 16 }
 0x387   :  { %v992_v39 = vrot.slane %v991_v1, 1  ;;  %v1000_v23 = vadd.f32 %v999_v20, %v998_v10  ;;  %v1865_v10 = vshll.u32 %v5129_v22, 16  ;;  %v1856_v20 = vrot.slane %v1854_v63, 4  ;;  %v3836_v63 = vld [vmem:[#allocation29 + $0x48] sm:$0xff]   ;;  %v5144_v22 = vld [vmem:[#allocation3] sm:$0xf8] }
 0x389   :  { %v993_v34 = vadd.f32 %v992_v39, %v991_v1  ;;  %v1003_v40 = vmul.f32 0.0625, %v1000_v23  ;;  %v3823_v1 = vld [vmem:[#allocation28 + $0xf0] sm:$0xff]   ;;  %v1859_v39 = vrot.slane %v1857_v30, 5  ;;  %v1864_v23 = vrot.slane %v1862_v0, 4 }
 0x38a   :  { %v5146_v0 = vld [vmem:[#allocation3 + $0x8] sm:$0xf] }
 0x38b   :  { %v1002_v31 = vmul.f32 0.0625, %v993_v34  ;;  %v1005_v4 = vpack.c.bf16 %v1003_v40, %v1003_v40  ;;  %v1867_v34 = vrot.slane %v1865_v10, 5  ;;  %v3824_v40 = vld [vmem:[#allocation28 + $0xf8] sm:$0xff]   ;;  %v3838_v10 = vld [vmem:[#allocation29 + $0x50] sm:$0xff]  }
 0x38d   :  { %v1004_v6 = vpack.c.bf16 %v1002_v31, %v1002_v31  ;;  %v1032_v7 = vunpack.c.l.b16 %v1005_v4  ;;  %v1860_v31 = vor.u32 %v1859_v39, %v1856_v20  ;;  %v1868_v4 = vor.u32 %v1867_v34, %v1864_v23  ;;  %v3839_v34 = vld [vmem:[#allocation28 + $0x58] sm:$0xff]  }
 0x38e   :  { %v1459_v20 = vshll.u32 %v5144_v22, 16  ;;  %v1464_v39 = vshrl.u32 %v5146_v0, 16  ;;  %v1467_v23 = vshll.u32 %v5146_v0, 16 }
 0x38f   :  { %v1031_v41 = vunpack.c.l.b16 %v1004_v6  ;;  %v3825_v6 = vld [vmem:[#allocation28 + $0x100] sm:$0xff]  }
 0x391   :  { %v1034_v13 = vsel %vm1033_vm6, %v1032_v7, %v1031_v41  ;;  %v1869_v7 = vsel %vm767_vm3, %v1860_v31, %v1868_v4  ;;  %v3826_v41 = vld [vmem:[#allocation28 + $0x108] sm:$0xff]   ;;  %v1461_v31 = vrot.slane %v1459_v20, 4  ;;  %v1466_v4 = vrot.slane %v1464_v39, 3  ;;  %v3089_v39 = vld [vmem:[#allocation26] ss:$0 sm:$0xff] }
 0x392   :  { %v1035_v24 = vpack.c.b16 %v1034_v13, %v1034_v13  ;;  %v3827_v13 = vld [vmem:[#allocation28 + $0x110] sm:$0xff]  }
 0x394   :  { %3371 = vmatmul.mubr.bf16.vlgmr.msra.gmra.mrb[4].mxu1 %v1035_v24  ;;  %v3077_v24 = vld [vmem:[#allocation22] ss:$0 sm:$0xff] }
 0x395   :  { %3381 = vmatpush3.bf16.msra.mxu1 %v3809_v55 }
 0x396   :  { %3382 = vmatprep.subr.bf16.mxu1 %v3810_v35 }
 0x399   :  { %3383 = vmatpush3.bf16.msra.mxu1 %v3810_v35 }
 0x39a   :  { %3384 = vmatprep.subr.bf16.mxu1 %v3811_v51 }
 0x39d   :  { %3385 = vmatpush3.bf16.msra.mxu1 %v3811_v51 }
 0x39e   :  { %3386 = vmatprep.subr.bf16.mxu1 %v3812_v8 }
 0x3a1   :  { %3387 = vmatpush3.bf16.msra.mxu1 %v3812_v8 }
 0x3a2   :  { %3388 = vmatprep.subr.bf16.mxu1 %v3813_v17 }
 0x3a5   :  { %3389 = vmatpush3.bf16.msra.mxu1 %v3813_v17 }
 0x3a6   :  { %3390 = vmatprep.subr.bf16.mxu1 %v3814_v36 }
 0x3a9   :  { %3391 = vmatpush3.bf16.msra.mxu1 %v3814_v36 }
 0x3aa   :  { %3392 = vmatprep.subr.bf16.mxu1 %v3815_v14 }
 0x3ad   :  { %3393 = vmatpush3.bf16.msra.mxu1 %v3815_v14 }
 0x3ae   :  { %3394 = vmatprep.subr.bf16.mxu1 %v3816_v57 }
 0x3b1   :  { %3395 = vmatpush3.bf16.msra.mxu1 %v3816_v57 }
 0x3b2   :  { %3400 = vmatprep.subr.bf16.mxu1 %v3833_v29 }
 0x467   :  { %v1119_v49 = vpop.f32.mrb[4].mxu1 }
 0x468   :  { %v1120_v48 = vadd.f32 %v3067_v5, %v1119_v49  ;;  %v3372_v16 = vpop.f32.mrb[5].mxu1 }
 0x469   :  { %v1122_v19 = vpop.f32.mrb[6].mxu1 }
 0x46a   :  { %v3076_v3 = vmul.f32 -1.442695, %v1120_v48  ;;  %v3373_v2 = vpop.f32.mrb[7].mxu1 }
 0x46b   :  { %v4492_v2 = vmov 1966171168  }
 0x46c   :  { %3937 = vpow2.f32 %v3076_v3 }
 0x476   :  { %v3938_v27 = vpop.eup %3937 }
 0x477   :  { %v1128_v56 = vadd.f32 1.0, %v3938_v27  ;;  %v1197_v27 = vunpack.c.l.s4 %v4492_v2 }
 0x479   :  { %3939 = vrcp.f32 %v1128_v56  ;;  %v1199_v56 = vlaneseq }
 0x483   :  { %v3940_v32 = vpop.eup %3939 }
 0x484   :  { %v1131_v61 = vmul.f32 %v3940_v32, %v1120_v48  ;;  %v1198_v32 = vunpack.c.0.s8 %v1197_v27 }
 0x486   :  { %v1132_v33 = vpack.c.bf16 %v1131_v61, %v1131_v61  ;;  %v1200_v61 = vshrl.u32 %v1199_v56, 7  ;;  %v3845_v56 = vld [vmem:[#allocation28 + $0x70] sm:$0xff]  }
 0x488   :  { %3377 = vmatmul.mubr.msk.bf16.vlgmr.msra.gmra.mrb[0].mxu0 %vm1141_vm8, %v1132_v33  ;;  %v1201_v33 = vsub.s32 %v1198_v32, %v1200_v61  ;;  %v1220_v51 = vsub.s32 0, %v1200_v61  ;;  %v3846_v32 = vld [vmem:[#allocation29 + $0x70] sm:$0xff]  }
 0x489   :  { %3461 = vmatpush3.bf16.msra.mxu0 %v3817_v60  ;;  %3476 = vmatprep.mubr.bf16.mxu0 %v1852_v9  ;;  %v3835_v9 = vld [vmem:[#allocation28 + $0x48] sm:$0xff]  }
 0x48a   :  { %3462 = vmatprep.subr.bf16.mxu0 %v3818_v37 }
 0x48d   :  { %3463 = vmatpush3.bf16.msra.mxu0 %v3818_v37 }
 0x48e   :  { %3464 = vmatprep.subr.bf16.mxu0 %v3819_v26 }
 0x491   :  { %3465 = vmatpush3.bf16.msra.mxu0 %v3819_v26 }
 0x492   :  { %3466 = vmatprep.subr.bf16.mxu0 %v3820_v54 }
 0x495   :  { %3467 = vmatpush3.bf16.msra.mxu0 %v3820_v54 }
 0x496   :  { %3468 = vmatprep.subr.bf16.mxu0 %v3821_v62 }
 0x499   :  { %3469 = vmatpush3.bf16.msra.mxu0 %v3821_v62  ;;  %v1999_v62 = vrot.slane %v1991_v59, 5  ;;  %v3867_v59 = vld [vmem:[#allocation28 + $0x88] sm:$0xff]  }
 0x49a   :  { %3470 = vmatprep.subr.bf16.mxu0 %v3822_v45 }
 0x49b   :  { %v2001_v30 = vsel %vm869_vm4, %v1999_v62, %v2000_v52  ;;  %v3865_v52 = vld [vmem:[#allocation28 + $0x80] sm:$0xff]   ;;  %v3871_v62 = vld [vmem:[#allocation28 + $0x98] sm:$0xff]  }
 0x49d   :  { %3471 = vmatpush3.bf16.msra.mxu0 %v3822_v45 }
 0x49e   :  { %3472 = vmatprep.subr.bf16.mxu0 %v3823_v1 }
 0x4a1   :  { %3473 = vmatpush3.bf16.msra.mxu0 %v3823_v1  ;;  %v1456_v1 = vshrl.u32 %v5144_v22, 16 }
 0x4a2   :  { %3474 = vmatprep.subr.bf16.mxu0 %v3824_v40 }
 0x4a5   :  { %3475 = vmatpush3.bf16.msra.mxu0 %v3824_v40  ;;  %v1458_v40 = vrot.slane %v1456_v1, 3  ;;  %v3088_v1 = vld [vmem:[#allocation25] ss:$0 sm:$0xff] }
 0x4a6   :  { %3480 = vmatprep.subr.bf16.mxu0 %v3825_v6 }
 0x4a8   :  { %3477 = vmatmul.mubr.bf16.vlgmr.msra.gmra.mrb[4].mxu0 %v1869_v7  ;;  %v3840_v7 = vld [vmem:[#allocation29 + $0x58] sm:$0xff]  }
 0x4a9   :  { %3481 = vmatpush3.bf16.msra.mxu0 %v3825_v6  ;;  %v1469_v6 = vrot.slane %v1467_v23, 4 }
 0x4aa   :  { %3482 = vmatprep.subr.bf16.mxu0 %v3826_v41 }
 0x4ad   :  { %3483 = vmatpush3.bf16.msra.mxu0 %v3826_v41  ;;  %v1462_v41 = vor.u32 %v1461_v31, %v1458_v40 }
 0x4ae   :  { %3484 = vmatprep.subr.bf16.mxu0 %v3827_v13 }
 0x4b1   :  { %3485 = vmatpush3.bf16.msra.mxu0 %v3827_v13  ;;  %v1470_v13 = vor.u32 %v1469_v6, %v1466_v4 }
 0x4b2   :  { %3486 = vmatprep.subr.bf16.mxu0 %v3828_v28 }
 0x4b5   :  { %3487 = vmatpush3.bf16.msra.mxu0 %v3828_v28  ;;  %v1429_v28 = vrot.slane %v5144_v22, 3  ;;  %v3875_v22 = vld [vmem:[#allocation28 + $0xa8] sm:$0xff]  }
 0x4b6   :  { %3488 = vmatprep.subr.bf16.mxu0 %v3829_v47 }
 0x4b9   :  { %3489 = vmatpush3.bf16.msra.mxu0 %v3829_v47 }
 0x4ba   :  { %3490 = vmatprep.subr.bf16.mxu0 %v3830_v18 }
 0x4bd   :  { %3491 = vmatpush3.bf16.msra.mxu0 %v3830_v18  ;;  %v3859_v18 = vld [vmem:[#allocation28 + $0x28] sm:$0xff]  }
 0x55b   :  { %v1183_v42 = vpop.f32.mrb[0].mxu0 }
 0x55c   :  { %v1184_v11 = vadd.f32 %v3077_v24, %v1183_v42  ;;  %v3378_v5 = vpop.f32.mrb[1].mxu0  ;;  %v3841_v24 = vld [vmem:[#allocation28 + $0x60] sm:$0xff]   ;;  %v1471_v42 = vsel %vm595_vm2, %v1462_v41, %v1470_v13 }
 0x55d   :  { %v1186_v49 = vpop.f32.mrb[2].mxu0  ;;  %v3843_v5 = vld [vmem:[#allocation28 + $0x68] sm:$0xff]  }
 0x55e   :  { %v3079_v48 = vmul.f32 -1.442695, %v1184_v11  ;;  %v3379_v16 = vpop.f32.mrb[3].mxu0  ;;  %v3842_v11 = vld [vmem:[#allocation29 + $0x60] sm:$0xff]  }
 0x55f   :  { %v5153_v49 = vld [vmem:[#allocation3 + $0x10] sm:$0xf8]  ;;  %v3844_v16 = vld [vmem:[#allocation29 + $0x68] sm:$0xff]  }
 0x560   :  { %3941 = vpow2.f32 %v3079_v48  ;;  %v5155_v48 = vld [vmem:[#allocation3 + $0x18] sm:$0xf] }
 0x561   :  { %v1481_v2 = vshrl.u32 %v5155_v48, 16  ;;  %v1484_v27 = vshll.u32 %v5155_v48, 16  ;;  %v1712_v41 = vrot.slane %v5155_v48, 4 }
 0x56a   :  { %v3942_v19 = vpop.eup %3941 }
 0x56b   :  { %v1192_v3 = vadd.f32 1.0, %v3942_v19  ;;  %v1473_v19 = vshrl.u32 %v5153_v49, 16 }
 0x56d   :  { %3943 = vrcp.f32 %v1192_v3  ;;  %v1476_v3 = vshll.u32 %v5153_v49, 16  ;;  %v1475_v61 = vrot.slane %v1473_v19, 3 }
 0x577   :  { %v3944_v55 = vpop.eup %3943 }
 0x578   :  { %v1202_v35 = vrot.slane %v3944_v55, %v1201_v33  ;;  %v1483_v55 = vrot.slane %v1481_v2, 3 }
 0x57a   :  { %v1203_v8 = vcombine.high %v1202_v35, %v1202_v35  ;;  %v1210_v17 = vrot.slane %v1202_v35, %v1201_v33  ;;  %v1486_v35 = vrot.slane %v1484_v27, 4 }
 0x57c   :  { %v1221_v36 = vrot.slane %v1210_v17, %v1220_v51  ;;  %v1217_v14 = vrot.slane %v1203_v8, %v1201_v33  ;;  %v1478_v33 = vrot.slane %v1476_v3, 4  ;;  %v3848_v8 = vld [vmem:[#allocation29 + $0x78] sm:$0xff]  }
 0x57e   :  { %v1228_v60 = vmul.f32 %v1221_v36, %v5110_v12  ;;  %v1229_v37 = vmul.f32 %v1221_v36, %v5114_v15  ;;  %v1225_v57 = vrot.slane %v1217_v14, %v1220_v51  ;;  %v3831_v12 = vld [vmem:[#allocation28 + $0x130] sm:$0xff]   ;;  %v3832_v15 = vld [vmem:[#allocation28 + $0x138] sm:$0xff]   ;;  %v1479_v17 = vor.u32 %v1478_v33, %v1475_v61  ;;  %v3849_v14 = vld [vmem:[#allocation28] sm:$0xff]  }
 0x57f   :  { %3492 = vmatprep.subr.bf16.mxu0 %v3831_v12  ;;  %v3847_v51 = vld [vmem:[#allocation28 + $0x78] sm:$0xff]   ;;  %v1487_v36 = vor.u32 %v1486_v35, %v1483_v55 }
 0x580   :  { %v1232_v43 = vpack.c.bf16 %v1229_v37, %v1228_v60  ;;  %v1230_v21 = vmul.f32 %v1225_v57, %v5106_v53  ;;  %v1231_v26 = vmul.f32 %v1225_v57, %v5108_v58  ;;  %3493 = vmatpush3.bf16.msra.mxu0 %v3831_v12  ;;  %v1990_v53 = vld [vmem:[#allocation3] sm:$0xe0]  ;;  %v1997_v58 = vrot.slane %v5120_v38, 5  ;;  %v5162_v37 = vld [vmem:[#allocation29] sm:$0xff]   ;;  %v3851_v57 = vld [vmem:[#allocation28 + $0x8] sm:$0xff]  }
 0x581   :  { %3494 = vmatprep.subr.bf16.mxu0 %v3832_v15  ;;  %v1996_v54 = vrot.slane %v1990_v53, 5  ;;  %v3837_v38 = vld [vmem:[#allocation28 + $0x50] sm:$0xff]   ;;  %v1488_v60 = vsel %vm595_vm2, %v1479_v17, %v1487_v36  ;;  %v1424_v53 = vld [vmem:[#allocation3 + $0x18] sm:$0x7] }
 0x582   :  { %3396 = vmatprep.mubr.bf16.mxu1 %v1232_v43  ;;  %v1233_v44 = vpack.c.bf16 %v1231_v26, %v1230_v21  ;;  %v3853_v43 = vld [vmem:[#allocation28 + $0x10] sm:$0xff]   ;;  %v3855_v21 = vld [vmem:[#allocation28 + $0x18] sm:$0xff]   ;;  %v3857_v26 = vld [vmem:[#allocation28 + $0x20] sm:$0xff]  }
 0x583   :  { %v1998_v45 = vsel %vm869_vm4, %v1996_v54, %v1997_v58  ;;  %v1432_v58 = vrot.slane %v5153_v49, 3 }
 0x584   :  { %3397 = vmatmul.mubr.bf16.vlgmr.msra.gmra.mrb[8].mxu1 %v1233_v44  ;;  %3495 = vmatpush3.bf16.msra.mxu0 %v3832_v15  ;;  %v1422_v44 = vld [vmem:[#allocation3 + $0x8] sm:$0x7] }
 0x585   :  { %3401 = vmatpush3.bf16.msra.mxu1 %v3833_v29  ;;  %3500 = vmatprep.subr.bf16.mxu0 %v3834_v50  ;;  %v1430_v47 = vrot.slane %v1422_v44, 3  ;;  %v3861_v15 = vld [vmem:[#allocation28 + $0x30] sm:$0xff]   ;;  %v3863_v29 = vld [vmem:[#allocation28 + $0x38] sm:$0xff]  }
 0x586   :  { %3496 = vmatprep.mubr.bf16.mxu0 %v1998_v45  ;;  %3402 = vmatprep.subr.bf16.mxu1 %v3835_v9  ;;  %v1708_v45 = vrot.slane %v5118_v25, 4  ;;  %v3879_v25 = vld [vmem:[#allocation28 + $0xb8] sm:$0xff]  }
 0x587   :  { %3497 = vmatmul.mubr.bf16.vlgmr.msra.gmra.mrb[4].mxu0 %v2001_v30  ;;  %3416 = vmatprep.mubr.bf16.mxu1 %v1471_v42  ;;  %v1431_v12 = vsel %vm529_vm0, %v1429_v28, %v1430_v47  ;;  %v3873_v30 = vld [vmem:[#allocation28 + $0xa0] sm:$0xff]  }
 0x588   :  { %3501 = vmatpush3.bf16.msra.mxu0 %v3834_v50  ;;  %v1433_v50 = vrot.slane %v1424_v53, 3 }
 0x589   :  { %3403 = vmatpush3.bf16.msra.mxu1 %v3835_v9  ;;  %3502 = vmatprep.subr.bf16.mxu0 %v3836_v63  ;;  %v3869_v9 = vld [vmem:[#allocation28 + $0x90] sm:$0xff]  }
 0x58a   :  { %3404 = vmatprep.subr.bf16.mxu1 %v3837_v38  ;;  %v1434_v54 = vsel %vm529_vm0, %v1432_v58, %v1433_v50 }
 0x58c   :  { %3503 = vmatpush3.bf16.msra.mxu0 %v3836_v63  ;;  %v1709_v63 = vrot.slane %v5146_v0, 4 }
 0x58d   :  { %3405 = vmatpush3.bf16.msra.mxu1 %v3837_v38  ;;  %3504 = vmatprep.subr.bf16.mxu0 %v3838_v10 }
 0x58e   :  { %3406 = vmatprep.subr.bf16.mxu1 %v3839_v34  ;;  %v1710_v38 = vsel %vm697_vm1, %v1708_v45, %v1709_v63 }
 0x590   :  { %3505 = vmatpush3.bf16.msra.mxu0 %v3838_v10  ;;  %v3877_v10 = vld [vmem:[#allocation28 + $0xb0] sm:$0xff]  }
 0x591   :  { %3407 = vmatpush3.bf16.msra.mxu1 %v3839_v34  ;;  %3506 = vmatprep.subr.bf16.mxu0 %v3840_v7 }
 0x592   :  { %3408 = vmatprep.subr.bf16.mxu1 %v3841_v24 }
 0x594   :  { %3507 = vmatpush3.bf16.msra.mxu0 %v3840_v7  ;;  %v1711_v7 = vrot.slane %v5127_v46, 4 }
 0x595   :  { %3409 = vmatpush3.bf16.msra.mxu1 %v3841_v24  ;;  %3508 = vmatprep.subr.bf16.mxu0 %v3842_v11 }
 0x596   :  { %3410 = vmatprep.subr.bf16.mxu1 %v3843_v5  ;;  %v1713_v19 = vsel %vm697_vm1, %v1711_v7, %v1712_v41  ;;  %v3856_v7 = vld [vmem:[#allocation29 + $0x18] sm:$0xff]   ;;  %v3858_v41 = vld [vmem:[#allocation29 + $0x20] sm:$0xff]  }
 0x598   :  { %3509 = vmatpush3.bf16.msra.mxu0 %v3842_v11 }
 0x599   :  { %3411 = vmatpush3.bf16.msra.mxu1 %v3843_v5  ;;  %3510 = vmatprep.subr.bf16.mxu0 %v3844_v16 }
 0x59a   :  { %3412 = vmatprep.subr.bf16.mxu1 %v3845_v56 }
 0x59c   :  { %3511 = vmatpush3.bf16.msra.mxu0 %v3844_v16 }
 0x59d   :  { %3413 = vmatpush3.bf16.msra.mxu1 %v3845_v56  ;;  %3512 = vmatprep.subr.bf16.mxu0 %v3846_v32 }
 0x59e   :  { %3414 = vmatprep.subr.bf16.mxu1 %v3847_v51 }
 0x5a0   :  { %3513 = vmatpush3.bf16.msra.mxu0 %v3846_v32 }
 0x5a1   :  { %3415 = vmatpush3.bf16.msra.mxu1 %v3847_v51  ;;  %3514 = vmatprep.subr.bf16.mxu0 %v3848_v8 }
 0x5a2   :  { %3420 = vmatprep.subr.bf16.mxu1 %v3849_v14 }
 0x5a4   :  { %3515 = vmatpush3.bf16.msra.mxu0 %v3848_v8  ;;  %3417 = vmatmul.mubr.bf16.vlgmr.msra.gmra.mrb[12].mxu1 %v1488_v60 }
 0x5a5   :  { %3421 = vmatpush3.bf16.msra.mxu1 %v3849_v14  ;;  %3520 = vmatprep.subr.bf16.mxu0 %v5162_v37 }
 0x5a6   :  { %3422 = vmatprep.subr.bf16.mxu1 %v3851_v57  ;;  %3436 = vmatprep.mubr.bf16.mxu1 %v1431_v12 }
 0x5a9   :  { %3423 = vmatpush3.bf16.msra.mxu1 %v3851_v57 }
 0x5aa   :  { %3424 = vmatprep.subr.bf16.mxu1 %v3853_v43 }
 0x5ad   :  { %3425 = vmatpush3.bf16.msra.mxu1 %v3853_v43 }
 0x5ae   :  { %3426 = vmatprep.subr.bf16.mxu1 %v3855_v21 }
 0x5b1   :  { %3427 = vmatpush3.bf16.msra.mxu1 %v3855_v21 }
 0x5b2   :  { %3428 = vmatprep.subr.bf16.mxu1 %v3857_v26 }
 0x5b5   :  { %3429 = vmatpush3.bf16.msra.mxu1 %v3857_v26 }
 0x5b6   :  { %3430 = vmatprep.subr.bf16.mxu1 %v3859_v18 }
 0x5b9   :  { %3431 = vmatpush3.bf16.msra.mxu1 %v3859_v18 }
 0x5ba   :  { %3432 = vmatprep.subr.bf16.mxu1 %v3861_v15 }
 0x5bd   :  { %3433 = vmatpush3.bf16.msra.mxu1 %v3861_v15 }
 0x5be   :  { %3434 = vmatprep.subr.bf16.mxu1 %v3863_v29 }
 0x5c1   :  { %3435 = vmatpush3.bf16.msra.mxu1 %v3863_v29 }
 0x5c2   :  { %3440 = vmatprep.subr.bf16.mxu1 %v3865_v52 }
 0x5c4   :  { %3437 = vmatmul.mubr.bf16.vlgmr.msra.gmra.mrb[12].mxu1 %v1434_v54 }
 0x5c5   :  { %3441 = vmatpush3.bf16.msra.mxu1 %v3865_v52  ;;  %3456 = vmatprep.mubr.bf16.mxu1 %v1710_v38 }
 0x5c6   :  { %3442 = vmatprep.subr.bf16.mxu1 %v3867_v59 }
 0x5c9   :  { %3443 = vmatpush3.bf16.msra.mxu1 %v3867_v59 }
 0x5ca   :  { %3444 = vmatprep.subr.bf16.mxu1 %v3869_v9 }
 0x5cd   :  { %3445 = vmatpush3.bf16.msra.mxu1 %v3869_v9 }
 0x5ce   :  { %3446 = vmatprep.subr.bf16.mxu1 %v3871_v62 }
 0x5d1   :  { %3447 = vmatpush3.bf16.msra.mxu1 %v3871_v62 }
 0x5d2   :  { %3448 = vmatprep.subr.bf16.mxu1 %v3873_v30 }
 0x5d5   :  { %3449 = vmatpush3.bf16.msra.mxu1 %v3873_v30 }
 0x5d6   :  { %3450 = vmatprep.subr.bf16.mxu1 %v3875_v22 }
 0x5d9   :  { %3451 = vmatpush3.bf16.msra.mxu1 %v3875_v22 }
 0x5da   :  { %3452 = vmatprep.subr.bf16.mxu1 %v3877_v10 }
 0x5dd   :  { %3453 = vmatpush3.bf16.msra.mxu1 %v3877_v10 }
 0x5de   :  { %3454 = vmatprep.subr.bf16.mxu1 %v3879_v25 }
 0x5e1   :  { %3455 = vmatpush3.bf16.msra.mxu1 %v3879_v25 }
 0x5e4   :  { %3457 = vmatmul.mubr.bf16.vlgmr.msra.gmra.mrb[12].mxu1 %v1713_v19 }
 0x657   :  { %v3398_v20 = vpop.f32.mrb[8].mxu1 }
 0x658   :  { %v1356_v23 = vmul.f32 %v3398_v20, %v3088_v1  ;;  %v1332_v0 = vpop.f32.mrb[9].mxu1 }
 0x659   :  { %v1354_v34 = vmul.f32 %v3088_v1, %v1332_v0  ;;  %v3399_v40 = vpop.f32.mrb[10].mxu1 }
 0x65a   :  { %v1367_v31 = vadd.f32 %v3089_v39, %v1356_v23  ;;  %v1357_v4 = vmul.f32 %v3399_v40, %v3088_v1  ;;  %v1335_v6 = vpop.f32.mrb[11].mxu1  ;;  %v3852_v40 = vld [vmem:[#allocation29 + $0x8] sm:$0xff]  }
 0x65b   :  { %v1365_v13 = vadd.f32 %v3089_v39, %v1354_v34  ;;  %v1355_v24 = vmul.f32 %v3088_v1, %v1335_v6  ;;  %v3854_v6 = vld [vmem:[#allocation29 + $0x10] sm:$0xff]  }
 0x65c   :  { %v3092_v42 = vmul.f32 -1.442695, %v1367_v31  ;;  %v1368_v11 = vadd.f32 %v3089_v39, %v1357_v4 }
 0x65d   :  { %v3090_v5 = vmul.f32 -1.442695, %v1365_v13  ;;  %v1366_v49 = vadd.f32 %v3089_v39, %v1355_v24  ;;  %v3862_v24 = vld [vmem:[#allocation29 + $0x30] sm:$0xff]  }
 0x65e   :  { %3945 = vpow2.f32 %v3092_v42  ;;  %v3093_v16 = vmul.f32 -1.442695, %v1368_v11  ;;  %v3864_v42 = vld [vmem:[#allocation29 + $0x38] sm:$0xff]  }
 0x65f   :  { %3947 = vpow2.f32 %v3090_v5  ;;  %v3091_v3 = vmul.f32 -1.442695, %v1366_v49  ;;  %v3866_v5 = vld [vmem:[#allocation29 + $0x80] sm:$0xff]  }
 0x660   :  { %3949 = vpow2.f32 %v3093_v16 }
 0x661   :  { %3951 = vpow2.f32 %v3091_v3 }
 0x668   :  { %v3946_v46 = vpop.eup %3945 }
 0x669   :  { %v3948_v2 = vpop.eup %3947  ;;  %v1383_v48 = vadd.f32 1.0, %v3946_v46  ;;  %v3868_v46 = vld [vmem:[#allocation29 + $0x88] sm:$0xff]  }
 0x66a   :  { %v3950_v27 = vpop.eup %3949  ;;  %v1381_v56 = vadd.f32 1.0, %v3948_v2 }
 0x66b   :  { %v3952_v32 = vpop.eup %3951  ;;  %3953 = vrcp.f32 %v1383_v48  ;;  %v1384_v61 = vadd.f32 1.0, %v3950_v27  ;;  %v3870_v27 = vld [vmem:[#allocation29 + $0x90] sm:$0xff]  }
 0x66c   :  { %3955 = vrcp.f32 %v1381_v56  ;;  %v1382_v33 = vadd.f32 1.0, %v3952_v32  ;;  %v3872_v56 = vld [vmem:[#allocation29 + $0x98] sm:$0xff]   ;;  %v3874_v32 = vld [vmem:[#allocation29 + $0xa0] sm:$0xff]  }
 0x66d   :  { %3957 = vrcp.f32 %v1384_v61  ;;  %v3876_v61 = vld [vmem:[#allocation29 + $0xa8] sm:$0xff]  }
 0x66e   :  { %3959 = vrcp.f32 %v1382_v33 }
 0x675   :  { %v3954_v55 = vpop.eup %3953 }
 0x676   :  { %v3956_v35 = vpop.eup %3955  ;;  %v1395_v17 = vmul.f32 %v3954_v55, %v1367_v31  ;;  %v3878_v55 = vld [vmem:[#allocation29 + $0xb0] sm:$0xff]  }
 0x677   :  { %v3958_v51 = vpop.eup %3957  ;;  %v1393_v14 = vmul.f32 %v3956_v35, %v1365_v13  ;;  %v3860_v13 = vld [vmem:[#allocation29 + $0x28] sm:$0xff]  }
 0x678   :  { %v3960_v8 = vpop.eup %3959  ;;  %v1396_v36 = vmul.f32 %v3958_v51, %v1368_v11 }
 0x679   :  { %v1394_v60 = vmul.f32 %v3960_v8, %v1366_v49 }
 0x67a   :  { %v1410_v57 = vpack.c.bf16 %v1396_v36, %v1395_v17  ;;  %v3880_v36 = vld [vmem:[#allocation29 + $0xb8] sm:$0xff]  }
 0x67b   :  { %v1409_v43 = vpack.c.bf16 %v1394_v60, %v1393_v14 }
 0x67c   :  { %v1414_v21 = vrot.slane %v1410_v57, 4 }
 0x67d   :  { %v1413_v26 = vrot.slane %v1409_v43, 4 }
 0x67e   :  { %1419 = vst [vmem:[#allocation4 + $0x18] ss:$-4 sps:$4 sm:$0xff] %v1414_v21  }
 0x67f   :  { %1417 = vst [vmem:[#allocation4 + $0x8] ss:$-4 sps:$4 sm:$0xff] %v1413_v26   ;;  %v3881_v26 = vld [vmem:[#allocation29 + $0xc0] sm:$0xff]  }
 0x685   :  { %v5175_v44 = vld [vmem:[#allocation4 + $0x10] sm:$0xf8]  ;;  %v5177_v28 = vld [vmem:[#allocation4 + $0x18] sm:$0xf] }
 0x686   :  { %v2122_v47 = vld [vmem:[#allocation4] sm:$0xf8]  ;;  %v5179_v18 = vld [vmem:[#allocation4 + $0x8] sm:$0xf]  ;;  %v2174_v12 = vshrl.u32 %v5175_v44, 16  ;;  %v2177_v15 = vshll.u32 %v5175_v44, 16 }
 0x687   :  { %v2157_v29 = vshrl.u32 %v2122_v47, 16  ;;  %v2160_v53 = vshll.u32 %v2122_v47, 16  ;;  %v2165_v58 = vshrl.u32 %v5179_v18, 16  ;;  %v2168_v50 = vshll.u32 %v5179_v18, 16  ;;  %v2123_v62 = vld [vmem:[#allocation4 + $0x8] sm:$0x7] }
 0x688   :  { %v2176_v52 = vrot.slane %v2174_v12, 3  ;;  %v2179_v54 = vrot.slane %v2177_v15, 4  ;;  %v2182_v59 = vshrl.u32 %v5177_v28, 16  ;;  %v2185_v9 = vshll.u32 %v5177_v28, 16  ;;  %v2125_v11 = vld [vmem:[#allocation4 + $0x18] sm:$0x7] }
 0x689   :  { %v2159_v45 = vrot.slane %v2157_v29, 3  ;;  %v2162_v63 = vrot.slane %v2160_v53, 4  ;;  %v2167_v30 = vrot.slane %v2165_v58, 3  ;;  %v2170_v38 = vrot.slane %v2168_v50, 4  ;;  %v5195_v33 = vld [vmem:[#allocation4 + $0x8] sm:$0x1f] }
 0x68a   :  { %v2180_v22 = vor.u32 %v2179_v54, %v2176_v52  ;;  %v2184_v10 = vrot.slane %v2182_v59, 3  ;;  %v2187_v1 = vrot.slane %v2185_v9, 4  ;;  %v2130_v25 = vrot.slane %v2122_v47, 3  ;;  %v2404_v14 = vld [vmem:[#allocation4 + $0x10] sm:$0xf0]  ;;  %v3882_v15 = vld [vmem:[#allocation29 + $0xc8] sm:$0xff]  }
 0x68b   :  { %v2163_v20 = vor.u32 %v2162_v63, %v2159_v45  ;;  %v2171_v39 = vor.u32 %v2170_v38, %v2167_v30  ;;  %v2131_v23 = vrot.slane %v2123_v62, 3  ;;  %v2133_v49 = vrot.slane %v5175_v44, 3  ;;  %v3883_v58 = vld [vmem:[#allocation29 + $0xd0] sm:$0xff]   ;;  %v3884_v50 = vld [vmem:[#allocation29 + $0xd8] sm:$0xff]   ;;  %v3886_v52 = vld [vmem:[#allocation29 + $0xe8] sm:$0xff]  }
 0x68c   :  { %v2188_v0 = vor.u32 %v2187_v1, %v2184_v10  ;;  %v2134_v16 = vrot.slane %v2125_v11, 3  ;;  %v2410_v3 = vrot.slane %v5179_v18, 4  ;;  %v2546_v8 = vshrl.u32 %v5195_v33, 16  ;;  %v2536_v54 = vld [vmem:[#allocation4 + $0x18] sm:$0x1f]  ;;  %v3887_v59 = vld [vmem:[#allocation29 + $0xf0] sm:$0xff]  }
 0x68d   :  { %v2172_v34 = vsel %vm595_vm2, %v2163_v20, %v2171_v39  ;;  %v2132_v4 = vsel %vm529_vm0, %v2130_v25, %v2131_v23  ;;  %v2549_v17 = vshll.u32 %v5195_v33, 16  ;;  %v2412_v44 = vrot.slane %v2404_v14, 4  ;;  %v3888_v30 = vld [vmem:[#allocation29 + $0xf8] sm:$0xff]   ;;  %v2691_v20 = vld [vmem:[#allocation4] sm:$0xe0]  ;;  %v3889_v39 = vld [vmem:[#allocation29 + $0x100] sm:$0xff]  }
 0x68e   :  { %3516 = vmatprep.mubr.bf16.mxu0 %v2172_v34  ;;  %v2189_v31 = vsel %vm595_vm2, %v2180_v22, %v2188_v0  ;;  %v2135_v2 = vsel %vm529_vm0, %v2133_v49, %v2134_v16  ;;  %v2548_v43 = vrot.slane %v2546_v8, 4  ;;  %v2413_v47 = vrot.slane %v5177_v28, 4  ;;  %v3885_v28 = vld [vmem:[#allocation29 + $0xe0] sm:$0xff]  }
 0x68f   :  { %3517 = vmatmul.mubr.bf16.vlgmr.msra.gmra.mrb[4].mxu0 %v2189_v31  ;;  %v2551_v21 = vrot.slane %v2549_v17, 5  ;;  %v2555_v9 = vshrl.u32 %v2404_v14, 16  ;;  %v2558_v62 = vshll.u32 %v2404_v14, 16  ;;  %v2563_v45 = vshrl.u32 %v2536_v54, 16  ;;  %v2692_v11 = vld [vmem:[#allocation4 + $0x10] sm:$0xe0] }
 0x690   :  { %3521 = vmatpush3.bf16.msra.mxu0 %v5162_v37  ;;  %3536 = vmatprep.mubr.bf16.mxu0 %v2132_v4  ;;  %v2403_v37 = vld [vmem:[#allocation4] sm:$0xf0]  ;;  %v2414_v29 = vsel %vm697_vm1, %v2412_v44, %v2413_v47  ;;  %v2566_v63 = vshll.u32 %v2536_v54, 16  ;;  %v2697_v0 = vrot.slane %v2691_v20, 5  ;;  %v2698_v34 = vrot.slane %v5195_v33, 5 }
 0x691   :  { %3522 = vmatprep.subr.bf16.mxu0 %v3852_v40  ;;  %v2409_v19 = vrot.slane %v2403_v37, 4  ;;  %v2538_v35 = vshrl.u32 %v2403_v37, 16  ;;  %v2541_v51 = vshll.u32 %v2403_v37, 16  ;;  %v2552_v12 = vor.u32 %v2551_v21, %v2548_v43  ;;  %v3903_v33 = vld [vmem:[#allocation34 + $0x30] sm:$0xff]  }
 0x692   :  { %v2557_v38 = vrot.slane %v2555_v9, 4  ;;  %v2560_v22 = vrot.slane %v2558_v62, 5  ;;  %v2565_v10 = vrot.slane %v2563_v45, 4  ;;  %v2568_v1 = vrot.slane %v2566_v63, 5 }
 0x693   :  { %v2411_v48 = vsel %vm697_vm1, %v2409_v19, %v2410_v3  ;;  %v2540_v60 = vrot.slane %v2538_v35, 4  ;;  %v2543_v57 = vrot.slane %v2541_v51, 5  ;;  %v2699_v4 = vsel %vm869_vm4, %v2697_v0, %v2698_v34  ;;  %v3178_v51 = vld [vmem:[#allocation31] ss:$0 sm:$0xff] }
 0x694   :  { %3523 = vmatpush3.bf16.msra.mxu0 %v3852_v40  ;;  %v2561_v25 = vor.u32 %v2560_v22, %v2557_v38  ;;  %v2569_v23 = vor.u32 %v2568_v1, %v2565_v10  ;;  %v3890_v40 = vld [vmem:[#allocation29 + $0x108] sm:$0xff]   ;;  %v2700_v37 = vrot.slane %v2692_v11, 5 }
 0x695   :  { %3524 = vmatprep.subr.bf16.mxu0 %v3854_v6  ;;  %v2544_v18 = vor.u32 %v2543_v57, %v2540_v60 }
 0x696   :  { %v2570_v31 = vsel %vm767_vm3, %v2561_v25, %v2569_v23 }
 0x697   :  { %v2553_v53 = vsel %vm767_vm3, %v2544_v18, %v2552_v12 }
 0x698   :  { %3525 = vmatpush3.bf16.msra.mxu0 %v3854_v6  ;;  %v3891_v6 = vld [vmem:[#allocation29 + $0x110] sm:$0xff]  }
 0x699   :  { %3526 = vmatprep.subr.bf16.mxu0 %v3856_v7 }
 0x69c   :  { %3527 = vmatpush3.bf16.msra.mxu0 %v3856_v7  ;;  %v3892_v7 = vld [vmem:[#allocation29 + $0x118] sm:$0xff]  }
 0x69d   :  { %3528 = vmatprep.subr.bf16.mxu0 %v3858_v41 }
 0x6a0   :  { %3529 = vmatpush3.bf16.msra.mxu0 %v3858_v41  ;;  %v3893_v41 = vld [vmem:[#allocation29 + $0x120] sm:$0xff]  }
 0x6a1   :  { %3530 = vmatprep.subr.bf16.mxu0 %v3860_v13 }
 0x6a4   :  { %3531 = vmatpush3.bf16.msra.mxu0 %v3860_v13  ;;  %v3894_v13 = vld [vmem:[#allocation29 + $0x128] sm:$0xff]  }
 0x6a5   :  { %3532 = vmatprep.subr.bf16.mxu0 %v3862_v24 }
 0x6a8   :  { %3533 = vmatpush3.bf16.msra.mxu0 %v3862_v24  ;;  %v3895_v24 = vld [vmem:[#allocation29 + $0x130] sm:$0xff]  }
 0x6a9   :  { %3534 = vmatprep.subr.bf16.mxu0 %v3864_v42 }
 0x6ac   :  { %3535 = vmatpush3.bf16.msra.mxu0 %v3864_v42  ;;  %v3896_v42 = vld [vmem:[#allocation29 + $0x138] sm:$0xff]  }
 0x6ad   :  { %3540 = vmatprep.subr.bf16.mxu0 %v3866_v5 }
 0x6af   :  { %3537 = vmatmul.mubr.bf16.vlgmr.msra.gmra.mrb[4].mxu0 %v2135_v2  ;;  %v3897_v2 = vld [vmem:[#allocation34] sm:$0xff]  }
 0x6b0   :  { %3541 = vmatpush3.bf16.msra.mxu0 %v3866_v5  ;;  %3556 = vmatprep.mubr.bf16.mxu0 %v2411_v48  ;;  %v2701_v5 = vrot.slane %v2536_v54, 5  ;;  %v3898_v48 = vld [vmem:[#allocation34 + $0x8] sm:$0xff]  }
 0x6b1   :  { %3542 = vmatprep.subr.bf16.mxu0 %v3868_v46  ;;  %3600 = vmatprep.subr.bf16.mxu1 %v3897_v2 }
 0x6b2   :  { %v2702_v49 = vsel %vm869_vm4, %v2700_v37, %v2701_v5  ;;  %3601 = vmatpush3.bf16.msra.mxu1 %v3897_v2 }
 0x6b3   :  { %3602 = vmatprep.subr.bf16.mxu1 %v3898_v48 }
 0x6b4   :  { %3543 = vmatpush3.bf16.msra.mxu0 %v3868_v46 }
 0x6b5   :  { %3544 = vmatprep.subr.bf16.mxu0 %v3870_v27 }
 0x6b6   :  { %3603 = vmatpush3.bf16.msra.mxu1 %v3898_v48 }
 0x6b7   :  { %v3458_v16 = vpop.f32.mrb[12].mxu1 }
 0x6b8   :  { %3545 = vmatpush3.bf16.msra.mxu0 %v3870_v27  ;;  %v1815_v19 = vpop.f32.mrb[13].mxu1  ;;  %v3899_v27 = vld [vmem:[#allocation34 + $0x10] sm:$0xff]  }
 0x6b9   :  { %3546 = vmatprep.subr.bf16.mxu0 %v3872_v56  ;;  %v3459_v3 = vpop.f32.mrb[14].mxu1  ;;  %3604 = vmatprep.subr.bf16.mxu1 %v3899_v27 }
 0x6ba   :  { %v1818_v46 = vpop.f32.mrb[15].mxu1  ;;  %3605 = vmatpush3.bf16.msra.mxu1 %v3899_v27 }
 0x6bc   :  { %3547 = vmatpush3.bf16.msra.mxu0 %v3872_v56  ;;  %v3900_v56 = vld [vmem:[#allocation34 + $0x18] sm:$0xff]  }
 0x6bd   :  { %3548 = vmatprep.subr.bf16.mxu0 %v3874_v32  ;;  %3606 = vmatprep.subr.bf16.mxu1 %v3900_v56 }
 0x6be   :  { %3607 = vmatpush3.bf16.msra.mxu1 %v3900_v56 }
 0x6c0   :  { %3549 = vmatpush3.bf16.msra.mxu0 %v3874_v32  ;;  %v3901_v32 = vld [vmem:[#allocation34 + $0x20] sm:$0xff]  }
 0x6c1   :  { %3550 = vmatprep.subr.bf16.mxu0 %v3876_v61  ;;  %3608 = vmatprep.subr.bf16.mxu1 %v3901_v32 }
 0x6c2   :  { %3609 = vmatpush3.bf16.msra.mxu1 %v3901_v32 }
 0x6c4   :  { %3551 = vmatpush3.bf16.msra.mxu0 %v3876_v61  ;;  %v3902_v61 = vld [vmem:[#allocation34 + $0x28] sm:$0xff]  }
 0x6c5   :  { %3552 = vmatprep.subr.bf16.mxu0 %v3878_v55  ;;  %3610 = vmatprep.subr.bf16.mxu1 %v3902_v61 }
 0x6c6   :  { %3611 = vmatpush3.bf16.msra.mxu1 %v3902_v61 }
 0x6c7   :  { %3612 = vmatprep.subr.bf16.mxu1 %v3903_v33 }
 0x6c8   :  { %3553 = vmatpush3.bf16.msra.mxu0 %v3878_v55  ;;  %v3904_v55 = vld [vmem:[#allocation34 + $0x38] sm:$0xff]  }
 0x6c9   :  { %3554 = vmatprep.subr.bf16.mxu0 %v3880_v36 }
 0x6ca   :  { %3613 = vmatpush3.bf16.msra.mxu1 %v3903_v33 }
 0x6cb   :  { %3614 = vmatprep.subr.bf16.mxu1 %v3904_v55 }
 0x6cc   :  { %3555 = vmatpush3.bf16.msra.mxu0 %v3880_v36  ;;  %v3179_v36 = vld [vmem:[#allocation32] ss:$0 sm:$0xff] }
 0x6cd   :  { %3560 = vmatprep.subr.bf16.mxu0 %v3881_v26 }
 0x6ce   :  { %3615 = vmatpush3.bf16.msra.mxu1 %v3904_v55 }
 0x6cf   :  { %3557 = vmatmul.mubr.bf16.vlgmr.msra.gmra.mrb[4].mxu0 %v2414_v29 }
 0x6d0   :  { %3561 = vmatpush3.bf16.msra.mxu0 %v3881_v26  ;;  %3576 = vmatprep.mubr.bf16.mxu0 %v2553_v53 }
 0x6d1   :  { %3562 = vmatprep.subr.bf16.mxu0 %v3882_v15 }
 0x6d4   :  { %3563 = vmatpush3.bf16.msra.mxu0 %v3882_v15 }
 0x6d5   :  { %3564 = vmatprep.subr.bf16.mxu0 %v3883_v58 }
 0x6d8   :  { %3565 = vmatpush3.bf16.msra.mxu0 %v3883_v58 }
 0x6d9   :  { %3566 = vmatprep.subr.bf16.mxu0 %v3884_v50 }
 0x6dc   :  { %3567 = vmatpush3.bf16.msra.mxu0 %v3884_v50 }
 0x6dd   :  { %3568 = vmatprep.subr.bf16.mxu0 %v3885_v28 }
 0x6e0   :  { %3569 = vmatpush3.bf16.msra.mxu0 %v3885_v28 }
 0x6e1   :  { %3570 = vmatprep.subr.bf16.mxu0 %v3886_v52 }
 0x6e4   :  { %3571 = vmatpush3.bf16.msra.mxu0 %v3886_v52 }
 0x6e5   :  { %3572 = vmatprep.subr.bf16.mxu0 %v3887_v59 }
 0x6e8   :  { %3573 = vmatpush3.bf16.msra.mxu0 %v3887_v59 }
 0x6e9   :  { %3574 = vmatprep.subr.bf16.mxu0 %v3888_v30 }
 0x6ec   :  { %3575 = vmatpush3.bf16.msra.mxu0 %v3888_v30 }
 0x6ed   :  { %3580 = vmatprep.subr.bf16.mxu0 %v3889_v39 }
 0x6ef   :  { %3577 = vmatmul.mubr.bf16.vlgmr.msra.gmra.mrb[4].mxu0 %v2570_v31  ;;  %v3184_v31 = vld [vmem:[#allocation35] ss:$0 sm:$0xff] }
 0x6f0   :  { %3581 = vmatpush3.bf16.msra.mxu0 %v3889_v39  ;;  %3596 = vmatprep.mubr.bf16.mxu0 %v2699_v4 }
 0x6f1   :  { %3582 = vmatprep.subr.bf16.mxu0 %v3890_v40 }
 0x6f4   :  { %3583 = vmatpush3.bf16.msra.mxu0 %v3890_v40 }
 0x6f5   :  { %3584 = vmatprep.subr.bf16.mxu0 %v3891_v6 }
 0x6f8   :  { %3585 = vmatpush3.bf16.msra.mxu0 %v3891_v6 }
 0x6f9   :  { %3586 = vmatprep.subr.bf16.mxu0 %v3892_v7 }
 0x6fc   :  { %3587 = vmatpush3.bf16.msra.mxu0 %v3892_v7 }
 0x6fd   :  { %3588 = vmatprep.subr.bf16.mxu0 %v3893_v41 }
 0x700   :  { %3589 = vmatpush3.bf16.msra.mxu0 %v3893_v41 }
 0x701   :  { %3590 = vmatprep.subr.bf16.mxu0 %v3894_v13 }
 0x704   :  { %3591 = vmatpush3.bf16.msra.mxu0 %v3894_v13 }
 0x705   :  { %3592 = vmatprep.subr.bf16.mxu0 %v3895_v24 }
 0x708   :  { %3593 = vmatpush3.bf16.msra.mxu0 %v3895_v24 }
 0x709   :  { %3594 = vmatprep.subr.bf16.mxu0 %v3896_v42 }
 0x70c   :  { %3595 = vmatpush3.bf16.msra.mxu0 %v3896_v42 }
 0x70f   :  { %3597 = vmatmul.mubr.bf16.vlgmr.msra.gmra.mrb[4].mxu0 %v2702_v49 }
 0x7e2   :  { %v3598_v35 = vpop.f32.mrb[4].mxu0 }
 0x7e3   :  { %v3620_v8 = vadd.f32 %v3598_v35, %v3458_v16  ;;  %v2804_v17 = vpop.f32.mrb[5].mxu0 }
 0x7e4   :  { %v3621_v14 = vadd.f32 %v2804_v17, %v1815_v19  ;;  %v3599_v60 = vpop.f32.mrb[6].mxu0 }
 0x7e5   :  { %v2836_v57 = vmul.f32 %v3620_v8, %v3178_v51  ;;  %v3622_v43 = vadd.f32 %v3599_v60, %v3459_v3  ;;  %v2807_v21 = vpop.f32.mrb[7].mxu0 }
 0x7e6   :  { %v2834_v26 = vmul.f32 %v3621_v14, %v3178_v51  ;;  %v3623_v44 = vadd.f32 %v2807_v21, %v1818_v46 }
 0x7e7   :  { %v2847_v47 = vadd.f32 %v3179_v36, %v2836_v57  ;;  %v2837_v18 = vmul.f32 %v3622_v43, %v3178_v51 }
 0x7e8   :  { %v2845_v12 = vadd.f32 %v3179_v36, %v2834_v26  ;;  %v2835_v15 = vmul.f32 %v3623_v44, %v3178_v51 }
 0x7e9   :  { %v3182_v29 = vmul.f32 -1.442695, %v2847_v47  ;;  %v2848_v53 = vadd.f32 %v3179_v36, %v2837_v18 }
 0x7ea   :  { %v3180_v58 = vmul.f32 -1.442695, %v2845_v12  ;;  %v2846_v50 = vadd.f32 %v3179_v36, %v2835_v15 }
 0x7eb   :  { %3961 = vpow2.f32 %v3182_v29  ;;  %v3183_v28 = vmul.f32 -1.442695, %v2848_v53 }
 0x7ec   :  { %3963 = vpow2.f32 %v3180_v58  ;;  %v3181_v52 = vmul.f32 -1.442695, %v2846_v50 }
 0x7ed   :  { %3965 = vpow2.f32 %v3183_v28 }
 0x7ee   :  { %3967 = vpow2.f32 %v3181_v52 }
 0x7f5   :  { %v3962_v54 = vpop.eup %3961 }
 0x7f6   :  { %v3964_v59 = vpop.eup %3963  ;;  %v2863_v9 = vadd.f32 1.0, %v3962_v54 }
 0x7f7   :  { %v3966_v62 = vpop.eup %3965  ;;  %v2861_v45 = vadd.f32 1.0, %v3964_v59 }
 0x7f8   :  { %v3968_v63 = vpop.eup %3967  ;;  %3969 = vrcp.f32 %v2863_v9  ;;  %v2864_v30 = vadd.f32 1.0, %v3966_v62 }
 0x7f9   :  { %3971 = vrcp.f32 %v2861_v45  ;;  %v2862_v38 = vadd.f32 1.0, %v3968_v63 }
 0x7fa   :  { %3973 = vrcp.f32 %v2864_v30 }
 0x7fb   :  { %3975 = vrcp.f32 %v2862_v38 }
 0x802   :  { %v3970_v22 = vpop.eup %3969 }
 0x803   :  { %v3972_v10 = vpop.eup %3971  ;;  %v2875_v39 = vmul.f32 %v3970_v22, %v2847_v47 }
 0x804   :  { %v3974_v1 = vpop.eup %3973  ;;  %v2873_v23 = vmul.f32 %v3972_v10, %v2845_v12 }
 0x805   :  { %v3976_v20 = vpop.eup %3975  ;;  %v2876_v25 = vmul.f32 %v3974_v1, %v2848_v53 }
 0x806   :  { %v2874_v0 = vmul.f32 %v3976_v20, %v2846_v50 }
 0x807   :  { %v2878_v34 = vpack.c.bf16 %v2876_v25, %v2875_v39 }
 0x808   :  { %v2877_v40 = vpack.c.bf16 %v2874_v0, %v2873_v23 }
 0x80a   :  { %3616 = vmatprep.mubr.bf16.mxu1 %v2877_v40 }
 0x80b   :  { %3617 = vmatmul.mubr.bf16.vlgmr.msra.gmra.mrb[16].mxu1 %v2878_v34 }
 0x8de   :  { %v3618_v4 = vpop.f32.mrb[16].mxu1 }
 0x8df   :  { %v2993_v6 = vadd.f32 %v3618_v4, %v3184_v31  ;;  %v2984_v7 = vpop.f32.mrb[17].mxu1 }
 0x8e0   :  { %v2985_v41 = vadd.f32 %v3184_v31, %v2984_v7  ;;  %v3619_v13 = vpop.f32.mrb[18].mxu1 }
 0x8e1   :  { %3001 = vst [vmem:[#allocation37 + $0x10] sm:$0xff] %v2993_v6  ;;  %v2996_v24 = vadd.f32 %v3619_v13, %v3184_v31  ;;  %v2987_v42 = vpop.f32.mrb[19].mxu1 }
 0x8e2   :  { %2999 = vst [vmem:[#allocation37] sm:$0xff] %v2985_v41  ;;  %v2988_v11 = vadd.f32 %v3184_v31, %v2987_v42 }
 0x8e3   :  { %3002 = vst [vmem:[#allocation37 + $0x18] sm:$0xff] %v2996_v24 }
 0x8e4   :  { %3000 = vst [vmem:[#allocation37 + $0x8] sm:$0xff] %v2988_v11 }
 0x8e5   :  { %4428 = shalt.err (!%p4425_p10)
}
 0x8e6   :  { %s4429_s11 = scalar_lea.hbm %s5241_s20, 512 }
 0x8e7   :  { %p4430_p11 = scmp.ne.s32.totalorder %s5241_s20, %s4429_s11  ;;  %p4433_p12 = scmp.lt.u32.totalorder %s4429_s11, %s5241_s20 }
 0x8e9   :  { %p4435_p13 = pnand %p4433_p12, %p4430_p11 }
 0x8eb   :  { %4438 = shalt.err (!%p4435_p13)
}
 0x8ec   :  { %3014 = dma.vmem_to_hbm [thread:$0]  %s3009_s23, 512, %s5241_s20, [#allocation7], %s4477_s3, %s4477_s3, %s4478_s24  }
 0x8ed   :  { %4461 = dma.done.wait [#allocation7], 512  }
 0x8ee   :  { %4462 = vsyncadd [#allocation7], 4294966784 }
 0x8ef   :  { %3018 = vsyncpa [#allocation6], 1 }
 0x8f0   :  { %3019 = vsyncpa [#allocation9], 1 }
 0x8f1   :  { %3020 = vsyncpa [#allocation12], 1 }
 0x8f2   :  { %3021 = vsyncpa [#allocation15], 1 }
 0x8f3   :  { %3022 = vsyncpa [#allocation18], 1 }
 0x8f4   :  { %3023 = vsyncpa [#allocation21], 1 }
 0x8f5   :  { %3024 = vsyncpa [#allocation24], 1 }
 0x8f6   :  { %3025 = vsyncpa [#allocation27], 1 }
 0x8f7   :  { %3026 = vsyncpa [#allocation30], 1 }
 0x8f8   :  { %3027 = vsyncpa [#allocation33], 1 }
 0x8f9   :  { %3028 = vsyncpa [#allocation36], 1 }
 0x8fa   :  { %3029 = vsyncpa [#allocation7], 1 }

</bundles_post_ra>
